<compile_context>
chip_gen: v7x
topology: tpu7x:2x2x1
jax: 0.10.0
libtpu: 0.0.40
codegen_flags: <defaults>
</compile_context>

<pallas_src>
import jax
import jax.numpy as jnp
from jax.experimental import pallas as pl
from jax.experimental.pallas import tpu as pltpu

IMG = 16                         # small stand-in for Config.image_size (=100)
BATCH = 2                        # batch per Siamese branch
C1, C2 = 4, 8                    # conv channel counts from the module
HP = WP = IMG + 2                # reflection-padded spatial dims
S = ((HP * WP + 127) // 128) * 128   # per-image flat stride, 128-lane aligned (=384)
HIDDEN = 500
HIDDEN_PAD = 512                 # 500 padded to a multiple of 128 lanes
OUT_DIM = 5
OUT_PAD = 128                    # 5 padded to a full lane group
BN_EPS = 1e-5

_VMEM = pl.BlockSpec(memory_space=pltpu.MemorySpace.VMEM)


# ---------------------------------------------------------------------------
# Kernel 1: fused conv stack, channel-major on a padded-flat spatial axis.
#   grid = (2 branches,), parallel.  Per branch: slab layout (C, B*S) with
#   lane index = b*S + y_pad*Wp + x_pad.  For each layer:
#     conv (9 lane-rolls + per-tap (Cout,Cin)@(Cin,B*S) dots) -> bias -> ReLU ->
#     per-branch BatchNorm (two-pass stats over interior positions) ->
#     masked-roll reflection refill of the 1-px halo for the next layer.
# ---------------------------------------------------------------------------
def _conv_stack_kernel(x_ref, masks_ref,
                       w1_ref, b1_ref, g1_ref, be1_ref,
                       w2_ref, b2_ref, g2_ref, be2_ref,
                       w3_ref, b3_ref, g3_ref, be3_ref,
                       out_ref):
    n = x_ref.shape[-1]                    # B * S lanes
    nb = out_ref.shape[0]                  # batch per branch
    inv_cnt = 1.0 / float(nb * IMG * IMG)  # BN count = B*H*W (interior positions)

    interior = masks_ref[0:1, :]           # (1, n) f32, 1 at valid output positions
    top = masks_ref[1:2, :] > 0.0
    bot = masks_ref[2:3, :] > 0.0
    left = masks_ref[3:4, :] > 0.0
    right = masks_ref[4:5, :] > 0.0

    def shift(a, d):
        # shifted[p] = a[p + d]; within-image for every interior p (wrap lands only on
        # halo / alignment-pad positions, which are masked out of stats and output).
        if d == 0:
            return a
        return pltpu.roll(a, shift=(-d) % n, axis=1)

    def conv_relu_bn(a, w_ref, b_ref, g_ref, be_ref):
        cout, cin = w_ref.shape[1], w_ref.shape[2]
        acc = jnp.zeros((cout, n), jnp.float32)
        for t in range(9):                                   # static unroll, 3x3 taps
            ky, kx = t // 3, t % 3
            a_t = shift(a, (ky - 1) * WP + (kx - 1))
            w_t = w_ref[t]                                   # (cout, cin)
            if cin == 1:
                acc = acc + w_t * a_t                        # (cout,1)*(1,n) broadcast
            else:
                acc = acc + jnp.dot(w_t, a_t, preferred_element_type=jnp.float32)
        acc = jnp.maximum(acc + b_ref[...], 0.0)             # bias + ReLU
        # Training-mode BatchNorm2d, per-branch batch stats over interior positions,
        # two-pass (centered) variance for numerical robustness.
        mean = jnp.sum(acc * interior, axis=1, keepdims=True) * inv_cnt
        cen = (acc - mean) * interior
        var = jnp.sum(cen * cen, axis=1, keepdims=True) * inv_cnt
        return (acc - mean) * jax.lax.rsqrt(var + BN_EPS) * g_ref[...] + be_ref[...]

    def reflect_fill(a):
        # ReflectionPad2d(1) for the next layer, done in place on the flat slab:
        # halo cols/rows are refilled from interior values with masked lane rolls.
        a = jnp.where(left, shift(a, 2), a)          # col 0      <- col 2
        a = jnp.where(right, shift(a, -2), a)        # col Wp-1   <- col Wp-3
        a = jnp.where(top, shift(a, 2 * WP), a)      # row 0      <- row 2
        a = jnp.where(bot, shift(a, -2 * WP), a)     # row Hp-1   <- row Hp-3
        return a

    a1 = conv_relu_bn(x_ref[...], w1_ref, b1_ref, g1_ref, be1_ref)         # (4, n)
    a2 = conv_relu_bn(reflect_fill(a1), w2_ref, b2_ref, g2_ref, be2_ref)   # (8, n)
    a3 = conv_relu_bn(reflect_fill(a2), w3_ref, b3_ref, g3_ref, be3_ref)   # (8, n)

    # Output is already channel-major; per sample it is a lane-aligned slice (no transpose).
    for i in range(nb):
        out_ref[i] = a3[:, i * S:(i + 1) * S].astype(jnp.bfloat16)


def conv_stack(xflat, masks, p):
    nbranch = xflat.shape[0]
    n = xflat.shape[-1]
    nb = n // S

    def const(shape):
        nd = len(shape)
        return pl.BlockSpec(shape, lambda r, _n=nd: (0,) * _n)

    in_specs = [
        pl.BlockSpec((None, 1, n), lambda r: (r, 0, 0)),    # branch-sliced input slab
        const(masks.shape),
        const(p["conv1_w"].shape), const(p["conv1_b"].shape),
        const(p["bn1_g"].shape), const(p["bn1_b"].shape),
        const(p["conv2_w"].shape), const(p["conv2_b"].shape),
        const(p["bn2_g"].shape), const(p["bn2_b"].shape),
        const(p["conv3_w"].shape), const(p["conv3_b"].shape),
        const(p["bn3_g"].shape), const(p["bn3_b"].shape),
    ]
    return pl.pallas_call(
        _conv_stack_kernel,
        out_shape=jax.ShapeDtypeStruct((nbranch, nb, C2, S), jnp.bfloat16),
        grid=(nbranch,),
        in_specs=in_specs,
        out_specs=pl.BlockSpec((None, nb, C2, S), lambda r: (r, 0, 0, 0)),
        compiler_params=pltpu.CompilerParams(
            dimension_semantics=("parallel",)),   # one Siamese branch per TensorCore
    )(xflat, masks,
      p["conv1_w"], p["conv1_b"], p["bn1_g"], p["bn1_b"],
      p["conv2_w"], p["conv2_b"], p["bn2_g"], p["bn2_b"],
      p["conv3_w"], p["conv3_b"], p["bn3_g"], p["bn3_b"])


# ---------------------------------------------------------------------------
# Kernel 2: fused MLP head (gridless at toy size; all weights resident in VMEM).
#   Linear(feat,512) -> ReLU -> Linear(512,512) -> ReLU -> Linear(512,128)
#   bf16 weights / activside casts, f32 accumulation; real dims 500/5 recovered
#   by zero padding + slicing.
# ---------------------------------------------------------------------------
def _mlp_kernel(x_ref, w1_ref, b1_ref, w2_ref, b2_ref, w3_ref, b3_ref, out_ref):
    h1 = jnp.dot(x_ref[...], w1_ref[...], preferred_element_type=jnp.float32)
    h1 = jnp.maximum(h1 + b1_ref[...], 0.0)
    h2 = jnp.dot(h1.astype(jnp.bfloat16), w2_ref[...],
                 preferred_element_type=jnp.float32)
    h2 = jnp.maximum(h2 + b2_ref[...], 0.0)
    out_ref[...] = jnp.dot(h2.astype(jnp.bfloat16), w3_ref[...],
                           preferred_element_type=jnp.float32) + b3_ref[...]


def mlp_head(x, p):
    rows = x.shape[0]
    return pl.pallas_call(
        _mlp_kernel,
        out_shape=jax.ShapeDtypeStruct((rows, OUT_PAD), jnp.float32),
        in_specs=[_VMEM] * 7,
        out_specs=_VMEM,
    )(x, p["fc_w1"], p["fc_b1"], p["fc_w2"], p["fc_b2"], p["fc_w3"], p["fc_b3"])


# ---------------------------------------------------------------------------
# SiameseNetwork forward
# ---------------------------------------------------------------------------
def _build_masks(batch):
    yy = jnp.arange(HP)[:, None]
    xx = jnp.arange(WP)[None, :]

    def flat(m):  # (Hp, Wp) bool -> (batch*S,) f32, zero in the alignment-pad tail
        v = m.astype(jnp.float32).reshape(HP * WP)
        v = jnp.pad(v, (0, S - HP * WP))
        return jnp.tile(v, batch)

    interior = (yy >= 1) & (yy <= HP - 2) & (xx >= 1) & (xx <= WP - 2)
    top = jnp.broadcast_to(yy == 0, (HP, WP))
    bot = jnp.broadcast_to(yy == HP - 1, (HP, WP))
    left = jnp.broadcast_to(xx == 0, (HP, WP))
    right = jnp.broadcast_to(xx == WP - 1, (HP, WP))
    return jnp.stack([flat(interior), flat(top), flat(bot),
                      flat(left), flat(right)], axis=0)        # (5, batch*S)


def siamese_forward(input1, input2, params):
    b = input1.shape[0]
    both = jnp.stack([input1, input2], axis=0).astype(jnp.float32)     # (2, B, 1, H, W)
    # First-layer ReflectionPad2d(1) + flatten into padded-flat, lane-aligned layout.
    xp = jnp.pad(both, ((0, 0), (0, 0), (0, 0), (1, 1), (1, 1)), mode="reflect")
    xp = xp.reshape(2, b, HP * WP)
    xp = jnp.pad(xp, ((0, 0), (0, 0), (0, S - HP * WP)))               # (2, B, S)
    xflat = xp.reshape(2, 1, b * S)                                    # (branch, Cin=1, B*S)
    masks = _build_masks(b)

    conv_out = conv_stack(xflat, masks, params)                        # (2, B, C2, S) bf16
    feats = conv_out.reshape(2 * b, C2 * S)                            # contiguous reshape
    out = mlp_head(feats, params)[:, :OUT_DIM].astype(jnp.float32)     # (2B, 5)
    return out[:b], out[b:]


# ---------------------------------------------------------------------------
# Parameters: PyTorch-layout init, then a one-time prep into kernel layout.
# ---------------------------------------------------------------------------
def init_params(key):
    ks = jax.random.split(key, 6)
    feat = C2 * IMG * IMG
    return {
        "conv1_w": 0.1 * jax.random.normal(ks[0], (C1, 1, 3, 3), jnp.float32),
        "conv1_b": jnp.zeros((C1,), jnp.float32),
        "bn1_g": jnp.ones((C1,), jnp.float32), "bn1_b": jnp.zeros((C1,), jnp.float32),
        "conv2_w": 0.1 * jax.random.normal(ks[1], (C2, C1, 3, 3), jnp.float32),
        "conv2_b": jnp.zeros((C2,), jnp.float32),
        "bn2_g": jnp.ones((C2,), jnp.float32), "bn2_b": jnp.zeros((C2,), jnp.float32),
        "conv3_w": 0.1 * jax.random.normal(ks[2], (C2, C2, 3, 3), jnp.float32),
        "conv3_b": jnp.zeros((C2,), jnp.float32),
        "bn3_g": jnp.ones((C2,), jnp.float32), "bn3_b": jnp.zeros((C2,), jnp.float32),
        "fc_w1": 0.02 * jax.random.normal(ks[3], (feat, HIDDEN), jnp.float32),
        "fc_b1": jnp.zeros((HIDDEN,), jnp.float32),
        "fc_w2": 0.05 * jax.random.normal(ks[4], (HIDDEN, HIDDEN), jnp.float32),
        "fc_b2": jnp.zeros((HIDDEN,), jnp.float32),
        "fc_w3": 0.05 * jax.random.normal(ks[5], (HIDDEN, OUT_DIM), jnp.float32),
        "fc_b3": jnp.zeros((OUT_DIM,), jnp.float32),
    }


def prepare_params(p):
    """PyTorch layout -> kernel layout (tap-major conv weights, padded/bf16 fc)."""
    def conv_w(w):  # (Cout, Cin, 3, 3) -> (9, Cout, Cin), tap t = ky*3 + kx
        return (jnp.transpose(w, (2, 3, 0, 1))
                .reshape(9, w.shape[0], w.shape[1]).astype(jnp.float32))

    def col(v):  # (C,) -> (C, 1) for broadcasting against (C, B*S) slabs
        return v.reshape(-1, 1).astype(jnp.float32)

    q = {}
    for i in (1, 2, 3):
        q[f"conv{i}_w"] = conv_w(p[f"conv{i}_w"])
        q[f"conv{i}_b"] = col(p[f"conv{i}_b"])
        q[f"bn{i}_g"] = col(p[f"bn{i}_g"])
        q[f"bn{i}_b"] = col(p[f"bn{i}_b"])

    dh = HIDDEN_PAD - HIDDEN
    do = OUT_PAD - OUT_DIM
    # fc1: permute rows from PyTorch NCHW-flat order (c*H*W + y*W + x) to the conv
    # kernel's padded-flat order (c*S + (y+1)*Wp + (x+1)); halo/alignment positions get
    # all-zero rows, so the garbage there contributes exactly 0.  Zero-pad cols 500->512.
    w1 = jnp.pad(p["fc_w1"], ((0, 0), (0, dh)))                          # (feat, 512)
    c = jnp.arange(C2)[:, None, None]
    y = jnp.arange(IMG)[None, :, None]
    x = jnp.arange(IMG)[None, None, :]
    new_idx = (c * S + (y + 1) * WP + (x + 1)).reshape(-1)               # (feat,)
    w1_new = jnp.zeros((C2 * S, HIDDEN_PAD), jnp.float32).at[new_idx].set(w1)
    q["fc_w1"] = w1_new.astype(jnp.bfloat16)
    q["fc_b1"] = jnp.pad(p["fc_b1"], ((0, dh),)).reshape(1, -1).astype(jnp.float32)
    q["fc_w2"] = jnp.pad(p["fc_w2"], ((0, dh), (0, dh))).astype(jnp.bfloat16)
    q["fc_b2"] = jnp.pad(p["fc_b2"], ((0, dh),)).reshape(1, -1).astype(jnp.float32)
    q["fc_w3"] = jnp.pad(p["fc_w3"], ((0, dh), (0, do))).astype(jnp.bfloat16)
    q["fc_b3"] = jnp.pad(p["fc_b3"], ((0, do),)).reshape(1, -1).astype(jnp.float32)
    return q


# ---------------------------------------------------------------------------
# Pure-JAX reference (mirrors the PyTorch forward_once, with the same intended
# bf16 casts as the kernels) for a numerical sanity check.
# ---------------------------------------------------------------------------
def reference_forward_once(x, p):
    hp = jax.lax.Precision.HIGHEST
    a = x.astype(jnp.float32)
    h, w = a.shape[2], a.shape[3]
    for i in (1, 2, 3):
        cw, cb = p[f"conv{i}_w"], p[f"conv{i}_b"]
        g, be = p[f"bn{i}_g"], p[f"bn{i}_b"]
        ap = jnp.pad(a, ((0, 0), (0, 0), (1, 1), (1, 1)), mode="reflect")
        out = jnp.zeros((a.shape[0], cw.shape[0], h, w), jnp.float32)
        for ky in range(3):
            for kx in range(3):
                out = out + jnp.einsum("oc,bcyx->boyx", cw[:, :, ky, kx],
                                       ap[:, :, ky:ky + h, kx:kx + w], precision=hp)
        out = jnp.maximum(out + cb.reshape(1, -1, 1, 1), 0.0)
        mean = jnp.mean(out, axis=(0, 2, 3), keepdims=True)
        var = jnp.mean((out - mean) ** 2, axis=(0, 2, 3), keepdims=True)
        a = ((out - mean) * jax.lax.rsqrt(var + BN_EPS)
             * g.reshape(1, -1, 1, 1) + be.reshape(1, -1, 1, 1))
    feats = a.reshape(a.shape[0], -1)
    f = feats.astype(jnp.bfloat16).astype(jnp.float32)
    w1 = p["fc_w1"].astype(jnp.bfloat16).astype(jnp.float32)
    w2 = p["fc_w2"].astype(jnp.bfloat16).astype(jnp.float32)
    w3 = p["fc_w3"].astype(jnp.bfloat16).astype(jnp.float32)
    h1 = jnp.maximum(jnp.dot(f, w1, precision=hp) + p["fc_b1"], 0.0)
    h1 = h1.astype(jnp.bfloat16).astype(jnp.float32)
    h2 = jnp.maximum(jnp.dot(h1, w2, precision=hp) + p["fc_b2"], 0.0)
    h2 = h2.astype(jnp.bfloat16).astype(jnp.float32)
    return jnp.dot(h2, w3, precision=hp) + p["fc_b3"]


if __name__ == "__main__":
    key = jax.random.PRNGKey(0)
    k_params, k_x1, k_x2 = jax.random.split(key, 3)
    raw_params = init_params(k_params)
    params = prepare_params(raw_params)

    input1 = jax.random.normal(k_x1, (BATCH, 1, IMG, IMG), jnp.float32)
    input2 = jax.random.normal(k_x2, (BATCH, 1, IMG, IMG), jnp.float32)

    out1, out2 = jax.jit(siamese_forward)(input1, input2, params)
    jax.block_until_ready((out1, out2))

    assert out1.shape == (BATCH, OUT_DIM) and out2.shape == (BATCH, OUT_DIM)
    assert out1.dtype == jnp.float32 and out2.dtype == jnp.float32

    ref_fn = jax.jit(reference_forward_once)
    ref1 = ref_fn(input1, raw_params)
    ref2 = ref_fn(input2, raw_params)
    jax.block_until_ready((ref1, ref2))
    assert jnp.allclose(out1, ref1, rtol=3e-2, atol=3e-2), (out1, ref1)
    assert jnp.allclose(out2, ref2, rtol=3e-2, atol=3e-2), (out2, ref2)

    print("KERNEL_OK")
</pallas_src>

<mosaic_0001>
module attributes {stable_mosaic.version = 11 : i64} {
  func.func @_mlp_kernel(%arg0: memref<4x3072xbf16, #tpu.memory_space<vmem>>, %arg1: memref<3072x512xbf16, #tpu.memory_space<vmem>>, %arg2: memref<1x512xf32, #tpu.memory_space<vmem>>, %arg3: memref<512x512xbf16, #tpu.memory_space<vmem>>, %arg4: memref<1x512xf32, #tpu.memory_space<vmem>>, %arg5: memref<512x128xbf16, #tpu.memory_space<vmem>>, %arg6: memref<1x128xf32, #tpu.memory_space<vmem>>, %arg7: memref<4x128xf32, #tpu.memory_space<vmem>>) attributes {dimension_semantics = [], scalar_prefetch = 0 : i64, scratch_operands = 0 : i64, tpu.core_type = #tpu.core_type<tc>} {
    %c0 = arith.constant 0 : index
    %c0_0 = arith.constant 0 : index
    %0 = vector.load %arg0[%c0, %c0_0] : memref<4x3072xbf16, #tpu.memory_space<vmem>>, vector<4x3072xbf16>
    %c0_1 = arith.constant 0 : index
    %c0_2 = arith.constant 0 : index
    %1 = vector.load %arg1[%c0_1, %c0_2] : memref<3072x512xbf16, #tpu.memory_space<vmem>>, vector<3072x512xbf16>
    %cst = arith.constant dense<0.000000e+00> : vector<4x512xf32>
    %2 = tpu.matmul %0, %1, %cst {dimension_numbers = #tpu.dot_dimension_numbers<[1], [0], [0], [1], [0, 0, 1, 1], [], []>} : vector<4x3072xbf16>, vector<3072x512xbf16>, vector<4x512xf32> -> vector<4x512xf32>
    %c0_3 = arith.constant 0 : index
    %c0_4 = arith.constant 0 : index
    %3 = vector.load %arg2[%c0_3, %c0_4] : memref<1x512xf32, #tpu.memory_space<vmem>>, vector<1x512xf32>
    %4 = vector.broadcast %3 : vector<1x512xf32> to vector<4x512xf32>
    %5 = arith.addf %2, %4 : vector<4x512xf32>
    %cst_5 = arith.constant 0.000000e+00 : f32
    %6 = vector.broadcast %cst_5 : f32 to vector<4x512xf32>
    %7 = arith.maximumf %5, %6 : vector<4x512xf32>
    %8 = arith.truncf %7 : vector<4x512xf32> to vector<4x512xbf16>
    %c0_6 = arith.constant 0 : index
    %c0_7 = arith.constant 0 : index
    %9 = vector.load %arg3[%c0_6, %c0_7] : memref<512x512xbf16, #tpu.memory_space<vmem>>, vector<512x512xbf16>
    %cst_8 = arith.constant dense<0.000000e+00> : vector<4x512xf32>
    %10 = tpu.matmul %8, %9, %cst_8 {dimension_numbers = #tpu.dot_dimension_numbers<[1], [0], [0], [1], [0, 0, 1, 1], [], []>} : vector<4x512xbf16>, vector<512x512xbf16>, vector<4x512xf32> -> vector<4x512xf32>
    %c0_9 = arith.constant 0 : index
    %c0_10 = arith.constant 0 : index
    %11 = vector.load %arg4[%c0_9, %c0_10] : memref<1x512xf32, #tpu.memory_space<vmem>>, vector<1x512xf32>
    %12 = vector.broadcast %11 : vector<1x512xf32> to vector<4x512xf32>
    %13 = arith.addf %10, %12 : vector<4x512xf32>
    %cst_11 = arith.constant 0.000000e+00 : f32
    %14 = vector.broadcast %cst_11 : f32 to vector<4x512xf32>
    %15 = arith.maximumf %13, %14 : vector<4x512xf32>
    %16 = arith.truncf %15 : vector<4x512xf32> to vector<4x512xbf16>
    %c0_12 = arith.constant 0 : index
    %c0_13 = arith.constant 0 : index
    %17 = vector.load %arg5[%c0_12, %c0_13] : memref<512x128xbf16, #tpu.memory_space<vmem>>, vector<512x128xbf16>
    %cst_14 = arith.constant dense<0.000000e+00> : vector<4x128xf32>
    %18 = tpu.matmul %16, %17, %cst_14 {dimension_numbers = #tpu.dot_dimension_numbers<[1], [0], [0], [1], [0, 0, 1, 1], [], []>} : vector<4x512xbf16>, vector<512x128xbf16>, vector<4x128xf32> -> vector<4x128xf32>
    %c0_15 = arith.constant 0 : index
    %c0_16 = arith.constant 0 : index
    %19 = vector.load %arg6[%c0_15, %c0_16] : memref<1x128xf32, #tpu.memory_space<vmem>>, vector<1x128xf32>
    %20 = vector.broadcast %19 : vector<1x128xf32> to vector<4x128xf32>
    %21 = arith.addf %18, %20 : vector<4x128xf32>
    %c0_17 = arith.constant 0 : index
    %c0_18 = arith.constant 0 : index
    %22 = vector.load %arg7[%c0_17, %c0_18] : memref<4x128xf32, #tpu.memory_space<vmem>>, vector<4x128xf32>
    tpu.vector_store %arg7[%c0_17, %c0_18], %21 {strides = array<i32>} : memref<4x128xf32, #tpu.memory_space<vmem>>, vector<4x128xf32>,
    return
  }
}

module attributes {stable_mosaic.version = 11 : i64} {
  func.func @_conv_stack_kernel(%arg0: i32, %arg1: memref<1x1x768xf32, #tpu.memory_space<vmem>>, %arg2: memref<5x768xf32, #tpu.memory_space<vmem>>, %arg3: memref<9x4x1xf32, #tpu.memory_space<vmem>>, %arg4: memref<4x1xf32, #tpu.memory_space<vmem>>, %arg5: memref<4x1xf32, #tpu.memory_space<vmem>>, %arg6: memref<4x1xf32, #tpu.memory_space<vmem>>, %arg7: memref<9x8x4xf32, #tpu.memory_space<vmem>>, %arg8: memref<8x1xf32, #tpu.memory_space<vmem>>, %arg9: memref<8x1xf32, #tpu.memory_space<vmem>>, %arg10: memref<8x1xf32, #tpu.memory_space<vmem>>, %arg11: memref<9x8x8xf32, #tpu.memory_space<vmem>>, %arg12: memref<8x1xf32, #tpu.memory_space<vmem>>, %arg13: memref<8x1xf32, #tpu.memory_space<vmem>>, %arg14: memref<8x1xf32, #tpu.memory_space<vmem>>, %arg15: memref<1x2x8x384xbf16, #tpu.memory_space<vmem>>) attributes {dimension_semantics = [#tpu.dimension_semantics<parallel>], iteration_bounds = array<i64: 2>, scalar_prefetch = 0 : i64, scratch_operands = 0 : i64, tpu.core_type = #tpu.core_type<tc>, window_params = [{transform_indices = @transform_0, window_bounds = array<i64: 1, 1, 768>}, {pipeline_mode = #tpu.pipeline_mode<synchronous>, transform_indices = @transform_1, window_bounds = array<i64: 5, 768>}, {pipeline_mode = #tpu.pipeline_mode<synchronous>, transform_indices = @transform_2, window_bounds = array<i64: 9, 4, 1>}, {pipeline_mode = #tpu.pipeline_mode<synchronous>, transform_indices = @transform_3, window_bounds = array<i64: 4, 1>}, {pipeline_mode = #tpu.pipeline_mode<synchronous>, transform_indices = @transform_4, window_bounds = array<i64: 4, 1>}, {pipeline_mode = #tpu.pipeline_mode<synchronous>, transform_indices = @transform_5, window_bounds = array<i64: 4, 1>}, {pipeline_mode = #tpu.pipeline_mode<synchronous>, transform_indices = @transform_6, window_bounds = array<i64: 9, 8, 4>}, {pipeline_mode = #tpu.pipeline_mode<synchronous>, transform_indices = @transform_7, window_bounds = array<i64: 8, 1>}, {pipeline_mode = #tpu.pipeline_mode<synchronous>, transform_indices = @transform_8, window_bounds = array<i64: 8, 1>}, {pipeline_mode = #tpu.pipeline_mode<synchronous>, transform_indices = @transform_9, window_bounds = array<i64: 8, 1>}, {pipeline_mode = #tpu.pipeline_mode<synchronous>, transform_indices = @transform_10, window_bounds = array<i64: 9, 8, 8>}, {pipeline_mode = #tpu.pipeline_mode<synchronous>, transform_indices = @transform_11, window_bounds = array<i64: 8, 1>}, {pipeline_mode = #tpu.pipeline_mode<synchronous>, transform_indices = @transform_12, window_bounds = array<i64: 8, 1>}, {pipeline_mode = #tpu.pipeline_mode<synchronous>, transform_indices = @transform_13, window_bounds = array<i64: 8, 1>}, {transform_indices = @transform_14, window_bounds = array<i64: 1, 2, 8, 384>}]} {
    %c0 = arith.constant 0 : index
    %c0_0 = arith.constant 0 : index
    %0 = vector.load %arg2[%c0, %c0_0] : memref<5x768xf32, #tpu.memory_space<vmem>>, vector<1x768xf32>
    %c1 = arith.constant 1 : index
    %c0_1 = arith.constant 0 : index
    %1 = vector.load %arg2[%c1, %c0_1] : memref<5x768xf32, #tpu.memory_space<vmem>>, vector<1x768xf32>
    %cst = arith.constant 0.000000e+00 : f32
    %2 = vector.broadcast %cst : f32 to vector<1x768xf32>
    %3 = arith.cmpf ogt, %1, %2 : vector<1x768xf32>
    %c2 = arith.constant 2 : index
    %c0_2 = arith.constant 0 : index
    %4 = vector.load %arg2[%c2, %c0_2] : memref<5x768xf32, #tpu.memory_space<vmem>>, vector<1x768xf32>
    %cst_3 = arith.constant 0.000000e+00 : f32
    %5 = vector.broadcast %cst_3 : f32 to vector<1x768xf32>
    %6 = arith.cmpf ogt, %4, %5 : vector<1x768xf32>
    %c3 = arith.constant 3 : index
    %c0_4 = arith.constant 0 : index
    %7 = vector.load %arg2[%c3, %c0_4] : memref<5x768xf32, #tpu.memory_space<vmem>>, vector<1x768xf32>
    %cst_5 = arith.constant 0.000000e+00 : f32
    %8 = vector.broadcast %cst_5 : f32 to vector<1x768xf32>
    %9 = arith.cmpf ogt, %7, %8 : vector<1x768xf32>
    %c4 = arith.constant 4 : index
    %c0_6 = arith.constant 0 : index
    %10 = vector.load %arg2[%c4, %c0_6] : memref<5x768xf32, #tpu.memory_space<vmem>>, vector<1x768xf32>
    %cst_7 = arith.constant 0.000000e+00 : f32
    %11 = vector.broadcast %cst_7 : f32 to vector<1x768xf32>
    %12 = arith.cmpf ogt, %10, %11 : vector<1x768xf32>
    %c0_8 = arith.constant 0 : index
    %c0_9 = arith.constant 0 : index
    %c0_10 = arith.constant 0 : index
    %13 = vector.load %arg1[%c0_8, %c0_9, %c0_10] : memref<1x1x768xf32, #tpu.memory_space<vmem>>, vector<1x1x768xf32>
    %14 = vector.shape_cast %13 : vector<1x1x768xf32> to vector<1x768xf32>
    %cst_11 = arith.constant 0.000000e+00 : f32
    %15 = vector.broadcast %cst_11 : f32 to vector<4x768xf32>
    %c19_i32 = arith.constant 19 : i32
    %16 = tpu.dynamic_rotate %14 by %c19_i32 dim 1 : vector<1x768xf32>, i32 -> vector<1x768xf32>
    %c0_12 = arith.constant 0 : index
    %c0_13 = arith.constant 0 : index
    %c0_14 = arith.constant 0 : index
    %17 = vector.load %arg3[%c0_12, %c0_13, %c0_14] : memref<9x4x1xf32, #tpu.memory_space<vmem>>, vector<1x4x1xf32>
    %18 = vector.shape_cast %17 : vector<1x4x1xf32> to vector<4x1xf32>
    %19 = vector.broadcast %18 : vector<4x1xf32> to vector<4x768xf32>
    %20 = vector.broadcast %16 : vector<1x768xf32> to vector<4x768xf32>
    %21 = arith.mulf %19, %20 : vector<4x768xf32>
    %22 = arith.addf %15, %21 : vector<4x768xf32>
    %c18_i32 = arith.constant 18 : i32
    %23 = tpu.dynamic_rotate %14 by %c18_i32 dim 1 : vector<1x768xf32>, i32 -> vector<1x768xf32>
    %c1_15 = arith.constant 1 : index
    %c0_16 = arith.constant 0 : index
    %c0_17 = arith.constant 0 : index
    %24 = vector.load %arg3[%c1_15, %c0_16, %c0_17] : memref<9x4x1xf32, #tpu.memory_space<vmem>>, vector<1x4x1xf32>
    %25 = vector.shape_cast %24 : vector<1x4x1xf32> to vector<4x1xf32>
    %26 = vector.broadcast %25 : vector<4x1xf32> to vector<4x768xf32>
    %27 = vector.broadcast %23 : vector<1x768xf32> to vector<4x768xf32>
    %28 = arith.mulf %26, %27 : vector<4x768xf32>
    %29 = arith.addf %22, %28 : vector<4x768xf32>
    %c17_i32 = arith.constant 17 : i32
    %30 = tpu.dynamic_rotate %14 by %c17_i32 dim 1 : vector<1x768xf32>, i32 -> vector<1x768xf32>
    %c2_18 = arith.constant 2 : index
    %c0_19 = arith.constant 0 : index
    %c0_20 = arith.constant 0 : index
    %31 = vector.load %arg3[%c2_18, %c0_19, %c0_20] : memref<9x4x1xf32, #tpu.memory_space<vmem>>, vector<1x4x1xf32>
    %32 = vector.shape_cast %31 : vector<1x4x1xf32> to vector<4x1xf32>
    %33 = vector.broadcast %32 : vector<4x1xf32> to vector<4x768xf32>
    %34 = vector.broadcast %30 : vector<1x768xf32> to vector<4x768xf32>
    %35 = arith.mulf %33, %34 : vector<4x768xf32>
    %36 = arith.addf %29, %35 : vector<4x768xf32>
    %c1_i32 = arith.constant 1 : i32
    %37 = tpu.dynamic_rotate %14 by %c1_i32 dim 1 : vector<1x768xf32>, i32 -> vector<1x768xf32>
    %c3_21 = arith.constant 3 : index
    %c0_22 = arith.constant 0 : index
    %c0_23 = arith.constant 0 : index
    %38 = vector.load %arg3[%c3_21, %c0_22, %c0_23] : memref<9x4x1xf32, #tpu.memory_space<vmem>>, vector<1x4x1xf32>
    %39 = vector.shape_cast %38 : vector<1x4x1xf32> to vector<4x1xf32>
    %40 = vector.broadcast %39 : vector<4x1xf32> to vector<4x768xf32>
    %41 = vector.broadcast %37 : vector<1x768xf32> to vector<4x768xf32>
    %42 = arith.mulf %40, %41 : vector<4x768xf32>
    %43 = arith.addf %36, %42 : vector<4x768xf32>
    %c4_24 = arith.constant 4 : index
    %c0_25 = arith.constant 0 : index
    %c0_26 = arith.constant 0 : index
    %44 = vector.load %arg3[%c4_24, %c0_25, %c0_26] : memref<9x4x1xf32, #tpu.memory_space<vmem>>, vector<1x4x1xf32>
    %45 = vector.shape_cast %44 : vector<1x4x1xf32> to vector<4x1xf32>
    %46 = vector.broadcast %45 : vector<4x1xf32> to vector<4x768xf32>
    %47 = vector.broadcast %14 : vector<1x768xf32> to vector<4x768xf32>
    %48 = arith.mulf %46, %47 : vector<4x768xf32>
    %49 = arith.addf %43, %48 : vector<4x768xf32>
    %c767_i32 = arith.constant 767 : i32
    %50 = tpu.dynamic_rotate %14 by %c767_i32 dim 1 : vector<1x768xf32>, i32 -> vector<1x768xf32>
    %c5 = arith.constant 5 : index
    %c0_27 = arith.constant 0 : index
    %c0_28 = arith.constant 0 : index
    %51 = vector.load %arg3[%c5, %c0_27, %c0_28] : memref<9x4x1xf32, #tpu.memory_space<vmem>>, vector<1x4x1xf32>
    %52 = vector.shape_cast %51 : vector<1x4x1xf32> to vector<4x1xf32>
    %53 = vector.broadcast %52 : vector<4x1xf32> to vector<4x768xf32>
    %54 = vector.broadcast %50 : vector<1x768xf32> to vector<4x768xf32>
    %55 = arith.mulf %53, %54 : vector<4x768xf32>
    %56 = arith.addf %49, %55 : vector<4x768xf32>
    %c751_i32 = arith.constant 751 : i32
    %57 = tpu.dynamic_rotate %14 by %c751_i32 dim 1 : vector<1x768xf32>, i32 -> vector<1x768xf32>
    %c6 = arith.constant 6 : index
    %c0_29 = arith.constant 0 : index
    %c0_30 = arith.constant 0 : index
    %58 = vector.load %arg3[%c6, %c0_29, %c0_30] : memref<9x4x1xf32, #tpu.memory_space<vmem>>, vector<1x4x1xf32>
    %59 = vector.shape_cast %58 : vector<1x4x1xf32> to vector<4x1xf32>
    %60 = vector.broadcast %59 : vector<4x1xf32> to vector<4x768xf32>
    %61 = vector.broadcast %57 : vector<1x768xf32> to vector<4x768xf32>
    %62 = arith.mulf %60, %61 : vector<4x768xf32>
    %63 = arith.addf %56, %62 : vector<4x768xf32>
    %c750_i32 = arith.constant 750 : i32
    %64 = tpu.dynamic_rotate %14 by %c750_i32 dim 1 : vector<1x768xf32>, i32 -> vector<1x768xf32>
    %c7 = arith.constant 7 : index
    %c0_31 = arith.constant 0 : index
    %c0_32 = arith.constant 0 : index
    %65 = vector.load %arg3[%c7, %c0_31, %c0_32] : memref<9x4x1xf32, #tpu.memory_space<vmem>>, vector<1x4x1xf32>
    %66 = vector.shape_cast %65 : vector<1x4x1xf32> to vector<4x1xf32>
    %67 = vector.broadcast %66 : vector<4x1xf32> to vector<4x768xf32>
    %68 = vector.broadcast %64 : vector<1x768xf32> to vector<4x768xf32>
    %69 = arith.mulf %67, %68 : vector<4x768xf32>
    %70 = arith.addf %63, %69 : vector<4x768xf32>
    %c749_i32 = arith.constant 749 : i32
    %71 = tpu.dynamic_rotate %14 by %c749_i32 dim 1 : vector<1x768xf32>, i32 -> vector<1x768xf32>
    %c8 = arith.constant 8 : index
    %c0_33 = arith.constant 0 : index
    %c0_34 = arith.constant 0 : index
    %72 = vector.load %arg3[%c8, %c0_33, %c0_34] : memref<9x4x1xf32, #tpu.memory_space<vmem>>, vector<1x4x1xf32>
    %73 = vector.shape_cast %72 : vector<1x4x1xf32> to vector<4x1xf32>
    %74 = vector.broadcast %73 : vector<4x1xf32> to vector<4x768xf32>
    %75 = vector.broadcast %71 : vector<1x768xf32> to vector<4x768xf32>
    %76 = arith.mulf %74, %75 : vector<4x768xf32>
    %77 = arith.addf %70, %76 : vector<4x768xf32>
    %c0_35 = arith.constant 0 : index
    %c0_36 = arith.constant 0 : index
    %78 = vector.load %arg4[%c0_35, %c0_36] : memref<4x1xf32, #tpu.memory_space<vmem>>, vector<4x1xf32>
    %79 = vector.broadcast %78 : vector<4x1xf32> to vector<4x768xf32>
    %80 = arith.addf %77, %79 : vector<4x768xf32>
    %cst_37 = arith.constant 0.000000e+00 : f32
    %81 = vector.broadcast %cst_37 : f32 to vector<4x768xf32>
    %82 = arith.maximumf %80, %81 : vector<4x768xf32>
    %83 = vector.broadcast %0 : vector<1x768xf32> to vector<4x768xf32>
    %84 = arith.mulf %82, %83 : vector<4x768xf32>
    %cst_38 = arith.constant dense<0.000000e+00> : vector<4xf32>
    %85 = vector.multi_reduction <add>, %84, %cst_38 [1] : vector<4x768xf32> to vector<4xf32>
    %86 = vector.shape_cast %85 : vector<4xf32> to vector<4x1xf32>
    %cst_39 = arith.constant 0.001953125 : f32
    %87 = vector.broadcast %cst_39 : f32 to vector<4x1xf32>
    %88 = arith.mulf %86, %87 : vector<4x1xf32>
    %89 = vector.broadcast %88 : vector<4x1xf32> to vector<4x768xf32>
    %90 = arith.subf %82, %89 : vector<4x768xf32>
    %91 = vector.broadcast %0 : vector<1x768xf32> to vector<4x768xf32>
    %92 = arith.mulf %90, %91 : vector<4x768xf32>
    %93 = arith.mulf %92, %92 : vector<4x768xf32>
    %cst_40 = arith.constant dense<0.000000e+00> : vector<4xf32>
    %94 = vector.multi_reduction <add>, %93, %cst_40 [1] : vector<4x768xf32> to vector<4xf32>
    %95 = vector.shape_cast %94 : vector<4xf32> to vector<4x1xf32>
    %cst_41 = arith.constant 0.001953125 : f32
    %96 = vector.broadcast %cst_41 : f32 to vector<4x1xf32>
    %97 = arith.mulf %95, %96 : vector<4x1xf32>
    %98 = vector.broadcast %88 : vector<4x1xf32> to vector<4x768xf32>
    %99 = arith.subf %82, %98 : vector<4x768xf32>
    %cst_42 = arith.constant 9.99999974E-6 : f32
    %100 = vector.broadcast %cst_42 : f32 to vector<4x1xf32>
    %101 = arith.addf %97, %100 : vector<4x1xf32>
    %102 = math.rsqrt %101 : vector<4x1xf32>
    %103 = vector.broadcast %102 : vector<4x1xf32> to vector<4x768xf32>
    %104 = arith.mulf %99, %103 : vector<4x768xf32>
    %c0_43 = arith.constant 0 : index
    %c0_44 = arith.constant 0 : index
    %105 = vector.load %arg5[%c0_43, %c0_44] : memref<4x1xf32, #tpu.memory_space<vmem>>, vector<4x1xf32>
    %106 = vector.broadcast %105 : vector<4x1xf32> to vector<4x768xf32>
    %107 = arith.mulf %104, %106 : vector<4x768xf32>
    %c0_45 = arith.constant 0 : index
    %c0_46 = arith.constant 0 : index
    %108 = vector.load %arg6[%c0_45, %c0_46] : memref<4x1xf32, #tpu.memory_space<vmem>>, vector<4x1xf32>
    %109 = vector.broadcast %108 : vector<4x1xf32> to vector<4x768xf32>
    %110 = arith.addf %107, %109 : vector<4x768xf32>
    %c766_i32 = arith.constant 766 : i32
    %111 = tpu.dynamic_rotate %110 by %c766_i32 dim 1 : vector<4x768xf32>, i32 -> vector<4x768xf32>
    %112 = vector.shape_cast %9 : vector<1x768xi1> to vector<1x768xi1>
    %113 = vector.broadcast %112 : vector<1x768xi1> to vector<4x768xi1>
    %114 = arith.select %113, %111, %110 : vector<4x768xi1>, vector<4x768xf32>
    %c2_i32 = arith.constant 2 : i32
    %115 = tpu.dynamic_rotate %114 by %c2_i32 dim 1 : vector<4x768xf32>, i32 -> vector<4x768xf32>
    %116 = vector.shape_cast %12 : vector<1x768xi1> to vector<1x768xi1>
    %117 = vector.broadcast %116 : vector<1x768xi1> to vector<4x768xi1>
    %118 = arith.select %117, %115, %114 : vector<4x768xi1>, vector<4x768xf32>
    %c732_i32 = arith.constant 732 : i32
    %119 = tpu.dynamic_rotate %118 by %c732_i32 dim 1 : vector<4x768xf32>, i32 -> vector<4x768xf32>
    %120 = vector.shape_cast %3 : vector<1x768xi1> to vector<1x768xi1>
    %121 = vector.broadcast %120 : vector<1x768xi1> to vector<4x768xi1>
    %122 = arith.select %121, %119, %118 : vector<4x768xi1>, vector<4x768xf32>
    %c36_i32 = arith.constant 36 : i32
    %123 = tpu.dynamic_rotate %122 by %c36_i32 dim 1 : vector<4x768xf32>, i32 -> vector<4x768xf32>
    %124 = vector.shape_cast %6 : vector<1x768xi1> to vector<1x768xi1>
    %125 = vector.broadcast %124 : vector<1x768xi1> to vector<4x768xi1>
    %126 = arith.select %125, %123, %122 : vector<4x768xi1>, vector<4x768xf32>
    %cst_47 = arith.constant 0.000000e+00 : f32
    %127 = vector.broadcast %cst_47 : f32 to vector<8x768xf32>
    %c19_i32_48 = arith.constant 19 : i32
    %128 = tpu.dynamic_rotate %126 by %c19_i32_48 dim 1 : vector<4x768xf32>, i32 -> vector<4x768xf32>
    %c0_49 = arith.constant 0 : index
    %c0_50 = arith.constant 0 : index
    %c0_51 = arith.constant 0 : index
    %129 = vector.load %arg7[%c0_49, %c0_50, %c0_51] : memref<9x8x4xf32, #tpu.memory_space<vmem>>, vector<1x8x4xf32>
    %130 = vector.shape_cast %129 : vector<1x8x4xf32> to vector<8x4xf32>
    %cst_52 = arith.constant dense<0.000000e+00> : vector<8x768xf32>
    %131 = tpu.matmul %130, %128, %cst_52 {dimension_numbers = #tpu.dot_dimension_numbers<[1], [0], [0], [1], [0, 0, 1, 1], [], []>} : vector<8x4xf32>, vector<4x768xf32>, vector<8x768xf32> -> vector<8x768xf32>
    %132 = arith.addf %127, %131 : vector<8x768xf32>
    %c18_i32_53 = arith.constant 18 : i32
    %133 = tpu.dynamic_rotate %126 by %c18_i32_53 dim 1 : vector<4x768xf32>, i32 -> vector<4x768xf32>
    %c1_54 = arith.constant 1 : index
    %c0_55 = arith.constant 0 : index
    %c0_56 = arith.constant 0 : index
    %134 = vector.load %arg7[%c1_54, %c0_55, %c0_56] : memref<9x8x4xf32, #tpu.memory_space<vmem>>, vector<1x8x4xf32>
    %135 = vector.shape_cast %134 : vector<1x8x4xf32> to vector<8x4xf32>
    %cst_57 = arith.constant dense<0.000000e+00> : vector<8x768xf32>
    %136 = tpu.matmul %135, %133, %cst_57 {dimension_numbers = #tpu.dot_dimension_numbers<[1], [0], [0], [1], [0, 0, 1, 1], [], []>} : vector<8x4xf32>, vector<4x768xf32>, vector<8x768xf32> -> vector<8x768xf32>
    %137 = arith.addf %132, %136 : vector<8x768xf32>
    %c17_i32_58 = arith.constant 17 : i32
    %138 = tpu.dynamic_rotate %126 by %c17_i32_58 dim 1 : vector<4x768xf32>, i32 -> vector<4x768xf32>
    %c2_59 = arith.constant 2 : index
    %c0_60 = arith.constant 0 : index
    %c0_61 = arith.constant 0 : index
    %139 = vector.load %arg7[%c2_59, %c0_60, %c0_61] : memref<9x8x4xf32, #tpu.memory_space<vmem>>, vector<1x8x4xf32>
    %140 = vector.shape_cast %139 : vector<1x8x4xf32> to vector<8x4xf32>
    %cst_62 = arith.constant dense<0.000000e+00> : vector<8x768xf32>
    %141 = tpu.matmul %140, %138, %cst_62 {dimension_numbers = #tpu.dot_dimension_numbers<[1], [0], [0], [1], [0, 0, 1, 1], [], []>} : vector<8x4xf32>, vector<4x768xf32>, vector<8x768xf32> -> vector<8x768xf32>
    %142 = arith.addf %137, %141 : vector<8x768xf32>
    %c1_i32_63 = arith.constant 1 : i32
    %143 = tpu.dynamic_rotate %126 by %c1_i32_63 dim 1 : vector<4x768xf32>, i32 -> vector<4x768xf32>
    %c3_64 = arith.constant 3 : index
    %c0_65 = arith.constant 0 : index
    %c0_66 = arith.constant 0 : index
    %144 = vector.load %arg7[%c3_64, %c0_65, %c0_66] : memref<9x8x4xf32, #tpu.memory_space<vmem>>, vector<1x8x4xf32>
    %145 = vector.shape_cast %144 : vector<1x8x4xf32> to vector<8x4xf32>
    %cst_67 = arith.constant dense<0.000000e+00> : vector<8x768xf32>
    %146 = tpu.matmul %145, %143, %cst_67 {dimension_numbers = #tpu.dot_dimension_numbers<[1], [0], [0], [1], [0, 0, 1, 1], [], []>} : vector<8x4xf32>, vector<4x768xf32>, vector<8x768xf32> -> vector<8x768xf32>
    %147 = arith.addf %142, %146 : vector<8x768xf32>
    %c4_68 = arith.constant 4 : index
    %c0_69 = arith.constant 0 : index
    %c0_70 = arith.constant 0 : index
    %148 = vector.load %arg7[%c4_68, %c0_69, %c0_70] : memref<9x8x4xf32, #tpu.memory_space<vmem>>, vector<1x8x4xf32>
    %149 = vector.shape_cast %148 : vector<1x8x4xf32> to vector<8x4xf32>
    %cst_71 = arith.constant dense<0.000000e+00> : vector<8x768xf32>
    %150 = tpu.matmul %149, %126, %cst_71 {dimension_numbers = #tpu.dot_dimension_numbers<[1], [0], [0], [1], [0, 0, 1, 1], [], []>} : vector<8x4xf32>, vector<4x768xf32>, vector<8x768xf32> -> vector<8x768xf32>
    %151 = arith.addf %147, %150 : vector<8x768xf32>
    %c767_i32_72 = arith.constant 767 : i32
    %152 = tpu.dynamic_rotate %126 by %c767_i32_72 dim 1 : vector<4x768xf32>, i32 -> vector<4x768xf32>
    %c5_73 = arith.constant 5 : index
    %c0_74 = arith.constant 0 : index
    %c0_75 = arith.constant 0 : index
    %153 = vector.load %arg7[%c5_73, %c0_74, %c0_75] : memref<9x8x4xf32, #tpu.memory_space<vmem>>, vector<1x8x4xf32>
    %154 = vector.shape_cast %153 : vector<1x8x4xf32> to vector<8x4xf32>
    %cst_76 = arith.constant dense<0.000000e+00> : vector<8x768xf32>
    %155 = tpu.matmul %154, %152, %cst_76 {dimension_numbers = #tpu.dot_dimension_numbers<[1], [0], [0], [1], [0, 0, 1, 1], [], []>} : vector<8x4xf32>, vector<4x768xf32>, vector<8x768xf32> -> vector<8x768xf32>
    %156 = arith.addf %151, %155 : vector<8x768xf32>
    %c751_i32_77 = arith.constant 751 : i32
    %157 = tpu.dynamic_rotate %126 by %c751_i32_77 dim 1 : vector<4x768xf32>, i32 -> vector<4x768xf32>
    %c6_78 = arith.constant 6 : index
    %c0_79 = arith.constant 0 : index
    %c0_80 = arith.constant 0 : index
    %158 = vector.load %arg7[%c6_78, %c0_79, %c0_80] : memref<9x8x4xf32, #tpu.memory_space<vmem>>, vector<1x8x4xf32>
    %159 = vector.shape_cast %158 : vector<1x8x4xf32> to vector<8x4xf32>
    %cst_81 = arith.constant dense<0.000000e+00> : vector<8x768xf32>
    %160 = tpu.matmul %159, %157, %cst_81 {dimension_numbers = #tpu.dot_dimension_numbers<[1], [0], [0], [1], [0, 0, 1, 1], [], []>} : vector<8x4xf32>, vector<4x768xf32>, vector<8x768xf32> -> vector<8x768xf32>
    %161 = arith.addf %156, %160 : vector<8x768xf32>
    %c750_i32_82 = arith.constant 750 : i32
    %162 = tpu.dynamic_rotate %126 by %c750_i32_82 dim 1 : vector<4x768xf32>, i32 -> vector<4x768xf32>
    %c7_83 = arith.constant 7 : index
    %c0_84 = arith.constant 0 : index
    %c0_85 = arith.constant 0 : index
    %163 = vector.load %arg7[%c7_83, %c0_84, %c0_85] : memref<9x8x4xf32, #tpu.memory_space<vmem>>, vector<1x8x4xf32>
    %164 = vector.shape_cast %163 : vector<1x8x4xf32> to vector<8x4xf32>
    %cst_86 = arith.constant dense<0.000000e+00> : vector<8x768xf32>
    %165 = tpu.matmul %164, %162, %cst_86 {dimension_numbers = #tpu.dot_dimension_numbers<[1], [0], [0], [1], [0, 0, 1, 1], [], []>} : vector<8x4xf32>, vector<4x768xf32>, vector<8x768xf32> -> vector<8x768xf32>
    %166 = arith.addf %161, %165 : vector<8x768xf32>
    %c749_i32_87 = arith.constant 749 : i32
    %167 = tpu.dynamic_rotate %126 by %c749_i32_87 dim 1 : vector<4x768xf32>, i32 -> vector<4x768xf32>
    %c8_88 = arith.constant 8 : index
    %c0_89 = arith.constant 0 : index
    %c0_90 = arith.constant 0 : index
    %168 = vector.load %arg7[%c8_88, %c0_89, %c0_90] : memref<9x8x4xf32, #tpu.memory_space<vmem>>, vector<1x8x4xf32>
    %169 = vector.shape_cast %168 : vector<1x8x4xf32> to vector<8x4xf32>
    %cst_91 = arith.constant dense<0.000000e+00> : vector<8x768xf32>
    %170 = tpu.matmul %169, %167, %cst_91 {dimension_numbers = #tpu.dot_dimension_numbers<[1], [0], [0], [1], [0, 0, 1, 1], [], []>} : vector<8x4xf32>, vector<4x768xf32>, vector<8x768xf32> -> vector<8x768xf32>
    %171 = arith.addf %166, %170 : vector<8x768xf32>
    %c0_92 = arith.constant 0 : index
    %c0_93 = arith.constant 0 : index
    %172 = vector.load %arg8[%c0_92, %c0_93] : memref<8x1xf32, #tpu.memory_space<vmem>>, vector<8x1xf32>
    %173 = vector.broadcast %172 : vector<8x1xf32> to vector<8x768xf32>
    %174 = arith.addf %171, %173 : vector<8x768xf32>
    %cst_94 = arith.constant 0.000000e+00 : f32
    %175 = vector.broadcast %cst_94 : f32 to vector<8x768xf32>
    %176 = arith.maximumf %174, %175 : vector<8x768xf32>
    %177 = vector.broadcast %0 : vector<1x768xf32> to vector<8x768xf32>
    %178 = arith.mulf %176, %177 : vector<8x768xf32>
    %cst_95 = arith.constant dense<0.000000e+00> : vector<8xf32>
    %179 = vector.multi_reduction <add>, %178, %cst_95 [1] : vector<8x768xf32> to vector<8xf32>
    %180 = vector.shape_cast %179 : vector<8xf32> to vector<8x1xf32>
    %cst_96 = arith.constant 0.001953125 : f32
    %181 = vector.broadcast %cst_96 : f32 to vector<8x1xf32>
    %182 = arith.mulf %180, %181 : vector<8x1xf32>
    %183 = vector.broadcast %182 : vector<8x1xf32> to vector<8x768xf32>
    %184 = arith.subf %176, %183 : vector<8x768xf32>
    %185 = vector.broadcast %0 : vector<1x768xf32> to vector<8x768xf32>
    %186 = arith.mulf %184, %185 : vector<8x768xf32>
    %187 = arith.mulf %186, %186 : vector<8x768xf32>
    %cst_97 = arith.constant dense<0.000000e+00> : vector<8xf32>
    %188 = vector.multi_reduction <add>, %187, %cst_97 [1] : vector<8x768xf32> to vector<8xf32>
    %189 = vector.shape_cast %188 : vector<8xf32> to vector<8x1xf32>
    %cst_98 = arith.constant 0.001953125 : f32
    %190 = vector.broadcast %cst_98 : f32 to vector<8x1xf32>
    %191 = arith.mulf %189, %190 : vector<8x1xf32>
    %192 = vector.broadcast %182 : vector<8x1xf32> to vector<8x768xf32>
    %193 = arith.subf %176, %192 : vector<8x768xf32>
    %cst_99 = arith.constant 9.99999974E-6 : f32
    %194 = vector.broadcast %cst_99 : f32 to vector<8x1xf32>
    %195 = arith.addf %191, %194 : vector<8x1xf32>
    %196 = math.rsqrt %195 : vector<8x1xf32>
    %197 = vector.broadcast %196 : vector<8x1xf32> to vector<8x768xf32>
    %198 = arith.mulf %193, %197 : vector<8x768xf32>
    %c0_100 = arith.constant 0 : index
    %c0_101 = arith.constant 0 : index
    %199 = vector.load %arg9[%c0_100, %c0_101] : memref<8x1xf32, #tpu.memory_space<vmem>>, vector<8x1xf32>
    %200 = vector.broadcast %199 : vector<8x1xf32> to vector<8x768xf32>
    %201 = arith.mulf %198, %200 : vector<8x768xf32>
    %c0_102 = arith.constant 0 : index
    %c0_103 = arith.constant 0 : index
    %202 = vector.load %arg10[%c0_102, %c0_103] : memref<8x1xf32, #tpu.memory_space<vmem>>, vector<8x1xf32>
    %203 = vector.broadcast %202 : vector<8x1xf32> to vector<8x768xf32>
    %204 = arith.addf %201, %203 : vector<8x768xf32>
    %c766_i32_104 = arith.constant 766 : i32
    %205 = tpu.dynamic_rotate %204 by %c766_i32_104 dim 1 : vector<8x768xf32>, i32 -> vector<8x768xf32>
    %206 = vector.shape_cast %9 : vector<1x768xi1> to vector<1x768xi1>
    %207 = vector.broadcast %206 : vector<1x768xi1> to vector<8x768xi1>
    %208 = arith.select %207, %205, %204 : vector<8x768xi1>, vector<8x768xf32>
    %c2_i32_105 = arith.constant 2 : i32
    %209 = tpu.dynamic_rotate %208 by %c2_i32_105 dim 1 : vector<8x768xf32>, i32 -> vector<8x768xf32>
    %210 = vector.shape_cast %12 : vector<1x768xi1> to vector<1x768xi1>
    %211 = vector.broadcast %210 : vector<1x768xi1> to vector<8x768xi1>
    %212 = arith.select %211, %209, %208 : vector<8x768xi1>, vector<8x768xf32>
    %c732_i32_106 = arith.constant 732 : i32
    %213 = tpu.dynamic_rotate %212 by %c732_i32_106 dim 1 : vector<8x768xf32>, i32 -> vector<8x768xf32>
    %214 = vector.shape_cast %3 : vector<1x768xi1> to vector<1x768xi1>
    %215 = vector.broadcast %214 : vector<1x768xi1> to vector<8x768xi1>
    %216 = arith.select %215, %213, %212 : vector<8x768xi1>, vector<8x768xf32>
    %c36_i32_107 = arith.constant 36 : i32
    %217 = tpu.dynamic_rotate %216 by %c36_i32_107 dim 1 : vector<8x768xf32>, i32 -> vector<8x768xf32>
    %218 = vector.shape_cast %6 : vector<1x768xi1> to vector<1x768xi1>
    %219 = vector.broadcast %218 : vector<1x768xi1> to vector<8x768xi1>
    %220 = arith.select %219, %217, %216 : vector<8x768xi1>, vector<8x768xf32>
    %cst_108 = arith.constant 0.000000e+00 : f32
    %221 = vector.broadcast %cst_108 : f32 to vector<8x768xf32>
    %c19_i32_109 = arith.constant 19 : i32
    %222 = tpu.dynamic_rotate %220 by %c19_i32_109 dim 1 : vector<8x768xf32>, i32 -> vector<8x768xf32>
    %c0_110 = arith.constant 0 : index
    %c0_111 = arith.constant 0 : index
    %c0_112 = arith.constant 0 : index
    %223 = vector.load %arg11[%c0_110, %c0_111, %c0_112] : memref<9x8x8xf32, #tpu.memory_space<vmem>>, vector<1x8x8xf32>
    %224 = vector.shape_cast %223 : vector<1x8x8xf32> to vector<8x8xf32>
    %cst_113 = arith.constant dense<0.000000e+00> : vector<8x768xf32>
    %225 = tpu.matmul %224, %222, %cst_113 {dimension_numbers = #tpu.dot_dimension_numbers<[1], [0], [0], [1], [0, 0, 1, 1], [], []>} : vector<8x8xf32>, vector<8x768xf32>, vector<8x768xf32> -> vector<8x768xf32>
    %226 = arith.addf %221, %225 : vector<8x768xf32>
    %c18_i32_114 = arith.constant 18 : i32
    %227 = tpu.dynamic_rotate %220 by %c18_i32_114 dim 1 : vector<8x768xf32>, i32 -> vector<8x768xf32>
    %c1_115 = arith.constant 1 : index
    %c0_116 = arith.constant 0 : index
    %c0_117 = arith.constant 0 : index
    %228 = vector.load %arg11[%c1_115, %c0_116, %c0_117] : memref<9x8x8xf32, #tpu.memory_space<vmem>>, vector<1x8x8xf32>
    %229 = vector.shape_cast %228 : vector<1x8x8xf32> to vector<8x8xf32>
    %cst_118 = arith.constant dense<0.000000e+00> : vector<8x768xf32>
    %230 = tpu.matmul %229, %227, %cst_118 {dimension_numbers = #tpu.dot_dimension_numbers<[1], [0], [0], [1], [0, 0, 1, 1], [], []>} : vector<8x8xf32>, vector<8x768xf32>, vector<8x768xf32> -> vector<8x768xf32>
    %231 = arith.addf %226, %230 : vector<8x768xf32>
    %c17_i32_119 = arith.constant 17 : i32
    %232 = tpu.dynamic_rotate %220 by %c17_i32_119 dim 1 : vector<8x768xf32>, i32 -> vector<8x768xf32>
    %c2_120 = arith.constant 2 : index
    %c0_121 = arith.constant 0 : index
    %c0_122 = arith.constant 0 : index
    %233 = vector.load %arg11[%c2_120, %c0_121, %c0_122] : memref<9x8x8xf32, #tpu.memory_space<vmem>>, vector<1x8x8xf32>
    %234 = vector.shape_cast %233 : vector<1x8x8xf32> to vector<8x8xf32>
    %cst_123 = arith.constant dense<0.000000e+00> : vector<8x768xf32>
    %235 = tpu.matmul %234, %232, %cst_123 {dimension_numbers = #tpu.dot_dimension_numbers<[1], [0], [0], [1], [0, 0, 1, 1], [], []>} : vector<8x8xf32>, vector<8x768xf32>, vector<8x768xf32> -> vector<8x768xf32>
    %236 = arith.addf %231, %235 : vector<8x768xf32>
    %c1_i32_124 = arith.constant 1 : i32
    %237 = tpu.dynamic_rotate %220 by %c1_i32_124 dim 1 : vector<8x768xf32>, i32 -> vector<8x768xf32>
    %c3_125 = arith.constant 3 : index
    %c0_126 = arith.constant 0 : index
    %c0_127 = arith.constant 0 : index
    %238 = vector.load %arg11[%c3_125, %c0_126, %c0_127] : memref<9x8x8xf32, #tpu.memory_space<vmem>>, vector<1x8x8xf32>
    %239 = vector.shape_cast %238 : vector<1x8x8xf32> to vector<8x8xf32>
    %cst_128 = arith.constant dense<0.000000e+00> : vector<8x768xf32>
    %240 = tpu.matmul %239, %237, %cst_128 {dimension_numbers = #tpu.dot_dimension_numbers<[1], [0], [0], [1], [0, 0, 1, 1], [], []>} : vector<8x8xf32>, vector<8x768xf32>, vector<8x768xf32> -> vector<8x768xf32>
    %241 = arith.addf %236, %240 : vector<8x768xf32>
    %c4_129 = arith.constant 4 : index
    %c0_130 = arith.constant 0 : index
    %c0_131 = arith.constant 0 : index
    %242 = vector.load %arg11[%c4_129, %c0_130, %c0_131] : memref<9x8x8xf32, #tpu.memory_space<vmem>>, vector<1x8x8xf32>
    %243 = vector.shape_cast %242 : vector<1x8x8xf32> to vector<8x8xf32>
    %cst_132 = arith.constant dense<0.000000e+00> : vector<8x768xf32>
    %244 = tpu.matmul %243, %220, %cst_132 {dimension_numbers = #tpu.dot_dimension_numbers<[1], [0], [0], [1], [0, 0, 1, 1], [], []>} : vector<8x8xf32>, vector<8x768xf32>, vector<8x768xf32> -> vector<8x768xf32>
    %245 = arith.addf %241, %244 : vector<8x768xf32>
    %c767_i32_133 = arith.constant 767 : i32
    %246 = tpu.dynamic_rotate %220 by %c767_i32_133 dim 1 : vector<8x768xf32>, i32 -> vector<8x768xf32>
    %c5_134 = arith.constant 5 : index
    %c0_135 = arith.constant 0 : index
    %c0_136 = arith.constant 0 : index
    %247 = vector.load %arg11[%c5_134, %c0_135, %c0_136] : memref<9x8x8xf32, #tpu.memory_space<vmem>>, vector<1x8x8xf32>
    %248 = vector.shape_cast %247 : vector<1x8x8xf32> to vector<8x8xf32>
    %cst_137 = arith.constant dense<0.000000e+00> : vector<8x768xf32>
    %249 = tpu.matmul %248, %246, %cst_137 {dimension_numbers = #tpu.dot_dimension_numbers<[1], [0], [0], [1], [0, 0, 1, 1], [], []>} : vector<8x8xf32>, vector<8x768xf32>, vector<8x768xf32> -> vector<8x768xf32>
    %250 = arith.addf %245, %249 : vector<8x768xf32>
    %c751_i32_138 = arith.constant 751 : i32
    %251 = tpu.dynamic_rotate %220 by %c751_i32_138 dim 1 : vector<8x768xf32>, i32 -> vector<8x768xf32>
    %c6_139 = arith.constant 6 : index
    %c0_140 = arith.constant 0 : index
    %c0_141 = arith.constant 0 : index
    %252 = vector.load %arg11[%c6_139, %c0_140, %c0_141] : memref<9x8x8xf32, #tpu.memory_space<vmem>>, vector<1x8x8xf32>
    %253 = vector.shape_cast %252 : vector<1x8x8xf32> to vector<8x8xf32>
    %cst_142 = arith.constant dense<0.000000e+00> : vector<8x768xf32>
    %254 = tpu.matmul %253, %251, %cst_142 {dimension_numbers = #tpu.dot_dimension_numbers<[1], [0], [0], [1], [0, 0, 1, 1], [], []>} : vector<8x8xf32>, vector<8x768xf32>, vector<8x768xf32> -> vector<8x768xf32>
    %255 = arith.addf %250, %254 : vector<8x768xf32>
    %c750_i32_143 = arith.constant 750 : i32
    %256 = tpu.dynamic_rotate %220 by %c750_i32_143 dim 1 : vector<8x768xf32>, i32 -> vector<8x768xf32>
    %c7_144 = arith.constant 7 : index
    %c0_145 = arith.constant 0 : index
    %c0_146 = arith.constant 0 : index
    %257 = vector.load %arg11[%c7_144, %c0_145, %c0_146] : memref<9x8x8xf32, #tpu.memory_space<vmem>>, vector<1x8x8xf32>
    %258 = vector.shape_cast %257 : vector<1x8x8xf32> to vector<8x8xf32>
    %cst_147 = arith.constant dense<0.000000e+00> : vector<8x768xf32>
    %259 = tpu.matmul %258, %256, %cst_147 {dimension_numbers = #tpu.dot_dimension_numbers<[1], [0], [0], [1], [0, 0, 1, 1], [], []>} : vector<8x8xf32>, vector<8x768xf32>, vector<8x768xf32> -> vector<8x768xf32>
    %260 = arith.addf %255, %259 : vector<8x768xf32>
    %c749_i32_148 = arith.constant 749 : i32
    %261 = tpu.dynamic_rotate %220 by %c749_i32_148 dim 1 : vector<8x768xf32>, i32 -> vector<8x768xf32>
    %c8_149 = arith.constant 8 : index
    %c0_150 = arith.constant 0 : index
    %c0_151 = arith.constant 0 : index
    %262 = vector.load %arg11[%c8_149, %c0_150, %c0_151] : memref<9x8x8xf32, #tpu.memory_space<vmem>>, vector<1x8x8xf32>
    %263 = vector.shape_cast %262 : vector<1x8x8xf32> to vector<8x8xf32>
    %cst_152 = arith.constant dense<0.000000e+00> : vector<8x768xf32>
    %264 = tpu.matmul %263, %261, %cst_152 {dimension_numbers = #tpu.dot_dimension_numbers<[1], [0], [0], [1], [0, 0, 1, 1], [], []>} : vector<8x8xf32>, vector<8x768xf32>, vector<8x768xf32> -> vector<8x768xf32>
    %265 = arith.addf %260, %264 : vector<8x768xf32>
    %c0_153 = arith.constant 0 : index
    %c0_154 = arith.constant 0 : index
    %266 = vector.load %arg12[%c0_153, %c0_154] : memref<8x1xf32, #tpu.memory_space<vmem>>, vector<8x1xf32>
    %267 = vector.broadcast %266 : vector<8x1xf32> to vector<8x768xf32>
    %268 = arith.addf %265, %267 : vector<8x768xf32>
    %cst_155 = arith.constant 0.000000e+00 : f32
    %269 = vector.broadcast %cst_155 : f32 to vector<8x768xf32>
    %270 = arith.maximumf %268, %269 : vector<8x768xf32>
    %271 = vector.broadcast %0 : vector<1x768xf32> to vector<8x768xf32>
    %272 = arith.mulf %270, %271 : vector<8x768xf32>
    %cst_156 = arith.constant dense<0.000000e+00> : vector<8xf32>
    %273 = vector.multi_reduction <add>, %272, %cst_156 [1] : vector<8x768xf32> to vector<8xf32>
    %274 = vector.shape_cast %273 : vector<8xf32> to vector<8x1xf32>
    %cst_157 = arith.constant 0.001953125 : f32
    %275 = vector.broadcast %cst_157 : f32 to vector<8x1xf32>
    %276 = arith.mulf %274, %275 : vector<8x1xf32>
    %277 = vector.broadcast %276 : vector<8x1xf32> to vector<8x768xf32>
    %278 = arith.subf %270, %277 : vector<8x768xf32>
    %279 = vector.broadcast %0 : vector<1x768xf32> to vector<8x768xf32>
    %280 = arith.mulf %278, %279 : vector<8x768xf32>
    %281 = arith.mulf %280, %280 : vector<8x768xf32>
    %cst_158 = arith.constant dense<0.000000e+00> : vector<8xf32>
    %282 = vector.multi_reduction <add>, %281, %cst_158 [1] : vector<8x768xf32> to vector<8xf32>
    %283 = vector.shape_cast %282 : vector<8xf32> to vector<8x1xf32>
    %cst_159 = arith.constant 0.001953125 : f32
    %284 = vector.broadcast %cst_159 : f32 to vector<8x1xf32>
    %285 = arith.mulf %283, %284 : vector<8x1xf32>
    %286 = vector.broadcast %276 : vector<8x1xf32> to vector<8x768xf32>
    %287 = arith.subf %270, %286 : vector<8x768xf32>
    %cst_160 = arith.constant 9.99999974E-6 : f32
    %288 = vector.broadcast %cst_160 : f32 to vector<8x1xf32>
    %289 = arith.addf %285, %288 : vector<8x1xf32>
    %290 = math.rsqrt %289 : vector<8x1xf32>
    %291 = vector.broadcast %290 : vector<8x1xf32> to vector<8x768xf32>
    %292 = arith.mulf %287, %291 : vector<8x768xf32>
    %c0_161 = arith.constant 0 : index
    %c0_162 = arith.constant 0 : index
    %293 = vector.load %arg13[%c0_161, %c0_162] : memref<8x1xf32, #tpu.memory_space<vmem>>, vector<8x1xf32>
    %294 = vector.broadcast %293 : vector<8x1xf32> to vector<8x768xf32>
    %295 = arith.mulf %292, %294 : vector<8x768xf32>
    %c0_163 = arith.constant 0 : index
    %c0_164 = arith.constant 0 : index
    %296 = vector.load %arg14[%c0_163, %c0_164] : memref<8x1xf32, #tpu.memory_space<vmem>>, vector<8x1xf32>
    %297 = vector.broadcast %296 : vector<8x1xf32> to vector<8x768xf32>
    %298 = arith.addf %295, %297 : vector<8x768xf32>
    %299 = vector.extract_strided_slice %298 {offsets = [0, 0], sizes = [8, 384], strides = [1, 1]} : vector<8x768xf32> to vector<8x384xf32>
    %300 = arith.truncf %299 : vector<8x384xf32> to vector<8x384xbf16>
    %c0_165 = arith.constant 0 : index
    %c0_166 = arith.constant 0 : index
    %c0_167 = arith.constant 0 : index
    %c0_168 = arith.constant 0 : index
    %301 = vector.load %arg15[%c0_165, %c0_166, %c0_167, %c0_168] : memref<1x2x8x384xbf16, #tpu.memory_space<vmem>>, vector<1x1x8x384xbf16>
    %302 = vector.shape_cast %301 : vector<1x1x8x384xbf16> to vector<8x384xbf16>
    %303 = vector.shape_cast %300 : vector<8x384xbf16> to vector<1x1x8x384xbf16>
    tpu.vector_store %arg15[%c0_165, %c0_166, %c0_167, %c0_168], %303 {strides = array<i32>} : memref<1x2x8x384xbf16, #tpu.memory_space<vmem>>, vector<1x1x8x384xbf16>,
    %304 = vector.extract_strided_slice %298 {offsets = [0, 384], sizes = [8, 384], strides = [1, 1]} : vector<8x768xf32> to vector<8x384xf32>
    %305 = arith.truncf %304 : vector<8x384xf32> to vector<8x384xbf16>
    %c0_169 = arith.constant 0 : index
    %c1_170 = arith.constant 1 : index
    %c0_171 = arith.constant 0 : index
    %c0_172 = arith.constant 0 : index
    %306 = vector.load %arg15[%c0_169, %c1_170, %c0_171, %c0_172] : memref<1x2x8x384xbf16, #tpu.memory_space<vmem>>, vector<1x1x8x384xbf16>
    %307 = vector.shape_cast %306 : vector<1x1x8x384xbf16> to vector<8x384xbf16>
    %308 = vector.shape_cast %305 : vector<8x384xbf16> to vector<1x1x8x384xbf16>
    tpu.vector_store %arg15[%c0_169, %c1_170, %c0_171, %c0_172], %308 {strides = array<i32>} : memref<1x2x8x384xbf16, #tpu.memory_space<vmem>>, vector<1x1x8x384xbf16>,
    return
  }
  func.func @transform_0(%arg0: i32) -> (i32, i32, i32) {
    %c0_i32 = arith.constant 0 : i32
    %c0_i32_0 = arith.constant 0 : i32
    %c0_i32_1 = arith.constant 0 : i32
    return %arg0, %c0_i32, %c0_i32_0 : i32, i32, i32
  }
  func.func @transform_1(%arg0: i32) -> (i32, i32) {
    %c0_i32 = arith.constant 0 : i32
    %c0_i32_0 = arith.constant 0 : i32
    %c0_i32_1 = arith.constant 0 : i32
    return %c0_i32, %c0_i32_0 : i32, i32
  }
  func.func @transform_2(%arg0: i32) -> (i32, i32, i32) {
    %c0_i32 = arith.constant 0 : i32
    %c0_i32_0 = arith.constant 0 : i32
    %c0_i32_1 = arith.constant 0 : i32
    %c0_i32_2 = arith.constant 0 : i32
    return %c0_i32, %c0_i32_0, %c0_i32_1 : i32, i32, i32
  }
  func.func @transform_3(%arg0: i32) -> (i32, i32) {
    %c0_i32 = arith.constant 0 : i32
    %c0_i32_0 = arith.constant 0 : i32
    %c0_i32_1 = arith.constant 0 : i32
    return %c0_i32, %c0_i32_0 : i32, i32
  }
  func.func @transform_4(%arg0: i32) -> (i32, i32) {
    %c0_i32 = arith.constant 0 : i32
    %c0_i32_0 = arith.constant 0 : i32
    %c0_i32_1 = arith.constant 0 : i32
    return %c0_i32, %c0_i32_0 : i32, i32
  }
  func.func @transform_5(%arg0: i32) -> (i32, i32) {
    %c0_i32 = arith.constant 0 : i32
    %c0_i32_0 = arith.constant 0 : i32
    %c0_i32_1 = arith.constant 0 : i32
    return %c0_i32, %c0_i32_0 : i32, i32
  }
  func.func @transform_6(%arg0: i32) -> (i32, i32, i32) {
    %c0_i32 = arith.constant 0 : i32
    %c0_i32_0 = arith.constant 0 : i32
    %c0_i32_1 = arith.constant 0 : i32
    %c0_i32_2 = arith.constant 0 : i32
    return %c0_i32, %c0_i32_0, %c0_i32_1 : i32, i32, i32
  }
  func.func @transform_7(%arg0: i32) -> (i32, i32) {
    %c0_i32 = arith.constant 0 : i32
    %c0_i32_0 = arith.constant 0 : i32
    %c0_i32_1 = arith.constant 0 : i32
    return %c0_i32, %c0_i32_0 : i32, i32
  }
  func.func @transform_8(%arg0: i32) -> (i32, i32) {
    %c0_i32 = arith.constant 0 : i32
    %c0_i32_0 = arith.constant 0 : i32
    %c0_i32_1 = arith.constant 0 : i32
    return %c0_i32, %c0_i32_0 : i32, i32
  }
  func.func @transform_9(%arg0: i32) -> (i32, i32) {
    %c0_i32 = arith.constant 0 : i32
    %c0_i32_0 = arith.constant 0 : i32
    %c0_i32_1 = arith.constant 0 : i32
    return %c0_i32, %c0_i32_0 : i32, i32
  }
  func.func @transform_10(%arg0: i32) -> (i32, i32, i32) {
    %c0_i32 = arith.constant 0 : i32
    %c0_i32_0 = arith.constant 0 : i32
    %c0_i32_1 = arith.constant 0 : i32
    %c0_i32_2 = arith.constant 0 : i32
    return %c0_i32, %c0_i32_0, %c0_i32_1 : i32, i32, i32
  }
  func.func @transform_11(%arg0: i32) -> (i32, i32) {
    %c0_i32 = arith.constant 0 : i32
    %c0_i32_0 = arith.constant 0 : i32
    %c0_i32_1 = arith.constant 0 : i32
    return %c0_i32, %c0_i32_0 : i32, i32
  }
  func.func @transform_12(%arg0: i32) -> (i32, i32) {
    %c0_i32 = arith.constant 0 : i32
    %c0_i32_0 = arith.constant 0 : i32
    %c0_i32_1 = arith.constant 0 : i32
    return %c0_i32, %c0_i32_0 : i32, i32
  }
  func.func @transform_13(%arg0: i32) -> (i32, i32) {
    %c0_i32 = arith.constant 0 : i32
    %c0_i32_0 = arith.constant 0 : i32
    %c0_i32_1 = arith.constant 0 : i32
    return %c0_i32, %c0_i32_0 : i32, i32
  }
  func.func @transform_14(%arg0: i32) -> (i32, i32, i32, i32) {
    %c0_i32 = arith.constant 0 : i32
    %c0_i32_0 = arith.constant 0 : i32
    %c0_i32_1 = arith.constant 0 : i32
    %c0_i32_2 = arith.constant 0 : i32
    return %arg0, %c0_i32, %c0_i32_0, %c0_i32_1 : i32, i32, i32, i32
  }
}

</mosaic_0001>

<bundles_post_ra>
// kernel: siamese_forward.2
= control target key start
LH: loop header
LB: loop body
LE: loop exit
PB: predicated region body
PF: predicated region fallthrough
CT: control target
= control target key end

     0   :  { %s6597_s29 = smov 0   ;;  %s8282_s0 = inlined_call_operand.vmem [shape: f32[2,1,768], index: 0, kind: input, shape index: {}]   ;;  %s8283_s1 = inlined_call_operand.vmem [shape: f32[5,768], index: 1, kind: input, shape index: {}]   ;;  %s8284_s2 = inlined_call_operand.vmem [shape: f32[9,4,1], index: 2, kind: input, shape index: {}]   ;;  %s8285_s3 = inlined_call_operand.vmem [shape: f32[4,1], index: 3, kind: input, shape index: {}]   ;;  %s8286_s4 = inlined_call_operand.vmem [shape: f32[4,1], index: 4, kind: input, shape index: {}]   ;;  %s8287_s5 = inlined_call_operand.vmem [shape: f32[4,1], index: 5, kind: input, shape index: {}]   ;;  %s8288_s6 = inlined_call_operand.vmem [shape: f32[9,8,4], index: 6, kind: input, shape index: {}]   ;;  %s8289_s7 = inlined_call_operand.vmem [shape: f32[8,1], index: 7, kind: input, shape index: {}]   ;;  %s8290_s8 = inlined_call_operand.vmem [shape: f32[8,1], index: 8, kind: input, shape index: {}]   ;;  %s8291_s9 = inlined_call_operand.vmem [shape: f32[8,1], index: 9, kind: input, shape index: {}]   ;;  %s8292_s10 = inlined_call_operand.vmem [shape: f32[9,8,8], index: 10, kind: input, shape index: {}]   ;;  %s8293_s11 = inlined_call_operand.vmem [shape: f32[8,1], index: 11, kind: input, shape index: {}]   ;;  %s8294_s12 = inlined_call_operand.vmem [shape: f32[8,1], index: 12, kind: input, shape index: {}]   ;;  %s8295_s13 = inlined_call_operand.vmem [shape: f32[8,1], index: 13, kind: input, shape index: {}]   ;;  %s8296_s14 = inlined_call_operand.vmem [shape: bf16[2,2,8,384], index: 14, kind: output, shape index: {}]  }
   0x1 LB: > { %s6214_s30 = sadd.s32 4294967295, %s6506_s29   ;;  %p6218_p0 = scmp.ge.s32.totalorder %s6506_s29, 1  ;;  %s6506_s29 = sphi %s6597_s29, %s24_s29  }
   0x2   : > { %p411_p1 = scmp.lt.s32.totalorder %s6506_s29, 3 }
   0x4   : > { %p412_p2 = pnand %p6218_p0, %p411_p1 }
   0x6   : > { %415 = sbr.rel (%p412_p2) target bundleno = 3106 (0xc22), region = 76 }
   0xd   : > { %v6229_v0 = vld [vmem:[%s8284_s2 + $0x8] sm:$0xf]  ;;  %v541_v1 = vld [vmem:[%s8284_s2] sm:$0xf]  ;;  %p456_p3 = scmp.lt.s32.totalorder %s6214_s30, 1  ;;  %v490_v2 = vlaneseq  ;;  %v8297_v3 = vmov 0  }
   0xe   : > { %6493 = vset.pattern.permute.xlu1 %v8297_v3  ;;  %6492 = vset.pattern.permute.xlu0 %v8297_v3  ;;  %v6228_v5 = vld [vmem:[%s8284_s2 + $0x4] sm:$0xf]  ;;  %s6509_s25 = smov 19   ;;  %s6510_s26 = smov 18   ;;  %v6230_v15 = vld [vmem:[%s8284_s2 + $0xc] sm:$0xf] }
   0xf   : > { %668 = vperm.xlu1 %6493, %v6229_v0   ;;  %544 = vperm.xlu0 %6492, %v541_v1   ;;  %s8570_s30 = smov (!%p456_p3, %s6214_s30), 1  ;;  %v491_v4 = vshrl.u32 %v490_v2, 7  ;;  %s6511_s15 = smov 17   ;;  %v6231_v18 = vld [vmem:[%s8284_s2 + $0x10] sm:$0xf]  ;;  %v6815_v55 = vand.u32 127, %v490_v2 }
  0x10   : > { %s6468_s21 = smul.u32 6, %s8570_s30  ;;  %s6512_s18 = smov 1   ;;  %v6232_v20 = vld [vmem:[%s8284_s2 + $0x14] sm:$0xf]  ;;  %v6233_v22 = vld [vmem:[%s8284_s2 + $0x18] sm:$0xf] }
  0x11   : > { %v6620_v6 = vsub.s32 0, %v491_v4  ;;  %v6622_v7 = vsub.s32 1, %v491_v4  ;;  %v6627_v8 = vsub.s32 5, %v491_v4  ;;  %v6646_v13 = vsub.s32 2, %v491_v4  ;;  %s6513_s23 = smov 127   ;;  %s6514_s28 = smov 111  }
  0x12   : > { %s459_s24 = scalar_lea.vmem %s8282_s0, %s6468_s21  ;;  %v6664_v16 = vsub.s32 3, %v491_v4  ;;  %v6686_v19 = vsub.s32 4, %v491_v4  ;;  %v6234_v23 = vld [vmem:[%s8284_s2 + $0x1c] sm:$0xf]  ;;  %v6235_v24 = vld [vmem:[%s8284_s2 + $0x20] sm:$0xf] }
  0x13   : > { %606 = vperm.xlu0 %6492, %v6228_v5   ;;  %8336 = vst [vmem:[#allocation2_spill] sm:$0xff] %v6627_v8  ;;  %v488_v9 = vld [vmem:[%s459_s24] sm:$0x3f]  ;;  %s6515_s19 = smov 110   ;;  %s6516_s20 = smov 109   ;;  %vm8315_vm0 = vcmp.lt.s32.totalorder %v6815_v55, 18 }
  0x14   : > { %v6630_v10 = vrot.slane %v488_v9, %v6622_v7  ;;  %v6633_v11 = vrot.slane %v488_v9, %v6620_v6  ;;  %v6640_v12 = vrot.slane %v488_v9, %v6627_v8  ;;  %v6653_v14 = vrot.slane %v488_v9, %v6646_v13  ;;  %8337 = vst [vmem:[#allocation3_spill] sm:$0xff] %v6686_v19  ;;  %v1036_v25 = vld [vmem:[%s8285_s3] sm:$0xf]  ;;  %s6517_s16 = smov 126   ;;  %s8310_s27 = smov 2  }
  0x15   : > { %v6671_v17 = vrot.slane %v488_v9, %v6664_v16  ;;  %v6694_v21 = vrot.slane %v488_v9, %v6686_v19  ;;  %vm8313_vm1 = vcmp.lt.s32.totalorder %v6815_v55, 19  ;;  %vm8309_vm2 = vcmp.lt.s32.totalorder %v6815_v55, 17  ;;  %v465_v62 = vld [vmem:[%s8283_s1] ss:$8 sm:$0xf]  ;;  %s8319_s17 = smov 92  }
  0x16   : > { %520 = vrot.lane.b32.xlu1 %v6633_v11, %s6509_s25  ;;  %vm8308_vm3 = vcmp.lt.s32.totalorder %v6815_v55, 1  ;;  %v466_v63 = vld [vmem:[%s8283_s1] ss:$8 sm:$0x30]  ;;  %vm8307_vm4 = vcmp.lt.s32.totalorder %v6815_v55, 127  ;;  %vm8306_vm5 = vcmp.lt.s32.totalorder %v6815_v55, 111 }
  0x17   : > { %522 = vrot.lane.b32.xlu0 %v6630_v10, %s6509_s25  ;;  %vm8305_vm6 = vcmp.lt.s32.totalorder %v6815_v55, 110  ;;  %vm8304_vm7 = vcmp.lt.s32.totalorder %v6815_v55, 109  ;;  %vm8314_vm8 = vcmask 1043456   ;;  %vm8303_vm10 = vcmp.lt.s32.totalorder %v6815_v55, 126  ;;  %s6469_s22 = smul.u32 24, %s8570_s30 }
  0x1a   : > { %530 = vrot.lane.b32.xlu1 %v6640_v12, %s6509_s25 }
  0x1b   : > { %583 = vrot.lane.b32.xlu0 %v6633_v11, %s6510_s26 }
  0x1e   : > { %585 = vrot.lane.b32.xlu1 %v6630_v10, %s6510_s26 }
  0x1f   : > { %593 = vrot.lane.b32.xlu0 %v6640_v12, %s6510_s26 }
  0x22   : > { %730 = vperm.xlu1 %6493, %v6230_v15  }
  0x23   : > { %524 = vrot.lane.b32.xlu0 %v6653_v14, %s6509_s25 }
  0x26   : > { %587 = vrot.lane.b32.xlu1 %v6653_v14, %s6510_s26 }
  0x27   : > { %645 = vrot.lane.b32.xlu0 %v6633_v11, %s6511_s15 }
  0x2a   : > { %647 = vrot.lane.b32.xlu1 %v6630_v10, %s6511_s15 }
  0x2b   : > { %655 = vrot.lane.b32.xlu0 %v6640_v12, %s6511_s15 }
  0x2e   : > { %773 = vperm.xlu1 %6493, %v6231_v18  }
  0x2f   : > { %526 = vrot.lane.b32.xlu0 %v6671_v17, %s6509_s25 }
  0x32   : > { %589 = vrot.lane.b32.xlu1 %v6671_v17, %s6510_s26 }
  0x33   : > { %649 = vrot.lane.b32.xlu0 %v6653_v14, %s6511_s15 }
  0x36   : > { %707 = vrot.lane.b32.xlu1 %v6633_v11, %s6512_s18 }
  0x37   : > { %709 = vrot.lane.b32.xlu0 %v6630_v10, %s6512_s18 }
  0x3a   : > { %717 = vrot.lane.b32.xlu1 %v6640_v12, %s6512_s18 }
  0x3b   : > { %811 = vperm.xlu0 %6492, %v6232_v20  }
  0x3e   : > { %528 = vrot.lane.b32.xlu1 %v6694_v21, %s6509_s25 }
  0x3f   : > { %591 = vrot.lane.b32.xlu0 %v6694_v21, %s6510_s26 }
  0x42   : > { %651 = vrot.lane.b32.xlu1 %v6671_v17, %s6511_s15 }
  0x43   : > { %711 = vrot.lane.b32.xlu0 %v6653_v14, %s6512_s18 }
  0x46   : > { %873 = vperm.xlu1 %6493, %v6233_v22   ;;  %v6859_v22 = vor.u32 %v466_v63, %v465_v62 }
  0x47   : > { %653 = vrot.lane.b32.xlu0 %v6694_v21, %s6511_s15 }
  0x4a   : > { %713 = vrot.lane.b32.xlu1 %v6671_v17, %s6512_s18 }
  0x4b   : > { %788 = vrot.lane.b32.xlu0 %v6633_v11, %s6513_s23 }
  0x4e   : > { %790 = vrot.lane.b32.xlu1 %v6630_v10, %s6513_s23 }
  0x4f   : > { %792 = vrot.lane.b32.xlu0 %v6653_v14, %s6513_s23 }
  0x52   : > { %935 = vperm.xlu1 %6493, %v6234_v23  }
  0x53   : > { %715 = vrot.lane.b32.xlu0 %v6694_v21, %s6512_s18 }
  0x56   : > { %794 = vrot.lane.b32.xlu1 %v6671_v17, %s6513_s23 }
  0x57   : > { %850 = vrot.lane.b32.xlu0 %v6633_v11, %s6514_s28 }
  0x5a   : > { %852 = vrot.lane.b32.xlu1 %v6630_v10, %s6514_s28 }
  0x5b   : > { %854 = vrot.lane.b32.xlu0 %v6653_v14, %s6514_s28 }
  0x5e   : > { %997 = vperm.xlu1 %6493, %v6235_v24  }
  0x5f   : > { %796 = vrot.lane.b32.xlu0 %v6694_v21, %s6513_s23 }
  0x62   : > { %856 = vrot.lane.b32.xlu1 %v6671_v17, %s6514_s28 }
  0x63   : > { %912 = vrot.lane.b32.xlu0 %v6633_v11, %s6515_s19 }
  0x66   : > { %914 = vrot.lane.b32.xlu1 %v6630_v10, %s6515_s19 }
  0x67   : > { %916 = vrot.lane.b32.xlu0 %v6653_v14, %s6515_s19 }
  0x6a   : > { %798 = vrot.lane.b32.xlu1 %v6640_v12, %s6513_s23 }
  0x6b   : > { %858 = vrot.lane.b32.xlu0 %v6694_v21, %s6514_s28 }
  0x6e   : > { %918 = vrot.lane.b32.xlu1 %v6671_v17, %s6515_s19 }
  0x6f   : > { %974 = vrot.lane.b32.xlu0 %v6633_v11, %s6516_s20 }
  0x72   : > { %976 = vrot.lane.b32.xlu1 %v6630_v10, %s6516_s20 }
  0x73   : > { %978 = vrot.lane.b32.xlu0 %v6653_v14, %s6516_s20 }
  0x76   : > { %1039 = vperm.xlu1 %6493, %v1036_v25  }
  0x77   : > { %860 = vrot.lane.b32.xlu0 %v6640_v12, %s6514_s28 }
  0x7a   : > { %920 = vrot.lane.b32.xlu1 %v6694_v21, %s6515_s19 }
  0x7b   : > { %980 = vrot.lane.b32.xlu0 %v6671_v17, %s6516_s20 }
  0x7e   : > { %922 = vrot.lane.b32.xlu1 %v6640_v12, %s6515_s19 }
  0x7f   : > { %982 = vrot.lane.b32.xlu0 %v6694_v21, %s6516_s20 }
  0x82   : > { %984 = vrot.lane.b32.xlu1 %v6640_v12, %s6516_s20 }
  0x8e   : > { %v6770_v26 = vpop.permute.xlu1 %668  ;;  %v6772_v27 = vpop.permute.xlu0 %544 }
  0x92   : > { %v6774_v28 = vpop.permute.xlu0 %606  ;;  %v521_v29 = vpop.permute.xlu1 %520 }
  0x96   : > { %v523_v30 = vpop.permute.xlu0 %522  ;;  %v6776_v31 = vpop.permute.xlu1 %530 }
  0x97   : > { %v539_v0 = vsel %vm8313_vm1, %v521_v29, %v523_v30  ;;  %v540_v2 = vsel %vm8313_vm1, %v6776_v31, %v521_v29 }
  0x98   : > { %v554_v23 = vrot.slane %v539_v0, %v6620_v6 }
  0x9a   : > { %v584_v32 = vpop.permute.xlu0 %583  ;;  %v586_v33 = vpop.permute.xlu1 %585 }
  0x9b   : > { %v600_v60 = vsel %vm8315_vm0, %v584_v32, %v586_v33 }
  0x9c   : > { %v616_v4 = vrot.slane %v600_v60, %v6620_v6 }
  0x9e   : > { %v6778_v34 = vpop.permute.xlu0 %593  ;;  %v634_v60 = vmul.f32 %v616_v4, %v6774_v28  ;;  %v572_v4 = vmul.f32 %v554_v23, %v6772_v27 }
  0x9f   : > { %v601_v61 = vsel %vm8315_vm0, %v6778_v34, %v584_v32  ;;  %v550_v32 = vrot.slane %v540_v2, %v6620_v6 }
  0xa0   : > { %v612_v18 = vrot.slane %v601_v61, %v6620_v6 }
  0xa1   : > { %v6782_v36 = vpop.permute.xlu1 %730 }
  0xa2   : > { %v6780_v35 = vpop.permute.xlu0 %524 }
  0xa3   : > { %v538_v24 = vsel %vm8313_vm1, %v523_v30, %v6780_v35 }
  0xa4   : > { %v558_v0 = vrot.slane %v538_v24, %v6620_v6 }
  0xa5   : > { %v588_v38 = vpop.permute.xlu1 %587 }
  0xa6   : > { %v646_v37 = vpop.permute.xlu0 %645  ;;  %v599_v5 = vsel %vm8315_vm0, %v586_v33, %v588_v38  ;;  %v573_v19 = vmul.f32 %v558_v0, %v6772_v27 }
  0xa7   : > { %v620_v33 = vrot.slane %v599_v5, %v6620_v6  ;;  %v6890_v5 = vrot.slane %v6859_v22, %v6620_v6 }
  0xa9   : > { %v648_v40 = vpop.permute.xlu1 %647 }
  0xaa   : > { %v6784_v39 = vpop.permute.xlu0 %655  ;;  %v662_v1 = vsel %vm8309_vm2, %v646_v37, %v648_v40 }
  0xab   : > { %v663_v25 = vsel %vm8309_vm2, %v6784_v39, %v646_v37  ;;  %v678_v29 = vrot.slane %v662_v1, %v6620_v6  ;;  %v633_v37 = vmul.f32 %v612_v18, %v6774_v28  ;;  %v635_v18 = vmul.f32 %v620_v33, %v6774_v28 }
  0xac   : > { %v674_v1 = vrot.slane %v663_v25, %v6620_v6 }
  0xad   : > { %v6788_v42 = vpop.permute.xlu1 %773  ;;  %v641_v0 = vadd.f32 %v635_v18, %v573_v19 }
  0xae   : > { %v6786_v41 = vpop.permute.xlu0 %526  ;;  %v6938_v19 = vmul.f32 %v6788_v42, %v6653_v14 }
  0xaf   : > { %v537_v24 = vsel %vm8313_vm1, %v6780_v35, %v6786_v41  ;;  %v695_v35 = vmul.f32 %v674_v1, %v6770_v26 }
  0xb1   : > { %v6792_v44 = vpop.permute.xlu1 %589 }
  0xb2   : > { %v6790_v43 = vpop.permute.xlu0 %649  ;;  %v598_v2 = vsel %vm8315_vm0, %v588_v38, %v6792_v44  ;;  %v640_v38 = vadd.f32 %v634_v60, %v572_v4  ;;  %v6912_v60 = vrot.slane %v6859_v22, %v6646_v13 }
  0xb3   : > { %v661_v61 = vsel %vm8309_vm2, %v648_v40, %v6790_v43  ;;  %v696_v40 = vmul.f32 %v678_v29, %v6770_v26  ;;  %v624_v23 = vrot.slane %v598_v2, %v6620_v6 }
  0xb4   : > { %v682_v25 = vrot.slane %v661_v61, %v6620_v6 }
  0xb5   : > { %v6796_v46 = vpop.permute.xlu1 %707  ;;  %v702_v61 = vadd.f32 %v696_v40, %v640_v38  ;;  %v6931_v40 = vmul.f32 %v6788_v42, %v6633_v11 }
  0xb6   : > { %v6794_v45 = vpop.permute.xlu0 %709  ;;  %v697_v1 = vmul.f32 %v682_v25, %v6770_v26 }
  0xb7   : > { %v724_v20 = vsel %vm8308_vm3, %v6796_v46, %v6794_v45 }
  0xb8   : > { %v740_v62 = vrot.slane %v724_v20, %v6620_v6  ;;  %v571_v20 = vmul.f32 %v550_v32, %v6772_v27  ;;  %v6906_v32 = vrot.slane %v6859_v22, %v6622_v7 }
  0xb9   : > { %v6800_v48 = vpop.permute.xlu1 %717 }
  0xba   : > { %v6798_v47 = vpop.permute.xlu0 %811  ;;  %v758_v29 = vmul.f32 %v740_v62, %v6782_v36  ;;  %v639_v33 = vadd.f32 %v633_v37, %v571_v20  ;;  %v562_v62 = vrot.slane %v537_v24, %v6620_v6  ;;  %v725_v2 = vsel %vm8308_vm3, %v6800_v48, %v6796_v46 }
  0xbb   : > { %v636_v46 = vmul.f32 %v624_v23, %v6774_v28 }
  0xbc   : > { %v764_v20 = vadd.f32 %v758_v29, %v702_v61  ;;  %v701_v14 = vadd.f32 %v695_v35, %v639_v33  ;;  %v574_v38 = vmul.f32 %v562_v62, %v6772_v27  ;;  %v6959_v29 = vmul.f32 %v6788_v42, %v6671_v17 }
  0xbd   : > { %v6804_v50 = vpop.permute.xlu1 %528  ;;  %v6961_v61 = vadd.f32 %v697_v1, %v641_v0 }
  0xbe   : > { %v6802_v49 = vpop.permute.xlu0 %591  ;;  %v536_v4 = vsel %vm8313_vm1, %v6786_v41, %v6804_v50  ;;  %v736_v41 = vrot.slane %v725_v2, %v6620_v6 }
  0xbf   : > { %v597_v37 = vsel %vm8315_vm0, %v6792_v44, %v6802_v49  ;;  %v777_v44 = vmul.f32 %v6788_v42, %v6630_v10  ;;  %v596_v11 = vsel %vm8315_vm0, %v6802_v49, %v6778_v34  ;;  %v535_v10 = vsel %vm8313_vm1, %v6804_v50, %v6776_v31 }
  0xc0   : > { %v628_v25 = vrot.slane %v597_v37, %v6620_v6  ;;  %v566_v23 = vrot.slane %v536_v4, %v6620_v6  ;;  %v6969_v31 = vmul.f32 %v6788_v42, %v6694_v21  ;;  %v6973_v49 = vmul.f32 %v6788_v42, %v6640_v12 }
  0xc1   : > { %v6808_v52 = vpop.permute.xlu1 %651  ;;  %v642_v50 = vadd.f32 %v636_v46, %v574_v38  ;;  %v632_v33 = vrot.slane %v596_v11, %v6620_v6  ;;  %v570_v17 = vrot.slane %v535_v10, %v6620_v6  ;;  %v757_v21 = vmul.f32 %v736_v41, %v6782_v36 }
  0xc2   : > { %v6806_v51 = vpop.permute.xlu0 %711  ;;  %v660_v34 = vsel %vm8309_vm2, %v6790_v43, %v6808_v52  ;;  %v637_v2 = vmul.f32 %v628_v25, %v6774_v28  ;;  %v783_v42 = vadd.f32 %v777_v44, %v764_v20  ;;  %v575_v37 = vmul.f32 %v566_v23, %v6772_v27 }
  0xc3   : > { %v723_v12 = vsel %vm8308_vm3, %v6794_v45, %v6806_v51  ;;  %v686_v0 = vrot.slane %v660_v34, %v6620_v6  ;;  %v763_v38 = vadd.f32 %v757_v21, %v701_v14  ;;  %vm8321_vm1 = vcmp.lt.s32.totalorder %v6815_v55, 92 }
  0xc4   : > { %v744_v20 = vrot.slane %v723_v12, %v6620_v6  ;;  %v643_v23 = vadd.f32 %v637_v2, %v575_v37 }
  0xc5   : > { %v6812_v54 = vpop.permute.xlu1 %873 }
  0xc6   : > { %v6810_v53 = vpop.permute.xlu0 %653  ;;  %v759_v14 = vmul.f32 %v744_v20, %v6782_v36 }
  0xc7   : > { %v659_v35 = vsel %vm8309_vm2, %v6808_v52, %v6810_v53  ;;  %v658_v52 = vsel %vm8309_vm2, %v6810_v53, %v6784_v39  ;;  %v638_v53 = vmul.f32 %v632_v33, %v6774_v28  ;;  %v698_v28 = vmul.f32 %v686_v0, %v6770_v26 }
  0xc8   : > { %v690_v4 = vrot.slane %v659_v35, %v6620_v6 }
  0xc9   : > { %v6819_v57 = vpop.permute.xlu1 %713  ;;  %v704_v37 = vadd.f32 %v698_v28, %v642_v50  ;;  %v782_v50 = vadd.f32 %v6931_v40, %v763_v38 }
  0xca   : > { %v6817_v56 = vpop.permute.xlu0 %788  ;;  %v722_v1 = vsel %vm8308_vm3, %v6806_v51, %v6819_v57  ;;  %v576_v51 = vmul.f32 %v570_v17, %v6772_v27  ;;  %v699_v34 = vmul.f32 %v690_v4, %v6770_v26 }
  0xcb   : > { %v748_v25 = vrot.slane %v722_v1, %v6620_v6 }
  0xcc   : > { %v644_v1 = vadd.f32 %v638_v53, %v576_v51  ;;  %v705_v20 = vadd.f32 %v699_v34, %v643_v23 }
  0xcd   : > { %v6826_v59 = vpop.permute.xlu1 %790  ;;  %v760_v2 = vmul.f32 %v748_v25, %v6782_v36 }
  0xce   : > { %v6824_v58 = vpop.permute.xlu0 %792  ;;  %v805_v46 = vsel %vm8307_vm4, %v6817_v56, %v6826_v59 }
  0xcf   : > { %v804_v45 = vsel %vm8307_vm4, %v6826_v59, %v6824_v58  ;;  %v694_v59 = vrot.slane %v658_v52, %v6620_v6  ;;  %v817_v10 = vrot.slane %v805_v46, %v6620_v6 }
  0xd1   : > { %v6852_v15 = vpop.permute.xlu1 %935  ;;  %v700_v21 = vmul.f32 %v694_v59, %v6770_v26  ;;  %v838_v4 = vmul.f32 %v817_v10, %v6798_v47 }
  0xd2   : > { %v6850_v9 = vpop.permute.xlu0 %715 }
  0xd3   : > { %v721_v39 = vsel %vm8308_vm3, %v6819_v57, %v6850_v9  ;;  %v720_v44 = vsel %vm8308_vm3, %v6850_v9, %v6800_v48  ;;  %v821_v48 = vrot.slane %v804_v45, %v6620_v6  ;;  %v844_v28 = vadd.f32 %v838_v4, %v782_v50 }
  0xd4   : > { %v752_v9 = vrot.slane %v721_v39, %v6620_v6  ;;  %v756_v33 = vrot.slane %v720_v44, %v6620_v6 }
  0xd5   : > { %v6878_v30 = vpop.permute.xlu1 %794  ;;  %v839_v45 = vmul.f32 %v821_v48, %v6798_v47 }
  0xd6   : > { %v6876_v63 = vpop.permute.xlu0 %850  ;;  %v761_v46 = vmul.f32 %v752_v9, %v6782_v36  ;;  %v762_v39 = vmul.f32 %v756_v33, %v6782_v36  ;;  %v803_v53 = vsel %vm8307_vm4, %v6824_v58, %v6878_v30  ;;  %v765_v36 = vadd.f32 %v759_v14, %v6961_v61 }
  0xd7   : > { %v845_v10 = vadd.f32 %v839_v45, %v783_v42  ;;  %v825_v40 = vrot.slane %v803_v53, %v6620_v6 }
  0xd8   : > { %v767_v48 = vadd.f32 %v761_v46, %v705_v20  ;;  %v784_v20 = vadd.f32 %v6938_v19, %v765_v36 }
  0xd9   : > { %v853_v8 = vpop.permute.xlu1 %852  ;;  %v840_v14 = vmul.f32 %v825_v40, %v6798_v47 }
  0xda   : > { %v6902_v3 = vpop.permute.xlu0 %854  ;;  %v867_v27 = vsel %vm8306_vm5, %v6876_v63, %v853_v8 }
  0xdb   : > { %v866_v57 = vsel %vm8306_vm5, %v853_v8, %v6902_v3  ;;  %v879_v17 = vrot.slane %v867_v27, %v6620_v6  ;;  %v766_v27 = vadd.f32 %v760_v2, %v704_v37 }
  0xdc   : > { %v883_v8 = vrot.slane %v866_v57, %v6620_v6  ;;  %v706_v57 = vadd.f32 %v700_v21, %v644_v1 }
  0xdd   : > { %v6942_v24 = vpop.permute.xlu1 %997  ;;  %v900_v44 = vmul.f32 %v879_v17, %v6812_v54  ;;  %v785_v50 = vadd.f32 %v6959_v29, %v766_v27  ;;  %v846_v29 = vadd.f32 %v840_v14, %v784_v20 }
  0xde   : > { %v6940_v18 = vpop.permute.xlu0 %796  ;;  %v768_v9 = vadd.f32 %v762_v39, %v706_v57 }
  0xdf   : > { %v802_v58 = vsel %vm8307_vm4, %v6878_v30, %v6940_v18  ;;  %v906_v34 = vadd.f32 %v900_v44, %v844_v28 }
  0xe0   : > { %v829_v17 = vrot.slane %v802_v58, %v6620_v6 }
  0xe1   : > { %v6983_v43 = vpop.permute.xlu1 %856 }
  0xe2   : > { %v6981_v62 = vpop.permute.xlu0 %912  ;;  %v865_v38 = vsel %vm8306_vm5, %v6902_v3, %v6983_v43  ;;  %v841_v44 = vmul.f32 %v829_v17, %v6798_v47 }
  0xe5   : > { %v915_v11 = vpop.permute.xlu1 %914 }
  0xe6   : > { %v917_v41 = vpop.permute.xlu0 %916  ;;  %v929_v12 = vsel %vm8305_vm6, %v6981_v62, %v915_v11 }
  0xe7   : > { %v928_v35 = vsel %vm8305_vm6, %v915_v11, %v917_v41  ;;  %v941_v51 = vrot.slane %v929_v12, %v6620_v6  ;;  %v901_v11 = vmul.f32 %v883_v8, %v6812_v54 }
  0xe8   : > { %v945_v26 = vrot.slane %v928_v35, %v6620_v6 }
  0xe9   : > { %v799_v52 = vpop.permute.xlu1 %798  ;;  %v962_v61 = vmul.f32 %v941_v51, %v6852_v15  ;;  %v907_v33 = vadd.f32 %v901_v11, %v845_v10  ;;  %v786_v11 = vadd.f32 %v6969_v31, %v767_v48  ;;  %v787_v10 = vadd.f32 %v6973_v49, %v768_v9 }
  0xea   : > { %v859_v0 = vpop.permute.xlu0 %858  ;;  %v963_v23 = vmul.f32 %v945_v26, %v6852_v15  ;;  %v801_v35 = vsel %vm8307_vm4, %v6940_v18, %v799_v52 }
  0xeb   : > { %v864_v30 = vsel %vm8306_vm5, %v6983_v43, %v859_v0  ;;  %v887_v43 = vrot.slane %v865_v38, %v6620_v6  ;;  %v968_v37 = vadd.f32 %v962_v61, %v906_v34  ;;  %v833_v45 = vrot.slane %v801_v35, %v6620_v6 }
  0xec   : > { %v969_v18 = vadd.f32 %v963_v23, %v907_v33  ;;  %v891_v4 = vrot.slane %v864_v30, %v6620_v6  ;;  %v847_v38 = vadd.f32 %v841_v44, %v785_v50 }
  0xed   : > { %v919_v25 = vpop.permute.xlu1 %918  ;;  %v842_v36 = vmul.f32 %v833_v45, %v6798_v47 }
  0xee   : > { %v7059_v59 = vpop.permute.xlu0 %974  ;;  %v927_v3 = vsel %vm8305_vm6, %v917_v41, %v919_v25  ;;  %v806_v41 = vsel %vm8307_vm4, %v799_v52, %v6817_v56  ;;  %v902_v52 = vmul.f32 %v887_v43, %v6812_v54  ;;  %v903_v28 = vmul.f32 %v891_v4, %v6812_v54 }
  0xef   : > { %v949_v46 = vrot.slane %v927_v3, %v6620_v6  ;;  %v837_v40 = vrot.slane %v806_v41, %v6620_v6  ;;  %v848_v35 = vadd.f32 %v842_v36, %v786_v11 }
  0xf0   : > { %v908_v23 = vadd.f32 %v902_v52, %v846_v29 }
  0xf1   : > { %v977_v8 = vpop.permute.xlu1 %976  ;;  %v964_v27 = vmul.f32 %v949_v46, %v6852_v15  ;;  %v843_v30 = vmul.f32 %v837_v40, %v6798_v47 }
  0xf2   : > { %v979_v42 = vpop.permute.xlu0 %978  ;;  %v991_v1 = vsel %vm8304_vm7, %v7059_v59, %v977_v8 }
  0xf3   : > { %v990_v12 = vsel %vm8304_vm7, %v977_v8, %v979_v42  ;;  %v1003_v21 = vrot.slane %v991_v1, %v6620_v6  ;;  %v849_v45 = vadd.f32 %v843_v30, %v787_v10 }
  0xf4   : > { %v1007_v2 = vrot.slane %v990_v12, %v6620_v6 }
  0xf5   : > { %v1024_v39 = vmul.f32 %v1003_v21, %v6942_v24  ;;  %v7099_v26 = vpop.permute.xlu1 %1039 }
  0xf6   : > { %v1025_v53 = vmul.f32 %v1007_v2, %v6942_v24  ;;  %v861_v51 = vpop.permute.xlu0 %860 }
  0xf7   : > { %v863_v56 = vsel %vm8306_vm5, %v859_v0, %v861_v51  ;;  %v1030_v57 = vadd.f32 %v1024_v39, %v968_v37  ;;  %v868_v0 = vsel %vm8306_vm5, %v861_v51, %v6876_v63  ;;  %v909_v63 = vadd.f32 %v903_v28, %v847_v38 }
  0xf8   : > { %v1031_v58 = vadd.f32 %v1025_v53, %v969_v18  ;;  %v895_v19 = vrot.slane %v863_v56, %v6620_v6  ;;  %v899_v8 = vrot.slane %v868_v0, %v6620_v6 }
  0xf9   : > { %v921_v48 = vpop.permute.xlu1 %920  ;;  %v7122_v9 = vadd.f32 %v7099_v26, %v1030_v57 }
  0xfa   : > { %v981_v31 = vpop.permute.xlu0 %980  ;;  %v926_v49 = vsel %vm8305_vm6, %v919_v25, %v921_v48  ;;  %v7127_v17 = vadd.f32 %v7099_v26, %v1031_v58  ;;  %v970_v25 = vadd.f32 %v964_v27, %v908_v23  ;;  %v905_v46 = vmul.f32 %v899_v8, %v6812_v54 }
  0xfb   : > { %v989_v61 = vsel %vm8304_vm7, %v979_v42, %v981_v31  ;;  %v953_v33 = vrot.slane %v926_v49, %v6620_v6  ;;  %v904_v42 = vmul.f32 %v895_v19, %v6812_v54  ;;  %v1048_v2 = vmax.f32 %v7122_v9, 0.0 }
  0xfc   : > { %v1011_v34 = vrot.slane %v989_v61, %v6620_v6  ;;  %v1049_v41 = vmax.f32 %v7127_v17, 0.0  ;;  %v911_v40 = vadd.f32 %v905_v46, %v849_v45 }
  0xfd   : > { %v965_v12 = vmul.f32 %v953_v33, %v6852_v15  ;;  %v923_v14 = vpop.permute.xlu1 %922  ;;  %v910_v39 = vadd.f32 %v904_v42, %v848_v35  ;;  %v1085_v11 = vmul.f32 %v6890_v5, %v1048_v2 }
  0xfe   : > { %v1026_v3 = vmul.f32 %v1011_v34, %v6942_v24  ;;  %v983_v1 = vpop.permute.xlu0 %982  ;;  %v925_v21 = vsel %vm8305_vm6, %v921_v48, %v923_v14  ;;  %v930_v47 = vsel %vm8305_vm6, %v923_v14, %v6981_v62  ;;  %v1086_v10 = vmul.f32 %v6906_v32, %v1049_v41  ;;  %v8338_v34 = vld [vmem:[#allocation3_spill] sm:$0xff] }
  0xff   : > { %v988_v43 = vsel %vm8304_vm7, %v981_v31, %v983_v1  ;;  %v957_v4 = vrot.slane %v925_v21, %v6620_v6  ;;  %v961_v53 = vrot.slane %v930_v47, %v6620_v6  ;;  %v971_v20 = vadd.f32 %v965_v12, %v909_v63 }
 0x100   : > { %v1032_v37 = vadd.f32 %v1026_v3, %v970_v25  ;;  %v1015_v18 = vrot.slane %v988_v43, %v6620_v6  ;;  %v1092_v61 = vsel %vm8314_vm8, %v1085_v11, 0.0  ;;  %v1093_v49 = vsel %vm8314_vm8, %v1086_v10, 0.0 }
 0x101   : > { %v966_v50 = vmul.f32 %v957_v4, %v6852_v15  ;;  %v985_v44 = vpop.permute.xlu1 %984  ;;  %v967_v56 = vmul.f32 %v961_v53, %v6852_v15  ;;  %v7162_v15 = vrot.slane %v6859_v22, %v6664_v16  ;;  %v7173_v33 = vrot.slane %v6859_v22, %v8338_v34 }
 0x102   : > { %v1044_v51 = vadd.f32 %v7099_v26, %v1032_v37  ;;  %v1027_v62 = vmul.f32 %v1015_v18, %v6942_v24  ;;  %v987_v52 = vsel %vm8304_vm7, %v983_v1, %v985_v44  ;;  %v992_v54 = vsel %vm8304_vm7, %v985_v44, %v7059_v59 }
 0x103   : > { %v1019_v28 = vrot.slane %v987_v52, %v6620_v6  ;;  %v1023_v19 = vrot.slane %v992_v54, %v6620_v6  ;;  %v972_v36 = vadd.f32 %v966_v50, %v910_v39  ;;  %v973_v0 = vadd.f32 %v967_v56, %v911_v40 }
 0x104   : > { %v1050_v57 = vmax.f32 %v1044_v51, 0.0  ;;  %v1033_v58 = vadd.f32 %v1027_v62, %v971_v20  ;;  %v1094_v42 = vadd.f32 %v1093_v49, %v1092_v61  ;;  %v1158_v61 = vld [vmem:[%s8287_s5] sm:$0xf]  ;;  %vm8312_vm7 = vcmp.lt.s32.totalorder %v6815_v55, 2 }
 0x105   : > { %v1028_v59 = vmul.f32 %v1019_v28, %v6942_v24  ;;  %v1029_v31 = vmul.f32 %v1023_v19, %v6942_v24  ;;  %v8339_v24 = vld [vmem:[#allocation2_spill] sm:$0xff] }
 0x106   : > { %v1045_v29 = vadd.f32 %v7099_v26, %v1033_v58  ;;  %v1087_v27 = vmul.f32 %v6912_v60, %v1050_v57  ;;  %v7180_v8 = vrot.slane %v6859_v22, %v8339_v24  ;;  %v1146_v22 = vld [vmem:[%s8286_s4] sm:$0xf] }
 0x107   : > { %v1034_v48 = vadd.f32 %v1028_v59, %v972_v36  ;;  %v1035_v9 = vadd.f32 %v1029_v31, %v973_v0 }
 0x108   : > { %v1051_v38 = vmax.f32 %v1045_v29, 0.0  ;;  %v1095_v63 = vsel %vm8314_vm8, %v1087_v27, 0.0 }
 0x109   : > { %v1046_v23 = vadd.f32 %v7099_v26, %v1034_v48  ;;  %v1047_v30 = vadd.f32 %v7099_v26, %v1035_v9  ;;  %v1096_v12 = vadd.f32 %v1095_v63, %v1094_v42 }
 0x10a   : > { %v1088_v17 = vmul.f32 %v7162_v15, %v1051_v38 }
 0x10b   : > { %v1052_v35 = vmax.f32 %v1046_v23, 0.0  ;;  %v1053_v3 = vmax.f32 %v1047_v30, 0.0 }
 0x10c   : > { %v1097_v25 = vsel %vm8314_vm8, %v1088_v17, 0.0 }
 0x10d   : > { %v1089_v1 = vmul.f32 %v7173_v33, %v1052_v35  ;;  %v1090_v14 = vmul.f32 %v7180_v8, %v1053_v3  ;;  %v1098_v43 = vadd.f32 %v1097_v25, %v1096_v12 }
 0x10f   : > { %v1099_v21 = vsel %vm8314_vm8, %v1089_v1, 0.0  ;;  %v1101_v26 = vsel %vm8314_vm8, %v1090_v14, 0.0 }
 0x110   : > { %v1100_v47 = vadd.f32 %v1099_v21, %v1098_v43 }
 0x112   : > { %v1102_v37 = vadd.f32 %v1101_v26, %v1100_v47 }
 0x114   : > { %1103 = vadd.xlane.f32.xlu0 %v1102_v37 }
 0x12a   : > { %1149 = vperm.xlu0 %6492, %v1146_v22  }
 0x1a1   : > { %v1104_v18 = vpop.xlane.xlu0 %1103 }
 0x1a2   : > { %v1105_v4 = vmul.f32 0.001953125, %v1104_v18 }
 0x1a4   : > { %v1106_v45 = vsub.f32 %v1048_v2, %v1105_v4  ;;  %v1107_v46 = vsub.f32 %v1049_v41, %v1105_v4  ;;  %v1108_v39 = vsub.f32 %v1050_v57, %v1105_v4  ;;  %v1109_v53 = vsub.f32 %v1051_v38, %v1105_v4 }
 0x1a5   : > { %v1110_v51 = vsub.f32 %v1052_v35, %v1105_v4  ;;  %v1111_v20 = vsub.f32 %v1053_v3, %v1105_v4 }
 0x1a6   : > { %v1112_v62 = vmul.f32 %v1106_v45, %v6890_v5  ;;  %v1113_v50 = vmul.f32 %v1107_v46, %v6906_v32  ;;  %v1114_v44 = vmul.f32 %v1108_v39, %v6912_v60  ;;  %v1115_v56 = vmul.f32 %v1109_v53, %v7162_v15 }
 0x1a7   : > { %v1116_v52 = vmul.f32 %v1110_v51, %v7173_v33  ;;  %v1117_v2 = vmul.f32 %v1111_v20, %v7180_v8 }
 0x1a8   : > { %v1118_v54 = vmul.f32 %v1112_v62, %v1112_v62  ;;  %v1119_v11 = vmul.f32 %v1113_v50, %v1113_v50  ;;  %v1120_v58 = vmul.f32 %v1114_v44, %v1114_v44  ;;  %v1121_v41 = vmul.f32 %v1115_v56, %v1115_v56 }
 0x1a9   : > { %v1122_v40 = vmul.f32 %v1116_v52, %v1116_v52  ;;  %v1123_v36 = vmul.f32 %v1117_v2, %v1117_v2  ;;  %v1150_v25 = vpop.permute.xlu0 %1149  ;;  %v8340_v62 = vmov 0  }
 0x1aa   : > { %v1124_v57 = vsel %vm8314_vm8, %v1118_v54, 0.0  ;;  %v1125_v28 = vsel %vm8314_vm8, %v1119_v11, 0.0  ;;  %v1127_v19 = vsel %vm8314_vm8, %v1120_v58, 0.0  ;;  %v1129_v59 = vsel %vm8314_vm8, %v1121_v41, 0.0 }
 0x1ab   : > { %v1126_v10 = vadd.f32 %v1125_v28, %v1124_v57  ;;  %v1131_v0 = vsel %vm8314_vm8, %v1122_v40, 0.0  ;;  %v1133_v48 = vsel %vm8314_vm8, %v1123_v36, 0.0 }
 0x1ad   : > { %v1128_v29 = vadd.f32 %v1127_v19, %v1126_v10 }
 0x1af   : > { %v1130_v27 = vadd.f32 %v1129_v59, %v1128_v29 }
 0x1b1   : > { %v1132_v31 = vadd.f32 %v1131_v0, %v1130_v27 }
 0x1b3   : > { %v1134_v38 = vadd.f32 %v1133_v48, %v1132_v31 }
 0x1b5   : > { %1135 = vadd.xlane.f32.xlu1 %v1134_v38 }
 0x1c6   : > { %1161 = vperm.xlu1 %6493, %v1158_v61  }
 0x242   : > { %v1136_v49 = vpop.xlane.xlu1 %1135 }
 0x243   : > { %v1137_v9 = vmul.f32 0.001953125, %v1136_v49 }
 0x245   : > { %v1138_v23 = vadd.f32 1e-05, %v1137_v9 }
 0x246   : > { %v1162_v1 = vpop.permute.xlu1 %1161 }
 0x247   : > { %6494 = vrsqrt.f32 %v1138_v23 }
 0x251   : > { %v6495_v17 = vpop.eup %6494 }
 0x252   : > { %v1141_v63 = vmul.f32 %v6495_v17, %v1107_v46  ;;  %v1140_v30 = vmul.f32 %v6495_v17, %v1106_v45  ;;  %v1143_v42 = vmul.f32 %v6495_v17, %v1109_v53  ;;  %v1142_v35 = vmul.f32 %v6495_v17, %v1108_v39  ;;  %v6224_v53 = vld [vmem:[%s8283_s1 + $0x3] ss:$8 sm:$0xf] }
 0x253   : > { %v1145_v14 = vmul.f32 %v6495_v17, %v1111_v20  ;;  %v1144_v43 = vmul.f32 %v6495_v17, %v1110_v51  ;;  %v6225_v51 = vld [vmem:[%s8283_s1 + $0x3] ss:$8 sm:$0x30] }
 0x254   : > { %v1153_v3 = vmul.f32 %v1150_v25, %v1141_v63  ;;  %v1152_v12 = vmul.f32 %v1150_v25, %v1140_v30  ;;  %v1155_v26 = vmul.f32 %v1150_v25, %v1143_v42  ;;  %v1154_v37 = vmul.f32 %v1150_v25, %v1142_v35 }
 0x255   : > { %v1157_v4 = vmul.f32 %v1150_v25, %v1145_v14  ;;  %v1156_v45 = vmul.f32 %v1150_v25, %v1144_v43  ;;  %v481_v20 = vor.u32 %v6225_v51, %v6224_v53  ;;  %v6226_v25 = vld [vmem:[%s8283_s1 + $0x4] ss:$8 sm:$0xf] }
 0x256   : > { %v1165_v21 = vadd.f32 %v1162_v1, %v1153_v3  ;;  %v1164_v47 = vadd.f32 %v1162_v1, %v1152_v12  ;;  %v1167_v22 = vadd.f32 %v1162_v1, %v1155_v26  ;;  %v1166_v18 = vadd.f32 %v1162_v1, %v1154_v37  ;;  %v6227_v3 = vld [vmem:[%s8283_s1 + $0x4] ss:$8 sm:$0x30] }
 0x257   : > { %v1169_v46 = vadd.f32 %v1162_v1, %v1157_v4  ;;  %v1168_v39 = vadd.f32 %v1162_v1, %v1156_v45  ;;  %vm482_vm9 = vcmp.gt.f32.partialorder %v481_v20, 0.0  ;;  %v486_v12 = vor.u32 %v6227_v3, %v6226_v25 }
 0x258   : > { %1172 = vrot.lane.b32.xlu1 %v1165_v21, %s6517_s16  ;;  %1170 = vrot.lane.b32.xlu0 %v1164_v47, %s6517_s16  ;;  %v1189_v50 = vsel %vm482_vm9, 1, %v8340_v62 }
 0x259   : > { %v1193_v44 = vrot.slane %v1189_v50, %v6620_v6  ;;  %v1197_v52 = vrot.slane %v1189_v50, %v6622_v7  ;;  %v1201_v54 = vrot.slane %v1189_v50, %v6646_v13  ;;  %v1213_v10 = vrot.slane %v1189_v50, %v8339_v24 }
 0x25a   : > { %v1209_v40 = vrot.slane %v1189_v50, %v8338_v34  ;;  %v1205_v38 = vrot.slane %v1189_v50, %v6664_v16 }
 0x25b   : > { %vm7220_vm11 = vcmp.eq.s32.totalorder %v1193_v44, 1  ;;  %vm7231_vm12 = vcmp.eq.s32.totalorder %v1197_v52, 1  ;;  %vm7235_vm13 = vcmp.eq.s32.totalorder %v1201_v54, 1  ;;  %vm7251_vm14 = vcmp.eq.s32.totalorder %v1213_v10, 1 }
 0x25c   : > { %1176 = vrot.lane.b32.xlu1 %v1167_v22, %s6517_s16  ;;  %1174 = vrot.lane.b32.xlu0 %v1166_v18, %s6517_s16  ;;  %vm7255_vm15 = vcmp.eq.s32.totalorder %v1209_v40, 1  ;;  %vm7272_vm9 = vcmp.eq.s32.totalorder %v1205_v38, 1  ;;  %v6221_v38 = vld [vmem:[%s8283_s1 + $0x1] ss:$8 sm:$0x30] }
 0x260   : > { %1180 = vrot.lane.b32.xlu1 %v1169_v46, %s6517_s16  ;;  %1178 = vrot.lane.b32.xlu0 %v1168_v39, %s6517_s16 }
 0x2ca   : > { %v1173_v11 = vpop.permute.xlu1 %1172  ;;  %v1171_v58 = vpop.permute.xlu0 %1170 }
 0x2cb   : > { %v1187_v2 = vsel %vm8303_vm10, %v1171_v58, %v1173_v11 }
 0x2cc   : > { %v1220_v41 = vsel %vm7220_vm11, %v1187_v2, %v1164_v47  ;;  %v8361_v2 = vmov 0 }
 0x2cd   : > { %1226 = vrot.lane.b32.xlu0 %v1220_v41, %s8310_s27 }
 0x2ce   : > { %v1177_v19 = vpop.permute.xlu1 %1176  ;;  %v1175_v29 = vpop.permute.xlu0 %1174 }
 0x2cf   : > { %v1185_v36 = vsel %vm8303_vm10, %v1175_v29, %v1177_v19  ;;  %v1186_v59 = vsel %vm8303_vm10, %v1173_v11, %v1175_v29 }
 0x2d0   : > { %v1221_v27 = vsel %vm7231_vm12, %v1186_v59, %v1165_v21  ;;  %v1222_v0 = vsel %vm7235_vm13, %v1185_v36, %v1166_v18  ;;  %v8363_v59 = vmov 0 }
 0x2d1   : > { %1228 = vrot.lane.b32.xlu1 %v1221_v27, %s8310_s27  ;;  %1230 = vrot.lane.b32.xlu0 %v1222_v0, %s8310_s27 }
 0x2d2   : > { %v1181_v61 = vpop.permute.xlu1 %1180  ;;  %v1179_v49 = vpop.permute.xlu0 %1178 }
 0x2d3   : > { %v1188_v9 = vsel %vm8303_vm10, %v1181_v61, %v1171_v58  ;;  %v1183_v23 = vsel %vm8303_vm10, %v1179_v49, %v1181_v61  ;;  %v1184_v30 = vsel %vm8303_vm10, %v1177_v19, %v1179_v49  ;;  %vm487_vm10 = vcmp.gt.f32.partialorder %v486_v12, 0.0 }
 0x2d4   : > { %v1225_v17 = vsel %vm7251_vm14, %v1188_v9, %v1169_v46  ;;  %v1224_v63 = vsel %vm7255_vm15, %v1183_v23, %v1168_v39  ;;  %v1223_v35 = vsel %vm7272_vm9, %v1184_v30, %v1167_v22  ;;  %v1245_v1 = vsel %vm487_vm10, 1, %v8340_v62 }
 0x2d5   : > { %1236 = vrot.lane.b32.xlu0 %v1225_v17, %s8310_s27  ;;  %1234 = vrot.lane.b32.xlu1 %v1224_v63, %s8310_s27  ;;  %v1253_v14 = vrot.slane %v1245_v1, %v6622_v7  ;;  %v1249_v47 = vrot.slane %v1245_v1, %v6620_v6  ;;  %v1269_v26 = vrot.slane %v1245_v1, %v8339_v24  ;;  %v8357_v46 = vmov 0 }
 0x2d6   : > { %v1257_v39 = vrot.slane %v1245_v1, %v6646_v13  ;;  %v1261_v53 = vrot.slane %v1245_v1, %v6664_v16  ;;  %v8359_v58 = vmov 0 }
 0x2d7   : > { %vm7288_vm6 = vcmp.eq.s32.totalorder %v1253_v14, 1  ;;  %vm7299_vm10 = vcmp.eq.s32.totalorder %v1249_v47, 1  ;;  %vm7303_vm5 = vcmp.eq.s32.totalorder %v1269_v26, 1 }
 0x2d8   : > { %v8358_v46 = vsel %vm7303_vm5, 4294967295, %v8357_v46  ;;  %vm7321_vm4 = vcmp.eq.s32.totalorder %v1257_v39, 1  ;;  %vm7325_vm3 = vcmp.eq.s32.totalorder %v1261_v53, 1 }
 0x2d9   : > { %1232 = vrot.lane.b32.xlu1 %v1223_v35, %s8310_s27  ;;  %v8360_v58 = vsel %vm7321_vm4, 4294967295, %v8359_v58  ;;  %v8362_v2 = vsel %vm7325_vm3, 4294967295, %v8361_v2  ;;  %s6520_s27 = smov 36  }
 0x33f   : > { %v1227_v43 = vpop.permute.xlu0 %1226 }
 0x343   : > { %v1229_v37 = vpop.permute.xlu1 %1228  ;;  %v1231_v22 = vpop.permute.xlu0 %1230 }
 0x344   : > { %v1243_v18 = vsel %vm8312_vm7, %v1227_v43, %v1229_v37  ;;  %v1242_v11 = vsel %vm8312_vm7, %v1229_v37, %v1231_v22 }
 0x345   : > { %v1277_v4 = vsel %vm7288_vm6, %v1243_v18, %v1221_v27  ;;  %v1278_v19 = vsel %vm7321_vm4, %v1242_v11, %v1222_v0  ;;  %v6220_v0 = vld [vmem:[%s8283_s1 + $0x1] ss:$8 sm:$0xf] }
 0x346   : > { %1284 = vrot.lane.b32.xlu1 %v1277_v4, %s8319_s17  ;;  %v471_v61 = vor.u32 %v6221_v38, %v6220_v0 }
 0x347   : > { %v1235_v51 = vpop.permute.xlu1 %1234  ;;  %v1237_v20 = vpop.permute.xlu0 %1236 }
 0x348   : > { %v1239_v50 = vsel %vm8312_vm7, %v1235_v51, %v1237_v20  ;;  %v1244_v44 = vsel %vm8312_vm7, %v1237_v20, %v1227_v43  ;;  %v8369_v43 = vmov 0  ;;  %v8371_v20 = vmov 0 }
 0x349   : > { %v1276_v52 = vsel %vm7299_vm10, %v1244_v44, %v1220_v41  ;;  %v1281_v54 = vsel %vm7303_vm5, %v1239_v50, %v1225_v17  ;;  %v1265_v41 = vrot.slane %v1245_v1, %v8338_v34  ;;  %v8367_v1 = vmov 0 }
 0x34a   : > { %1282 = vrot.lane.b32.xlu0 %v1276_v52, %s8319_s17  ;;  %1292 = vrot.lane.b32.xlu1 %v1281_v54, %s8319_s17  ;;  %v8373_v50 = vmov 0 }
 0x34b   : > { %v1233_v10 = vpop.permute.xlu1 %1232  ;;  %vm7340_vm2 = vcmp.eq.s32.totalorder %v1265_v41, 1 }
 0x34c   : > { %v1241_v40 = vsel %vm8312_vm7, %v1231_v22, %v1233_v10  ;;  %v1240_v36 = vsel %vm8312_vm7, %v1233_v10, %v1235_v51  ;;  %v8364_v59 = vsel %vm7340_vm2, 4294967295, %v8363_v59  ;;  %vm472_vm7 = vcmp.gt.f32.partialorder %v471_v61, 0.0 }
 0x34d   : > { %v1279_v29 = vsel %vm7325_vm3, %v1241_v40, %v1223_v35  ;;  %v1280_v27 = vsel %vm7340_vm2, %v1240_v36, %v1224_v63  ;;  %v1301_v49 = vsel %vm472_vm7, 1, %v8340_v62  ;;  %v8365_v63 = vmov 0  ;;  %v6223_v36 = vld [vmem:[%s8283_s1 + $0x2] ss:$8 sm:$0x30] }
 0x34e   : > { %1286 = vrot.lane.b32.xlu0 %v1278_v19, %s8319_s17  ;;  %1288 = vrot.lane.b32.xlu1 %v1279_v29, %s8319_s17  ;;  %v1305_v9 = vrot.slane %v1301_v49, %v6620_v6  ;;  %v1325_v17 = vrot.slane %v1301_v49, %v8339_v24  ;;  %v1309_v30 = vrot.slane %v1301_v49, %v6622_v7  ;;  %v8375_v10 = vmov 0 }
 0x34f   : > { %v1321_v47 = vrot.slane %v1301_v49, %v8338_v34  ;;  %v1313_v26 = vrot.slane %v1301_v49, %v6646_v13 }
 0x350   : > { %vm7357_vm8 = vcmp.eq.s32.totalorder %v1305_v9, 1  ;;  %vm7366_vm7 = vcmp.eq.s32.totalorder %v1325_v17, 1  ;;  %vm7373_vm0 = vcmp.eq.s32.totalorder %v1309_v30, 1  ;;  %v8377_v9 = vmov 0 }
 0x351   : > { %v8366_v63 = vsel %vm7357_vm8, 4294967295, %v8365_v63  ;;  %v8368_v1 = vsel %vm7366_vm7, 4294967295, %v8367_v1  ;;  %v8370_v43 = vsel %vm7373_vm0, 4294967295, %v8369_v43  ;;  %vm7393_vm2 = vcmp.eq.s32.totalorder %v1313_v26, 1 }
 0x352   : > { %1290 = vrot.lane.b32.xlu0 %v1280_v27, %s8319_s17  ;;  %v8374_v50 = vsel %vm7393_vm2, 4294967295, %v8373_v50  ;;  %s8480_s17 = smov 2  }
 0x3b8   : > { %v1285_v23 = vpop.permute.xlu1 %1284 }
 0x3bc   : > { %v1283_v35 = vpop.permute.xlu0 %1282  ;;  %v1293_v25 = vpop.permute.xlu1 %1292 }
 0x3bd   : > { %v1299_v3 = vsel %vm8321_vm1, %v1283_v35, %v1285_v23  ;;  %v1300_v14 = vsel %vm8321_vm1, %v1293_v25, %v1283_v35 }
 0x3be   : > { %v1332_v12 = vsel %vm7357_vm8, %v1299_v3, %v1276_v52  ;;  %v1337_v53 = vsel %vm7366_vm7, %v1300_v14, %v1281_v54  ;;  %vm7389_vm8 = vcmp.eq.s32.totalorder %v1321_v47, 1 }
 0x3bf   : > { %1338 = vrot.lane.b32.xlu0 %v1332_v12, %s6520_s27  ;;  %v8372_v20 = vsel %vm7389_vm8, 4294967295, %v8371_v20 }
 0x3c0   : > { %v1287_v37 = vpop.permute.xlu0 %1286  ;;  %v1289_v22 = vpop.permute.xlu1 %1288 }
 0x3c1   : > { %v1298_v18 = vsel %vm8321_vm1, %v1285_v23, %v1287_v37  ;;  %v1297_v51 = vsel %vm8321_vm1, %v1287_v37, %v1289_v22  ;;  %v8379_v23 = vmov 0 }
 0x3c2   : > { %v1333_v39 = vsel %vm7373_vm0, %v1298_v18, %v1277_v4  ;;  %v1317_v4 = vrot.slane %v1301_v49, %v6664_v16  ;;  %v1334_v11 = vsel %vm7393_vm2, %v1297_v51, %v1278_v19  ;;  %v6222_v19 = vld [vmem:[%s8283_s1 + $0x2] ss:$8 sm:$0xf] }
 0x3c3   : > { %1340 = vrot.lane.b32.xlu1 %v1333_v39, %s6520_s27  ;;  %1348 = vrot.lane.b32.xlu0 %v1337_v53, %s6520_s27 }
 0x3c4   : > { %v1291_v44 = vpop.permute.xlu0 %1290  ;;  %vm7408_vm7 = vcmp.eq.s32.totalorder %v1317_v4, 1 }
 0x3c5   : > { %v1295_v52 = vsel %vm8321_vm1, %v1291_v44, %v1293_v25  ;;  %v1296_v41 = vsel %vm8321_vm1, %v1289_v22, %v1291_v44  ;;  %v8376_v10 = vsel %vm7408_vm7, 4294967295, %v8375_v10 }
 0x3c6   : > { %v1336_v54 = vsel %vm7389_vm8, %v1295_v52, %v1280_v27  ;;  %v1335_v40 = vsel %vm7408_vm7, %v1296_v41, %v1279_v29  ;;  %v476_v27 = vor.u32 %v6223_v36, %v6222_v19  ;;  %v6521_v29 = vmov 0.0  }
 0x3c7   : > { %1346 = vrot.lane.b32.xlu1 %v1336_v54, %s6520_s27  ;;  %1342 = vrot.lane.b32.xlu0 %v1334_v11, %s6520_s27  ;;  %vm8328_vm7 = vcmp.lt.s32.totalorder %v6815_v55, 36 }
 0x3c8   : > { %vm477_vm1 = vcmp.gt.f32.partialorder %v476_v27, 0.0  ;;  %1519 = vmatprep.mubr.f32.mxu0 %v6521_v29  ;;  %3997 = vmatprep.mubr.f32.mxu1 %v6521_v29  ;;  %v6236_v27 = vld [vmem:[%s8288_s6 + $0x8] sm:$0xff] }
 0x3c9   : > { %v1357_v0 = vsel %vm477_vm1, 1, %v8340_v62 }
 0x3ca   : > { %v1361_v38 = vrot.slane %v1357_v0, %v6620_v6  ;;  %v1365_v61 = vrot.slane %v1357_v0, %v6622_v7  ;;  %v1369_v6 = vrot.slane %v1357_v0, %v6646_v13  ;;  %v1381_v7 = vrot.slane %v1357_v0, %v8339_v24 }
 0x3cb   : > { %1344 = vrot.lane.b32.xlu1 %v1335_v40, %s6520_s27  ;;  %v8381_v13 = vmov 0  ;;  %v8383_v24 = vmov 0  ;;  %v1377_v14 = vrot.slane %v1357_v0, %v8338_v34  ;;  %v8387_v34 = vmov 0 }
 0x3cc   : > { %vm7427_vm2 = vcmp.eq.s32.totalorder %v1361_v38, 1  ;;  %vm7431_vm8 = vcmp.eq.s32.totalorder %v1365_v61, 1  ;;  %vm7453_vm1 = vcmp.eq.s32.totalorder %v1369_v6, 1  ;;  %vm7457_vm0 = vcmp.eq.s32.totalorder %v1381_v7, 1 }
 0x3cd   : > { %v8378_v9 = vsel %vm7427_vm2, 4294967295, %v8377_v9  ;;  %v8380_v23 = vsel %vm7431_vm8, 4294967295, %v8379_v23  ;;  %v8382_v13 = vsel %vm7453_vm1, 4294967295, %v8381_v13  ;;  %v8384_v24 = vsel %vm7457_vm0, 4294967295, %v8383_v24 }
 0x431   : > { %v1339_v49 = vpop.permute.xlu0 %1338 }
 0x435   : > { %v1349_v62 = vpop.permute.xlu0 %1348  ;;  %v1341_v17 = vpop.permute.xlu1 %1340 }
 0x436   : > { %v1356_v30 = vsel %vm8328_vm7, %v1349_v62, %v1339_v49  ;;  %v1355_v35 = vsel %vm8328_vm7, %v1339_v49, %v1341_v17 }
 0x437   : > { %v7443_v25 = vsel %vm7427_vm2, %v1356_v30, %v1332_v12  ;;  %v7447_v3 = vsel %vm7431_vm8, %v1355_v35, %v1333_v39  ;;  %v1373_v12 = vrot.slane %v1357_v0, %v6664_v16  ;;  %v8385_v16 = vmov 0 }
 0x438   : > { %1413 = vrot.lane.b32.xlu0 %v7443_v25, %s6510_s26  ;;  %1415 = vrot.lane.b32.xlu1 %v7447_v3, %s6510_s26  ;;  %vm7483_vm2 = vcmp.eq.s32.totalorder %v1377_v14, 1 }
 0x439   : > { %v1343_v47 = vpop.permute.xlu0 %1342  ;;  %v1347_v26 = vpop.permute.xlu1 %1346  ;;  %vm7479_vm8 = vcmp.eq.s32.totalorder %v1373_v12, 1  ;;  %v8388_v34 = vsel %vm7483_vm2, 4294967295, %v8387_v34 }
 0x43a   : > { %v1354_v37 = vsel %vm8328_vm7, %v1341_v17, %v1343_v47  ;;  %v1351_v22 = vsel %vm8328_vm7, %v1347_v26, %v1349_v62  ;;  %v8386_v16 = vsel %vm7479_vm8, 4294967295, %v8385_v16 }
 0x43b   : > { %v7469_v18 = vsel %vm7453_vm1, %v1354_v37, %v1334_v11  ;;  %v7473_v39 = vsel %vm7457_vm0, %v1351_v22, %v1337_v53 }
 0x43c   : > { %1417 = vrot.lane.b32.xlu1 %v7469_v18, %s6510_s26  ;;  %1423 = vrot.lane.b32.xlu0 %v7473_v39, %s6510_s26 }
 0x43d   : > { %v1345_v51 = vpop.permute.xlu1 %1344 }
 0x43e   : > { %v1352_v4 = vsel %vm8328_vm7, %v1345_v51, %v1347_v26  ;;  %v1353_v53 = vsel %vm8328_vm7, %v1343_v47, %v1345_v51  ;;  %vm8389_vm7 = vcmp.lt.s32.totalorder %v6815_v55, 18  ;;  %v1412_v26 = vld [vmem:[%s8288_s6] sm:$0xff] }
 0x43f   : > { %v7493_v44 = vsel %vm7479_vm8, %v1353_v53, %v1335_v40  ;;  %v7497_v52 = vsel %vm7483_vm2, %v1352_v4, %v1336_v54  ;;  %v3704_v54 = vld [vmem:[%s8289_s7] sm:$0xff]  ;;  %vm8390_vm2 = vcmask 1043456   ;;  %vm1433_vm8 = vcmask 31744   ;;  %vm8391_vm0 = vmmov %vm8389_vm7 }
 0x440   : > { %1419 = vrot.lane.b32.xlu0 %v7493_v44, %s6510_s26  ;;  %1421 = vrot.lane.b32.xlu1 %v7497_v52, %s6510_s26  ;;  %vm8392_vm1 = vmmov %vm8390_vm2 }
 0x441   : > { %vm8395_vm3 = vmmov %vm8392_vm1 }
 0x442   : > { %vm8396_vm4 = vmmov %vm8392_vm1 }
 0x443   : > { %vm8398_vm5 = vmmov %vm8395_vm3 }
 0x444   : > { %1394 = vrot.lane.b32.xlu0 %v7443_v25, %s6509_s25  ;;  %1396 = vrot.lane.b32.xlu1 %v7447_v3, %s6509_s25 }
 0x448   : > { %1404 = vrot.lane.b32.xlu0 %v7473_v39, %s6509_s25  ;;  %1398 = vrot.lane.b32.xlu1 %v7469_v18, %s6509_s25 }
 0x44c   : > { %1400 = vrot.lane.b32.xlu0 %v7493_v44, %s6509_s25  ;;  %1402 = vrot.lane.b32.xlu1 %v7497_v52, %s6509_s25 }
 0x450   : > { %1902 = vrot.lane.b32.xlu0 %v7443_v25, %s6511_s15  ;;  %1904 = vrot.lane.b32.xlu1 %v7447_v3, %s6511_s15 }
 0x454   : > { %1912 = vrot.lane.b32.xlu0 %v7473_v39, %s6511_s15  ;;  %1906 = vrot.lane.b32.xlu1 %v7469_v18, %s6511_s15 }
 0x458   : > { %1908 = vrot.lane.b32.xlu0 %v7493_v44, %s6511_s15  ;;  %1910 = vrot.lane.b32.xlu1 %v7497_v52, %s6511_s15 }
 0x45c   : > { %2162 = vrot.lane.b32.xlu0 %v7443_v25, %s6512_s18  ;;  %2164 = vrot.lane.b32.xlu1 %v7447_v3, %s6512_s18 }
 0x460   : > { %2172 = vrot.lane.b32.xlu0 %v7473_v39, %s6512_s18  ;;  %2166 = vrot.lane.b32.xlu1 %v7469_v18, %s6512_s18 }
 0x464   : > { %2168 = vrot.lane.b32.xlu0 %v7493_v44, %s6512_s18  ;;  %2170 = vrot.lane.b32.xlu1 %v7497_v52, %s6512_s18 }
 0x468   : > { %2666 = vrot.lane.b32.xlu0 %v7447_v3, %s6513_s23  ;;  %2668 = vrot.lane.b32.xlu1 %v7469_v18, %s6513_s23 }
 0x46c   : > { %2664 = vrot.lane.b32.xlu0 %v7443_v25, %s6513_s23  ;;  %2670 = vrot.lane.b32.xlu1 %v7493_v44, %s6513_s23 }
 0x470   : > { %2672 = vrot.lane.b32.xlu0 %v7497_v52, %s6513_s23  ;;  %2674 = vrot.lane.b32.xlu1 %v7473_v39, %s6513_s23 }
 0x474   : > { %2926 = vrot.lane.b32.xlu0 %v7447_v3, %s6514_s28  ;;  %2928 = vrot.lane.b32.xlu1 %v7469_v18, %s6514_s28 }
 0x478   : > { %2924 = vrot.lane.b32.xlu0 %v7443_v25, %s6514_s28  ;;  %2930 = vrot.lane.b32.xlu1 %v7493_v44, %s6514_s28 }
 0x47c   : > { %2932 = vrot.lane.b32.xlu0 %v7497_v52, %s6514_s28  ;;  %2934 = vrot.lane.b32.xlu1 %v7473_v39, %s6514_s28 }
 0x480   : > { %3186 = vrot.lane.b32.xlu0 %v7447_v3, %s6515_s19  ;;  %3188 = vrot.lane.b32.xlu1 %v7469_v18, %s6515_s19 }
 0x484   : > { %3184 = vrot.lane.b32.xlu0 %v7443_v25, %s6515_s19  ;;  %3190 = vrot.lane.b32.xlu1 %v7493_v44, %s6515_s19 }
 0x488   : > { %3192 = vrot.lane.b32.xlu0 %v7497_v52, %s6515_s19  ;;  %3194 = vrot.lane.b32.xlu1 %v7473_v39, %s6515_s19 }
 0x48c   : > { %3446 = vrot.lane.b32.xlu0 %v7447_v3, %s6516_s20  ;;  %3448 = vrot.lane.b32.xlu1 %v7469_v18, %s6516_s20 }
 0x490   : > { %3444 = vrot.lane.b32.xlu0 %v7443_v25, %s6516_s20  ;;  %3450 = vrot.lane.b32.xlu1 %v7493_v44, %s6516_s20 }
 0x494   : > { %3452 = vrot.lane.b32.xlu0 %v7497_v52, %s6516_s20  ;;  %3454 = vrot.lane.b32.xlu1 %v7473_v39, %s6516_s20 }
 0x498   : > { %3707 = vperm.xlu0 %6492, %v3704_v54  }
 0x4aa   : > { %v1414_v11 = vpop.permute.xlu0 %1413  ;;  %v1416_v41 = vpop.permute.xlu1 %1415 }
 0x4ab   : > { %v1429_v40 = vsel %vm8389_vm7, %v1414_v11, %v1416_v41  ;;  %vm8394_vm7 = vmmov %vm8391_vm0 }
 0x4ac   : > { %6237 = vmatprep.subr.msk.mxu0 %vm8390_vm2, %v1429_v40  ;;  %vm8393_vm2 = vmmov %vm8391_vm0 }
 0x4ae   : > { %v1424_v19 = vpop.permute.xlu0 %1423  ;;  %v1418_v36 = vpop.permute.xlu1 %1417 }
 0x4af   : > { %v1430_v0 = vsel %vm8391_vm0, %v1424_v19, %v1414_v11  ;;  %v1428_v6 = vsel %vm8394_vm7, %v1416_v41, %v1418_v36  ;;  %vm8400_vm7 = vcmp.lt.s32.totalorder %v6815_v55, 19 }
 0x4b0   : > { %6238 = vmatpush1.msk.msra.mxu0 %vm8392_vm1, %v1430_v0  ;;  %vm8397_vm1 = vmmov %vm8391_vm0  ;;  %v6255_v0 = vld [vmem:[%s8288_s6 + $0x10] sm:$0xff] }
 0x4b1   : > { %6239 = vmatmul.mubr.msk.f32.vlgmr.msra.gmra.mrb[0].mxu0 %vm1433_vm8, %v6236_v27 }
 0x4b2   : > { %v1420_v38 = vpop.permute.xlu0 %1419  ;;  %v1422_v61 = vpop.permute.xlu1 %1421  ;;  %1590 = vmatprep.mubr.f32.mxu0 %v6521_v29 }
 0x4b3   : > { %v1427_v49 = vsel %vm8393_vm2, %v1418_v36, %v1420_v38  ;;  %v1425_v7 = vsel %vm8391_vm0, %v1422_v61, %v1424_v19  ;;  %v1426_v62 = vsel %vm8397_vm1, %v1420_v38, %v1422_v61  ;;  %vm8399_vm2 = vmmov %vm8395_vm3 }
 0x4b4   : > { %6240 = vmatprep.subr.msk.mxu0 %vm8395_vm3, %v1427_v49  ;;  %vm8401_vm3 = vmmov %vm8399_vm2 }
 0x4b5   : > { %6241 = vmatpush1.msk.msra.mxu0 %vm8396_vm4, %v1428_v6  ;;  %vm8402_vm4 = vmmov %vm8400_vm7 }
 0x4b6   : > { %v1395_v17 = vpop.permute.xlu0 %1394  ;;  %6242 = vmatmul.mubr.msk.f32.vlgmr.msra.gmra.mrb[2].mxu0 %vm1433_vm8, %v6236_v27  ;;  %6243 = vmatprep.subr.msk.mxu0 %vm8398_vm5, %v1425_v7  ;;  %v1397_v30 = vpop.permute.xlu1 %1396  ;;  %vm8403_vm5 = vmmov %vm8399_vm2 }
 0x4b7   : > { %6244 = vmatpush1.msk.msra.mxu0 %vm8399_vm2, %v1426_v62  ;;  %v1410_v35 = vsel %vm8400_vm7, %v1395_v17, %v1397_v30  ;;  %1661 = vmatprep.mubr.f32.mxu0 %v6521_v29  ;;  %vm8404_vm0 = vmmov %vm8402_vm4 }
 0x4b8   : > { %6246 = vmatprep.subr.msk.mxu0 %vm8401_vm3, %v1410_v35  ;;  %vm8405_vm1 = vmmov %vm8404_vm0 }
 0x4b9   : > { %vm8406_vm7 = vmmov %vm8399_vm2 }
 0x4ba   : > { %v1405_v12 = vpop.permute.xlu0 %1404  ;;  %6245 = vmatmul.mubr.msk.f32.vlgmr.msra.gmra.mrb[4].mxu0 %vm1433_vm8, %v6236_v27  ;;  %v1399_v14 = vpop.permute.xlu1 %1398  ;;  %vm8407_vm3 = vmmov %vm8404_vm0 }
 0x4bb   : > { %v1411_v47 = vsel %vm8402_vm4, %v1405_v12, %v1395_v17  ;;  %1753 = vmatprep.mubr.f32.mxu0 %v6521_v29  ;;  %v1409_v4 = vsel %vm8405_vm1, %v1397_v30, %v1399_v14  ;;  %vm8408_vm4 = vmmov %vm8404_vm0  ;;  %vm8411_vm1 = vcmp.lt.s32.totalorder %v6815_v55, 17 }
 0x4bc   : > { %6247 = vmatpush1.msk.msra.mxu0 %vm8403_vm5, %v1411_v47  ;;  %vm8409_vm5 = vmmov %vm8399_vm2 }
 0x4be   : > { %v1401_v37 = vpop.permute.xlu0 %1400  ;;  %6248 = vmatmul.mubr.msk.f32.vlgmr.msra.gmra.mrb[0].mxu0 %vm1433_vm8, %v1412_v26  ;;  %v1403_v22 = vpop.permute.xlu1 %1402 }
 0x4bf   : > { %v1408_v51 = vsel %vm8404_vm0, %v1399_v14, %v1401_v37  ;;  %1824 = vmatprep.mubr.f32.mxu0 %v6521_v29  ;;  %v1406_v53 = vsel %vm8407_vm3, %v1403_v22, %v1405_v12  ;;  %v1407_v54 = vsel %vm8408_vm4, %v1401_v37, %v1403_v22  ;;  %vm8410_vm0 = vmmov %vm8399_vm2 }
 0x4c0   : > { %6249 = vmatprep.subr.msk.mxu0 %vm8399_vm2, %v1408_v51  ;;  %vm8412_vm2 = vmmov %vm8410_vm0 }
 0x4c1   : > { %6250 = vmatpush1.msk.msra.mxu0 %vm8406_vm7, %v1409_v4  ;;  %vm8413_vm7 = vmmov %vm8411_vm1 }
 0x4c2   : > { %v1903_v11 = vpop.permute.xlu0 %1902  ;;  %6251 = vmatmul.mubr.msk.f32.vlgmr.msra.gmra.mrb[2].mxu0 %vm1433_vm8, %v1412_v26  ;;  %6252 = vmatprep.subr.msk.mxu0 %vm8409_vm5, %v1406_v53  ;;  %v1905_v41 = vpop.permute.xlu1 %1904  ;;  %vm8414_vm3 = vmmov %vm8410_vm0 }
 0x4c3   : > { %6253 = vmatpush1.msk.msra.mxu0 %vm8410_vm0, %v1407_v54  ;;  %v1918_v40 = vsel %vm8411_vm1, %v1903_v11, %v1905_v41  ;;  %1895 = vmatprep.mubr.f32.mxu0 %v6521_v29  ;;  %vm8415_vm4 = vmmov %vm8411_vm1 }
 0x4c4   : > { %6256 = vmatprep.subr.msk.mxu0 %vm8412_vm2, %v1918_v40  ;;  %vm8416_vm5 = vmmov %vm8411_vm1 }
 0x4c5   : > { %vm8417_vm1 = vmmov %vm8410_vm0 }
 0x4c6   : > { %v1913_v19 = vpop.permute.xlu0 %1912  ;;  %6254 = vmatmul.mubr.msk.f32.vlgmr.msra.gmra.mrb[4].mxu0 %vm1433_vm8, %v1412_v26  ;;  %v1907_v36 = vpop.permute.xlu1 %1906  ;;  %vm8418_vm2 = vmmov %vm8415_vm4  ;;  %v6265_v26 = vld [vmem:[%s8288_s6 + $0x18] sm:$0xff] }
 0x4c7   : > { %v1919_v27 = vsel %vm8413_vm7, %v1913_v19, %v1903_v11  ;;  %2007 = vmatprep.mubr.f32.mxu0 %v6521_v29  ;;  %v1917_v6 = vsel %vm8416_vm5, %v1905_v41, %v1907_v36  ;;  %vm8419_vm7 = vmmov %vm8418_vm2  ;;  %vm8422_vm5 = vcmp.lt.s32.totalorder %v6815_v55, 1 }
 0x4c8   : > { %6257 = vmatpush1.msk.msra.mxu0 %vm8414_vm3, %v1919_v27  ;;  %vm8420_vm3 = vmmov %vm8410_vm0 }
 0x4ca   : > { %v1909_v38 = vpop.permute.xlu0 %1908  ;;  %6258 = vmatmul.mubr.msk.f32.vlgmr.msra.gmra.mrb[0].mxu0 %vm1433_vm8, %v6255_v0  ;;  %v1911_v61 = vpop.permute.xlu1 %1910 }
 0x4cb   : > { %v1916_v49 = vsel %vm8415_vm4, %v1907_v36, %v1909_v38  ;;  %2078 = vmatprep.mubr.f32.mxu0 %v6521_v29  ;;  %v1914_v7 = vsel %vm8418_vm2, %v1911_v61, %v1913_v19  ;;  %v1915_v62 = vsel %vm8419_vm7, %v1909_v38, %v1911_v61  ;;  %vm8421_vm4 = vmmov %vm8410_vm0  ;;  %v6275_v36 = vld [vmem:[%s8288_s6 + $0x20] sm:$0xff] }
 0x4cc   : > { %6259 = vmatprep.subr.msk.mxu0 %vm8410_vm0, %v1916_v49  ;;  %vm8424_vm2 = vmmov %vm8410_vm0 }
 0x4cd   : > { %6260 = vmatpush1.msk.msra.mxu0 %vm8417_vm1, %v1917_v6  ;;  %vm8423_vm1 = vmmov %vm8422_vm5 }
 0x4ce   : > { %v2163_v17 = vpop.permute.xlu0 %2162  ;;  %6261 = vmatmul.mubr.msk.f32.vlgmr.msra.gmra.mrb[2].mxu0 %vm1433_vm8, %v6255_v0  ;;  %6262 = vmatprep.subr.msk.mxu0 %vm8420_vm3, %v1914_v7  ;;  %v2165_v30 = vpop.permute.xlu1 %2164  ;;  %vm8425_vm7 = vmmov %vm8423_vm1 }
 0x4cf   : > { %6263 = vmatpush1.msk.msra.mxu0 %vm8421_vm4, %v1915_v62  ;;  %v2178_v35 = vsel %vm8422_vm5, %v2163_v17, %v2165_v30  ;;  %2149 = vmatprep.mubr.f32.mxu0 %v6521_v29  ;;  %vm8426_vm3 = vmmov %vm8423_vm1 }
 0x4d0   : > { %6266 = vmatprep.subr.msk.mxu0 %vm8410_vm0, %v2178_v35  ;;  %vm8427_vm4 = vmmov %vm8410_vm0 }
 0x4d1   : > { %vm8428_vm5 = vmmov %vm8410_vm0 }
 0x4d2   : > { %v2173_v12 = vpop.permute.xlu0 %2172  ;;  %6264 = vmatmul.mubr.msk.f32.vlgmr.msra.gmra.mrb[4].mxu0 %vm1433_vm8, %v6255_v0  ;;  %v2167_v14 = vpop.permute.xlu1 %2166  ;;  %vm8429_vm0 = vmmov %vm8423_vm1 }
 0x4d3   : > { %v2179_v47 = vsel %vm8423_vm1, %v2173_v12, %v2163_v17  ;;  %2267 = vmatprep.mubr.f32.mxu0 %v6521_v29  ;;  %v2177_v4 = vsel %vm8426_vm3, %v2165_v30, %v2167_v14  ;;  %vm8430_vm1 = vmmov %vm8429_vm0 }
 0x4d4   : > { %6267 = vmatpush1.msk.msra.mxu0 %vm8424_vm2, %v2179_v47  ;;  %vm8432_vm3 = vmmov %vm8424_vm2 }
 0x4d6   : > { %v2169_v37 = vpop.permute.xlu0 %2168  ;;  %6268 = vmatmul.mubr.msk.f32.vlgmr.msra.gmra.mrb[0].mxu0 %vm1433_vm8, %v6265_v26  ;;  %v2171_v22 = vpop.permute.xlu1 %2170 }
 0x4d7   : > { %v2176_v51 = vsel %vm8425_vm7, %v2167_v14, %v2169_v37  ;;  %2338 = vmatprep.mubr.f32.mxu0 %v6521_v29  ;;  %v2174_v53 = vsel %vm8429_vm0, %v2171_v22, %v2173_v12  ;;  %v2175_v54 = vsel %vm8430_vm1, %v2169_v37, %v2171_v22  ;;  %vm8431_vm7 = vmmov %vm8424_vm2  ;;  %v6295_v37 = vld [vmem:[%s8288_s6 + $0x30] sm:$0xff] }
 0x4d8   : > { %6269 = vmatprep.subr.msk.mxu0 %vm8427_vm4, %v2176_v51  ;;  %vm8433_vm4 = vmmov %vm8424_vm2 }
 0x4d9   : > { %6270 = vmatpush1.msk.msra.mxu0 %vm8428_vm5, %v2177_v4  ;;  %vm8434_vm5 = vmmov %vm8424_vm2 }
 0x4da   : > { %v2667_v11 = vpop.permute.xlu0 %2666  ;;  %6271 = vmatmul.mubr.msk.f32.vlgmr.msra.gmra.mrb[2].mxu0 %vm1433_vm8, %v6265_v26  ;;  %6272 = vmatprep.subr.msk.mxu0 %vm8424_vm2, %v2174_v53  ;;  %v2669_v41 = vpop.permute.xlu1 %2668  ;;  %vm8435_vm0 = vmmov %vm8424_vm2 }
 0x4db   : > { %6273 = vmatpush1.msk.msra.mxu0 %vm8431_vm7, %v2175_v54  ;;  %2409 = vmatprep.mubr.f32.mxu0 %v6521_v29  ;;  %vm8436_vm1 = vmmov %vm8435_vm0  ;;  %vm8438_vm7 = vcmp.lt.s32.totalorder %v6815_v55, 127 }
 0x4dc   : > { %6276 = vmatprep.subr.msk.mxu0 %vm8432_vm3, %v7447_v3  ;;  %vm8437_vm2 = vmmov %vm8435_vm0 }
 0x4dd   : > { %vm8439_vm3 = vmmov %vm8435_vm0 }
 0x4de   : > { %v2665_v40 = vpop.permute.xlu0 %2664  ;;  %6274 = vmatmul.mubr.msk.f32.vlgmr.msra.gmra.mrb[4].mxu0 %vm1433_vm8, %v6265_v26  ;;  %v2671_v19 = vpop.permute.xlu1 %2670 }
 0x4df   : > { %6277 = vmatpush1.msk.msra.mxu0 %vm8433_vm4, %v7443_v25  ;;  %2509 = vmatprep.mubr.f32.mxu0 %v6521_v29  ;;  %vm8440_vm4 = vmmov %vm8438_vm7 }
 0x4e0   : > { %6279 = vmatprep.subr.msk.mxu0 %vm8434_vm5, %v7493_v44  ;;  %v2679_v44 = vsel %vm8438_vm7, %v2667_v11, %v2669_v41  ;;  %vm8441_vm5 = vmmov %vm8435_vm0 }
 0x4e1   : > { %vm8444_vm7 = vmmov %vm8436_vm1 }
 0x4e2   : > { %v2673_v27 = vpop.permute.xlu0 %2672  ;;  %6278 = vmatmul.mubr.msk.f32.vlgmr.msra.gmra.mrb[0].mxu0 %vm1433_vm8, %v6275_v36  ;;  %v2675_v3 = vpop.permute.xlu1 %2674 }
 0x4e3   : > { %6280 = vmatpush1.msk.msra.mxu0 %vm8435_vm0, %v7469_v18  ;;  %2580 = vmatprep.mubr.f32.mxu0 %v6521_v29  ;;  %v2680_v18 = vsel %vm8440_vm4, %v2665_v40, %v2667_v11  ;;  %vm8442_vm0 = vmmov %vm8440_vm4 }
 0x4e4   : > { %6282 = vmatprep.subr.msk.mxu0 %vm8436_vm1, %v7473_v39  ;;  %v2677_v61 = vsel %vm8442_vm0, %v2671_v19, %v2673_v27  ;;  %vm8446_vm4 = vmmov %vm8436_vm1 }
 0x4e6   : > { %v2927_v25 = vpop.permute.xlu0 %2926  ;;  %6281 = vmatmul.mubr.msk.f32.vlgmr.msra.gmra.mrb[2].mxu0 %vm1433_vm8, %v6275_v36  ;;  %v2929_v0 = vpop.permute.xlu1 %2928 }
 0x4e7   : > { %6283 = vmatpush1.msk.msra.mxu0 %vm8437_vm2, %v7497_v52  ;;  %2651 = vmatprep.mubr.f32.mxu0 %v6521_v29  ;;  %v6285_v52 = vld [vmem:[%s8288_s6 + $0x28] sm:$0xff]  ;;  %vm8443_vm2 = vmmov %vm8442_vm0 }
 0x4e8   : > { %6286 = vmatprep.subr.msk.mxu0 %vm8439_vm3, %v2679_v44  ;;  %v2678_v49 = vsel %vm8443_vm2, %v2669_v41, %v2671_v19  ;;  %vm8445_vm3 = vmmov %vm8442_vm0 }
 0x4e9   : > { %v2681_v62 = vsel %vm8445_vm3, %v2675_v3, %v2665_v40 }
 0x4ea   : > { %v2925_v38 = vpop.permute.xlu0 %2924  ;;  %6284 = vmatmul.mubr.msk.f32.vlgmr.msra.gmra.mrb[4].mxu0 %vm1433_vm8, %v6275_v36  ;;  %v2931_v39 = vpop.permute.xlu1 %2930 }
 0x4eb   : > { %6287 = vmatpush1.msk.msra.mxu0 %vm8441_vm5, %v2680_v18  ;;  %2769 = vmatprep.mubr.f32.mxu0 %v6521_v29  ;;  %vm8447_vm5 = vmmov %vm8442_vm0 }
 0x4ec   : > { %6289 = vmatprep.subr.msk.mxu0 %vm8436_vm1, %v2677_v61  ;;  %v2676_v17 = vsel %vm8447_vm5, %v2673_v27, %v2675_v3  ;;  %vm8448_vm0 = vmmov %vm8436_vm1  ;;  %vm8449_vm1 = vcmp.lt.s32.totalorder %v6815_v55, 111  ;;  %v6305_v27 = vld [vmem:[%s8288_s6 + $0x38] sm:$0xff] }
 0x4ed   : > { %v2939_v12 = vsel %vm8449_vm1, %v2927_v25, %v2929_v0  ;;  %vm8450_vm2 = vmmov %vm8448_vm0 }
 0x4ee   : > { %v2933_v6 = vpop.permute.xlu0 %2932  ;;  %6288 = vmatmul.mubr.msk.f32.vlgmr.msra.gmra.mrb[0].mxu0 %vm1433_vm8, %v6285_v52  ;;  %v2935_v7 = vpop.permute.xlu1 %2934  ;;  %vm8452_vm3 = vmmov %vm8449_vm1 }
 0x4ef   : > { %6290 = vmatpush1.msk.msra.mxu0 %vm8444_vm7, %v2678_v49  ;;  %2840 = vmatprep.mubr.f32.mxu0 %v6521_v29  ;;  %vm8451_vm7 = vmmov %vm8449_vm1  ;;  %v2937_v26 = vsel %vm8452_vm3, %v2931_v39, %v2933_v6 }
 0x4f0   : > { %6292 = vmatprep.subr.msk.mxu0 %vm8446_vm4, %v2681_v62  ;;  %v2940_v14 = vsel %vm8451_vm7, %v2925_v38, %v2927_v25  ;;  %vm8453_vm4 = vmmov %vm8448_vm0 }
 0x4f1   : > { %vm8454_vm5 = vmmov %vm8448_vm0 }
 0x4f2   : > { %v3187_v30 = vpop.permute.xlu0 %3186  ;;  %6291 = vmatmul.mubr.msk.f32.vlgmr.msra.gmra.mrb[2].mxu0 %vm1433_vm8, %v6285_v52  ;;  %v3189_v35 = vpop.permute.xlu1 %3188  ;;  %vm8457_vm7 = vmmov %vm8450_vm2 }
 0x4f3   : > { %6293 = vmatpush1.msk.msra.mxu0 %vm8448_vm0, %v2676_v17  ;;  %2911 = vmatprep.mubr.f32.mxu0 %v6521_v29  ;;  %vm8455_vm0 = vmmov %vm8449_vm1 }
 0x4f4   : > { %6296 = vmatprep.subr.msk.mxu0 %vm8450_vm2, %v2939_v12  ;;  %v2938_v51 = vsel %vm8455_vm0, %v2929_v0, %v2931_v39  ;;  %vm8456_vm1 = vmmov %vm8455_vm0 }
 0x4f5   : > { %v2941_v53 = vsel %vm8456_vm1, %v2935_v7, %v2925_v38  ;;  %vm8458_vm3 = vmmov %vm8455_vm0 }
 0x4f6   : > { %v3185_v47 = vpop.permute.xlu0 %3184  ;;  %6294 = vmatmul.mubr.msk.f32.vlgmr.msra.gmra.mrb[4].mxu0 %vm1433_vm8, %v6285_v52  ;;  %v3191_v22 = vpop.permute.xlu1 %3190  ;;  %v2936_v54 = vsel %vm8458_vm3, %v2933_v6, %v2935_v7  ;;  %vm8461_vm0 = vmmov %vm8450_vm2  ;;  %v6315_v6 = vld [vmem:[%s8288_s6 + $0x40] sm:$0xff] }
 0x4f7   : > { %6297 = vmatpush1.msk.msra.mxu0 %vm8453_vm4, %v2940_v14  ;;  %3029 = vmatprep.mubr.f32.mxu0 %v6521_v29  ;;  %vm8459_vm4 = vcmp.lt.s32.totalorder %v6815_v55, 110  ;;  %vm8465_vm3 = vmmov %vm8461_vm0 }
 0x4f8   : > { %6299 = vmatprep.subr.msk.mxu0 %vm8454_vm5, %v2937_v26  ;;  %v3199_v41 = vsel %vm8459_vm4, %v3187_v30, %v3189_v35  ;;  %vm8460_vm5 = vmmov %vm8450_vm2 }
 0x4f9   : > { %vm8462_vm1 = vmmov %vm8459_vm4 }
 0x4fa   : > { %v3193_v4 = vpop.permute.xlu0 %3192  ;;  %6298 = vmatmul.mubr.msk.f32.vlgmr.msra.gmra.mrb[0].mxu0 %vm1433_vm8, %v6295_v37  ;;  %v3195_v11 = vpop.permute.xlu1 %3194  ;;  %v3200_v19 = vsel %vm8462_vm1, %v3185_v47, %v3187_v30  ;;  %vm8466_vm4 = vmmov %vm8462_vm1 }
 0x4fb   : > { %6300 = vmatpush1.msk.msra.mxu0 %vm8450_vm2, %v2938_v51  ;;  %3100 = vmatprep.mubr.f32.mxu0 %v6521_v29  ;;  %vm8463_vm2 = vmmov %vm8462_vm1  ;;  %v3198_v25 = vsel %vm8466_vm4, %v3189_v35, %v3191_v22 }
 0x4fc   : > { %6302 = vmatprep.subr.msk.mxu0 %vm8457_vm7, %v2941_v53  ;;  %v3197_v36 = vsel %vm8463_vm2, %v3191_v22, %v3193_v4  ;;  %vm8464_vm7 = vmmov %vm8461_vm0  ;;  %v3196_v18 = vsel %vm8463_vm2, %v3193_v4, %v3195_v11 }
 0x4fd   : > { %vm8471_vm4 = vmmov %vm8461_vm0 }
 0x4fe   : > { %6301 = vmatmul.mubr.msk.f32.vlgmr.msra.gmra.mrb[2].mxu0 %vm1433_vm8, %v6295_v37  ;;  %v3447_v40 = vpop.permute.xlu0 %3446  ;;  %v3449_v3 = vpop.permute.xlu1 %3448 }
 0x4ff   : > { %6303 = vmatpush1.msk.msra.mxu0 %vm8460_vm5, %v2936_v54  ;;  %3171 = vmatprep.mubr.f32.mxu0 %v6521_v29  ;;  %vm8467_vm5 = vmmov %vm8462_vm1 }
 0x500   : > { %6306 = vmatprep.subr.msk.mxu0 %vm8461_vm0, %v3199_v41  ;;  %v3201_v44 = vsel %vm8467_vm5, %v3195_v11, %v3185_v47  ;;  %vm8468_vm1 = vmmov %vm8461_vm0 }
 0x501   : > { %vm8474_vm2 = vmmov %vm8468_vm1 }
 0x502   : > { %6304 = vmatmul.mubr.msk.f32.vlgmr.msra.gmra.mrb[4].mxu0 %vm1433_vm8, %v6295_v37  ;;  %v3445_v0 = vpop.permute.xlu0 %3444  ;;  %v3451_v38 = vpop.permute.xlu1 %3450 }
 0x503   : > { %6307 = vmatpush1.msk.msra.mxu0 %vm8464_vm7, %v3200_v19  ;;  %3289 = vmatprep.mubr.f32.mxu0 %v6521_v29  ;;  %vm8469_vm7 = vcmp.lt.s32.totalorder %v6815_v55, 109 }
 0x504   : > { %6309 = vmatprep.subr.msk.mxu0 %vm8465_vm3, %v3197_v36  ;;  %v3459_v39 = vsel %vm8469_vm7, %v3447_v40, %v3449_v3  ;;  %vm8470_vm3 = vmmov %vm8461_vm0 }
 0x505   : > { %vm8472_vm5 = vmmov %vm8469_vm7 }
 0x506   : > { %6308 = vmatmul.mubr.msk.f32.vlgmr.msra.gmra.mrb[0].mxu0 %vm1433_vm8, %v6305_v27  ;;  %v3453_v61 = vpop.permute.xlu0 %3452  ;;  %v3460_v52 = vsel %vm8472_vm5, %v3445_v0, %v3447_v40  ;;  %v3455_v7 = vpop.permute.xlu1 %3454 }
 0x507   : > { %6310 = vmatpush1.msk.msra.mxu0 %vm8461_vm0, %v3198_v25  ;;  %3360 = vmatprep.mubr.f32.mxu0 %v6521_v29  ;;  %vm8473_vm0 = vmmov %vm8472_vm5 }
 0x508   : > { %6312 = vmatprep.subr.msk.mxu0 %vm8468_vm1, %v3201_v44  ;;  %v3457_v49 = vsel %vm8473_vm0, %v3451_v38, %v3453_v61  ;;  %vm8475_vm7 = vmmov %vm8473_vm0  ;;  %v3456_v30 = vsel %vm8473_vm0, %v3453_v61, %v3455_v7 }
 0x509   : > { %v3458_v62 = vsel %vm8475_vm7, %v3449_v3, %v3451_v38  ;;  %vm8478_vm5 = vmmov %vm8468_vm1 }
 0x50a   : > { %6311 = vmatmul.mubr.msk.f32.vlgmr.msra.gmra.mrb[2].mxu0 %vm1433_vm8, %v6305_v27 }
 0x50b   : > { %6313 = vmatpush1.msk.msra.mxu0 %vm8470_vm3, %v3196_v18  ;;  %3431 = vmatprep.mubr.f32.mxu0 %v6521_v29  ;;  %vm8476_vm3 = vmmov %vm8473_vm0  ;;  %vm8494_vm0 = vnez %v8362_v2 }
 0x50c   : > { %6316 = vmatprep.subr.msk.mxu0 %vm8471_vm4, %v3459_v39  ;;  %v3461_v17 = vsel %vm8476_vm3, %v3455_v7, %v3445_v0  ;;  %vm8477_vm4 = vmmov %vm8468_vm1 }
 0x50e   : > { %6314 = vmatmul.mubr.msk.f32.vlgmr.msra.gmra.mrb[4].mxu0 %vm1433_vm8, %v6305_v27 }
 0x50f   : > { %6317 = vmatpush1.msk.msra.mxu0 %vm8468_vm1, %v3460_v52  ;;  %3549 = vmatprep.mubr.f32.mxu0 %v6521_v29 }
 0x510   : > { %6319 = vmatprep.subr.msk.mxu0 %vm8474_vm2, %v3457_v49 }
 0x512   : > { %6318 = vmatmul.mubr.msk.f32.vlgmr.msra.gmra.mrb[0].mxu0 %vm1433_vm8, %v6315_v6 }
 0x513   : > { %6320 = vmatpush1.msk.msra.mxu0 %vm8477_vm4, %v3458_v62  ;;  %3620 = vmatprep.mubr.f32.mxu0 %v6521_v29 }
 0x514   : > { %6322 = vmatprep.subr.msk.mxu0 %vm8478_vm5, %v3461_v17  ;;  %v3782_v17 = vld [vmem:[%s8291_s9] sm:$0xff]  ;;  %vm8493_vm5 = vnez %v8360_v58 }
 0x516   : > { %6321 = vmatmul.mubr.msk.f32.vlgmr.msra.gmra.mrb[2].mxu0 %vm1433_vm8, %v6315_v6 }
 0x517   : > { %6323 = vmatpush1.msk.msra.mxu0 %vm8468_vm1, %v3456_v30  ;;  %3691 = vmatprep.mubr.f32.mxu0 %v6521_v29  ;;  %v3708_v35 = vpop.permute.xlu0 %3707  ;;  %vm8496_vm1 = vnez %v8364_v59 }
 0x51a   : > { %6324 = vmatmul.mubr.msk.f32.vlgmr.msra.gmra.mrb[4].mxu0 %vm1433_vm8, %v6315_v6  ;;  %vm8479_vm8 = vcmp.lt.s32.totalorder %v6815_v55, 126 }
 0x51b   : > { %vm8481_vm2 = vmmov %vm8479_vm8 }
 0x51c   : > { %vm8482_vm7 = vmmov %vm8481_vm2 }
 0x51d   : > { %vm8484_vm3 = vmmov %vm8481_vm2 }
 0x5e5   : > { %v3551_v12 = vpop.f32.mrb[0].mxu0 }
 0x5e6   : > { %v3710_v14 = vadd.f32 %v3708_v35, %v3551_v12  ;;  %v3553_v47 = vpop.f32.mrb[1].mxu0 }
 0x5e7   : > { %v3711_v26 = vadd.f32 %v3708_v35, %v3553_v47 }
 0x5e8   : > { %v3716_v37 = vmax.f32 %v3710_v14, 0.0 }
 0x5e9   : > { %v3717_v22 = vmax.f32 %v3711_v26, 0.0  ;;  %v3622_v51 = vpop.f32.mrb[2].mxu0 }
 0x5ea   : > { %v3722_v4 = vmul.f32 %v3716_v37, %v6890_v5  ;;  %v3712_v53 = vadd.f32 %v3708_v35, %v3622_v51  ;;  %v3624_v54 = vpop.f32.mrb[3].mxu0 }
 0x5eb   : > { %v3723_v11 = vmul.f32 %v3717_v22, %v6906_v32  ;;  %v3713_v41 = vadd.f32 %v3708_v35, %v3624_v54 }
 0x5ec   : > { %v3718_v40 = vmax.f32 %v3712_v53, 0.0 }
 0x5ed   : > { %v3728_v19 = vadd.f32 %v3723_v11, %v3722_v4  ;;  %v3719_v36 = vmax.f32 %v3713_v41, 0.0  ;;  %v3693_v27 = vpop.f32.mrb[4].mxu0 }
 0x5ee   : > { %v3724_v3 = vmul.f32 %v3718_v40, %v6912_v60  ;;  %v3714_v25 = vadd.f32 %v3708_v35, %v3693_v27  ;;  %v3695_v0 = vpop.f32.mrb[5].mxu0 }
 0x5ef   : > { %v3725_v44 = vmul.f32 %v3719_v36, %v7162_v15  ;;  %v3715_v18 = vadd.f32 %v3708_v35, %v3695_v0 }
 0x5f0   : > { %v3729_v38 = vadd.f32 %v3728_v19, %v3724_v3  ;;  %v3720_v39 = vmax.f32 %v3714_v25, 0.0 }
 0x5f1   : > { %v3721_v61 = vmax.f32 %v3715_v18, 0.0 }
 0x5f2   : > { %v3730_v52 = vadd.f32 %v3729_v38, %v3725_v44  ;;  %v3726_v49 = vmul.f32 %v3720_v39, %v7173_v33 }
 0x5f3   : > { %v3727_v6 = vmul.f32 %v3721_v61, %v7180_v8 }
 0x5f4   : > { %v3731_v7 = vadd.f32 %v3730_v52, %v3726_v49 }
 0x5f6   : > { %v3732_v62 = vadd.f32 %v3731_v7, %v3727_v6 }
 0x5f8   : > { %3733 = vadd.xlane.f32.xlu1 %v3732_v62 }
 0x609   : > { %3785 = vperm.xlu1 %6493, %v3782_v17  }
 0x685   : > { %v3734_v30 = vpop.xlane.xlu1 %3733 }
 0x686   : > { %v3735_v12 = vmul.f32 0.001953125, %v3734_v30 }
 0x688   : > { %v3736_v14 = vsub.f32 %v3716_v37, %v3735_v12  ;;  %v3737_v35 = vsub.f32 %v3717_v22, %v3735_v12  ;;  %v3738_v47 = vsub.f32 %v3718_v40, %v3735_v12  ;;  %v3739_v26 = vsub.f32 %v3719_v36, %v3735_v12 }
 0x689   : > { %v3740_v51 = vsub.f32 %v3720_v39, %v3735_v12  ;;  %v3741_v11 = vsub.f32 %v3721_v61, %v3735_v12  ;;  %v3770_v61 = vld [vmem:[%s8290_s8] sm:$0xff] }
 0x68a   : > { %v3742_v4 = vmul.f32 %v3736_v14, %v6890_v5  ;;  %v3743_v53 = vmul.f32 %v3737_v35, %v6906_v32  ;;  %v3744_v54 = vmul.f32 %v3738_v47, %v6912_v60  ;;  %v3745_v41 = vmul.f32 %v3739_v26, %v7162_v15 }
 0x68b   : > { %v3746_v3 = vmul.f32 %v3740_v51, %v7173_v33  ;;  %v3747_v37 = vmul.f32 %v3741_v11, %v7180_v8 }
 0x68c   : > { %v3748_v19 = vmul.f32 %v3742_v4, %v3742_v4  ;;  %v3749_v27 = vmul.f32 %v3743_v53, %v3743_v53  ;;  %v3750_v25 = vmul.f32 %v3744_v54, %v3744_v54  ;;  %v3751_v22 = vmul.f32 %v3745_v41, %v3745_v41  ;;  %v3786_v41 = vpop.permute.xlu1 %3785 }
 0x68d   : > { %v3752_v36 = vmul.f32 %v3746_v3, %v3746_v3  ;;  %v3753_v18 = vmul.f32 %v3747_v37, %v3747_v37 }
 0x68e   : > { %v3754_v0 = vadd.f32 %v3749_v27, %v3748_v19 }
 0x690   : > { %v3755_v40 = vadd.f32 %v3754_v0, %v3750_v25 }
 0x692   : > { %v3756_v44 = vadd.f32 %v3755_v40, %v3751_v22 }
 0x694   : > { %v3757_v38 = vadd.f32 %v3756_v44, %v3752_v36 }
 0x696   : > { %v3758_v39 = vadd.f32 %v3757_v38, %v3753_v18 }
 0x698   : > { %3759 = vadd.xlane.f32.xlu0 %v3758_v39 }
 0x6ae   : > { %3773 = vperm.xlu0 %6492, %v3770_v61  }
 0x725   : > { %v3760_v52 = vpop.xlane.xlu0 %3759 }
 0x726   : > { %v3761_v49 = vmul.f32 0.001953125, %v3760_v52 }
 0x728   : > { %v3762_v6 = vadd.f32 1e-05, %v3761_v49 }
 0x72a   : > { %6496 = vrsqrt.f32 %v3762_v6 }
 0x72d   : > { %v3774_v4 = vpop.permute.xlu0 %3773 }
 0x734   : > { %v6497_v7 = vpop.eup %6496 }
 0x735   : > { %v3765_v62 = vmul.f32 %v6497_v7, %v3737_v35  ;;  %v3764_v17 = vmul.f32 %v6497_v7, %v3736_v14  ;;  %v3767_v30 = vmul.f32 %v6497_v7, %v3739_v26  ;;  %v3766_v12 = vmul.f32 %v6497_v7, %v3738_v47 }
 0x736   : > { %v3769_v19 = vmul.f32 %v6497_v7, %v3741_v11  ;;  %v3768_v27 = vmul.f32 %v6497_v7, %v3740_v51 }
 0x737   : > { %v3777_v53 = vmul.f32 %v3774_v4, %v3765_v62  ;;  %v3776_v54 = vmul.f32 %v3774_v4, %v3764_v17  ;;  %v3779_v0 = vmul.f32 %v3774_v4, %v3767_v30  ;;  %v3778_v37 = vmul.f32 %v3774_v4, %v3766_v12 }
 0x738   : > { %v3781_v35 = vmul.f32 %v3774_v4, %v3769_v19  ;;  %v3780_v14 = vmul.f32 %v3774_v4, %v3768_v27 }
 0x739   : > { %v3789_v3 = vadd.f32 %v3786_v41, %v3777_v53  ;;  %v3788_v25 = vadd.f32 %v3786_v41, %v3776_v54  ;;  %v3791_v22 = vadd.f32 %v3786_v41, %v3779_v0  ;;  %v3790_v40 = vadd.f32 %v3786_v41, %v3778_v37 }
 0x73a   : > { %v3793_v47 = vadd.f32 %v3786_v41, %v3781_v35  ;;  %v3792_v26 = vadd.f32 %v3786_v41, %v3780_v14 }
 0x73b   : > { %3796 = vrot.lane.b32.xlu0 %v3789_v3, %s6517_s16  ;;  %3794 = vrot.lane.b32.xlu1 %v3788_v25, %s6517_s16 }
 0x73f   : > { %3800 = vrot.lane.b32.xlu0 %v3791_v22, %s6517_s16  ;;  %3798 = vrot.lane.b32.xlu1 %v3790_v40, %s6517_s16 }
 0x743   : > { %3804 = vrot.lane.b32.xlu0 %v3793_v47, %s6517_s16  ;;  %3802 = vrot.lane.b32.xlu1 %v3792_v26, %s6517_s16  ;;  %s8487_s16 = smov 92  }
 0x7ad   : > { %v3797_v51 = vpop.permute.xlu0 %3796  ;;  %v3795_v11 = vpop.permute.xlu1 %3794 }
 0x7ae   : > { %v3810_v36 = vsel %vm8479_vm8, %v3795_v11, %v3797_v51  ;;  %vm8497_vm8 = vcmp.lt.s32.totalorder %v6815_v55, 92 }
 0x7af   : > { %v3812_v44 = vsel %vm7220_vm11, %v3810_v36, %v3788_v25  ;;  %vm8483_vm11 = vmmov %vm8481_vm2 }
 0x7b0   : > { %3818 = vrot.lane.b32.xlu1 %v3812_v44, %s8480_s17 }
 0x7b1   : > { %v3801_v18 = vpop.permute.xlu0 %3800  ;;  %v3799_v38 = vpop.permute.xlu1 %3798 }
 0x7b2   : > { %v3808_v39 = vsel %vm8481_vm2, %v3799_v38, %v3801_v18  ;;  %v3809_v61 = vsel %vm8482_vm7, %v3797_v51, %v3799_v38  ;;  %vm8499_vm7 = vmmov %vm8497_vm8 }
 0x7b3   : > { %v3813_v52 = vsel %vm7231_vm12, %v3809_v61, %v3789_v3  ;;  %v3814_v49 = vsel %vm7235_vm13, %v3808_v39, %v3790_v40  ;;  %vm8485_vm12 = vmmov %vm8481_vm2  ;;  %vm8486_vm13 = vcmp.lt.s32.totalorder %v6815_v55, 2  ;;  %vm8498_vm2 = vnez %v8366_v63 }
 0x7b4   : > { %3820 = vrot.lane.b32.xlu0 %v3813_v52, %s8480_s17  ;;  %3822 = vrot.lane.b32.xlu1 %v3814_v49, %s8480_s17  ;;  %vm8491_vm4 = vmmov %vm8486_vm13 }
 0x7b5   : > { %v3805_v56 = vpop.permute.xlu0 %3804  ;;  %v3803_v6 = vpop.permute.xlu1 %3802 }
 0x7b6   : > { %v3811_v7 = vsel %vm8483_vm11, %v3805_v56, %v3795_v11  ;;  %v3806_v62 = vsel %vm8484_vm3, %v3803_v6, %v3805_v56  ;;  %v3807_v28 = vsel %vm8485_vm12, %v3801_v18, %v3803_v6  ;;  %vm8500_vm11 = vmmov %vm8499_vm7  ;;  %vm8501_vm3 = vnez %v8370_v43 }
 0x7b7   : > { %v3817_v17 = vsel %vm7251_vm14, %v3811_v7, %v3793_v47  ;;  %v3816_v57 = vsel %vm7255_vm15, %v3806_v62, %v3792_v26  ;;  %v3815_v30 = vsel %vm7272_vm9, %v3807_v28, %v3791_v22  ;;  %vm8488_vm14 = vmmov %vm8486_vm13  ;;  %vm8490_vm9 = vnez %v8358_v46 }
 0x7b8   : > { %3828 = vrot.lane.b32.xlu1 %v3817_v17, %s8480_s17  ;;  %3826 = vrot.lane.b32.xlu0 %v3816_v57, %s8480_s17  ;;  %vm8489_vm15 = vmmov %vm8486_vm13  ;;  %vm8502_vm12 = vnez %v8368_v1 }
 0x7bc   : > { %3824 = vrot.lane.b32.xlu0 %v3815_v30, %s8480_s17 }
 0x822   : > { %v3819_v12 = vpop.permute.xlu1 %3818 }
 0x826   : > { %v3821_v4 = vpop.permute.xlu0 %3820  ;;  %v3823_v53 = vpop.permute.xlu1 %3822 }
 0x827   : > { %v3834_v31 = vsel %vm8486_vm13, %v3819_v12, %v3821_v4  ;;  %v3833_v21 = vsel %vm8491_vm4, %v3821_v4, %v3823_v53  ;;  %vm8503_vm13 = vmmov %vm8499_vm7 }
 0x828   : > { %v3837_v48 = vsel %vm7288_vm6, %v3834_v31, %v3813_v52  ;;  %vm8492_vm6 = vmmov %vm8491_vm4  ;;  %v3838_v37 = vsel %vm8493_vm5, %v3833_v21, %v3814_v49  ;;  %vm8509_vm5 = vcmp.lt.s32.totalorder %v6815_v55, 36 }
 0x829   : > { %3844 = vrot.lane.b32.xlu0 %v3837_v48, %s8487_s16 }
 0x82a   : > { %v3827_v54 = vpop.permute.xlu0 %3826  ;;  %v3829_v41 = vpop.permute.xlu1 %3828 }
 0x82b   : > { %v3830_v19 = vsel %vm8488_vm14, %v3827_v54, %v3829_v41  ;;  %v3835_v42 = vsel %vm8489_vm15, %v3829_v41, %v3819_v12  ;;  %vm8504_vm14 = vmmov %vm8499_vm7  ;;  %vm8505_vm15 = vnez %v8372_v20 }
 0x82c   : > { %v3836_v27 = vsel %vm7299_vm10, %v3835_v42, %v3812_v44  ;;  %v3841_v3 = vsel %vm8490_vm9, %v3830_v19, %v3817_v17  ;;  %vm8495_vm10 = vmmov %vm8491_vm4  ;;  %vm8506_vm9 = vnez %v8374_v50 }
 0x82d   : > { %3842 = vrot.lane.b32.xlu1 %v3836_v27, %s8487_s16  ;;  %3852 = vrot.lane.b32.xlu0 %v3841_v3, %s8487_s16  ;;  %vm8507_vm4 = vmmov %vm8499_vm7 }
 0x82e   : > { %v3825_v25 = vpop.permute.xlu0 %3824 }
 0x82f   : > { %v3832_v0 = vsel %vm8492_vm6, %v3823_v53, %v3825_v25  ;;  %v3831_v46 = vsel %vm8495_vm10, %v3825_v25, %v3827_v54  ;;  %vm8508_vm6 = vnez %v8376_v10  ;;  %vm8511_vm10 = vnez %v8378_v9 }
 0x830   : > { %v3839_v45 = vsel %vm8494_vm0, %v3832_v0, %v3815_v30  ;;  %v3840_v22 = vsel %vm8496_vm1, %v3831_v46, %v3816_v57  ;;  %vm8510_vm0 = vmmov %vm8509_vm5  ;;  %vm8512_vm1 = vnez %v8380_v23 }
 0x831   : > { %3846 = vrot.lane.b32.xlu1 %v3838_v37, %s8487_s16  ;;  %3848 = vrot.lane.b32.xlu0 %v3839_v45, %s8487_s16 }
 0x835   : > { %3850 = vrot.lane.b32.xlu1 %v3840_v22, %s8487_s16  ;;  %s464_s16 = scalar_lea.vmem %s8296_s14, %s6469_s22 }
 0x89b   : > { %v3845_v40 = vpop.permute.xlu0 %3844 }
 0x89f   : > { %v3843_v35 = vpop.permute.xlu1 %3842  ;;  %v3853_v14 = vpop.permute.xlu0 %3852 }
 0x8a0   : > { %v3858_v58 = vsel %vm8497_vm8, %v3843_v35, %v3845_v40  ;;  %v3859_v47 = vsel %vm8499_vm7, %v3853_v14, %v3843_v35  ;;  %vm8513_vm8 = vmmov %vm8510_vm0  ;;  %vm8515_vm7 = vnez %v8382_v13 }
 0x8a1   : > { %v3860_v2 = vsel %vm8498_vm2, %v3858_v58, %v3836_v27  ;;  %v3865_v36 = vsel %vm8502_vm12, %v3859_v47, %v3841_v3  ;;  %vm8514_vm2 = vmmov %vm8510_vm0 }
 0x8a2   : > { %3866 = vrot.lane.b32.xlu1 %v3860_v2, %s6520_s27  ;;  %vm8518_vm12 = vmmov %vm8510_vm0 }
 0x8a3   : > { %v3847_v26 = vpop.permute.xlu1 %3846  ;;  %v3849_v51 = vpop.permute.xlu0 %3848 }
 0x8a4   : > { %v3857_v59 = vsel %vm8500_vm11, %v3845_v40, %v3847_v26  ;;  %v3856_v63 = vsel %vm8503_vm13, %v3847_v26, %v3849_v51  ;;  %vm8516_vm11 = vnez %v8384_v24  ;;  %vm8519_vm13 = vnez %v8386_v16  ;;  %v6038_v16 = vld [vmem:[%s8293_s11] sm:$0xff] }
 0x8a5   : > { %v3861_v11 = vsel %vm8501_vm3, %v3857_v59, %v3837_v48  ;;  %v3862_v43 = vsel %vm8506_vm9, %v3856_v63, %v3838_v37  ;;  %vm8517_vm3 = vmmov %vm8510_vm0  ;;  %v6325_v48 = vld [vmem:[%s8292_s10 + $0x8] sm:$0xff]  ;;  %vm3929_vm9 = vcmask 64512   ;;  %v3908_v40 = vld [vmem:[%s8292_s10] sm:$0xff] }
 0x8a6   : > { %3868 = vrot.lane.b32.xlu0 %v3861_v11, %s6520_s27  ;;  %3876 = vrot.lane.b32.xlu1 %v3865_v36, %s6520_s27 }
 0x8a7   : > { %v3851_v44 = vpop.permute.xlu1 %3850 }
 0x8a8   : > { %v3854_v18 = vsel %vm8504_vm14, %v3851_v44, %v3853_v14  ;;  %v3855_v1 = vsel %vm8507_vm4, %v3849_v51, %v3851_v44  ;;  %vm8520_vm14 = vnez %v8388_v34 }
 0x8a9   : > { %v3864_v38 = vsel %vm8505_vm15, %v3854_v18, %v3840_v22  ;;  %v3863_v39 = vsel %vm8508_vm6, %v3855_v1, %v3839_v45  ;;  %vm8521_vm15 = vcmp.lt.s32.totalorder %v6815_v55, 18  ;;  %v6332_v18 = vld [vmem:[%s8292_s10 + $0x10] sm:$0xff] }
 0x8aa   : > { %3874 = vrot.lane.b32.xlu0 %v3864_v38, %s6520_s27  ;;  %3870 = vrot.lane.b32.xlu1 %v3862_v43, %s6520_s27  ;;  %vm8522_vm4 = vmmov %vm8521_vm15 }
 0x8ab   : > { %vm8523_vm6 = vmmov %vm8522_vm4 }
 0x8ae   : > { %3872 = vrot.lane.b32.xlu0 %v3863_v39, %s6520_s27 }
 0x914   : > { %v3867_v61 = vpop.permute.xlu1 %3866 }
 0x918   : > { %v3877_v52 = vpop.permute.xlu1 %3876  ;;  %v3869_v49 = vpop.permute.xlu0 %3868 }
 0x919   : > { %v3883_v20 = vsel %vm8509_vm5, %v3877_v52, %v3867_v61  ;;  %v3882_v50 = vsel %vm8510_vm0, %v3867_v61, %v3869_v49  ;;  %vm8524_vm5 = vmmov %vm8522_vm4 }
 0x91a   : > { %v7946_v56 = vsel %vm8511_vm10, %v3883_v20, %v3860_v2  ;;  %v7950_v6 = vsel %vm8512_vm1, %v3882_v50, %v3861_v11  ;;  %vm8525_vm0 = vmmov %vm8522_vm4  ;;  %vm8527_vm1 = vcmp.lt.s32.totalorder %v6815_v55, 19 }
 0x91b   : > { %3909 = vrot.lane.b32.xlu1 %v7946_v56, %s6510_s26  ;;  %3911 = vrot.lane.b32.xlu0 %v7950_v6, %s6510_s26  ;;  %vm8526_vm10 = vmmov %vm8525_vm0 }
 0x91c   : > { %v3871_v10 = vpop.permute.xlu1 %3870  ;;  %v3875_v7 = vpop.permute.xlu0 %3874 }
 0x91d   : > { %v3881_v62 = vsel %vm8513_vm8, %v3869_v49, %v3871_v10  ;;  %v3878_v9 = vsel %vm8514_vm2, %v3875_v7, %v3877_v52  ;;  %vm8528_vm8 = vmmov %vm8527_vm1 }
 0x91e   : > { %v7962_v17 = vsel %vm8515_vm7, %v3881_v62, %v3862_v43  ;;  %v7966_v23 = vsel %vm8516_vm11, %v3878_v9, %v3865_v36  ;;  %vm8529_vm2 = vmmov %vm8527_vm1  ;;  %v6336_v9 = vld [vmem:[%s8292_s10 + $0x18] sm:$0xff] }
 0x91f   : > { %3913 = vrot.lane.b32.xlu0 %v7962_v17, %s6510_s26  ;;  %3919 = vrot.lane.b32.xlu1 %v7966_v23, %s6510_s26  ;;  %vm8530_vm7 = vmmov %vm8527_vm1 }
 0x920   : > { %v3873_v57 = vpop.permute.xlu0 %3872  ;;  %vm8531_vm11 = vmmov %vm8527_vm1 }
 0x921   : > { %v3879_v28 = vsel %vm8517_vm3, %v3873_v57, %v3875_v7  ;;  %v3880_v30 = vsel %vm8518_vm12, %v3871_v10, %v3873_v57  ;;  %vm8532_vm3 = vmmov %vm8527_vm1  ;;  %vm8533_vm12 = vcmp.lt.s32.totalorder %v6815_v55, 17 }
 0x922   : > { %v7978_v13 = vsel %vm8519_vm13, %v3880_v30, %v3863_v39  ;;  %v7982_v24 = vsel %vm8520_vm14, %v3879_v28, %v3864_v38  ;;  %vm8534_vm13 = vmmov %vm8533_vm12 }
 0x923   : > { %3915 = vrot.lane.b32.xlu1 %v7978_v13, %s6510_s26  ;;  %3917 = vrot.lane.b32.xlu0 %v7982_v24, %s6510_s26  ;;  %vm8535_vm14 = vmmov %vm8533_vm12 }
 0x927   : > { %3890 = vrot.lane.b32.xlu1 %v7946_v56, %s6509_s25  ;;  %3892 = vrot.lane.b32.xlu0 %v7950_v6, %s6509_s25 }
 0x92b   : > { %3900 = vrot.lane.b32.xlu1 %v7966_v23, %s6509_s25  ;;  %3894 = vrot.lane.b32.xlu0 %v7962_v17, %s6509_s25 }
 0x92f   : > { %3896 = vrot.lane.b32.xlu1 %v7978_v13, %s6509_s25  ;;  %3898 = vrot.lane.b32.xlu0 %v7982_v24, %s6509_s25 }
 0x933   : > { %4362 = vrot.lane.b32.xlu1 %v7946_v56, %s6511_s15  ;;  %4364 = vrot.lane.b32.xlu0 %v7950_v6, %s6511_s15 }
 0x937   : > { %4372 = vrot.lane.b32.xlu1 %v7966_v23, %s6511_s15  ;;  %4366 = vrot.lane.b32.xlu0 %v7962_v17, %s6511_s15 }
 0x93b   : > { %4368 = vrot.lane.b32.xlu1 %v7978_v13, %s6511_s15  ;;  %4370 = vrot.lane.b32.xlu0 %v7982_v24, %s6511_s15 }
 0x93f   : > { %4604 = vrot.lane.b32.xlu1 %v7946_v56, %s6512_s18  ;;  %4606 = vrot.lane.b32.xlu0 %v7950_v6, %s6512_s18 }
 0x943   : > { %4614 = vrot.lane.b32.xlu1 %v7966_v23, %s6512_s18  ;;  %4608 = vrot.lane.b32.xlu0 %v7962_v17, %s6512_s18 }
 0x947   : > { %4610 = vrot.lane.b32.xlu1 %v7978_v13, %s6512_s18  ;;  %4612 = vrot.lane.b32.xlu0 %v7982_v24, %s6512_s18 }
 0x94b   : > { %5072 = vrot.lane.b32.xlu1 %v7950_v6, %s6513_s23  ;;  %5074 = vrot.lane.b32.xlu0 %v7962_v17, %s6513_s23 }
 0x94f   : > { %5070 = vrot.lane.b32.xlu1 %v7946_v56, %s6513_s23  ;;  %5076 = vrot.lane.b32.xlu0 %v7978_v13, %s6513_s23 }
 0x953   : > { %5078 = vrot.lane.b32.xlu1 %v7982_v24, %s6513_s23  ;;  %5080 = vrot.lane.b32.xlu0 %v7966_v23, %s6513_s23 }
 0x957   : > { %5314 = vrot.lane.b32.xlu1 %v7950_v6, %s6514_s28  ;;  %5316 = vrot.lane.b32.xlu0 %v7962_v17, %s6514_s28 }
 0x95b   : > { %5312 = vrot.lane.b32.xlu1 %v7946_v56, %s6514_s28  ;;  %5318 = vrot.lane.b32.xlu0 %v7978_v13, %s6514_s28 }
 0x95f   : > { %5320 = vrot.lane.b32.xlu1 %v7982_v24, %s6514_s28  ;;  %5322 = vrot.lane.b32.xlu0 %v7966_v23, %s6514_s28 }
 0x963   : > { %5556 = vrot.lane.b32.xlu1 %v7950_v6, %s6515_s19  ;;  %5558 = vrot.lane.b32.xlu0 %v7962_v17, %s6515_s19 }
 0x967   : > { %5554 = vrot.lane.b32.xlu1 %v7946_v56, %s6515_s19  ;;  %5560 = vrot.lane.b32.xlu0 %v7978_v13, %s6515_s19 }
 0x96b   : > { %5562 = vrot.lane.b32.xlu1 %v7982_v24, %s6515_s19  ;;  %5564 = vrot.lane.b32.xlu0 %v7966_v23, %s6515_s19 }
 0x96f   : > { %5798 = vrot.lane.b32.xlu1 %v7950_v6, %s6516_s20  ;;  %5800 = vrot.lane.b32.xlu0 %v7962_v17, %s6516_s20 }
 0x973   : > { %5796 = vrot.lane.b32.xlu1 %v7946_v56, %s6516_s20  ;;  %5802 = vrot.lane.b32.xlu0 %v7978_v13, %s6516_s20 }
 0x977   : > { %5804 = vrot.lane.b32.xlu1 %v7982_v24, %s6516_s20  ;;  %5806 = vrot.lane.b32.xlu0 %v7966_v23, %s6516_s20 }
 0x97b   : > { %6041 = vperm.xlu1 %6493, %v6038_v16  }
 0x98d   : > { %v3910_v34 = vpop.permute.xlu1 %3909  ;;  %v3912_v12 = vpop.permute.xlu0 %3911 }
 0x98e   : > { %v3925_v4 = vsel %vm8521_vm15, %v3910_v34, %v3912_v12  ;;  %vm8536_vm15 = vmmov %vm8533_vm12 }
 0x98f   : > { %3933 = vmatprep.subr.mxu1 %v3925_v4 }
 0x991   : > { %v3920_v53 = vpop.permute.xlu1 %3919  ;;  %v3914_v31 = vpop.permute.xlu0 %3913 }
 0x992   : > { %v3926_v54 = vsel %vm8522_vm4, %v3920_v53, %v3910_v34  ;;  %v3924_v27 = vsel %vm8524_vm5, %v3912_v12, %v3914_v31  ;;  %vm8537_vm4 = vmmov %vm8533_vm12  ;;  %vm8539_vm5 = vcmp.lt.s32.totalorder %v6815_v55, 1 }
 0x993   : > { %3934 = vmatpush1.msra.mxu1 %v3926_v54  ;;  %v6340_v54 = vld [vmem:[%s8292_s10 + $0x20] sm:$0xff] }
 0x994   : > { %6326 = vmatmul.mubr.msk.f32.vlgmr.msra.gmra.mrb[0].mxu1 %vm3929_vm9, %v6325_v48 }
 0x995   : > { %v3916_v41 = vpop.permute.xlu1 %3915  ;;  %v3918_v19 = vpop.permute.xlu0 %3917  ;;  %4068 = vmatprep.mubr.f32.mxu1 %v6521_v29 }
 0x996   : > { %v3923_v42 = vsel %vm8523_vm6, %v3914_v31, %v3916_v41  ;;  %v3921_v3 = vsel %vm8525_vm0, %v3918_v19, %v3920_v53  ;;  %v3922_v21 = vsel %vm8526_vm10, %v3916_v41, %v3918_v19  ;;  %vm8538_vm6 = vmmov %vm8537_vm4 }
 0x997   : > { %4004 = vmatprep.subr.mxu1 %v3923_v42  ;;  %vm8540_vm0 = vmmov %vm8539_vm5 }
 0x998   : > { %4005 = vmatpush1.msra.mxu1 %v3924_v27  ;;  %vm8541_vm10 = vmmov %vm8540_vm0 }
 0x999   : > { %v3891_v25 = vpop.permute.xlu1 %3890  ;;  %6327 = vmatmul.mubr.msk.f32.vlgmr.msra.gmra.mrb[2].mxu1 %vm3929_vm9, %v6325_v48  ;;  %4075 = vmatprep.subr.mxu1 %v3921_v3  ;;  %v3893_v0 = vpop.permute.xlu0 %3892 }
 0x99a   : > { %4076 = vmatpush1.msra.mxu1 %v3922_v21  ;;  %v3906_v37 = vsel %vm8527_vm1, %v3891_v25, %v3893_v0  ;;  %4139 = vmatprep.mubr.f32.mxu1 %v6521_v29  ;;  %vm8542_vm1 = vmmov %vm8540_vm0 }
 0x99b   : > { %4149 = vmatprep.subr.mxu1 %v3906_v37 }
 0x99d   : > { %v3901_v45 = vpop.permute.xlu1 %3900  ;;  %6328 = vmatmul.mubr.msk.f32.vlgmr.msra.gmra.mrb[4].mxu1 %vm3929_vm9, %v6325_v48  ;;  %v3895_v46 = vpop.permute.xlu0 %3894 }
 0x99e   : > { %v3907_v22 = vsel %vm8528_vm8, %v3901_v45, %v3891_v25  ;;  %4213 = vmatprep.mubr.f32.mxu1 %v6521_v29  ;;  %v3905_v2 = vsel %vm8530_vm7, %v3893_v0, %v3895_v46  ;;  %vm8543_vm8 = vmmov %vm8540_vm0  ;;  %vm8545_vm7 = vcmp.lt.s32.totalorder %v6815_v55, 127 }
 0x99f   : > { %4150 = vmatpush1.msra.mxu1 %v3907_v22 }
 0x9a1   : > { %v3897_v35 = vpop.permute.xlu1 %3896  ;;  %6329 = vmatmul.mubr.msk.f32.vlgmr.msra.gmra.mrb[0].mxu1 %vm3929_vm9, %v3908_v40  ;;  %v3899_v14 = vpop.permute.xlu0 %3898 }
 0x9a2   : > { %v3904_v58 = vsel %vm8529_vm2, %v3895_v46, %v3897_v35  ;;  %4284 = vmatprep.mubr.f32.mxu1 %v6521_v29  ;;  %v3902_v47 = vsel %vm8531_vm11, %v3899_v14, %v3901_v45  ;;  %v3903_v26 = vsel %vm8532_vm3, %v3897_v35, %v3899_v14  ;;  %vm8544_vm2 = vmmov %vm8540_vm0 }
 0x9a3   : > { %4220 = vmatprep.subr.mxu1 %v3904_v58  ;;  %vm8546_vm11 = vmmov %vm8545_vm7  ;;  %v6348_v58 = vld [vmem:[%s8292_s10 + $0x30] sm:$0xff] }
 0x9a4   : > { %4221 = vmatpush1.msra.mxu1 %v3905_v2  ;;  %vm8547_vm3 = vmmov %vm8545_vm7 }
 0x9a5   : > { %v4363_v51 = vpop.permute.xlu1 %4362  ;;  %6330 = vmatmul.mubr.msk.f32.vlgmr.msra.gmra.mrb[2].mxu1 %vm3929_vm9, %v3908_v40  ;;  %4291 = vmatprep.subr.mxu1 %v3902_v47  ;;  %v4365_v59 = vpop.permute.xlu0 %4364 }
 0x9a6   : > { %4292 = vmatpush1.msra.mxu1 %v3903_v26  ;;  %v4378_v11 = vsel %vm8533_vm12, %v4363_v51, %v4365_v59  ;;  %4355 = vmatprep.mubr.f32.mxu1 %v6521_v29  ;;  %vm8548_vm12 = vmmov %vm8547_vm3 }
 0x9a7   : > { %4385 = vmatprep.subr.mxu1 %v4378_v11 }
 0x9a9   : > { %v4373_v36 = vpop.permute.xlu1 %4372  ;;  %6331 = vmatmul.mubr.msk.f32.vlgmr.msra.gmra.mrb[4].mxu1 %vm3929_vm9, %v3908_v40  ;;  %v4367_v63 = vpop.permute.xlu0 %4366 }
 0x9aa   : > { %v4379_v44 = vsel %vm8534_vm13, %v4373_v36, %v4363_v51  ;;  %4449 = vmatprep.mubr.f32.mxu1 %v6521_v29  ;;  %v4377_v39 = vsel %vm8536_vm15, %v4365_v59, %v4367_v63  ;;  %vm8549_vm13 = vmmov %vm8547_vm3  ;;  %vm8551_vm15 = vcmp.lt.s32.totalorder %v6815_v55, 111 }
 0x9ab   : > { %4386 = vmatpush1.msra.mxu1 %v4379_v44 }
 0x9ad   : > { %v4369_v38 = vpop.permute.xlu1 %4368  ;;  %6333 = vmatmul.mubr.msk.f32.vlgmr.msra.gmra.mrb[0].mxu1 %vm3929_vm9, %v6332_v18  ;;  %v4371_v43 = vpop.permute.xlu0 %4370 }
 0x9ae   : > { %v4376_v1 = vsel %vm8535_vm14, %v4367_v63, %v4369_v38  ;;  %4520 = vmatprep.mubr.f32.mxu1 %v6521_v29  ;;  %v4374_v61 = vsel %vm8537_vm4, %v4371_v43, %v4373_v36  ;;  %v4375_v52 = vsel %vm8538_vm6, %v4369_v38, %v4371_v43  ;;  %vm8550_vm14 = vmmov %vm8547_vm3  ;;  %v6352_v38 = vld [vmem:[%s8292_s10 + $0x38] sm:$0xff] }
 0x9af   : > { %4456 = vmatprep.subr.mxu1 %v4376_v1  ;;  %vm8552_vm4 = vmmov %vm8551_vm15 }
 0x9b0   : > { %4457 = vmatpush1.msra.mxu1 %v4377_v39  ;;  %vm8553_vm6 = vmmov %vm8552_vm4 }
 0x9b1   : > { %v4605_v49 = vpop.permute.xlu1 %4604  ;;  %6334 = vmatmul.mubr.msk.f32.vlgmr.msra.gmra.mrb[2].mxu1 %vm3929_vm9, %v6332_v18  ;;  %4527 = vmatprep.subr.mxu1 %v4374_v61  ;;  %v4607_v20 = vpop.permute.xlu0 %4606 }
 0x9b2   : > { %4528 = vmatpush1.msra.mxu1 %v4375_v52  ;;  %v4620_v50 = vsel %vm8539_vm5, %v4605_v49, %v4607_v20  ;;  %4591 = vmatprep.mubr.f32.mxu1 %v6521_v29  ;;  %vm8554_vm5 = vmmov %vm8552_vm4 }
 0x9b3   : > { %4627 = vmatprep.subr.mxu1 %v4620_v50 }
 0x9b5   : > { %v4615_v10 = vpop.permute.xlu1 %4614  ;;  %6335 = vmatmul.mubr.msk.f32.vlgmr.msra.gmra.mrb[4].mxu1 %vm3929_vm9, %v6332_v18  ;;  %v4609_v7 = vpop.permute.xlu0 %4608 }
 0x9b6   : > { %v4621_v62 = vsel %vm8540_vm0, %v4615_v10, %v4605_v49  ;;  %4691 = vmatprep.mubr.f32.mxu1 %v6521_v29  ;;  %v4619_v16 = vsel %vm8542_vm1, %v4607_v20, %v4609_v7  ;;  %vm8555_vm0 = vmmov %vm8552_vm4  ;;  %vm8557_vm1 = vcmp.lt.s32.totalorder %v6815_v55, 110 }
 0x9b7   : > { %4628 = vmatpush1.msra.mxu1 %v4621_v62  ;;  %v6356_v62 = vld [vmem:[%s8292_s10 + $0x40] sm:$0xff] }
 0x9b9   : > { %v4611_v57 = vpop.permute.xlu1 %4610  ;;  %6337 = vmatmul.mubr.msk.f32.vlgmr.msra.gmra.mrb[0].mxu1 %vm3929_vm9, %v6336_v9  ;;  %v4613_v28 = vpop.permute.xlu0 %4612 }
 0x9ba   : > { %v4618_v30 = vsel %vm8541_vm10, %v4609_v7, %v4611_v57  ;;  %4762 = vmatprep.mubr.f32.mxu1 %v6521_v29  ;;  %v4616_v34 = vsel %vm8543_vm8, %v4613_v28, %v4615_v10  ;;  %v4617_v12 = vsel %vm8544_vm2, %v4611_v57, %v4613_v28  ;;  %vm8556_vm10 = vmmov %vm8555_vm0 }
 0x9bb   : > { %4698 = vmatprep.subr.mxu1 %v4618_v30  ;;  %vm8558_vm8 = vmmov %vm8557_vm1 }
 0x9bc   : > { %4699 = vmatpush1.msra.mxu1 %v4619_v16  ;;  %vm8559_vm2 = vmmov %vm8557_vm1 }
 0x9bd   : > { %v5073_v4 = vpop.permute.xlu1 %5072  ;;  %6338 = vmatmul.mubr.msk.f32.vlgmr.msra.gmra.mrb[2].mxu1 %vm3929_vm9, %v6336_v9  ;;  %4769 = vmatprep.subr.mxu1 %v4616_v34  ;;  %v5075_v53 = vpop.permute.xlu0 %5074 }
 0x9be   : > { %4770 = vmatpush1.msra.mxu1 %v4617_v12  ;;  %4833 = vmatprep.mubr.f32.mxu1 %v6521_v29  ;;  %v5085_v42 = vsel %vm8545_vm7, %v5073_v4, %v5075_v53  ;;  %vm8560_vm7 = vmmov %vm8557_vm1 }
 0x9bf   : > { %4851 = vmatprep.subr.mxu1 %v7950_v6 }
 0x9c1   : > { %v5071_v31 = vpop.permute.xlu1 %5070  ;;  %6339 = vmatmul.mubr.msk.f32.vlgmr.msra.gmra.mrb[4].mxu1 %vm3929_vm9, %v6336_v9  ;;  %v5077_v48 = vpop.permute.xlu0 %5076 }
 0x9c2   : > { %4852 = vmatpush1.msra.mxu1 %v7946_v56  ;;  %4915 = vmatprep.mubr.f32.mxu1 %v6521_v29  ;;  %v5084_v3 = vsel %vm8548_vm12, %v5075_v53, %v5077_v48  ;;  %vm8563_vm12 = vcmp.lt.s32.totalorder %v6815_v55, 109 }
 0x9c3   : > { %4922 = vmatprep.subr.mxu1 %v7978_v13  ;;  %v5086_v13 = vsel %vm8546_vm11, %v5071_v31, %v5073_v4  ;;  %vm8561_vm11 = vmmov %vm8557_vm1 }
 0x9c5   : > { %v5079_v41 = vpop.permute.xlu1 %5078  ;;  %6341 = vmatmul.mubr.msk.f32.vlgmr.msra.gmra.mrb[0].mxu1 %vm3929_vm9, %v6340_v54  ;;  %v5081_v19 = vpop.permute.xlu0 %5080 }
 0x9c6   : > { %4923 = vmatpush1.msra.mxu1 %v7962_v17  ;;  %4986 = vmatprep.mubr.f32.mxu1 %v6521_v29  ;;  %v5087_v0 = vsel %vm8549_vm13, %v5081_v19, %v5071_v31  ;;  %v5082_v37 = vsel %vm8550_vm14, %v5079_v41, %v5081_v19  ;;  %vm8564_vm13 = vmmov %vm8563_vm12 }
 0x9c7   : > { %4993 = vmatprep.subr.mxu1 %v7966_v23  ;;  %v5083_v23 = vsel %vm8547_vm3, %v5077_v48, %v5079_v41  ;;  %vm8562_vm3 = vmmov %vm8557_vm1 }
 0x9c8   : > { %vm8565_vm14 = vmmov %vm8563_vm12 }
 0x9c9   : > { %v5315_v6 = vpop.permute.xlu1 %5314  ;;  %6342 = vmatmul.mubr.msk.f32.vlgmr.msra.gmra.mrb[2].mxu1 %vm3929_vm9, %v6340_v54  ;;  %v5317_v56 = vpop.permute.xlu0 %5316 }
 0x9ca   : > { %4994 = vmatpush1.msra.mxu1 %v7982_v24  ;;  %5057 = vmatprep.mubr.f32.mxu1 %v6521_v29  ;;  %v6344_v24 = vld [vmem:[%s8292_s10 + $0x28] sm:$0xff]  ;;  %v5327_v22 = vsel %vm8551_vm15, %v5315_v6, %v5317_v56  ;;  %vm8566_vm15 = vmmov %vm8563_vm12 }
 0x9cb   : > { %5093 = vmatprep.subr.mxu1 %v5085_v42 }
 0x9cd   : > { %v5313_v17 = vpop.permute.xlu1 %5312  ;;  %6343 = vmatmul.mubr.msk.f32.vlgmr.msra.gmra.mrb[4].mxu1 %vm3929_vm9, %v6340_v54  ;;  %v5319_v27 = vpop.permute.xlu0 %5318 }
 0x9ce   : > { %5094 = vmatpush1.msra.mxu1 %v5086_v13  ;;  %5157 = vmatprep.mubr.f32.mxu1 %v6521_v29  ;;  %v5328_v40 = vsel %vm8552_vm4, %v5313_v17, %v5315_v6  ;;  %v5326_v47 = vsel %vm8554_vm5, %v5317_v56, %v5319_v27  ;;  %vm8567_vm4 = vmmov %vm8563_vm12 }
 0x9cf   : > { %5164 = vmatprep.subr.mxu1 %v5083_v23 }
 0x9d1   : > { %v5321_v21 = vpop.permute.xlu1 %5320  ;;  %6345 = vmatmul.mubr.msk.f32.vlgmr.msra.gmra.mrb[0].mxu1 %vm3929_vm9, %v6344_v24  ;;  %v5323_v25 = vpop.permute.xlu0 %5322 }
 0x9d2   : > { %5165 = vmatpush1.msra.mxu1 %v5084_v3  ;;  %5228 = vmatprep.mubr.f32.mxu1 %v6521_v29  ;;  %v5325_v14 = vsel %vm8553_vm6, %v5319_v27, %v5321_v21  ;;  %v5329_v51 = vsel %vm8555_vm0, %v5323_v25, %v5313_v17  ;;  %v5324_v59 = vsel %vm8556_vm10, %v5321_v21, %v5323_v25  ;;  %vm8568_vm6 = vmmov %vm8567_vm4 }
 0x9d3   : > { %5235 = vmatprep.subr.mxu1 %v5087_v0 }
 0x9d5   : > { %v5557_v45 = vpop.permute.xlu1 %5556  ;;  %6346 = vmatmul.mubr.msk.f32.vlgmr.msra.gmra.mrb[2].mxu1 %vm3929_vm9, %v6344_v24  ;;  %v5559_v46 = vpop.permute.xlu0 %5558 }
 0x9d6   : > { %5236 = vmatpush1.msra.mxu1 %v5082_v37  ;;  %5299 = vmatprep.mubr.f32.mxu1 %v6521_v29  ;;  %v5569_v36 = vsel %vm8557_vm1, %v5557_v45, %v5559_v46 }
 0x9d7   : > { %5335 = vmatprep.subr.mxu1 %v5327_v22 }
 0x9d9   : > { %v5555_v35 = vpop.permute.xlu1 %5554  ;;  %6347 = vmatmul.mubr.msk.f32.vlgmr.msra.gmra.mrb[4].mxu1 %vm3929_vm9, %v6344_v24  ;;  %v5561_v2 = vpop.permute.xlu0 %5560 }
 0x9da   : > { %5336 = vmatpush1.msra.mxu1 %v5328_v40  ;;  %5399 = vmatprep.mubr.f32.mxu1 %v6521_v29  ;;  %v5570_v44 = vsel %vm8558_vm8, %v5555_v35, %v5557_v45  ;;  %v5568_v1 = vsel %vm8560_vm7, %v5559_v46, %v5561_v2 }
 0x9db   : > { %5406 = vmatprep.subr.mxu1 %v5325_v14  ;;  %v6104_v14 = vld [vmem:[%s8294_s12] sm:$0xff] }
 0x9dd   : > { %v5563_v26 = vpop.permute.xlu1 %5562  ;;  %6349 = vmatmul.mubr.msk.f32.vlgmr.msra.gmra.mrb[0].mxu1 %vm3929_vm9, %v6348_v58  ;;  %v5565_v11 = vpop.permute.xlu0 %5564 }
 0x9de   : > { %5407 = vmatpush1.msra.mxu1 %v5326_v47  ;;  %5470 = vmatprep.mubr.f32.mxu1 %v6521_v29  ;;  %v5567_v18 = vsel %vm8559_vm2, %v5561_v2, %v5563_v26  ;;  %v5571_v61 = vsel %vm8561_vm11, %v5565_v11, %v5555_v35  ;;  %v5566_v52 = vsel %vm8562_vm3, %v5563_v26, %v5565_v11 }
 0x9df   : > { %5477 = vmatprep.subr.mxu1 %v5329_v51 }
 0x9e1   : > { %6350 = vmatmul.mubr.msk.f32.vlgmr.msra.gmra.mrb[2].mxu1 %vm3929_vm9, %v6348_v58  ;;  %v5799_v63 = vpop.permute.xlu1 %5798  ;;  %v5801_v43 = vpop.permute.xlu0 %5800 }
 0x9e2   : > { %5478 = vmatpush1.msra.mxu1 %v5324_v59  ;;  %5541 = vmatprep.mubr.f32.mxu1 %v6521_v29  ;;  %v5811_v20 = vsel %vm8563_vm12, %v5799_v63, %v5801_v43 }
 0x9e3   : > { %5577 = vmatprep.subr.mxu1 %v5569_v36 }
 0x9e5   : > { %6351 = vmatmul.mubr.msk.f32.vlgmr.msra.gmra.mrb[4].mxu1 %vm3929_vm9, %v6348_v58  ;;  %v5797_v39 = vpop.permute.xlu1 %5796  ;;  %v5803_v49 = vpop.permute.xlu0 %5802 }
 0x9e6   : > { %5578 = vmatpush1.msra.mxu1 %v5570_v44  ;;  %5641 = vmatprep.mubr.f32.mxu1 %v6521_v29  ;;  %v5812_v10 = vsel %vm8564_vm13, %v5797_v39, %v5799_v63  ;;  %v5810_v57 = vsel %vm8566_vm15, %v5801_v43, %v5803_v49 }
 0x9e7   : > { %5648 = vmatprep.subr.mxu1 %v5567_v18 }
 0x9e9   : > { %6353 = vmatmul.mubr.msk.f32.vlgmr.msra.gmra.mrb[0].mxu1 %vm3929_vm9, %v6352_v38  ;;  %v5805_v50 = vpop.permute.xlu1 %5804  ;;  %v5807_v9 = vpop.permute.xlu0 %5806 }
 0x9ea   : > { %5649 = vmatpush1.msra.mxu1 %v5568_v1  ;;  %5712 = vmatprep.mubr.f32.mxu1 %v6521_v29  ;;  %v5809_v7 = vsel %vm8565_vm14, %v5803_v49, %v5805_v50  ;;  %v5813_v28 = vsel %vm8567_vm4, %v5807_v9, %v5797_v39  ;;  %v5808_v30 = vsel %vm8568_vm6, %v5805_v50, %v5807_v9 }
 0x9eb   : > { %5719 = vmatprep.subr.mxu1 %v5571_v61 }
 0x9ed   : > { %6354 = vmatmul.mubr.msk.f32.vlgmr.msra.gmra.mrb[2].mxu1 %vm3929_vm9, %v6352_v38 }
 0x9ee   : > { %5720 = vmatpush1.msra.mxu1 %v5566_v52  ;;  %5783 = vmatprep.mubr.f32.mxu1 %v6521_v29 }
 0x9ef   : > { %5819 = vmatprep.subr.mxu1 %v5811_v20 }
 0x9f1   : > { %6355 = vmatmul.mubr.msk.f32.vlgmr.msra.gmra.mrb[4].mxu1 %vm3929_vm9, %v6352_v38 }
 0x9f2   : > { %5820 = vmatpush1.msra.mxu1 %v5812_v10  ;;  %5883 = vmatprep.mubr.f32.mxu1 %v6521_v29 }
 0x9f3   : > { %5890 = vmatprep.subr.mxu1 %v5809_v7 }
 0x9f5   : > { %6357 = vmatmul.mubr.msk.f32.vlgmr.msra.gmra.mrb[0].mxu1 %vm3929_vm9, %v6356_v62 }
 0x9f6   : > { %5891 = vmatpush1.msra.mxu1 %v5810_v57  ;;  %5954 = vmatprep.mubr.f32.mxu1 %v6521_v29 }
 0x9f7   : > { %5961 = vmatprep.subr.mxu1 %v5813_v28 }
 0x9f9   : > { %6358 = vmatmul.mubr.msk.f32.vlgmr.msra.gmra.mrb[2].mxu1 %vm3929_vm9, %v6356_v62 }
 0x9fa   : > { %5962 = vmatpush1.msra.mxu1 %v5808_v30  ;;  %6025 = vmatprep.mubr.f32.mxu1 %v6521_v29  ;;  %v6042_v16 = vpop.permute.xlu1 %6041 }
 0x9fd   : > { %6359 = vmatmul.mubr.msk.f32.vlgmr.msra.gmra.mrb[4].mxu1 %vm3929_vm9, %v6356_v62 }
 0xac8   : > { %v5885_v34 = vpop.f32.mrb[0].mxu1 }
 0xac9   : > { %v6044_v12 = vadd.f32 %v6042_v16, %v5885_v34  ;;  %v5887_v4 = vpop.f32.mrb[1].mxu1 }
 0xaca   : > { %v6045_v53 = vadd.f32 %v6042_v16, %v5887_v4 }
 0xacb   : > { %v6050_v31 = vmax.f32 %v6044_v12, 0.0 }
 0xacc   : > { %v6051_v48 = vmax.f32 %v6045_v53, 0.0  ;;  %v5956_v54 = vpop.f32.mrb[2].mxu1 }
 0xacd   : > { %v6056_v41 = vmul.f32 %v6050_v31, %v6890_v5  ;;  %v6046_v19 = vadd.f32 %v6042_v16, %v5956_v54  ;;  %v5958_v55 = vpop.f32.mrb[3].mxu1 }
 0xace   : > { %v6057_v6 = vmul.f32 %v6051_v48, %v6906_v32  ;;  %v6047_v56 = vadd.f32 %v6042_v16, %v5958_v55 }
 0xacf   : > { %v6052_v42 = vmax.f32 %v6046_v19, 0.0 }
 0xad0   : > { %v6062_v13 = vadd.f32 %v6057_v6, %v6056_v41  ;;  %v6053_v29 = vmax.f32 %v6047_v56, 0.0  ;;  %v6027_v17 = vpop.f32.mrb[4].mxu1 }
 0xad1   : > { %v6058_v27 = vmul.f32 %v6052_v42, %v6912_v60  ;;  %v6048_v23 = vadd.f32 %v6042_v16, %v6027_v17  ;;  %v6029_v24 = vpop.f32.mrb[5].mxu1 }
 0xad2   : > { %v6059_v3 = vmul.f32 %v6053_v29, %v7162_v15  ;;  %v6049_v21 = vadd.f32 %v6042_v16, %v6029_v24 }
 0xad3   : > { %v6063_v25 = vadd.f32 %v6062_v13, %v6058_v27  ;;  %v6054_v0 = vmax.f32 %v6048_v23, 0.0 }
 0xad4   : > { %v6055_v37 = vmax.f32 %v6049_v21, 0.0 }
 0xad5   : > { %v6064_v45 = vadd.f32 %v6063_v25, %v6059_v3  ;;  %v6060_v46 = vmul.f32 %v6054_v0, %v7173_v33 }
 0xad6   : > { %v6061_v22 = vmul.f32 %v6055_v37, %v7180_v8 }
 0xad7   : > { %v6065_v40 = vadd.f32 %v6064_v45, %v6060_v46 }
 0xad9   : > { %v6066_v35 = vadd.f32 %v6065_v40, %v6061_v22 }
 0xadb   : > { %6067 = vadd.xlane.f32.xlu0 %v6066_v35 }
 0xaf1   : > { %6107 = vperm.xlu0 %6492, %v6104_v14  }
 0xb68   : > { %v6068_v58 = vpop.xlane.xlu0 %6067 }
 0xb69   : > { %v6069_v2 = vmul.f32 0.001953125, %v6068_v58 }
 0xb6b   : > { %v6070_v47 = vsub.f32 %v6050_v31, %v6069_v2  ;;  %v6071_v26 = vsub.f32 %v6051_v48, %v6069_v2  ;;  %v6072_v51 = vsub.f32 %v6052_v42, %v6069_v2  ;;  %v6073_v59 = vsub.f32 %v6053_v29, %v6069_v2 }
 0xb6c   : > { %v6074_v11 = vsub.f32 %v6054_v0, %v6069_v2  ;;  %v6075_v18 = vsub.f32 %v6055_v37, %v6069_v2 }
 0xb6d   : > { %v6076_v36 = vmul.f32 %v6070_v47, %v6890_v5  ;;  %v6077_v63 = vmul.f32 %v6071_v26, %v6906_v32  ;;  %v6078_v44 = vmul.f32 %v6072_v51, %v6912_v60  ;;  %v6079_v38 = vmul.f32 %v6073_v59, %v7162_v15  ;;  %v6116_v60 = vld [vmem:[%s8295_s13] sm:$0xff] }
 0xb6e   : > { %v6080_v39 = vmul.f32 %v6074_v11, %v7173_v33  ;;  %v6081_v49 = vmul.f32 %v6075_v18, %v7180_v8 }
 0xb6f   : > { %v6082_v43 = vmul.f32 %v6076_v36, %v6076_v36  ;;  %v6083_v1 = vmul.f32 %v6077_v63, %v6077_v63  ;;  %v6084_v61 = vmul.f32 %v6078_v44, %v6078_v44  ;;  %v6085_v20 = vmul.f32 %v6079_v38, %v6079_v38 }
 0xb70   : > { %v6086_v10 = vmul.f32 %v6080_v39, %v6080_v39  ;;  %v6087_v5 = vmul.f32 %v6081_v49, %v6081_v49  ;;  %v6108_v34 = vpop.permute.xlu0 %6107 }
 0xb71   : > { %v6088_v52 = vadd.f32 %v6083_v1, %v6082_v43 }
 0xb73   : > { %v6089_v50 = vadd.f32 %v6088_v52, %v6084_v61 }
 0xb75   : > { %v6090_v7 = vadd.f32 %v6089_v50, %v6085_v20 }
 0xb77   : > { %v6091_v32 = vadd.f32 %v6090_v7, %v6086_v10 }
 0xb79   : > { %v6092_v62 = vadd.f32 %v6091_v32, %v6087_v5 }
 0xb7b   : > { %6093 = vadd.xlane.f32.xlu1 %v6092_v62 }
 0xb8c   : > { %6119 = vperm.xlu1 %6493, %v6116_v60  }
 0xc08   : > { %v6094_v15 = vpop.xlane.xlu1 %6093 }
 0xc09   : > { %v6095_v33 = vmul.f32 0.001953125, %v6094_v15 }
 0xc0b   : > { %v6096_v9 = vadd.f32 1e-05, %v6095_v33 }
 0xc0c   : > { %v6120_v41 = vpop.permute.xlu1 %6119 }
 0xc0d   : > { %6498 = vrsqrt.f32 %v6096_v9 }
 0xc17   : > { %v6499_v57 = vpop.eup %6498 }
 0xc18   : > { %v6098_v8 = vmul.f32 %v6499_v57, %v6070_v47  ;;  %v6099_v28 = vmul.f32 %v6499_v57, %v6071_v26  ;;  %v6100_v30 = vmul.f32 %v6499_v57, %v6072_v51  ;;  %v6101_v16 = vmul.f32 %v6499_v57, %v6073_v59 }
 0xc19   : > { %v6102_v12 = vmul.f32 %v6499_v57, %v6074_v11  ;;  %v6103_v4 = vmul.f32 %v6499_v57, %v6075_v18 }
 0xc1a   : > { %v6110_v53 = vmul.f32 %v6108_v34, %v6098_v8  ;;  %v6111_v31 = vmul.f32 %v6108_v34, %v6099_v28  ;;  %v6112_v48 = vmul.f32 %v6108_v34, %v6100_v30  ;;  %v6113_v54 = vmul.f32 %v6108_v34, %v6101_v16 }
 0xc1b   : > { %v6114_v19 = vmul.f32 %v6108_v34, %v6102_v12  ;;  %v6115_v55 = vmul.f32 %v6108_v34, %v6103_v4 }
 0xc1c   : > { %v6122_v6 = vadd.f32 %v6120_v41, %v6110_v53  ;;  %v6123_v56 = vadd.f32 %v6120_v41, %v6111_v31  ;;  %v6124_v42 = vadd.f32 %v6120_v41, %v6112_v48  ;;  %v6125_v13 = vadd.f32 %v6120_v41, %v6113_v54 }
 0xc1d   : > { %v6126_v29 = vadd.f32 %v6120_v41, %v6114_v19  ;;  %v6127_v17 = vadd.f32 %v6120_v41, %v6115_v55 }
 0xc1e   : > { %v6368_v27 = vpack.c.bf16 %v6123_v56, %v6122_v6  ;;  %v6369_v23 = vpack.c.bf16 %v6124_v42, %v6124_v42 }
 0xc1f   : > { %v6370_v24 = vpack.c.bf16 %v6126_v29, %v6125_v13  ;;  %v6371_v3 = vpack.c.bf16 %v6127_v17, %v6127_v17 }
 0xc20   : > { %6141 = vst [vmem:[%s464_s16] sm:$0xff] %v6368_v27  ;;  %6142 = vst [vmem:[%s464_s16 + $0x8] sm:$0xf] %v6369_v23 }
 0xc21   : > { %6364 = vst [vmem:[%s464_s16 + $0xc] sm:$0xff] %v6370_v24  ;;  %6365 = vst [vmem:[%s464_s16 + $0x14] sm:$0xf] %v6371_v3 }
 0xc22 PF: > { %s24_s29 = sadd.s32 1, %s6506_s29  }
 0xc23   : > { %p21_p4 = scmp.ge.s32.totalorder %s24_s29, 4  }
 0xc25   :  { %23 = sbr.rel (!%p21_p4) target bundleno = 1 (0x1), region = 135 }

// kernel: siamese_forward.3
= control target key start
LH: loop header
LB: loop body
LE: loop exit
PB: predicated region body
PF: predicated region fallthrough
CT: control target
= control target key end

     0   :  { %12 = vsyncpa [#allocation3], 0  ;;  %s10068_s0 = inlined_call_operand.vmem [shape: bf16[4,3072], index: 0, kind: input, shape index: {}]   ;;  %s10069_s1 = inlined_call_operand.hbm [shape: bf16[3072,512], index: 1, kind: input, shape index: {}]   ;;  %s10070_s2 = inlined_call_operand.hbm [shape: f32[1,512], index: 2, kind: input, shape index: {}]   ;;  %s10071_s3 = inlined_call_operand.hbm [shape: bf16[512,512], index: 3, kind: input, shape index: {}]   ;;  %s10072_s4 = inlined_call_operand.hbm [shape: f32[1,512], index: 4, kind: input, shape index: {}]   ;;  %s10073_s5 = inlined_call_operand.hbm [shape: bf16[512,128], index: 5, kind: input, shape index: {}]   ;;  %s10074_s6 = inlined_call_operand.hbm [shape: f32[1,128], index: 6, kind: input, shape index: {}]   ;;  %s10075_s7 = inlined_call_operand.vmem [shape: f32[4,128], index: 7, kind: output, shape index: {}]  }
   0x1   :  { %13 = vsyncpa [#allocation5], 0 }
   0x2   :  { %14 = vsyncpa [#allocation8], 0 }
   0x3   :  { %15 = vsyncpa [#allocation11], 0  ;;  %s9787_s24 = smov [#allocation4]   ;;  %s9788_s26 = smov [#allocation7]  }
   0x4   :  { %s36_s25 = sshll.u32 %s9787_s24, 4  ;;  %s58_s27 = sshll.u32 %s9788_s26, 4  ;;  %s37_s25 = int_to_ptr.vmem [resolvable:$true] %s36_s25  ;;  %s59_s27 = int_to_ptr.vmem [resolvable:$true] %s58_s27 }
   0x5   :  { %s9647_s30 = scalar_lea.hbm %s10070_s2, 64 }
   0x6   :  { %p9648_p0 = scmp.ne.s32.totalorder %s10070_s2, %s9647_s30  ;;  %p9651_p1 = scmp.lt.u32.totalorder %s9647_s30, %s10070_s2 }
   0x8   :  { %p9653_p2 = pnand %p9651_p1, %p9648_p0 }
   0xa   :  { %9656 = shalt.err (!%p9653_p2)
}
   0xb   :  { %s9657_s12 = scalar_lea.vmem %s37_s25, 64  ;;  %p9662_p4 = scmp.lt.s32.totalorder %s37_s25, %s37_s25 }
   0xc   :  { %p9658_p3 = scmp.ne.s32.totalorder %s37_s25, %s9657_s12  ;;  %p9663_p5 = scmp.lt.s32.totalorder %s9657_s12, %s9657_s12 }
   0xe   :  { %p9664_p6 = por %p9663_p5, %p9662_p4 }
  0x10   :  { %p9665_p7 = pnand %p9664_p6, %p9658_p3 }
  0x12   :  { %9668 = shalt.err (!%p9665_p7)
}
  0x13   :  { %39 = dma.hbm_to_vmem [thread:$0]  %s10070_s2, 64, %s37_s25, [#allocation5]  }
  0x14   :  { %s9669_s17 = scalar_lea.hbm %s10072_s4, 64 }
  0x15   :  { %p9670_p8 = scmp.ne.s32.totalorder %s10072_s4, %s9669_s17  ;;  %p9673_p9 = scmp.lt.u32.totalorder %s9669_s17, %s10072_s4 }
  0x17   :  { %p9675_p10 = pnand %p9673_p9, %p9670_p8 }
  0x19   :  { %9678 = shalt.err (!%p9675_p10)
}
  0x1a   :  { %s9679_s22 = scalar_lea.vmem %s59_s27, 64  ;;  %p9684_p12 = scmp.lt.s32.totalorder %s59_s27, %s59_s27 }
  0x1b   :  { %p9680_p11 = scmp.ne.s32.totalorder %s59_s27, %s9679_s22  ;;  %p9685_p13 = scmp.lt.s32.totalorder %s9679_s22, %s9679_s22 }
  0x1d   :  { %p9686_p0 = por %p9685_p13, %p9684_p12 }
  0x1f   :  { %p9687_p1 = pnand %p9686_p0, %p9680_p11 }
  0x21   :  { %9690 = shalt.err (!%p9687_p1)
}
  0x22   :  { %61 = dma.hbm_to_vmem [thread:$0]  %s10072_s4, 64, %s59_s27, [#allocation8]  }
  0x23   :  { %s9789_s24 = smov [#allocation2]   ;;  %s9691_s29 = scalar_lea.hbm %s10069_s1, 98304 }
  0x24   :  { %s23_s25 = sshll.u32 %s9789_s24, 4  ;;  %p9692_p2 = scmp.ne.s32.totalorder %s10069_s1, %s9691_s29  ;;  %s24_s25 = int_to_ptr.vmem [resolvable:$true] %s23_s25 }
  0x25   :  { %p9695_p3 = scmp.lt.u32.totalorder %s9691_s29, %s10069_s1 }
  0x27   :  { %p9697_p4 = pnand %p9695_p3, %p9692_p2 }
  0x29   :  { %9700 = shalt.err (!%p9697_p4)
}
  0x2a   :  { %s9701_s11 = scalar_lea.vmem %s24_s25, 98304  ;;  %p9706_p6 = scmp.lt.s32.totalorder %s24_s25, %s24_s25 }
  0x2b   :  { %p9702_p5 = scmp.ne.s32.totalorder %s24_s25, %s9701_s11  ;;  %p9707_p7 = scmp.lt.s32.totalorder %s9701_s11, %s9701_s11 }
  0x2d   :  { %p9708_p8 = por %p9707_p7, %p9706_p6 }
  0x2f   :  { %p9709_p9 = pnand %p9708_p8, %p9702_p5 }
  0x31   :  { %9712 = shalt.err (!%p9709_p9)
}
  0x32   :  { %s9790_s4 = smov 256   ;;  %s9791_s27 = smov 16  }
  0x33   :  { %29 = dma.hbm_to_vmem [thread:$0]  %s10069_s1, 98304, %s24_s25, [#allocation3], %s9790_s4, %s9790_s4, %s9791_s27  }
  0x34   :  { %s9792_s14 = smov [#allocation6]   ;;  %s9793_s16 = smov [#allocation9]  }
  0x35   :  { %s45_s15 = sshll.u32 %s9792_s14, 4  ;;  %s67_s17 = sshll.u32 %s9793_s16, 4  ;;  %s46_s15 = int_to_ptr.vmem [resolvable:$true] %s45_s15  ;;  %s68_s17 = int_to_ptr.vmem [resolvable:$true] %s67_s17 }
  0x36   :  { %s9713_s20 = scalar_lea.hbm %s10071_s3, 16384 }
  0x37   :  { %p9714_p10 = scmp.ne.s32.totalorder %s10071_s3, %s9713_s20  ;;  %p9717_p11 = scmp.lt.u32.totalorder %s9713_s20, %s10071_s3 }
  0x39   :  { %p9719_p12 = pnand %p9717_p11, %p9714_p10 }
  0x3b   :  { %9722 = shalt.err (!%p9719_p12)
}
  0x3c   :  { %s9723_s1 = scalar_lea.vmem %s46_s15, 16384  ;;  %p9728_p0 = scmp.lt.s32.totalorder %s46_s15, %s46_s15 }
  0x3d   :  { %p9724_p13 = scmp.ne.s32.totalorder %s46_s15, %s9723_s1  ;;  %p9729_p1 = scmp.lt.s32.totalorder %s9723_s1, %s9723_s1 }
  0x3f   :  { %p9730_p2 = por %p9729_p1, %p9728_p0 }
  0x41   :  { %p9731_p3 = pnand %p9730_p2, %p9724_p13 }
  0x43   :  { %9734 = shalt.err (!%p9731_p3)
}
  0x44   :  { %51 = dma.hbm_to_vmem [thread:$0]  %s10071_s3, 16384, %s46_s15, [#allocation5], %s9790_s4, %s9790_s4, %s9791_s27  }
  0x45   :  { %s9735_s29 = scalar_lea.hbm %s10073_s5, 4096 }
  0x46   :  { %p9736_p4 = scmp.ne.s32.totalorder %s10073_s5, %s9735_s29  ;;  %p9739_p5 = scmp.lt.u32.totalorder %s9735_s29, %s10073_s5 }
  0x48   :  { %p9741_p6 = pnand %p9739_p5, %p9736_p4 }
  0x4a   :  { %9744 = shalt.err (!%p9741_p6)
}
  0x4b   :  { %s9745_s11 = scalar_lea.vmem %s68_s17, 4096  ;;  %p9750_p8 = scmp.lt.s32.totalorder %s68_s17, %s68_s17 }
  0x4c   :  { %p9746_p7 = scmp.ne.s32.totalorder %s68_s17, %s9745_s11  ;;  %p9751_p9 = scmp.lt.s32.totalorder %s9745_s11, %s9745_s11 }
  0x4e   :  { %p9752_p10 = por %p9751_p9, %p9750_p8 }
  0x50   :  { %p9753_p11 = pnand %p9752_p10, %p9746_p7 }
  0x52   :  { %9756 = shalt.err (!%p9753_p11)
}
  0x53   :  { %s9794_s3 = smov 64   ;;  %s9795_s4 = smov 4  }
  0x54   :  { %73 = dma.hbm_to_vmem [thread:$0]  %s10073_s5, 4096, %s68_s17, [#allocation8], %s9794_s3, %s9794_s3, %s9795_s4  }
  0x55   :  { %s9796_s13 = smov [#allocation10]   ;;  %s9757_s18 = scalar_lea.hbm %s10074_s6, 16 }
  0x56   :  { %s80_s14 = sshll.u32 %s9796_s13, 4  ;;  %p9758_p12 = scmp.ne.s32.totalorder %s10074_s6, %s9757_s18  ;;  %s81_s14 = int_to_ptr.vmem [resolvable:$true] %s80_s14 }
  0x57   :  { %p9761_p13 = scmp.lt.u32.totalorder %s9757_s18, %s10074_s6 }
  0x59   :  { %p9763_p0 = pnand %p9761_p13, %p9758_p12 }
  0x5b   :  { %9766 = shalt.err (!%p9763_p0)
}
  0x5c   :  { %s9767_s2 = scalar_lea.vmem %s81_s14, 16  ;;  %s9771_s5 = scalar_lea.vmem %s81_s14, 32 }
  0x5d   :  { %p9768_p1 = scmp.ne.s32.totalorder %s81_s14, %s9767_s2  ;;  %p9772_p2 = scmp.lt.s32.totalorder %s81_s14, %s81_s14 }
  0x5e   :  { %p9773_p3 = scmp.lt.s32.totalorder %s9771_s5, %s9767_s2 }
  0x60   :  { %p9774_p4 = por %p9773_p3, %p9772_p2 }
  0x62   :  { %p9775_p5 = pnand %p9774_p4, %p9768_p1 }
  0x64   :  { %9778 = shalt.err (!%p9775_p5)
}
  0x65   :  { %83 = dma.hbm_to_vmem [thread:$0]  %s10074_s6, 16, %s81_s14, [#allocation11]  }
  0x66   :  { %9779 = dma.done.wait [#allocation3], 98304  }
  0x67   :  { %9780 = vsyncadd [#allocation3], 4294868992 }
  0x68   :  { %9781 = dma.done.wait [#allocation5], 16448  }
  0x69   :  { %9782 = vsyncadd [#allocation5], 4294950848 }
  0x6a   :  { %9783 = dma.done.wait [#allocation8], 4160  }
  0x6b   :  { %9784 = vsyncadd [#allocation8], 4294963136 }
  0x6c   :  { %9785 = dma.done.wait [#allocation11], 16  }
  0x6d   :  { %9786 = vsyncadd [#allocation11], 4294967280  ;;  %v8265_v0 = vld [vmem:[#allocation2 + $0x4] ss:$16 sps:$4 sm:$0xff]   ;;  %v8267_v1 = vld [vmem:[#allocation2 + $0xc] ss:$16 sps:$4 sm:$0xff]   ;;  %v879_v36 = vlaneseq }
  0x6e   :  { %4871 = vmatprep.subr.bf16.mxu0 %v8265_v0  ;;  %v8269_v2 = vld [vmem:[#allocation2] ss:$16 sps:$4 sm:$0xff]   ;;  %v8270_v3 = vld [vmem:[#allocation2 + $0x8] ss:$16 sps:$4 sm:$0xff]   ;;  %5363 = vmatprep.subr.bf16.mxu1 %v8267_v1  ;;  %v8271_v4 = vld [vmem:[#allocation2 + $0x24] ss:$16 sps:$4 sm:$0xff]  }
  0x6f   :  { %4872 = vmatpush1.bf16.msra.mxu0 %v8269_v2  ;;  %5364 = vmatpush1.bf16.msra.mxu1 %v8270_v3  ;;  %v8273_v5 = vld [vmem:[#allocation2 + $0x2c] ss:$16 sps:$4 sm:$0xff]   ;;  %v8275_v6 = vld [vmem:[#allocation2 + $0x20] ss:$16 sps:$4 sm:$0xff]   ;;  %v8276_v7 = vld [vmem:[#allocation2 + $0x28] ss:$16 sps:$4 sm:$0xff]  }
  0x70   :  { %4873 = vmatprep.subr.bf16.mxu0 %v8271_v4  ;;  %5365 = vmatprep.subr.bf16.mxu1 %v8273_v5  ;;  %v8277_v8 = vld [vmem:[#allocation2 + $0x44] ss:$16 sps:$4 sm:$0xff]   ;;  %v8279_v9 = vld [vmem:[#allocation2 + $0x4c] ss:$16 sps:$4 sm:$0xff]   ;;  %v8281_v10 = vld [vmem:[#allocation2 + $0x40] ss:$16 sps:$4 sm:$0xff]  }
  0x71   :  { %v8282_v11 = vld [vmem:[#allocation2 + $0x48] ss:$16 sps:$4 sm:$0xff]   ;;  %v8283_v12 = vld [vmem:[#allocation2 + $0x64] ss:$16 sps:$4 sm:$0xff]   ;;  %v8285_v13 = vld [vmem:[#allocation2 + $0x6c] ss:$16 sps:$4 sm:$0xff]  }
  0x72   :  { %v8287_v14 = vld [vmem:[#allocation2 + $0x60] ss:$16 sps:$4 sm:$0xff]   ;;  %v8288_v15 = vld [vmem:[#allocation2 + $0x68] ss:$16 sps:$4 sm:$0xff]   ;;  %v8289_v16 = vld [vmem:[#allocation2 + $0x84] ss:$16 sps:$4 sm:$0xff]  }
  0x73   :  { %4874 = vmatpush1.bf16.msra.mxu0 %v8275_v6  ;;  %5366 = vmatpush1.bf16.msra.mxu1 %v8276_v7  ;;  %v8291_v17 = vld [vmem:[#allocation2 + $0x8c] ss:$16 sps:$4 sm:$0xff]   ;;  %v8293_v18 = vld [vmem:[#allocation2 + $0x80] ss:$16 sps:$4 sm:$0xff]   ;;  %v8294_v19 = vld [vmem:[#allocation2 + $0x88] ss:$16 sps:$4 sm:$0xff]  }
  0x74   :  { %4875 = vmatprep.subr.bf16.mxu0 %v8277_v8  ;;  %5367 = vmatprep.subr.bf16.mxu1 %v8279_v9  ;;  %v8295_v20 = vld [vmem:[#allocation2 + $0xa4] ss:$16 sps:$4 sm:$0xff]   ;;  %v8297_v21 = vld [vmem:[#allocation2 + $0xac] ss:$16 sps:$4 sm:$0xff]   ;;  %v8299_v22 = vld [vmem:[#allocation2 + $0xa0] ss:$16 sps:$4 sm:$0xff]  }
  0x75   :  { %v8300_v23 = vld [vmem:[#allocation2 + $0xa8] ss:$16 sps:$4 sm:$0xff]   ;;  %v8301_v24 = vld [vmem:[#allocation2 + $0xc4] ss:$16 sps:$4 sm:$0xff]   ;;  %v8303_v25 = vld [vmem:[#allocation2 + $0xcc] ss:$16 sps:$4 sm:$0xff]  }
  0x76   :  { %v8305_v26 = vld [vmem:[#allocation2 + $0xc0] ss:$16 sps:$4 sm:$0xff]   ;;  %v8306_v27 = vld [vmem:[#allocation2 + $0xc8] ss:$16 sps:$4 sm:$0xff]   ;;  %v8307_v28 = vld [vmem:[#allocation2 + $0xe4] ss:$16 sps:$4 sm:$0xff]  }
  0x77   :  { %4876 = vmatpush1.bf16.msra.mxu0 %v8281_v10  ;;  %5368 = vmatpush1.bf16.msra.mxu1 %v8282_v11  ;;  %v8309_v29 = vld [vmem:[#allocation2 + $0xec] ss:$16 sps:$4 sm:$0xff]   ;;  %v8311_v30 = vld [vmem:[#allocation2 + $0xe0] ss:$16 sps:$4 sm:$0xff]   ;;  %v8312_v31 = vld [vmem:[#allocation2 + $0xe8] ss:$16 sps:$4 sm:$0xff]  }
  0x78   :  { %4877 = vmatprep.subr.bf16.mxu0 %v8283_v12  ;;  %5369 = vmatprep.subr.bf16.mxu1 %v8285_v13  ;;  %v8313_v32 = vld [vmem:[#allocation2 + $0x104] ss:$16 sps:$4 sm:$0xff]   ;;  %v8315_v33 = vld [vmem:[#allocation2 + $0x10c] ss:$16 sps:$4 sm:$0xff]   ;;  %v8317_v34 = vld [vmem:[#allocation2 + $0x100] ss:$16 sps:$4 sm:$0xff]  }
  0x79   :  { %v8318_v35 = vld [vmem:[#allocation2 + $0x108] ss:$16 sps:$4 sm:$0xff]   ;;  %v9797_v37 = vmov 1983009808   ;;  %v8319_v39 = vld [vmem:[#allocation2 + $0x124] ss:$16 sps:$4 sm:$0xff]  }
  0x7a   :  { %v907_v38 = vunpack.c.l.s4 %v9797_v37  ;;  %v8321_v40 = vld [vmem:[#allocation2 + $0x12c] ss:$16 sps:$4 sm:$0xff]   ;;  %v8323_v41 = vld [vmem:[#allocation2 + $0x120] ss:$16 sps:$4 sm:$0xff]   ;;  %v9910_v42 = vshrl.u32 %v879_v36, 7 }
  0x7b   :  { %4878 = vmatpush1.bf16.msra.mxu0 %v8287_v14  ;;  %5370 = vmatpush1.bf16.msra.mxu1 %v8288_v15  ;;  %v8324_v44 = vld [vmem:[#allocation2 + $0x128] ss:$16 sps:$4 sm:$0xff]   ;;  %v8325_v45 = vld [vmem:[#allocation2 + $0x144] ss:$16 sps:$4 sm:$0xff]   ;;  %v8327_v46 = vld [vmem:[#allocation2 + $0x14c] ss:$16 sps:$4 sm:$0xff]  }
  0x7c   :  { %4879 = vmatprep.subr.bf16.mxu0 %v8289_v16  ;;  %5371 = vmatprep.subr.bf16.mxu1 %v8291_v17  ;;  %v908_v43 = vunpack.c.0.s8 %v907_v38  ;;  %v8329_v47 = vld [vmem:[#allocation2 + $0x140] ss:$16 sps:$4 sm:$0xff]   ;;  %v8330_v48 = vld [vmem:[#allocation2 + $0x148] ss:$16 sps:$4 sm:$0xff]   ;;  %v8331_v50 = vld [vmem:[#allocation2 + $0x164] ss:$16 sps:$4 sm:$0xff]  }
  0x7d   :  { %v8333_v51 = vld [vmem:[#allocation2 + $0x16c] ss:$16 sps:$4 sm:$0xff]   ;;  %v103_v52 = vld [vmem:[%s10068_s0] sm:$0xff]  ;;  %v8336_v55 = vld [vmem:[#allocation2 + $0x168] ss:$16 sps:$4 sm:$0xff]  }
  0x7e   :  { %v9913_v49 = vsub.s32 %v908_v43, %v9910_v42  ;;  %v8335_v53 = vld [vmem:[#allocation2 + $0x160] ss:$16 sps:$4 sm:$0xff]   ;;  %v8337_v56 = vld [vmem:[#allocation2 + $0x184] ss:$16 sps:$4 sm:$0xff]   ;;  %v8339_v57 = vld [vmem:[#allocation2 + $0x18c] ss:$16 sps:$4 sm:$0xff]   ;;  %v905_v7 = vcombine.high %v103_v52, %v103_v52 }
  0x7f   :  { %4880 = vmatpush1.bf16.msra.mxu0 %v8293_v18  ;;  %5372 = vmatpush1.bf16.msra.mxu1 %v8294_v19  ;;  %v8341_v59 = vld [vmem:[#allocation2 + $0x180] ss:$16 sps:$4 sm:$0xff]   ;;  %v8342_v60 = vld [vmem:[#allocation2 + $0x188] ss:$16 sps:$4 sm:$0xff]   ;;  %v8343_v61 = vld [vmem:[#allocation2 + $0x1a4] ss:$16 sps:$4 sm:$0xff]  }
  0x80   :  { %4881 = vmatprep.subr.bf16.mxu0 %v8295_v20  ;;  %5373 = vmatprep.subr.bf16.mxu1 %v8297_v21  ;;  %v912_v54 = vrot.slane %v103_v52, %v9913_v49  ;;  %v8345_v62 = vld [vmem:[#allocation2 + $0x1ac] ss:$16 sps:$4 sm:$0xff]   ;;  %v8347_v63 = vld [vmem:[#allocation2 + $0x1a0] ss:$16 sps:$4 sm:$0xff]   ;;  %v8348_v0 = vld [vmem:[#allocation2 + $0x1a8] ss:$16 sps:$4 sm:$0xff]   ;;  %v9920_v12 = vrot.slane %v905_v7, %v9913_v49 }
  0x81   :  { %v8349_v1 = vld [vmem:[#allocation2 + $0x1c4] ss:$16 sps:$4 sm:$0xff]   ;;  %v8351_v2 = vld [vmem:[#allocation2 + $0x1cc] ss:$16 sps:$4 sm:$0xff]   ;;  %v8353_v3 = vld [vmem:[#allocation2 + $0x1c0] ss:$16 sps:$4 sm:$0xff]  }
  0x82   :  { %v920_v58 = vcombine.high %v912_v54, %v912_v54  ;;  %v8354_v4 = vld [vmem:[#allocation2 + $0x1c8] ss:$16 sps:$4 sm:$0xff]   ;;  %v8355_v5 = vld [vmem:[#allocation2 + $0x1e4] ss:$16 sps:$4 sm:$0xff]   ;;  %v8357_v6 = vld [vmem:[#allocation2 + $0x1ec] ss:$16 sps:$4 sm:$0xff]   ;;  %v921_v17 = vcombine.high %v9920_v12, %v9920_v12 }
  0x83   :  { %4882 = vmatpush1.bf16.msra.mxu0 %v8299_v22  ;;  %5374 = vmatpush1.bf16.msra.mxu1 %v8300_v23  ;;  %v8359_v8 = vld [vmem:[#allocation2 + $0x1e0] ss:$16 sps:$4 sm:$0xff]   ;;  %v8360_v9 = vld [vmem:[#allocation2 + $0x1e8] ss:$16 sps:$4 sm:$0xff]   ;;  %v8364_v10 = vld [vmem:[#allocation2 + $0x204] ss:$16 sps:$4 sm:$0xff]  }
  0x84   :  { %4883 = vmatprep.subr.bf16.mxu0 %v8301_v24  ;;  %5375 = vmatprep.subr.bf16.mxu1 %v8303_v25  ;;  %v8367_v11 = vld [vmem:[#allocation2 + $0x20c] ss:$16 sps:$4 sm:$0xff]   ;;  %v8362_v13 = vld [vmem:[#allocation2 + $0x200] ss:$16 sps:$4 sm:$0xff]   ;;  %v8365_v14 = vld [vmem:[#allocation2 + $0x208] ss:$16 sps:$4 sm:$0xff]  }
  0x85   :  { %4903 = vmatprep.mubr.bf16.mxu0 %v920_v58  ;;  %5395 = vmatprep.mubr.bf16.mxu1 %v920_v58  ;;  %v8370_v15 = vld [vmem:[#allocation2 + $0x224] ss:$16 sps:$4 sm:$0xff]   ;;  %v8373_v16 = vld [vmem:[#allocation2 + $0x22c] ss:$16 sps:$4 sm:$0xff]   ;;  %v8368_v18 = vld [vmem:[#allocation2 + $0x220] ss:$16 sps:$4 sm:$0xff]  }
  0x86   :  { %v8371_v19 = vld [vmem:[#allocation2 + $0x228] ss:$16 sps:$4 sm:$0xff]   ;;  %v8376_v20 = vld [vmem:[#allocation2 + $0x244] ss:$16 sps:$4 sm:$0xff]   ;;  %v8379_v21 = vld [vmem:[#allocation2 + $0x24c] ss:$16 sps:$4 sm:$0xff]  }
  0x87   :  { %4884 = vmatpush1.bf16.msra.mxu0 %v8305_v26  ;;  %5376 = vmatpush1.bf16.msra.mxu1 %v8306_v27  ;;  %v8374_v22 = vld [vmem:[#allocation2 + $0x240] ss:$16 sps:$4 sm:$0xff]   ;;  %v8377_v23 = vld [vmem:[#allocation2 + $0x248] ss:$16 sps:$4 sm:$0xff]   ;;  %v8382_v24 = vld [vmem:[#allocation2 + $0x264] ss:$16 sps:$4 sm:$0xff]  }
  0x88   :  { %4885 = vmatprep.subr.bf16.mxu0 %v8307_v28  ;;  %5377 = vmatprep.subr.bf16.mxu1 %v8309_v29  ;;  %v8385_v25 = vld [vmem:[#allocation2 + $0x26c] ss:$16 sps:$4 sm:$0xff]   ;;  %v8380_v26 = vld [vmem:[#allocation2 + $0x260] ss:$16 sps:$4 sm:$0xff]   ;;  %v8383_v27 = vld [vmem:[#allocation2 + $0x268] ss:$16 sps:$4 sm:$0xff]  }
  0x89   :  { %v8388_v28 = vld [vmem:[#allocation2 + $0x284] ss:$16 sps:$4 sm:$0xff]   ;;  %v8391_v29 = vld [vmem:[#allocation2 + $0x28c] ss:$16 sps:$4 sm:$0xff]   ;;  %v8398_v38 = vld [vmem:[#allocation2 + $0x2c0] ss:$16 sps:$4 sm:$0xff]  }
  0x8a   :  { %v8400_v36 = vld [vmem:[#allocation2 + $0x2c4] ss:$16 sps:$4 sm:$0xff]   ;;  %v8403_v37 = vld [vmem:[#allocation2 + $0x2cc] ss:$16 sps:$4 sm:$0xff]   ;;  %v8404_v43 = vld [vmem:[#allocation2 + $0x2e0] ss:$16 sps:$4 sm:$0xff]  }
  0x8b   :  { %4886 = vmatpush1.bf16.msra.mxu0 %v8311_v30  ;;  %5378 = vmatpush1.bf16.msra.mxu1 %v8312_v31  ;;  %v8386_v30 = vld [vmem:[#allocation2 + $0x280] ss:$16 sps:$4 sm:$0xff]   ;;  %v8389_v31 = vld [vmem:[#allocation2 + $0x288] ss:$16 sps:$4 sm:$0xff]   ;;  %v8430_v58 = vld [vmem:[#allocation2 + $0x364] ss:$16 sps:$4 sm:$0xff]  }
  0x8c   :  { %4887 = vmatprep.subr.bf16.mxu0 %v8313_v32  ;;  %5379 = vmatprep.subr.bf16.mxu1 %v8315_v33  ;;  %v8394_v32 = vld [vmem:[#allocation2 + $0x2a4] ss:$16 sps:$4 sm:$0xff]   ;;  %v8397_v33 = vld [vmem:[#allocation2 + $0x2ac] ss:$16 sps:$4 sm:$0xff]   ;;  %v8416_v52 = vld [vmem:[#allocation2 + $0x320] ss:$16 sps:$4 sm:$0xff]  }
  0x8d   :  { %v8451_v7 = vld [vmem:[#allocation2 + $0x3cc] ss:$16 sps:$4 sm:$0xff]  }
  0x8f   :  { %4888 = vmatpush1.bf16.msra.mxu0 %v8317_v34  ;;  %5380 = vmatpush1.bf16.msra.mxu1 %v8318_v35  ;;  %v8392_v34 = vld [vmem:[#allocation2 + $0x2a0] ss:$16 sps:$4 sm:$0xff]   ;;  %v8395_v35 = vld [vmem:[#allocation2 + $0x2a8] ss:$16 sps:$4 sm:$0xff]  }
  0x90   :  { %4889 = vmatprep.subr.bf16.mxu0 %v8319_v39  ;;  %5381 = vmatprep.subr.bf16.mxu1 %v8321_v40  ;;  %v8401_v39 = vld [vmem:[#allocation2 + $0x2c8] ss:$16 sps:$4 sm:$0xff]   ;;  %v8406_v40 = vld [vmem:[#allocation2 + $0x2e4] ss:$16 sps:$4 sm:$0xff]  }
  0x93   :  { %4890 = vmatpush1.bf16.msra.mxu0 %v8323_v41  ;;  %5382 = vmatpush1.bf16.msra.mxu1 %v8324_v44  ;;  %v8409_v41 = vld [vmem:[#allocation2 + $0x2ec] ss:$16 sps:$4 sm:$0xff]   ;;  %v8407_v44 = vld [vmem:[#allocation2 + $0x2e8] ss:$16 sps:$4 sm:$0xff]  }
  0x94   :  { %4891 = vmatprep.subr.bf16.mxu0 %v8325_v45  ;;  %5383 = vmatprep.subr.bf16.mxu1 %v8327_v46  ;;  %v8412_v45 = vld [vmem:[#allocation2 + $0x304] ss:$16 sps:$4 sm:$0xff]   ;;  %v8415_v46 = vld [vmem:[#allocation2 + $0x30c] ss:$16 sps:$4 sm:$0xff]  }
  0x97   :  { %4892 = vmatpush1.bf16.msra.mxu0 %v8329_v47  ;;  %5384 = vmatpush1.bf16.msra.mxu1 %v8330_v48  ;;  %v8410_v47 = vld [vmem:[#allocation2 + $0x300] ss:$16 sps:$4 sm:$0xff]   ;;  %v8413_v48 = vld [vmem:[#allocation2 + $0x308] ss:$16 sps:$4 sm:$0xff]  }
  0x98   :  { %4893 = vmatprep.subr.bf16.mxu0 %v8331_v50  ;;  %5385 = vmatprep.subr.bf16.mxu1 %v8333_v51  ;;  %v8418_v50 = vld [vmem:[#allocation2 + $0x324] ss:$16 sps:$4 sm:$0xff]   ;;  %v8421_v51 = vld [vmem:[#allocation2 + $0x32c] ss:$16 sps:$4 sm:$0xff]  }
  0x9b   :  { %4894 = vmatpush1.bf16.msra.mxu0 %v8335_v53  ;;  %5386 = vmatpush1.bf16.msra.mxu1 %v8336_v55  ;;  %v8419_v53 = vld [vmem:[#allocation2 + $0x328] ss:$16 sps:$4 sm:$0xff]   ;;  %v8427_v55 = vld [vmem:[#allocation2 + $0x34c] ss:$16 sps:$4 sm:$0xff]  }
  0x9c   :  { %4895 = vmatprep.subr.bf16.mxu0 %v8337_v56  ;;  %5387 = vmatprep.subr.bf16.mxu1 %v8339_v57  ;;  %v8422_v56 = vld [vmem:[#allocation2 + $0x340] ss:$16 sps:$4 sm:$0xff]   ;;  %v8425_v57 = vld [vmem:[#allocation2 + $0x348] ss:$16 sps:$4 sm:$0xff]  }
  0x9f   :  { %4896 = vmatpush1.bf16.msra.mxu0 %v8341_v59  ;;  %5388 = vmatpush1.bf16.msra.mxu1 %v8342_v60  ;;  %v8433_v59 = vld [vmem:[#allocation2 + $0x36c] ss:$16 sps:$4 sm:$0xff]   ;;  %v8428_v60 = vld [vmem:[#allocation2 + $0x360] ss:$16 sps:$4 sm:$0xff]  }
  0xa0   :  { %4897 = vmatprep.subr.bf16.mxu0 %v8343_v61  ;;  %5389 = vmatprep.subr.bf16.mxu1 %v8345_v62  ;;  %v8431_v61 = vld [vmem:[#allocation2 + $0x368] ss:$16 sps:$4 sm:$0xff]   ;;  %v8436_v62 = vld [vmem:[#allocation2 + $0x384] ss:$16 sps:$4 sm:$0xff]  }
  0xa3   :  { %4898 = vmatpush1.bf16.msra.mxu0 %v8347_v63  ;;  %5390 = vmatpush1.bf16.msra.mxu1 %v8348_v0  ;;  %v8439_v63 = vld [vmem:[#allocation2 + $0x38c] ss:$16 sps:$4 sm:$0xff]   ;;  %v8434_v0 = vld [vmem:[#allocation2 + $0x380] ss:$16 sps:$4 sm:$0xff]  }
  0xa4   :  { %4899 = vmatprep.subr.bf16.mxu0 %v8349_v1  ;;  %5391 = vmatprep.subr.bf16.mxu1 %v8351_v2  ;;  %v8437_v1 = vld [vmem:[#allocation2 + $0x388] ss:$16 sps:$4 sm:$0xff]   ;;  %v8442_v2 = vld [vmem:[#allocation2 + $0x3a4] ss:$16 sps:$4 sm:$0xff]  }
  0xa7   :  { %4900 = vmatpush1.bf16.msra.mxu0 %v8353_v3  ;;  %5392 = vmatpush1.bf16.msra.mxu1 %v8354_v4  ;;  %v8445_v3 = vld [vmem:[#allocation2 + $0x3ac] ss:$16 sps:$4 sm:$0xff]   ;;  %v8440_v4 = vld [vmem:[#allocation2 + $0x3a0] ss:$16 sps:$4 sm:$0xff]  }
  0xa8   :  { %4901 = vmatprep.subr.bf16.mxu0 %v8355_v5  ;;  %5393 = vmatprep.subr.bf16.mxu1 %v8357_v6  ;;  %v8443_v5 = vld [vmem:[#allocation2 + $0x3a8] ss:$16 sps:$4 sm:$0xff]   ;;  %v8448_v6 = vld [vmem:[#allocation2 + $0x3c4] ss:$16 sps:$4 sm:$0xff]  }
  0xab   :  { %4902 = vmatpush1.bf16.msra.mxu0 %v8359_v8  ;;  %5394 = vmatpush1.bf16.msra.mxu1 %v8360_v9  ;;  %v8446_v8 = vld [vmem:[#allocation2 + $0x3c0] ss:$16 sps:$4 sm:$0xff]   ;;  %v8449_v9 = vld [vmem:[#allocation2 + $0x3c8] ss:$16 sps:$4 sm:$0xff]  }
  0xac   :  { %4912 = vmatprep.subr.bf16.mxu0 %v8364_v10  ;;  %5404 = vmatprep.subr.bf16.mxu1 %v8367_v11  ;;  %v8454_v10 = vld [vmem:[#allocation2 + $0x3e4] ss:$16 sps:$4 sm:$0xff]   ;;  %v8457_v11 = vld [vmem:[#allocation2 + $0x3ec] ss:$16 sps:$4 sm:$0xff]  }
  0xae   :  { %4904 = vmatmul.mubr.bf16.vlgmr.msra.gmra.mrb[0].mxu0 %v912_v54  ;;  %5396 = vmatmul.mubr.bf16.vlgmr.msra.gmra.mrb[0].mxu1 %v912_v54  ;;  %v8424_v54 = vld [vmem:[#allocation2 + $0x344] ss:$16 sps:$4 sm:$0xff]  }
  0xaf   :  { %4913 = vmatpush1.bf16.msra.mxu0 %v8362_v13  ;;  %5405 = vmatpush1.bf16.msra.mxu1 %v8365_v14  ;;  %v8452_v13 = vld [vmem:[#allocation2 + $0x3e0] ss:$16 sps:$4 sm:$0xff]   ;;  %v8455_v14 = vld [vmem:[#allocation2 + $0x3e8] ss:$16 sps:$4 sm:$0xff]  }
  0xb0   :  { %4914 = vmatprep.subr.bf16.mxu0 %v8370_v15  ;;  %5406 = vmatprep.subr.bf16.mxu1 %v8373_v16  ;;  %v8460_v15 = vld [vmem:[#allocation2 + $0x404] ss:$16 sps:$4 sm:$0xff]   ;;  %v8463_v16 = vld [vmem:[#allocation2 + $0x40c] ss:$16 sps:$4 sm:$0xff]  }
  0xb1   :  { %4944 = vmatprep.mubr.bf16.mxu0 %v921_v17  ;;  %5436 = vmatprep.mubr.bf16.mxu1 %v921_v17  ;;  %v8458_v17 = vld [vmem:[#allocation2 + $0x400] ss:$16 sps:$4 sm:$0xff]  }
  0xb3   :  { %4915 = vmatpush1.bf16.msra.mxu0 %v8368_v18  ;;  %5407 = vmatpush1.bf16.msra.mxu1 %v8371_v19  ;;  %v8461_v18 = vld [vmem:[#allocation2 + $0x408] ss:$16 sps:$4 sm:$0xff]  }
  0xb4   :  { %4916 = vmatprep.subr.bf16.mxu0 %v8376_v20  ;;  %5408 = vmatprep.subr.bf16.mxu1 %v8379_v21  ;;  %v9927_v19 = vld [vmem:[%s10068_s0 + $0x8] sm:$0xff]  ;;  %v8466_v20 = vld [vmem:[#allocation2 + $0x424] ss:$16 sps:$4 sm:$0xff]  }
  0xb5   :  { %v8469_v21 = vld [vmem:[#allocation2 + $0x42c] ss:$16 sps:$4 sm:$0xff]  }
  0xb7   :  { %4917 = vmatpush1.bf16.msra.mxu0 %v8374_v22  ;;  %5409 = vmatpush1.bf16.msra.mxu1 %v8377_v23  ;;  %v9931_v22 = vrot.slane %v9927_v19, %v9913_v49 }
  0xb8   :  { %4918 = vmatprep.subr.bf16.mxu0 %v8382_v24  ;;  %5410 = vmatprep.subr.bf16.mxu1 %v8385_v25  ;;  %v8464_v24 = vld [vmem:[#allocation2 + $0x420] ss:$16 sps:$4 sm:$0xff]   ;;  %v8467_v25 = vld [vmem:[#allocation2 + $0x428] ss:$16 sps:$4 sm:$0xff]  }
  0xb9   :  { %v937_v23 = vcombine.high %v9931_v22, %v9931_v22 }
  0xbb   :  { %4919 = vmatpush1.bf16.msra.mxu0 %v8380_v26  ;;  %5411 = vmatpush1.bf16.msra.mxu1 %v8383_v27  ;;  %v8472_v26 = vld [vmem:[#allocation2 + $0x444] ss:$16 sps:$4 sm:$0xff]   ;;  %v8475_v27 = vld [vmem:[#allocation2 + $0x44c] ss:$16 sps:$4 sm:$0xff]  }
  0xbc   :  { %4920 = vmatprep.subr.bf16.mxu0 %v8388_v28  ;;  %5412 = vmatprep.subr.bf16.mxu1 %v8391_v29  ;;  %v8470_v28 = vld [vmem:[#allocation2 + $0x440] ss:$16 sps:$4 sm:$0xff]   ;;  %v8473_v29 = vld [vmem:[#allocation2 + $0x448] ss:$16 sps:$4 sm:$0xff]  }
  0xbf   :  { %4921 = vmatpush1.bf16.msra.mxu0 %v8386_v30  ;;  %5413 = vmatpush1.bf16.msra.mxu1 %v8389_v31  ;;  %v8481_v30 = vld [vmem:[#allocation2 + $0x46c] ss:$16 sps:$4 sm:$0xff]   ;;  %v8476_v31 = vld [vmem:[#allocation2 + $0x460] ss:$16 sps:$4 sm:$0xff]  }
  0xc0   :  { %4922 = vmatprep.subr.bf16.mxu0 %v8394_v32  ;;  %5414 = vmatprep.subr.bf16.mxu1 %v8397_v33  ;;  %v8479_v32 = vld [vmem:[#allocation2 + $0x468] ss:$16 sps:$4 sm:$0xff]   ;;  %v8484_v33 = vld [vmem:[#allocation2 + $0x484] ss:$16 sps:$4 sm:$0xff]  }
  0xc3   :  { %4923 = vmatpush1.bf16.msra.mxu0 %v8392_v34  ;;  %5415 = vmatpush1.bf16.msra.mxu1 %v8395_v35  ;;  %v8487_v34 = vld [vmem:[#allocation2 + $0x48c] ss:$16 sps:$4 sm:$0xff]   ;;  %v8482_v35 = vld [vmem:[#allocation2 + $0x480] ss:$16 sps:$4 sm:$0xff]  }
  0xc4   :  { %4924 = vmatprep.subr.bf16.mxu0 %v8400_v36  ;;  %5416 = vmatprep.subr.bf16.mxu1 %v8403_v37  ;;  %v8485_v36 = vld [vmem:[#allocation2 + $0x488] ss:$16 sps:$4 sm:$0xff]   ;;  %v8490_v37 = vld [vmem:[#allocation2 + $0x4a4] ss:$16 sps:$4 sm:$0xff]  }
  0xc7   :  { %4925 = vmatpush1.bf16.msra.mxu0 %v8398_v38  ;;  %5417 = vmatpush1.bf16.msra.mxu1 %v8401_v39  ;;  %v8493_v38 = vld [vmem:[#allocation2 + $0x4ac] ss:$16 sps:$4 sm:$0xff]   ;;  %v8488_v39 = vld [vmem:[#allocation2 + $0x4a0] ss:$16 sps:$4 sm:$0xff]  }
  0xc8   :  { %4926 = vmatprep.subr.bf16.mxu0 %v8406_v40  ;;  %5418 = vmatprep.subr.bf16.mxu1 %v8409_v41  ;;  %v8491_v40 = vld [vmem:[#allocation2 + $0x4a8] ss:$16 sps:$4 sm:$0xff]   ;;  %v8496_v41 = vld [vmem:[#allocation2 + $0x4c4] ss:$16 sps:$4 sm:$0xff]  }
  0xcb   :  { %4927 = vmatpush1.bf16.msra.mxu0 %v8404_v43  ;;  %5419 = vmatpush1.bf16.msra.mxu1 %v8407_v44  ;;  %v8499_v43 = vld [vmem:[#allocation2 + $0x4cc] ss:$16 sps:$4 sm:$0xff]   ;;  %v8494_v44 = vld [vmem:[#allocation2 + $0x4c0] ss:$16 sps:$4 sm:$0xff]  }
  0xcc   :  { %4928 = vmatprep.subr.bf16.mxu0 %v8412_v45  ;;  %5420 = vmatprep.subr.bf16.mxu1 %v8415_v46  ;;  %v8497_v45 = vld [vmem:[#allocation2 + $0x4c8] ss:$16 sps:$4 sm:$0xff]   ;;  %v8502_v46 = vld [vmem:[#allocation2 + $0x4e4] ss:$16 sps:$4 sm:$0xff]  }
  0xcf   :  { %4929 = vmatpush1.bf16.msra.mxu0 %v8410_v47  ;;  %5421 = vmatpush1.bf16.msra.mxu1 %v8413_v48  ;;  %v8505_v47 = vld [vmem:[#allocation2 + $0x4ec] ss:$16 sps:$4 sm:$0xff]   ;;  %v8500_v48 = vld [vmem:[#allocation2 + $0x4e0] ss:$16 sps:$4 sm:$0xff]  }
  0xd0   :  { %4930 = vmatprep.subr.bf16.mxu0 %v8418_v50  ;;  %5422 = vmatprep.subr.bf16.mxu1 %v8421_v51  ;;  %v8503_v50 = vld [vmem:[#allocation2 + $0x4e8] ss:$16 sps:$4 sm:$0xff]   ;;  %v8508_v51 = vld [vmem:[#allocation2 + $0x504] ss:$16 sps:$4 sm:$0xff]  }
  0xd3   :  { %4931 = vmatpush1.bf16.msra.mxu0 %v8416_v52  ;;  %5423 = vmatpush1.bf16.msra.mxu1 %v8419_v53  ;;  %v8511_v52 = vld [vmem:[#allocation2 + $0x50c] ss:$16 sps:$4 sm:$0xff]   ;;  %v8506_v53 = vld [vmem:[#allocation2 + $0x500] ss:$16 sps:$4 sm:$0xff]  }
  0xd4   :  { %4932 = vmatprep.subr.bf16.mxu0 %v8424_v54  ;;  %5424 = vmatprep.subr.bf16.mxu1 %v8427_v55  ;;  %v8509_v54 = vld [vmem:[#allocation2 + $0x508] ss:$16 sps:$4 sm:$0xff]   ;;  %v8514_v55 = vld [vmem:[#allocation2 + $0x524] ss:$16 sps:$4 sm:$0xff]  }
  0xd7   :  { %4933 = vmatpush1.bf16.msra.mxu0 %v8422_v56  ;;  %5425 = vmatpush1.bf16.msra.mxu1 %v8425_v57  ;;  %v8517_v56 = vld [vmem:[#allocation2 + $0x52c] ss:$16 sps:$4 sm:$0xff]   ;;  %v8512_v57 = vld [vmem:[#allocation2 + $0x520] ss:$16 sps:$4 sm:$0xff]  }
  0xd8   :  { %4934 = vmatprep.subr.bf16.mxu0 %v8430_v58  ;;  %5426 = vmatprep.subr.bf16.mxu1 %v8433_v59  ;;  %v8515_v58 = vld [vmem:[#allocation2 + $0x528] ss:$16 sps:$4 sm:$0xff]   ;;  %v8520_v59 = vld [vmem:[#allocation2 + $0x544] ss:$16 sps:$4 sm:$0xff]  }
  0xdb   :  { %4935 = vmatpush1.bf16.msra.mxu0 %v8428_v60  ;;  %5427 = vmatpush1.bf16.msra.mxu1 %v8431_v61  ;;  %v8523_v60 = vld [vmem:[#allocation2 + $0x54c] ss:$16 sps:$4 sm:$0xff]   ;;  %v8518_v61 = vld [vmem:[#allocation2 + $0x540] ss:$16 sps:$4 sm:$0xff]  }
  0xdc   :  { %4936 = vmatprep.subr.bf16.mxu0 %v8436_v62  ;;  %5428 = vmatprep.subr.bf16.mxu1 %v8439_v63  ;;  %v8521_v62 = vld [vmem:[#allocation2 + $0x548] ss:$16 sps:$4 sm:$0xff]   ;;  %v8526_v63 = vld [vmem:[#allocation2 + $0x564] ss:$16 sps:$4 sm:$0xff]  }
  0xdf   :  { %4937 = vmatpush1.bf16.msra.mxu0 %v8434_v0  ;;  %5429 = vmatpush1.bf16.msra.mxu1 %v8437_v1  ;;  %v8529_v0 = vld [vmem:[#allocation2 + $0x56c] ss:$16 sps:$4 sm:$0xff]   ;;  %v8524_v1 = vld [vmem:[#allocation2 + $0x560] ss:$16 sps:$4 sm:$0xff]  }
  0xe0   :  { %4938 = vmatprep.subr.bf16.mxu0 %v8442_v2  ;;  %5430 = vmatprep.subr.bf16.mxu1 %v8445_v3  ;;  %v8527_v2 = vld [vmem:[#allocation2 + $0x568] ss:$16 sps:$4 sm:$0xff]   ;;  %v8532_v3 = vld [vmem:[#allocation2 + $0x584] ss:$16 sps:$4 sm:$0xff]  }
  0xe3   :  { %4939 = vmatpush1.bf16.msra.mxu0 %v8440_v4  ;;  %5431 = vmatpush1.bf16.msra.mxu1 %v8443_v5  ;;  %v8535_v4 = vld [vmem:[#allocation2 + $0x58c] ss:$16 sps:$4 sm:$0xff]   ;;  %v8530_v5 = vld [vmem:[#allocation2 + $0x580] ss:$16 sps:$4 sm:$0xff]  }
  0xe4   :  { %4940 = vmatprep.subr.bf16.mxu0 %v8448_v6  ;;  %5432 = vmatprep.subr.bf16.mxu1 %v8451_v7  ;;  %v8533_v6 = vld [vmem:[#allocation2 + $0x588] ss:$16 sps:$4 sm:$0xff]   ;;  %v8538_v7 = vld [vmem:[#allocation2 + $0x5a4] ss:$16 sps:$4 sm:$0xff]  }
  0xe7   :  { %4941 = vmatpush1.bf16.msra.mxu0 %v8446_v8  ;;  %5433 = vmatpush1.bf16.msra.mxu1 %v8449_v9  ;;  %v8541_v8 = vld [vmem:[#allocation2 + $0x5ac] ss:$16 sps:$4 sm:$0xff]   ;;  %v8536_v9 = vld [vmem:[#allocation2 + $0x5a0] ss:$16 sps:$4 sm:$0xff]  }
  0xe8   :  { %4942 = vmatprep.subr.bf16.mxu0 %v8454_v10  ;;  %5434 = vmatprep.subr.bf16.mxu1 %v8457_v11  ;;  %v8539_v10 = vld [vmem:[#allocation2 + $0x5a8] ss:$16 sps:$4 sm:$0xff]   ;;  %v8544_v11 = vld [vmem:[#allocation2 + $0x5c4] ss:$16 sps:$4 sm:$0xff]  }
  0xeb   :  { %4943 = vmatpush1.bf16.msra.mxu0 %v8452_v13  ;;  %5435 = vmatpush1.bf16.msra.mxu1 %v8455_v14  ;;  %v8547_v13 = vld [vmem:[#allocation2 + $0x5cc] ss:$16 sps:$4 sm:$0xff]   ;;  %v8542_v14 = vld [vmem:[#allocation2 + $0x5c0] ss:$16 sps:$4 sm:$0xff]  }
  0xec   :  { %4953 = vmatprep.subr.bf16.mxu0 %v8460_v15  ;;  %5445 = vmatprep.subr.bf16.mxu1 %v8463_v16  ;;  %v8545_v15 = vld [vmem:[#allocation2 + $0x5c8] ss:$16 sps:$4 sm:$0xff]   ;;  %v8550_v16 = vld [vmem:[#allocation2 + $0x5e4] ss:$16 sps:$4 sm:$0xff]  }
  0xee   :  { %4945 = vmatmul.mubr.bf16.vlgmr.msra.gmra.mrb[0].mxu0 %v9920_v12  ;;  %5437 = vmatmul.mubr.bf16.vlgmr.msra.gmra.mrb[0].mxu1 %v9920_v12  ;;  %v8478_v12 = vld [vmem:[#allocation2 + $0x464] ss:$16 sps:$4 sm:$0xff]  }
  0xef   :  { %4954 = vmatpush1.bf16.msra.mxu0 %v8458_v17  ;;  %5446 = vmatpush1.bf16.msra.mxu1 %v8461_v18  ;;  %v8553_v17 = vld [vmem:[#allocation2 + $0x5ec] ss:$16 sps:$4 sm:$0xff]   ;;  %v922_v18 = vcombine.high %v9927_v19, %v9927_v19 }
  0xf0   :  { %4955 = vmatprep.subr.bf16.mxu0 %v8466_v20  ;;  %5447 = vmatprep.subr.bf16.mxu1 %v8469_v21  ;;  %v8548_v20 = vld [vmem:[#allocation2 + $0x5e0] ss:$16 sps:$4 sm:$0xff]   ;;  %v8551_v21 = vld [vmem:[#allocation2 + $0x5e8] ss:$16 sps:$4 sm:$0xff]  }
  0xf1   :  { %4985 = vmatprep.mubr.bf16.mxu0 %v937_v23  ;;  %5477 = vmatprep.mubr.bf16.mxu1 %v937_v23  ;;  %v8556_v23 = vld [vmem:[#allocation2 + $0x604] ss:$16 sps:$4 sm:$0xff]  }
  0xf3   :  { %4956 = vmatpush1.bf16.msra.mxu0 %v8464_v24  ;;  %5448 = vmatpush1.bf16.msra.mxu1 %v8467_v25  ;;  %v8559_v24 = vld [vmem:[#allocation2 + $0x60c] ss:$16 sps:$4 sm:$0xff]   ;;  %v9940_v25 = vrot.slane %v922_v18, %v9913_v49 }
  0xf4   :  { %4957 = vmatprep.subr.bf16.mxu0 %v8472_v26  ;;  %5449 = vmatprep.subr.bf16.mxu1 %v8475_v27  ;;  %v8554_v26 = vld [vmem:[#allocation2 + $0x600] ss:$16 sps:$4 sm:$0xff]   ;;  %v8557_v27 = vld [vmem:[#allocation2 + $0x608] ss:$16 sps:$4 sm:$0xff]   ;;  %v8643_v18 = vld [vmem:[#allocation2 + $0x7cc] ss:$16 sps:$4 sm:$0xff]  }
  0xf5   :  { %v938_v19 = vcombine.high %v9940_v25, %v9940_v25 }
  0xf7   :  { %4958 = vmatpush1.bf16.msra.mxu0 %v8470_v28  ;;  %5450 = vmatpush1.bf16.msra.mxu1 %v8473_v29  ;;  %v8562_v28 = vld [vmem:[#allocation2 + $0x624] ss:$16 sps:$4 sm:$0xff]   ;;  %v8565_v29 = vld [vmem:[#allocation2 + $0x62c] ss:$16 sps:$4 sm:$0xff]  }
  0xf8   :  { %4959 = vmatprep.subr.bf16.mxu0 %v8478_v12  ;;  %5451 = vmatprep.subr.bf16.mxu1 %v8481_v30  ;;  %v8560_v12 = vld [vmem:[#allocation2 + $0x620] ss:$16 sps:$4 sm:$0xff]   ;;  %v8563_v30 = vld [vmem:[#allocation2 + $0x628] ss:$16 sps:$4 sm:$0xff]  }
  0xfb   :  { %4960 = vmatpush1.bf16.msra.mxu0 %v8476_v31  ;;  %5452 = vmatpush1.bf16.msra.mxu1 %v8479_v32  ;;  %v8568_v31 = vld [vmem:[#allocation2 + $0x644] ss:$16 sps:$4 sm:$0xff]   ;;  %v8571_v32 = vld [vmem:[#allocation2 + $0x64c] ss:$16 sps:$4 sm:$0xff]  }
  0xfc   :  { %4961 = vmatprep.subr.bf16.mxu0 %v8484_v33  ;;  %5453 = vmatprep.subr.bf16.mxu1 %v8487_v34  ;;  %v8566_v33 = vld [vmem:[#allocation2 + $0x640] ss:$16 sps:$4 sm:$0xff]   ;;  %v8569_v34 = vld [vmem:[#allocation2 + $0x648] ss:$16 sps:$4 sm:$0xff]  }
  0xff   :  { %4962 = vmatpush1.bf16.msra.mxu0 %v8482_v35  ;;  %5454 = vmatpush1.bf16.msra.mxu1 %v8485_v36  ;;  %v8574_v35 = vld [vmem:[#allocation2 + $0x664] ss:$16 sps:$4 sm:$0xff]   ;;  %v8577_v36 = vld [vmem:[#allocation2 + $0x66c] ss:$16 sps:$4 sm:$0xff]  }
 0x100   :  { %4963 = vmatprep.subr.bf16.mxu0 %v8490_v37  ;;  %5455 = vmatprep.subr.bf16.mxu1 %v8493_v38  ;;  %v8575_v37 = vld [vmem:[#allocation2 + $0x668] ss:$16 sps:$4 sm:$0xff]   ;;  %v8580_v38 = vld [vmem:[#allocation2 + $0x684] ss:$16 sps:$4 sm:$0xff]  }
 0x103   :  { %4964 = vmatpush1.bf16.msra.mxu0 %v8488_v39  ;;  %5456 = vmatpush1.bf16.msra.mxu1 %v8491_v40  ;;  %v8583_v39 = vld [vmem:[#allocation2 + $0x68c] ss:$16 sps:$4 sm:$0xff]   ;;  %v8578_v40 = vld [vmem:[#allocation2 + $0x680] ss:$16 sps:$4 sm:$0xff]  }
 0x104   :  { %4965 = vmatprep.subr.bf16.mxu0 %v8496_v41  ;;  %5457 = vmatprep.subr.bf16.mxu1 %v8499_v43  ;;  %v8581_v41 = vld [vmem:[#allocation2 + $0x688] ss:$16 sps:$4 sm:$0xff]   ;;  %v8586_v43 = vld [vmem:[#allocation2 + $0x6a4] ss:$16 sps:$4 sm:$0xff]  }
 0x107   :  { %4966 = vmatpush1.bf16.msra.mxu0 %v8494_v44  ;;  %5458 = vmatpush1.bf16.msra.mxu1 %v8497_v45  ;;  %v8589_v44 = vld [vmem:[#allocation2 + $0x6ac] ss:$16 sps:$4 sm:$0xff]   ;;  %v8584_v45 = vld [vmem:[#allocation2 + $0x6a0] ss:$16 sps:$4 sm:$0xff]  }
 0x108   :  { %4967 = vmatprep.subr.bf16.mxu0 %v8502_v46  ;;  %5459 = vmatprep.subr.bf16.mxu1 %v8505_v47  ;;  %v8587_v46 = vld [vmem:[#allocation2 + $0x6a8] ss:$16 sps:$4 sm:$0xff]   ;;  %v8592_v47 = vld [vmem:[#allocation2 + $0x6c4] ss:$16 sps:$4 sm:$0xff]  }
 0x10b   :  { %4968 = vmatpush1.bf16.msra.mxu0 %v8500_v48  ;;  %5460 = vmatpush1.bf16.msra.mxu1 %v8503_v50  ;;  %v8595_v48 = vld [vmem:[#allocation2 + $0x6cc] ss:$16 sps:$4 sm:$0xff]   ;;  %v8590_v50 = vld [vmem:[#allocation2 + $0x6c0] ss:$16 sps:$4 sm:$0xff]  }
 0x10c   :  { %4969 = vmatprep.subr.bf16.mxu0 %v8508_v51  ;;  %5461 = vmatprep.subr.bf16.mxu1 %v8511_v52  ;;  %v8593_v51 = vld [vmem:[#allocation2 + $0x6c8] ss:$16 sps:$4 sm:$0xff]   ;;  %v8598_v52 = vld [vmem:[#allocation2 + $0x6e4] ss:$16 sps:$4 sm:$0xff]  }
 0x10f   :  { %4970 = vmatpush1.bf16.msra.mxu0 %v8506_v53  ;;  %5462 = vmatpush1.bf16.msra.mxu1 %v8509_v54  ;;  %v8601_v53 = vld [vmem:[#allocation2 + $0x6ec] ss:$16 sps:$4 sm:$0xff]   ;;  %v8596_v54 = vld [vmem:[#allocation2 + $0x6e0] ss:$16 sps:$4 sm:$0xff]  }
 0x110   :  { %4971 = vmatprep.subr.bf16.mxu0 %v8514_v55  ;;  %5463 = vmatprep.subr.bf16.mxu1 %v8517_v56  ;;  %v8599_v55 = vld [vmem:[#allocation2 + $0x6e8] ss:$16 sps:$4 sm:$0xff]   ;;  %v8604_v56 = vld [vmem:[#allocation2 + $0x704] ss:$16 sps:$4 sm:$0xff]  }
 0x113   :  { %4972 = vmatpush1.bf16.msra.mxu0 %v8512_v57  ;;  %5464 = vmatpush1.bf16.msra.mxu1 %v8515_v58  ;;  %v8607_v57 = vld [vmem:[#allocation2 + $0x70c] ss:$16 sps:$4 sm:$0xff]   ;;  %v8602_v58 = vld [vmem:[#allocation2 + $0x700] ss:$16 sps:$4 sm:$0xff]  }
 0x114   :  { %4973 = vmatprep.subr.bf16.mxu0 %v8520_v59  ;;  %5465 = vmatprep.subr.bf16.mxu1 %v8523_v60  ;;  %v8605_v59 = vld [vmem:[#allocation2 + $0x708] ss:$16 sps:$4 sm:$0xff]   ;;  %v8610_v60 = vld [vmem:[#allocation2 + $0x724] ss:$16 sps:$4 sm:$0xff]  }
 0x117   :  { %4974 = vmatpush1.bf16.msra.mxu0 %v8518_v61  ;;  %5466 = vmatpush1.bf16.msra.mxu1 %v8521_v62  ;;  %v8613_v61 = vld [vmem:[#allocation2 + $0x72c] ss:$16 sps:$4 sm:$0xff]   ;;  %v8608_v62 = vld [vmem:[#allocation2 + $0x720] ss:$16 sps:$4 sm:$0xff]  }
 0x118   :  { %4975 = vmatprep.subr.bf16.mxu0 %v8526_v63  ;;  %5467 = vmatprep.subr.bf16.mxu1 %v8529_v0  ;;  %v8611_v63 = vld [vmem:[#allocation2 + $0x728] ss:$16 sps:$4 sm:$0xff]   ;;  %v8616_v0 = vld [vmem:[#allocation2 + $0x744] ss:$16 sps:$4 sm:$0xff]  }
 0x11b   :  { %4976 = vmatpush1.bf16.msra.mxu0 %v8524_v1  ;;  %5468 = vmatpush1.bf16.msra.mxu1 %v8527_v2  ;;  %v8619_v1 = vld [vmem:[#allocation2 + $0x74c] ss:$16 sps:$4 sm:$0xff]   ;;  %v8614_v2 = vld [vmem:[#allocation2 + $0x740] ss:$16 sps:$4 sm:$0xff]  }
 0x11c   :  { %4977 = vmatprep.subr.bf16.mxu0 %v8532_v3  ;;  %5469 = vmatprep.subr.bf16.mxu1 %v8535_v4  ;;  %v8617_v3 = vld [vmem:[#allocation2 + $0x748] ss:$16 sps:$4 sm:$0xff]   ;;  %v8622_v4 = vld [vmem:[#allocation2 + $0x764] ss:$16 sps:$4 sm:$0xff]  }
 0x11f   :  { %4978 = vmatpush1.bf16.msra.mxu0 %v8530_v5  ;;  %5470 = vmatpush1.bf16.msra.mxu1 %v8533_v6  ;;  %v8625_v5 = vld [vmem:[#allocation2 + $0x76c] ss:$16 sps:$4 sm:$0xff]   ;;  %v8620_v6 = vld [vmem:[#allocation2 + $0x760] ss:$16 sps:$4 sm:$0xff]  }
 0x120   :  { %4979 = vmatprep.subr.bf16.mxu0 %v8538_v7  ;;  %5471 = vmatprep.subr.bf16.mxu1 %v8541_v8  ;;  %v8623_v7 = vld [vmem:[#allocation2 + $0x768] ss:$16 sps:$4 sm:$0xff]   ;;  %v8628_v8 = vld [vmem:[#allocation2 + $0x784] ss:$16 sps:$4 sm:$0xff]  }
 0x123   :  { %4980 = vmatpush1.bf16.msra.mxu0 %v8536_v9  ;;  %5472 = vmatpush1.bf16.msra.mxu1 %v8539_v10  ;;  %v8631_v9 = vld [vmem:[#allocation2 + $0x78c] ss:$16 sps:$4 sm:$0xff]   ;;  %v8626_v10 = vld [vmem:[#allocation2 + $0x780] ss:$16 sps:$4 sm:$0xff]  }
 0x124   :  { %4981 = vmatprep.subr.bf16.mxu0 %v8544_v11  ;;  %5473 = vmatprep.subr.bf16.mxu1 %v8547_v13  ;;  %v8629_v11 = vld [vmem:[#allocation2 + $0x788] ss:$16 sps:$4 sm:$0xff]   ;;  %v8634_v13 = vld [vmem:[#allocation2 + $0x7a4] ss:$16 sps:$4 sm:$0xff]  }
 0x127   :  { %4982 = vmatpush1.bf16.msra.mxu0 %v8542_v14  ;;  %5474 = vmatpush1.bf16.msra.mxu1 %v8545_v15  ;;  %v8637_v14 = vld [vmem:[#allocation2 + $0x7ac] ss:$16 sps:$4 sm:$0xff]   ;;  %v8632_v15 = vld [vmem:[#allocation2 + $0x7a0] ss:$16 sps:$4 sm:$0xff]  }
 0x128   :  { %4983 = vmatprep.subr.bf16.mxu0 %v8550_v16  ;;  %5475 = vmatprep.subr.bf16.mxu1 %v8553_v17  ;;  %v8635_v16 = vld [vmem:[#allocation2 + $0x7a8] ss:$16 sps:$4 sm:$0xff]   ;;  %v8640_v17 = vld [vmem:[#allocation2 + $0x7c4] ss:$16 sps:$4 sm:$0xff]  }
 0x12b   :  { %4984 = vmatpush1.bf16.msra.mxu0 %v8548_v20  ;;  %5476 = vmatpush1.bf16.msra.mxu1 %v8551_v21  ;;  %v8638_v20 = vld [vmem:[#allocation2 + $0x7c0] ss:$16 sps:$4 sm:$0xff]   ;;  %v8641_v21 = vld [vmem:[#allocation2 + $0x7c8] ss:$16 sps:$4 sm:$0xff]  }
 0x12c   :  { %4994 = vmatprep.subr.bf16.mxu0 %v8556_v23  ;;  %5486 = vmatprep.subr.bf16.mxu1 %v8559_v24  ;;  %v8646_v23 = vld [vmem:[#allocation2 + $0x7e4] ss:$16 sps:$4 sm:$0xff]   ;;  %v8649_v24 = vld [vmem:[#allocation2 + $0x7ec] ss:$16 sps:$4 sm:$0xff]  }
 0x12e   :  { %4986 = vmatmul.mubr.bf16.vlgmr.msra.gmra.mrb[0].mxu0 %v9931_v22  ;;  %5478 = vmatmul.mubr.bf16.vlgmr.msra.gmra.mrb[0].mxu1 %v9931_v22  ;;  %v8572_v22 = vld [vmem:[#allocation2 + $0x660] ss:$16 sps:$4 sm:$0xff]  }
 0x12f   :  { %4995 = vmatpush1.bf16.msra.mxu0 %v8554_v26  ;;  %5487 = vmatpush1.bf16.msra.mxu1 %v8557_v27  ;;  %v8644_v26 = vld [vmem:[#allocation2 + $0x7e0] ss:$16 sps:$4 sm:$0xff]  }
 0x130   :  { %4996 = vmatprep.subr.bf16.mxu0 %v8562_v28  ;;  %5488 = vmatprep.subr.bf16.mxu1 %v8565_v29  ;;  %v9949_v27 = vld [vmem:[%s10068_s0 + $0x10] sm:$0xff]  ;;  %v8647_v28 = vld [vmem:[#allocation2 + $0x7e8] ss:$16 sps:$4 sm:$0xff]  }
 0x131   :  { %5026 = vmatprep.mubr.bf16.mxu0 %v938_v19  ;;  %5518 = vmatprep.mubr.bf16.mxu1 %v938_v19  ;;  %v8653_v29 = vld [vmem:[#allocation2 + $0x804] ss:$16 sps:$4 sm:$0xff]   ;;  %v8656_v19 = vld [vmem:[#allocation2 + $0x80c] ss:$16 sps:$4 sm:$0xff]  }
 0x133   :  { %4997 = vmatpush1.bf16.msra.mxu0 %v8560_v12  ;;  %5489 = vmatpush1.bf16.msra.mxu1 %v8563_v30  ;;  %v9953_v12 = vrot.slane %v9949_v27, %v9913_v49  ;;  %v8651_v30 = vld [vmem:[#allocation2 + $0x800] ss:$16 sps:$4 sm:$0xff]  }
 0x134   :  { %4998 = vmatprep.subr.bf16.mxu0 %v8568_v31  ;;  %5490 = vmatprep.subr.bf16.mxu1 %v8571_v32  ;;  %v8654_v31 = vld [vmem:[#allocation2 + $0x808] ss:$16 sps:$4 sm:$0xff]   ;;  %v8659_v32 = vld [vmem:[#allocation2 + $0x824] ss:$16 sps:$4 sm:$0xff]  }
 0x137   :  { %4999 = vmatpush1.bf16.msra.mxu0 %v8566_v33  ;;  %5491 = vmatpush1.bf16.msra.mxu1 %v8569_v34  ;;  %v8662_v33 = vld [vmem:[#allocation2 + $0x82c] ss:$16 sps:$4 sm:$0xff]   ;;  %v954_v34 = vcombine.high %v9953_v12, %v9953_v12 }
 0x138   :  { %5000 = vmatprep.subr.bf16.mxu0 %v8574_v35  ;;  %5492 = vmatprep.subr.bf16.mxu1 %v8577_v36  ;;  %v8657_v35 = vld [vmem:[#allocation2 + $0x820] ss:$16 sps:$4 sm:$0xff]   ;;  %v8660_v36 = vld [vmem:[#allocation2 + $0x828] ss:$16 sps:$4 sm:$0xff]  }
 0x13b   :  { %5001 = vmatpush1.bf16.msra.mxu0 %v8572_v22  ;;  %5493 = vmatpush1.bf16.msra.mxu1 %v8575_v37  ;;  %v8665_v22 = vld [vmem:[#allocation2 + $0x844] ss:$16 sps:$4 sm:$0xff]   ;;  %v8668_v37 = vld [vmem:[#allocation2 + $0x84c] ss:$16 sps:$4 sm:$0xff]  }
 0x13c   :  { %5002 = vmatprep.subr.bf16.mxu0 %v8580_v38  ;;  %5494 = vmatprep.subr.bf16.mxu1 %v8583_v39  ;;  %v8663_v38 = vld [vmem:[#allocation2 + $0x840] ss:$16 sps:$4 sm:$0xff]   ;;  %v8666_v39 = vld [vmem:[#allocation2 + $0x848] ss:$16 sps:$4 sm:$0xff]  }
 0x13f   :  { %5003 = vmatpush1.bf16.msra.mxu0 %v8578_v40  ;;  %5495 = vmatpush1.bf16.msra.mxu1 %v8581_v41  ;;  %v8671_v40 = vld [vmem:[#allocation2 + $0x864] ss:$16 sps:$4 sm:$0xff]   ;;  %v8674_v41 = vld [vmem:[#allocation2 + $0x86c] ss:$16 sps:$4 sm:$0xff]  }
 0x140   :  { %5004 = vmatprep.subr.bf16.mxu0 %v8586_v43  ;;  %5496 = vmatprep.subr.bf16.mxu1 %v8589_v44  ;;  %v8672_v43 = vld [vmem:[#allocation2 + $0x868] ss:$16 sps:$4 sm:$0xff]   ;;  %v8677_v44 = vld [vmem:[#allocation2 + $0x884] ss:$16 sps:$4 sm:$0xff]  }
 0x143   :  { %5005 = vmatpush1.bf16.msra.mxu0 %v8584_v45  ;;  %5497 = vmatpush1.bf16.msra.mxu1 %v8587_v46  ;;  %v8680_v45 = vld [vmem:[#allocation2 + $0x88c] ss:$16 sps:$4 sm:$0xff]   ;;  %v8675_v46 = vld [vmem:[#allocation2 + $0x880] ss:$16 sps:$4 sm:$0xff]  }
 0x144   :  { %5006 = vmatprep.subr.bf16.mxu0 %v8592_v47  ;;  %5498 = vmatprep.subr.bf16.mxu1 %v8595_v48  ;;  %v8678_v47 = vld [vmem:[#allocation2 + $0x888] ss:$16 sps:$4 sm:$0xff]   ;;  %v8683_v48 = vld [vmem:[#allocation2 + $0x8a4] ss:$16 sps:$4 sm:$0xff]  }
 0x147   :  { %5007 = vmatpush1.bf16.msra.mxu0 %v8590_v50  ;;  %5499 = vmatpush1.bf16.msra.mxu1 %v8593_v51  ;;  %v8686_v50 = vld [vmem:[#allocation2 + $0x8ac] ss:$16 sps:$4 sm:$0xff]   ;;  %v8681_v51 = vld [vmem:[#allocation2 + $0x8a0] ss:$16 sps:$4 sm:$0xff]  }
 0x148   :  { %5008 = vmatprep.subr.bf16.mxu0 %v8598_v52  ;;  %5500 = vmatprep.subr.bf16.mxu1 %v8601_v53  ;;  %v8684_v52 = vld [vmem:[#allocation2 + $0x8a8] ss:$16 sps:$4 sm:$0xff]   ;;  %v8689_v53 = vld [vmem:[#allocation2 + $0x8c4] ss:$16 sps:$4 sm:$0xff]  }
 0x14b   :  { %5009 = vmatpush1.bf16.msra.mxu0 %v8596_v54  ;;  %5501 = vmatpush1.bf16.msra.mxu1 %v8599_v55  ;;  %v8692_v54 = vld [vmem:[#allocation2 + $0x8cc] ss:$16 sps:$4 sm:$0xff]   ;;  %v8687_v55 = vld [vmem:[#allocation2 + $0x8c0] ss:$16 sps:$4 sm:$0xff]  }
 0x14c   :  { %5010 = vmatprep.subr.bf16.mxu0 %v8604_v56  ;;  %5502 = vmatprep.subr.bf16.mxu1 %v8607_v57  ;;  %v8690_v56 = vld [vmem:[#allocation2 + $0x8c8] ss:$16 sps:$4 sm:$0xff]   ;;  %v8695_v57 = vld [vmem:[#allocation2 + $0x8e4] ss:$16 sps:$4 sm:$0xff]  }
 0x14f   :  { %5011 = vmatpush1.bf16.msra.mxu0 %v8602_v58  ;;  %5503 = vmatpush1.bf16.msra.mxu1 %v8605_v59  ;;  %v8698_v58 = vld [vmem:[#allocation2 + $0x8ec] ss:$16 sps:$4 sm:$0xff]   ;;  %v8693_v59 = vld [vmem:[#allocation2 + $0x8e0] ss:$16 sps:$4 sm:$0xff]  }
 0x150   :  { %5012 = vmatprep.subr.bf16.mxu0 %v8610_v60  ;;  %5504 = vmatprep.subr.bf16.mxu1 %v8613_v61  ;;  %v8696_v60 = vld [vmem:[#allocation2 + $0x8e8] ss:$16 sps:$4 sm:$0xff]   ;;  %v8701_v61 = vld [vmem:[#allocation2 + $0x904] ss:$16 sps:$4 sm:$0xff]  }
 0x153   :  { %5013 = vmatpush1.bf16.msra.mxu0 %v8608_v62  ;;  %5505 = vmatpush1.bf16.msra.mxu1 %v8611_v63  ;;  %v8704_v62 = vld [vmem:[#allocation2 + $0x90c] ss:$16 sps:$4 sm:$0xff]   ;;  %v8699_v63 = vld [vmem:[#allocation2 + $0x900] ss:$16 sps:$4 sm:$0xff]  }
 0x154   :  { %5014 = vmatprep.subr.bf16.mxu0 %v8616_v0  ;;  %5506 = vmatprep.subr.bf16.mxu1 %v8619_v1  ;;  %v8702_v0 = vld [vmem:[#allocation2 + $0x908] ss:$16 sps:$4 sm:$0xff]   ;;  %v8707_v1 = vld [vmem:[#allocation2 + $0x924] ss:$16 sps:$4 sm:$0xff]  }
 0x157   :  { %5015 = vmatpush1.bf16.msra.mxu0 %v8614_v2  ;;  %5507 = vmatpush1.bf16.msra.mxu1 %v8617_v3  ;;  %v8710_v2 = vld [vmem:[#allocation2 + $0x92c] ss:$16 sps:$4 sm:$0xff]   ;;  %v8705_v3 = vld [vmem:[#allocation2 + $0x920] ss:$16 sps:$4 sm:$0xff]  }
 0x158   :  { %5016 = vmatprep.subr.bf16.mxu0 %v8622_v4  ;;  %5508 = vmatprep.subr.bf16.mxu1 %v8625_v5  ;;  %v8708_v4 = vld [vmem:[#allocation2 + $0x928] ss:$16 sps:$4 sm:$0xff]   ;;  %v8713_v5 = vld [vmem:[#allocation2 + $0x944] ss:$16 sps:$4 sm:$0xff]  }
 0x15b   :  { %5017 = vmatpush1.bf16.msra.mxu0 %v8620_v6  ;;  %5509 = vmatpush1.bf16.msra.mxu1 %v8623_v7  ;;  %v8716_v6 = vld [vmem:[#allocation2 + $0x94c] ss:$16 sps:$4 sm:$0xff]   ;;  %v8711_v7 = vld [vmem:[#allocation2 + $0x940] ss:$16 sps:$4 sm:$0xff]  }
 0x15c   :  { %5018 = vmatprep.subr.bf16.mxu0 %v8628_v8  ;;  %5510 = vmatprep.subr.bf16.mxu1 %v8631_v9  ;;  %v8714_v8 = vld [vmem:[#allocation2 + $0x948] ss:$16 sps:$4 sm:$0xff]   ;;  %v8719_v9 = vld [vmem:[#allocation2 + $0x964] ss:$16 sps:$4 sm:$0xff]  }
 0x15f   :  { %5019 = vmatpush1.bf16.msra.mxu0 %v8626_v10  ;;  %5511 = vmatpush1.bf16.msra.mxu1 %v8629_v11  ;;  %v8722_v10 = vld [vmem:[#allocation2 + $0x96c] ss:$16 sps:$4 sm:$0xff]   ;;  %v8717_v11 = vld [vmem:[#allocation2 + $0x960] ss:$16 sps:$4 sm:$0xff]  }
 0x160   :  { %5020 = vmatprep.subr.bf16.mxu0 %v8634_v13  ;;  %5512 = vmatprep.subr.bf16.mxu1 %v8637_v14  ;;  %v8720_v13 = vld [vmem:[#allocation2 + $0x968] ss:$16 sps:$4 sm:$0xff]   ;;  %v8725_v14 = vld [vmem:[#allocation2 + $0x984] ss:$16 sps:$4 sm:$0xff]  }
 0x163   :  { %5021 = vmatpush1.bf16.msra.mxu0 %v8632_v15  ;;  %5513 = vmatpush1.bf16.msra.mxu1 %v8635_v16  ;;  %v8728_v15 = vld [vmem:[#allocation2 + $0x98c] ss:$16 sps:$4 sm:$0xff]   ;;  %v8723_v16 = vld [vmem:[#allocation2 + $0x980] ss:$16 sps:$4 sm:$0xff]  }
 0x164   :  { %5022 = vmatprep.subr.bf16.mxu0 %v8640_v17  ;;  %5514 = vmatprep.subr.bf16.mxu1 %v8643_v18  ;;  %v8726_v17 = vld [vmem:[#allocation2 + $0x988] ss:$16 sps:$4 sm:$0xff]   ;;  %v8731_v18 = vld [vmem:[#allocation2 + $0x9a4] ss:$16 sps:$4 sm:$0xff]  }
 0x167   :  { %5023 = vmatpush1.bf16.msra.mxu0 %v8638_v20  ;;  %5515 = vmatpush1.bf16.msra.mxu1 %v8641_v21  ;;  %v8734_v20 = vld [vmem:[#allocation2 + $0x9ac] ss:$16 sps:$4 sm:$0xff]   ;;  %v8729_v21 = vld [vmem:[#allocation2 + $0x9a0] ss:$16 sps:$4 sm:$0xff]  }
 0x168   :  { %5024 = vmatprep.subr.bf16.mxu0 %v8646_v23  ;;  %5516 = vmatprep.subr.bf16.mxu1 %v8649_v24  ;;  %v8732_v23 = vld [vmem:[#allocation2 + $0x9a8] ss:$16 sps:$4 sm:$0xff]   ;;  %v8737_v24 = vld [vmem:[#allocation2 + $0x9c4] ss:$16 sps:$4 sm:$0xff]  }
 0x16b   :  { %5025 = vmatpush1.bf16.msra.mxu0 %v8644_v26  ;;  %5517 = vmatpush1.bf16.msra.mxu1 %v8647_v28  ;;  %v8740_v26 = vld [vmem:[#allocation2 + $0x9cc] ss:$16 sps:$4 sm:$0xff]   ;;  %v8735_v28 = vld [vmem:[#allocation2 + $0x9c0] ss:$16 sps:$4 sm:$0xff]  }
 0x16c   :  { %5035 = vmatprep.subr.bf16.mxu0 %v8653_v29  ;;  %5527 = vmatprep.subr.bf16.mxu1 %v8656_v19  ;;  %v8738_v29 = vld [vmem:[#allocation2 + $0x9c8] ss:$16 sps:$4 sm:$0xff]   ;;  %v8743_v19 = vld [vmem:[#allocation2 + $0x9e4] ss:$16 sps:$4 sm:$0xff]  }
 0x16e   :  { %5027 = vmatmul.mubr.bf16.vlgmr.msra.gmra.mrb[0].mxu0 %v9940_v25  ;;  %5519 = vmatmul.mubr.bf16.vlgmr.msra.gmra.mrb[0].mxu1 %v9940_v25  ;;  %v8669_v25 = vld [vmem:[#allocation2 + $0x860] ss:$16 sps:$4 sm:$0xff]  }
 0x16f   :  { %5036 = vmatpush1.bf16.msra.mxu0 %v8651_v30  ;;  %5528 = vmatpush1.bf16.msra.mxu1 %v8654_v31  ;;  %v8746_v30 = vld [vmem:[#allocation2 + $0x9ec] ss:$16 sps:$4 sm:$0xff]   ;;  %v939_v31 = vcombine.high %v9949_v27, %v9949_v27 }
 0x170   :  { %5037 = vmatprep.subr.bf16.mxu0 %v8659_v32  ;;  %5529 = vmatprep.subr.bf16.mxu1 %v8662_v33  ;;  %v8741_v32 = vld [vmem:[#allocation2 + $0x9e0] ss:$16 sps:$4 sm:$0xff]   ;;  %v8744_v33 = vld [vmem:[#allocation2 + $0x9e8] ss:$16 sps:$4 sm:$0xff]  }
 0x171   :  { %5067 = vmatprep.mubr.bf16.mxu0 %v954_v34  ;;  %5559 = vmatprep.mubr.bf16.mxu1 %v954_v34  ;;  %v8749_v34 = vld [vmem:[#allocation2 + $0xa04] ss:$16 sps:$4 sm:$0xff]  }
 0x173   :  { %5038 = vmatpush1.bf16.msra.mxu0 %v8657_v35  ;;  %5530 = vmatpush1.bf16.msra.mxu1 %v8660_v36  ;;  %v8752_v35 = vld [vmem:[#allocation2 + $0xa0c] ss:$16 sps:$4 sm:$0xff]   ;;  %v9962_v36 = vrot.slane %v939_v31, %v9913_v49 }
 0x174   :  { %5039 = vmatprep.subr.bf16.mxu0 %v8665_v22  ;;  %5531 = vmatprep.subr.bf16.mxu1 %v8668_v37  ;;  %v8747_v22 = vld [vmem:[#allocation2 + $0xa00] ss:$16 sps:$4 sm:$0xff]   ;;  %v8750_v37 = vld [vmem:[#allocation2 + $0xa08] ss:$16 sps:$4 sm:$0xff]   ;;  %v8836_v31 = vld [vmem:[#allocation2 + $0xbcc] ss:$16 sps:$4 sm:$0xff]  }
 0x175   :  { %v955_v27 = vcombine.high %v9962_v36, %v9962_v36 }
 0x177   :  { %5040 = vmatpush1.bf16.msra.mxu0 %v8663_v38  ;;  %5532 = vmatpush1.bf16.msra.mxu1 %v8666_v39  ;;  %v8755_v38 = vld [vmem:[#allocation2 + $0xa24] ss:$16 sps:$4 sm:$0xff]   ;;  %v8758_v39 = vld [vmem:[#allocation2 + $0xa2c] ss:$16 sps:$4 sm:$0xff]  }
 0x178   :  { %5041 = vmatprep.subr.bf16.mxu0 %v8671_v40  ;;  %5533 = vmatprep.subr.bf16.mxu1 %v8674_v41  ;;  %v8753_v40 = vld [vmem:[#allocation2 + $0xa20] ss:$16 sps:$4 sm:$0xff]   ;;  %v8756_v41 = vld [vmem:[#allocation2 + $0xa28] ss:$16 sps:$4 sm:$0xff]  }
 0x17b   :  { %5042 = vmatpush1.bf16.msra.mxu0 %v8669_v25  ;;  %5534 = vmatpush1.bf16.msra.mxu1 %v8672_v43  ;;  %v8761_v25 = vld [vmem:[#allocation2 + $0xa44] ss:$16 sps:$4 sm:$0xff]   ;;  %v8764_v43 = vld [vmem:[#allocation2 + $0xa4c] ss:$16 sps:$4 sm:$0xff]  }
 0x17c   :  { %5043 = vmatprep.subr.bf16.mxu0 %v8677_v44  ;;  %5535 = vmatprep.subr.bf16.mxu1 %v8680_v45  ;;  %v8759_v44 = vld [vmem:[#allocation2 + $0xa40] ss:$16 sps:$4 sm:$0xff]   ;;  %v8762_v45 = vld [vmem:[#allocation2 + $0xa48] ss:$16 sps:$4 sm:$0xff]  }
 0x17f   :  { %5044 = vmatpush1.bf16.msra.mxu0 %v8675_v46  ;;  %5536 = vmatpush1.bf16.msra.mxu1 %v8678_v47  ;;  %v8767_v46 = vld [vmem:[#allocation2 + $0xa64] ss:$16 sps:$4 sm:$0xff]   ;;  %v8770_v47 = vld [vmem:[#allocation2 + $0xa6c] ss:$16 sps:$4 sm:$0xff]  }
 0x180   :  { %5045 = vmatprep.subr.bf16.mxu0 %v8683_v48  ;;  %5537 = vmatprep.subr.bf16.mxu1 %v8686_v50  ;;  %v8768_v48 = vld [vmem:[#allocation2 + $0xa68] ss:$16 sps:$4 sm:$0xff]   ;;  %v8773_v50 = vld [vmem:[#allocation2 + $0xa84] ss:$16 sps:$4 sm:$0xff]  }
 0x183   :  { %5046 = vmatpush1.bf16.msra.mxu0 %v8681_v51  ;;  %5538 = vmatpush1.bf16.msra.mxu1 %v8684_v52  ;;  %v8776_v51 = vld [vmem:[#allocation2 + $0xa8c] ss:$16 sps:$4 sm:$0xff]   ;;  %v8771_v52 = vld [vmem:[#allocation2 + $0xa80] ss:$16 sps:$4 sm:$0xff]  }
 0x184   :  { %5047 = vmatprep.subr.bf16.mxu0 %v8689_v53  ;;  %5539 = vmatprep.subr.bf16.mxu1 %v8692_v54  ;;  %v8774_v53 = vld [vmem:[#allocation2 + $0xa88] ss:$16 sps:$4 sm:$0xff]   ;;  %v8779_v54 = vld [vmem:[#allocation2 + $0xaa4] ss:$16 sps:$4 sm:$0xff]  }
 0x187   :  { %5048 = vmatpush1.bf16.msra.mxu0 %v8687_v55  ;;  %5540 = vmatpush1.bf16.msra.mxu1 %v8690_v56  ;;  %v8782_v55 = vld [vmem:[#allocation2 + $0xaac] ss:$16 sps:$4 sm:$0xff]   ;;  %v8777_v56 = vld [vmem:[#allocation2 + $0xaa0] ss:$16 sps:$4 sm:$0xff]  }
 0x188   :  { %5049 = vmatprep.subr.bf16.mxu0 %v8695_v57  ;;  %5541 = vmatprep.subr.bf16.mxu1 %v8698_v58  ;;  %v8780_v57 = vld [vmem:[#allocation2 + $0xaa8] ss:$16 sps:$4 sm:$0xff]   ;;  %v8785_v58 = vld [vmem:[#allocation2 + $0xac4] ss:$16 sps:$4 sm:$0xff]  }
 0x18b   :  { %5050 = vmatpush1.bf16.msra.mxu0 %v8693_v59  ;;  %5542 = vmatpush1.bf16.msra.mxu1 %v8696_v60  ;;  %v8788_v59 = vld [vmem:[#allocation2 + $0xacc] ss:$16 sps:$4 sm:$0xff]   ;;  %v8783_v60 = vld [vmem:[#allocation2 + $0xac0] ss:$16 sps:$4 sm:$0xff]  }
 0x18c   :  { %5051 = vmatprep.subr.bf16.mxu0 %v8701_v61  ;;  %5543 = vmatprep.subr.bf16.mxu1 %v8704_v62  ;;  %v8786_v61 = vld [vmem:[#allocation2 + $0xac8] ss:$16 sps:$4 sm:$0xff]   ;;  %v8791_v62 = vld [vmem:[#allocation2 + $0xae4] ss:$16 sps:$4 sm:$0xff]  }
 0x18f   :  { %5052 = vmatpush1.bf16.msra.mxu0 %v8699_v63  ;;  %5544 = vmatpush1.bf16.msra.mxu1 %v8702_v0  ;;  %v8794_v63 = vld [vmem:[#allocation2 + $0xaec] ss:$16 sps:$4 sm:$0xff]   ;;  %v8789_v0 = vld [vmem:[#allocation2 + $0xae0] ss:$16 sps:$4 sm:$0xff]  }
 0x190   :  { %5053 = vmatprep.subr.bf16.mxu0 %v8707_v1  ;;  %5545 = vmatprep.subr.bf16.mxu1 %v8710_v2  ;;  %v8792_v1 = vld [vmem:[#allocation2 + $0xae8] ss:$16 sps:$4 sm:$0xff]   ;;  %v8797_v2 = vld [vmem:[#allocation2 + $0xb04] ss:$16 sps:$4 sm:$0xff]  }
 0x193   :  { %5054 = vmatpush1.bf16.msra.mxu0 %v8705_v3  ;;  %5546 = vmatpush1.bf16.msra.mxu1 %v8708_v4  ;;  %v8800_v3 = vld [vmem:[#allocation2 + $0xb0c] ss:$16 sps:$4 sm:$0xff]   ;;  %v8795_v4 = vld [vmem:[#allocation2 + $0xb00] ss:$16 sps:$4 sm:$0xff]  }
 0x194   :  { %5055 = vmatprep.subr.bf16.mxu0 %v8713_v5  ;;  %5547 = vmatprep.subr.bf16.mxu1 %v8716_v6  ;;  %v8798_v5 = vld [vmem:[#allocation2 + $0xb08] ss:$16 sps:$4 sm:$0xff]   ;;  %v8803_v6 = vld [vmem:[#allocation2 + $0xb24] ss:$16 sps:$4 sm:$0xff]  }
 0x197   :  { %5056 = vmatpush1.bf16.msra.mxu0 %v8711_v7  ;;  %5548 = vmatpush1.bf16.msra.mxu1 %v8714_v8  ;;  %v8806_v7 = vld [vmem:[#allocation2 + $0xb2c] ss:$16 sps:$4 sm:$0xff]   ;;  %v8801_v8 = vld [vmem:[#allocation2 + $0xb20] ss:$16 sps:$4 sm:$0xff]  }
 0x198   :  { %5057 = vmatprep.subr.bf16.mxu0 %v8719_v9  ;;  %5549 = vmatprep.subr.bf16.mxu1 %v8722_v10  ;;  %v8804_v9 = vld [vmem:[#allocation2 + $0xb28] ss:$16 sps:$4 sm:$0xff]   ;;  %v8809_v10 = vld [vmem:[#allocation2 + $0xb44] ss:$16 sps:$4 sm:$0xff]  }
 0x19b   :  { %5058 = vmatpush1.bf16.msra.mxu0 %v8717_v11  ;;  %5550 = vmatpush1.bf16.msra.mxu1 %v8720_v13  ;;  %v8812_v11 = vld [vmem:[#allocation2 + $0xb4c] ss:$16 sps:$4 sm:$0xff]   ;;  %v8807_v13 = vld [vmem:[#allocation2 + $0xb40] ss:$16 sps:$4 sm:$0xff]  }
 0x19c   :  { %5059 = vmatprep.subr.bf16.mxu0 %v8725_v14  ;;  %5551 = vmatprep.subr.bf16.mxu1 %v8728_v15  ;;  %v8810_v14 = vld [vmem:[#allocation2 + $0xb48] ss:$16 sps:$4 sm:$0xff]   ;;  %v8815_v15 = vld [vmem:[#allocation2 + $0xb64] ss:$16 sps:$4 sm:$0xff]  }
 0x19f   :  { %5060 = vmatpush1.bf16.msra.mxu0 %v8723_v16  ;;  %5552 = vmatpush1.bf16.msra.mxu1 %v8726_v17  ;;  %v8818_v16 = vld [vmem:[#allocation2 + $0xb6c] ss:$16 sps:$4 sm:$0xff]   ;;  %v8813_v17 = vld [vmem:[#allocation2 + $0xb60] ss:$16 sps:$4 sm:$0xff]  }
 0x1a0   :  { %5061 = vmatprep.subr.bf16.mxu0 %v8731_v18  ;;  %5553 = vmatprep.subr.bf16.mxu1 %v8734_v20  ;;  %v8816_v18 = vld [vmem:[#allocation2 + $0xb68] ss:$16 sps:$4 sm:$0xff]   ;;  %v8821_v20 = vld [vmem:[#allocation2 + $0xb84] ss:$16 sps:$4 sm:$0xff]  }
 0x1a3   :  { %5062 = vmatpush1.bf16.msra.mxu0 %v8729_v21  ;;  %5554 = vmatpush1.bf16.msra.mxu1 %v8732_v23  ;;  %v8824_v21 = vld [vmem:[#allocation2 + $0xb8c] ss:$16 sps:$4 sm:$0xff]   ;;  %v8819_v23 = vld [vmem:[#allocation2 + $0xb80] ss:$16 sps:$4 sm:$0xff]  }
 0x1a4   :  { %5063 = vmatprep.subr.bf16.mxu0 %v8737_v24  ;;  %5555 = vmatprep.subr.bf16.mxu1 %v8740_v26  ;;  %v8822_v24 = vld [vmem:[#allocation2 + $0xb88] ss:$16 sps:$4 sm:$0xff]   ;;  %v8827_v26 = vld [vmem:[#allocation2 + $0xba4] ss:$16 sps:$4 sm:$0xff]  }
 0x1a7   :  { %5064 = vmatpush1.bf16.msra.mxu0 %v8735_v28  ;;  %5556 = vmatpush1.bf16.msra.mxu1 %v8738_v29  ;;  %v8830_v28 = vld [vmem:[#allocation2 + $0xbac] ss:$16 sps:$4 sm:$0xff]   ;;  %v8825_v29 = vld [vmem:[#allocation2 + $0xba0] ss:$16 sps:$4 sm:$0xff]  }
 0x1a8   :  { %5065 = vmatprep.subr.bf16.mxu0 %v8743_v19  ;;  %5557 = vmatprep.subr.bf16.mxu1 %v8746_v30  ;;  %v8828_v19 = vld [vmem:[#allocation2 + $0xba8] ss:$16 sps:$4 sm:$0xff]   ;;  %v8833_v30 = vld [vmem:[#allocation2 + $0xbc4] ss:$16 sps:$4 sm:$0xff]  }
 0x1ab   :  { %5066 = vmatpush1.bf16.msra.mxu0 %v8741_v32  ;;  %5558 = vmatpush1.bf16.msra.mxu1 %v8744_v33  ;;  %v8831_v32 = vld [vmem:[#allocation2 + $0xbc0] ss:$16 sps:$4 sm:$0xff]   ;;  %v8834_v33 = vld [vmem:[#allocation2 + $0xbc8] ss:$16 sps:$4 sm:$0xff]  }
 0x1ac   :  { %5076 = vmatprep.subr.bf16.mxu0 %v8749_v34  ;;  %5568 = vmatprep.subr.bf16.mxu1 %v8752_v35  ;;  %v8839_v34 = vld [vmem:[#allocation2 + $0xbe4] ss:$16 sps:$4 sm:$0xff]   ;;  %v8842_v35 = vld [vmem:[#allocation2 + $0xbec] ss:$16 sps:$4 sm:$0xff]  }
 0x1ae   :  { %5068 = vmatmul.mubr.bf16.vlgmr.msra.gmra.mrb[0].mxu0 %v9953_v12  ;;  %5560 = vmatmul.mubr.bf16.vlgmr.msra.gmra.mrb[0].mxu1 %v9953_v12  ;;  %v8765_v12 = vld [vmem:[#allocation2 + $0xa60] ss:$16 sps:$4 sm:$0xff]  }
 0x1af   :  { %5077 = vmatpush1.bf16.msra.mxu0 %v8747_v22  ;;  %5569 = vmatpush1.bf16.msra.mxu1 %v8750_v37  ;;  %v9971_v22 = vld [vmem:[%s10068_s0 + $0x18] sm:$0xff]  ;;  %v8837_v37 = vld [vmem:[#allocation2 + $0xbe0] ss:$16 sps:$4 sm:$0xff]  }
 0x1b0   :  { %5078 = vmatprep.subr.bf16.mxu0 %v8755_v38  ;;  %5570 = vmatprep.subr.bf16.mxu1 %v8758_v39  ;;  %v8840_v38 = vld [vmem:[#allocation2 + $0xbe8] ss:$16 sps:$4 sm:$0xff]   ;;  %v8846_v39 = vld [vmem:[#allocation2 + $0xc04] ss:$16 sps:$4 sm:$0xff]  }
 0x1b1   :  { %5108 = vmatprep.mubr.bf16.mxu0 %v955_v27  ;;  %5600 = vmatprep.mubr.bf16.mxu1 %v955_v27  ;;  %v8849_v27 = vld [vmem:[#allocation2 + $0xc0c] ss:$16 sps:$4 sm:$0xff]  }
 0x1b3   :  { %5079 = vmatpush1.bf16.msra.mxu0 %v8753_v40  ;;  %5571 = vmatpush1.bf16.msra.mxu1 %v8756_v41  ;;  %v9975_v40 = vrot.slane %v9971_v22, %v9913_v49  ;;  %v8844_v41 = vld [vmem:[#allocation2 + $0xc00] ss:$16 sps:$4 sm:$0xff]  }
 0x1b4   :  { %5080 = vmatprep.subr.bf16.mxu0 %v8761_v25  ;;  %5572 = vmatprep.subr.bf16.mxu1 %v8764_v43  ;;  %v8847_v25 = vld [vmem:[#allocation2 + $0xc08] ss:$16 sps:$4 sm:$0xff]   ;;  %v8852_v43 = vld [vmem:[#allocation2 + $0xc24] ss:$16 sps:$4 sm:$0xff]  }
 0x1b7   :  { %5081 = vmatpush1.bf16.msra.mxu0 %v8759_v44  ;;  %5573 = vmatpush1.bf16.msra.mxu1 %v8762_v45  ;;  %v8855_v44 = vld [vmem:[#allocation2 + $0xc2c] ss:$16 sps:$4 sm:$0xff]   ;;  %v971_v45 = vcombine.high %v9975_v40, %v9975_v40 }
 0x1b8   :  { %5082 = vmatprep.subr.bf16.mxu0 %v8767_v46  ;;  %5574 = vmatprep.subr.bf16.mxu1 %v8770_v47  ;;  %v8850_v46 = vld [vmem:[#allocation2 + $0xc20] ss:$16 sps:$4 sm:$0xff]   ;;  %v8853_v47 = vld [vmem:[#allocation2 + $0xc28] ss:$16 sps:$4 sm:$0xff]  }
 0x1bb   :  { %5083 = vmatpush1.bf16.msra.mxu0 %v8765_v12  ;;  %5575 = vmatpush1.bf16.msra.mxu1 %v8768_v48  ;;  %v8858_v12 = vld [vmem:[#allocation2 + $0xc44] ss:$16 sps:$4 sm:$0xff]   ;;  %v8861_v48 = vld [vmem:[#allocation2 + $0xc4c] ss:$16 sps:$4 sm:$0xff]  }
 0x1bc   :  { %5084 = vmatprep.subr.bf16.mxu0 %v8773_v50  ;;  %5576 = vmatprep.subr.bf16.mxu1 %v8776_v51  ;;  %v8856_v50 = vld [vmem:[#allocation2 + $0xc40] ss:$16 sps:$4 sm:$0xff]   ;;  %v8859_v51 = vld [vmem:[#allocation2 + $0xc48] ss:$16 sps:$4 sm:$0xff]  }
 0x1bf   :  { %5085 = vmatpush1.bf16.msra.mxu0 %v8771_v52  ;;  %5577 = vmatpush1.bf16.msra.mxu1 %v8774_v53  ;;  %v8864_v52 = vld [vmem:[#allocation2 + $0xc64] ss:$16 sps:$4 sm:$0xff]   ;;  %v8867_v53 = vld [vmem:[#allocation2 + $0xc6c] ss:$16 sps:$4 sm:$0xff]  }
 0x1c0   :  { %5086 = vmatprep.subr.bf16.mxu0 %v8779_v54  ;;  %5578 = vmatprep.subr.bf16.mxu1 %v8782_v55  ;;  %v8865_v54 = vld [vmem:[#allocation2 + $0xc68] ss:$16 sps:$4 sm:$0xff]   ;;  %v8870_v55 = vld [vmem:[#allocation2 + $0xc84] ss:$16 sps:$4 sm:$0xff]  }
 0x1c3   :  { %5087 = vmatpush1.bf16.msra.mxu0 %v8777_v56  ;;  %5579 = vmatpush1.bf16.msra.mxu1 %v8780_v57  ;;  %v8873_v56 = vld [vmem:[#allocation2 + $0xc8c] ss:$16 sps:$4 sm:$0xff]   ;;  %v8868_v57 = vld [vmem:[#allocation2 + $0xc80] ss:$16 sps:$4 sm:$0xff]  }
 0x1c4   :  { %5088 = vmatprep.subr.bf16.mxu0 %v8785_v58  ;;  %5580 = vmatprep.subr.bf16.mxu1 %v8788_v59  ;;  %v8871_v58 = vld [vmem:[#allocation2 + $0xc88] ss:$16 sps:$4 sm:$0xff]   ;;  %v8876_v59 = vld [vmem:[#allocation2 + $0xca4] ss:$16 sps:$4 sm:$0xff]  }
 0x1c7   :  { %5089 = vmatpush1.bf16.msra.mxu0 %v8783_v60  ;;  %5581 = vmatpush1.bf16.msra.mxu1 %v8786_v61  ;;  %v8879_v60 = vld [vmem:[#allocation2 + $0xcac] ss:$16 sps:$4 sm:$0xff]   ;;  %v8874_v61 = vld [vmem:[#allocation2 + $0xca0] ss:$16 sps:$4 sm:$0xff]  }
 0x1c8   :  { %5090 = vmatprep.subr.bf16.mxu0 %v8791_v62  ;;  %5582 = vmatprep.subr.bf16.mxu1 %v8794_v63  ;;  %v8877_v62 = vld [vmem:[#allocation2 + $0xca8] ss:$16 sps:$4 sm:$0xff]   ;;  %v8882_v63 = vld [vmem:[#allocation2 + $0xcc4] ss:$16 sps:$4 sm:$0xff]  }
 0x1cb   :  { %5091 = vmatpush1.bf16.msra.mxu0 %v8789_v0  ;;  %5583 = vmatpush1.bf16.msra.mxu1 %v8792_v1  ;;  %v8885_v0 = vld [vmem:[#allocation2 + $0xccc] ss:$16 sps:$4 sm:$0xff]   ;;  %v8880_v1 = vld [vmem:[#allocation2 + $0xcc0] ss:$16 sps:$4 sm:$0xff]  }
 0x1cc   :  { %5092 = vmatprep.subr.bf16.mxu0 %v8797_v2  ;;  %5584 = vmatprep.subr.bf16.mxu1 %v8800_v3  ;;  %v8883_v2 = vld [vmem:[#allocation2 + $0xcc8] ss:$16 sps:$4 sm:$0xff]   ;;  %v8888_v3 = vld [vmem:[#allocation2 + $0xce4] ss:$16 sps:$4 sm:$0xff]  }
 0x1cf   :  { %5093 = vmatpush1.bf16.msra.mxu0 %v8795_v4  ;;  %5585 = vmatpush1.bf16.msra.mxu1 %v8798_v5  ;;  %v8891_v4 = vld [vmem:[#allocation2 + $0xcec] ss:$16 sps:$4 sm:$0xff]   ;;  %v8886_v5 = vld [vmem:[#allocation2 + $0xce0] ss:$16 sps:$4 sm:$0xff]  }
 0x1d0   :  { %5094 = vmatprep.subr.bf16.mxu0 %v8803_v6  ;;  %5586 = vmatprep.subr.bf16.mxu1 %v8806_v7  ;;  %v8889_v6 = vld [vmem:[#allocation2 + $0xce8] ss:$16 sps:$4 sm:$0xff]   ;;  %v8894_v7 = vld [vmem:[#allocation2 + $0xd04] ss:$16 sps:$4 sm:$0xff]  }
 0x1d3   :  { %5095 = vmatpush1.bf16.msra.mxu0 %v8801_v8  ;;  %5587 = vmatpush1.bf16.msra.mxu1 %v8804_v9  ;;  %v8897_v8 = vld [vmem:[#allocation2 + $0xd0c] ss:$16 sps:$4 sm:$0xff]   ;;  %v8892_v9 = vld [vmem:[#allocation2 + $0xd00] ss:$16 sps:$4 sm:$0xff]  }
 0x1d4   :  { %5096 = vmatprep.subr.bf16.mxu0 %v8809_v10  ;;  %5588 = vmatprep.subr.bf16.mxu1 %v8812_v11  ;;  %v8895_v10 = vld [vmem:[#allocation2 + $0xd08] ss:$16 sps:$4 sm:$0xff]   ;;  %v8900_v11 = vld [vmem:[#allocation2 + $0xd24] ss:$16 sps:$4 sm:$0xff]  }
 0x1d7   :  { %5097 = vmatpush1.bf16.msra.mxu0 %v8807_v13  ;;  %5589 = vmatpush1.bf16.msra.mxu1 %v8810_v14  ;;  %v8903_v13 = vld [vmem:[#allocation2 + $0xd2c] ss:$16 sps:$4 sm:$0xff]   ;;  %v8898_v14 = vld [vmem:[#allocation2 + $0xd20] ss:$16 sps:$4 sm:$0xff]  }
 0x1d8   :  { %5098 = vmatprep.subr.bf16.mxu0 %v8815_v15  ;;  %5590 = vmatprep.subr.bf16.mxu1 %v8818_v16  ;;  %v8901_v15 = vld [vmem:[#allocation2 + $0xd28] ss:$16 sps:$4 sm:$0xff]   ;;  %v8906_v16 = vld [vmem:[#allocation2 + $0xd44] ss:$16 sps:$4 sm:$0xff]  }
 0x1db   :  { %5099 = vmatpush1.bf16.msra.mxu0 %v8813_v17  ;;  %5591 = vmatpush1.bf16.msra.mxu1 %v8816_v18  ;;  %v8909_v17 = vld [vmem:[#allocation2 + $0xd4c] ss:$16 sps:$4 sm:$0xff]   ;;  %v8904_v18 = vld [vmem:[#allocation2 + $0xd40] ss:$16 sps:$4 sm:$0xff]  }
 0x1dc   :  { %5100 = vmatprep.subr.bf16.mxu0 %v8821_v20  ;;  %5592 = vmatprep.subr.bf16.mxu1 %v8824_v21  ;;  %v8907_v20 = vld [vmem:[#allocation2 + $0xd48] ss:$16 sps:$4 sm:$0xff]   ;;  %v8912_v21 = vld [vmem:[#allocation2 + $0xd64] ss:$16 sps:$4 sm:$0xff]  }
 0x1df   :  { %5101 = vmatpush1.bf16.msra.mxu0 %v8819_v23  ;;  %5593 = vmatpush1.bf16.msra.mxu1 %v8822_v24  ;;  %v8915_v23 = vld [vmem:[#allocation2 + $0xd6c] ss:$16 sps:$4 sm:$0xff]   ;;  %v8910_v24 = vld [vmem:[#allocation2 + $0xd60] ss:$16 sps:$4 sm:$0xff]  }
 0x1e0   :  { %5102 = vmatprep.subr.bf16.mxu0 %v8827_v26  ;;  %5594 = vmatprep.subr.bf16.mxu1 %v8830_v28  ;;  %v8913_v26 = vld [vmem:[#allocation2 + $0xd68] ss:$16 sps:$4 sm:$0xff]   ;;  %v8918_v28 = vld [vmem:[#allocation2 + $0xd84] ss:$16 sps:$4 sm:$0xff]  }
 0x1e3   :  { %5103 = vmatpush1.bf16.msra.mxu0 %v8825_v29  ;;  %5595 = vmatpush1.bf16.msra.mxu1 %v8828_v19  ;;  %v8921_v29 = vld [vmem:[#allocation2 + $0xd8c] ss:$16 sps:$4 sm:$0xff]   ;;  %v8916_v19 = vld [vmem:[#allocation2 + $0xd80] ss:$16 sps:$4 sm:$0xff]  }
 0x1e4   :  { %5104 = vmatprep.subr.bf16.mxu0 %v8833_v30  ;;  %5596 = vmatprep.subr.bf16.mxu1 %v8836_v31  ;;  %v8919_v30 = vld [vmem:[#allocation2 + $0xd88] ss:$16 sps:$4 sm:$0xff]   ;;  %v8924_v31 = vld [vmem:[#allocation2 + $0xda4] ss:$16 sps:$4 sm:$0xff]  }
 0x1e7   :  { %5105 = vmatpush1.bf16.msra.mxu0 %v8831_v32  ;;  %5597 = vmatpush1.bf16.msra.mxu1 %v8834_v33  ;;  %v8927_v32 = vld [vmem:[#allocation2 + $0xdac] ss:$16 sps:$4 sm:$0xff]   ;;  %v8922_v33 = vld [vmem:[#allocation2 + $0xda0] ss:$16 sps:$4 sm:$0xff]  }
 0x1e8   :  { %5106 = vmatprep.subr.bf16.mxu0 %v8839_v34  ;;  %5598 = vmatprep.subr.bf16.mxu1 %v8842_v35  ;;  %v8925_v34 = vld [vmem:[#allocation2 + $0xda8] ss:$16 sps:$4 sm:$0xff]   ;;  %v8930_v35 = vld [vmem:[#allocation2 + $0xdc4] ss:$16 sps:$4 sm:$0xff]  }
 0x1eb   :  { %5107 = vmatpush1.bf16.msra.mxu0 %v8837_v37  ;;  %5599 = vmatpush1.bf16.msra.mxu1 %v8840_v38  ;;  %v8933_v37 = vld [vmem:[#allocation2 + $0xdcc] ss:$16 sps:$4 sm:$0xff]   ;;  %v8928_v38 = vld [vmem:[#allocation2 + $0xdc0] ss:$16 sps:$4 sm:$0xff]  }
 0x1ec   :  { %5117 = vmatprep.subr.bf16.mxu0 %v8846_v39  ;;  %5609 = vmatprep.subr.bf16.mxu1 %v8849_v27  ;;  %v8931_v39 = vld [vmem:[#allocation2 + $0xdc8] ss:$16 sps:$4 sm:$0xff]   ;;  %v8936_v27 = vld [vmem:[#allocation2 + $0xde4] ss:$16 sps:$4 sm:$0xff]  }
 0x1ee   :  { %5109 = vmatmul.mubr.bf16.vlgmr.msra.gmra.mrb[0].mxu0 %v9962_v36  ;;  %5601 = vmatmul.mubr.bf16.vlgmr.msra.gmra.mrb[0].mxu1 %v9962_v36  ;;  %v8862_v36 = vld [vmem:[#allocation2 + $0xc60] ss:$16 sps:$4 sm:$0xff]  }
 0x1ef   :  { %5118 = vmatpush1.bf16.msra.mxu0 %v8844_v41  ;;  %5610 = vmatpush1.bf16.msra.mxu1 %v8847_v25  ;;  %v8939_v41 = vld [vmem:[#allocation2 + $0xdec] ss:$16 sps:$4 sm:$0xff]   ;;  %v956_v25 = vcombine.high %v9971_v22, %v9971_v22 }
 0x1f0   :  { %5119 = vmatprep.subr.bf16.mxu0 %v8852_v43  ;;  %5611 = vmatprep.subr.bf16.mxu1 %v8855_v44  ;;  %v8934_v43 = vld [vmem:[#allocation2 + $0xde0] ss:$16 sps:$4 sm:$0xff]   ;;  %v8937_v44 = vld [vmem:[#allocation2 + $0xde8] ss:$16 sps:$4 sm:$0xff]  }
 0x1f1   :  { %5149 = vmatprep.mubr.bf16.mxu0 %v971_v45  ;;  %5641 = vmatprep.mubr.bf16.mxu1 %v971_v45  ;;  %v8942_v45 = vld [vmem:[#allocation2 + $0xe04] ss:$16 sps:$4 sm:$0xff]  }
 0x1f3   :  { %5120 = vmatpush1.bf16.msra.mxu0 %v8850_v46  ;;  %5612 = vmatpush1.bf16.msra.mxu1 %v8853_v47  ;;  %v8945_v46 = vld [vmem:[#allocation2 + $0xe0c] ss:$16 sps:$4 sm:$0xff]   ;;  %v9984_v47 = vrot.slane %v956_v25, %v9913_v49 }
 0x1f4   :  { %5121 = vmatprep.subr.bf16.mxu0 %v8858_v12  ;;  %5613 = vmatprep.subr.bf16.mxu1 %v8861_v48  ;;  %v8940_v12 = vld [vmem:[#allocation2 + $0xe00] ss:$16 sps:$4 sm:$0xff]   ;;  %v8943_v48 = vld [vmem:[#allocation2 + $0xe08] ss:$16 sps:$4 sm:$0xff]   ;;  %v9029_v25 = vld [vmem:[#allocation2 + $0xfcc] ss:$16 sps:$4 sm:$0xff]  }
 0x1f5   :  { %v972_v22 = vcombine.high %v9984_v47, %v9984_v47 }
 0x1f7   :  { %5122 = vmatpush1.bf16.msra.mxu0 %v8856_v50  ;;  %5614 = vmatpush1.bf16.msra.mxu1 %v8859_v51  ;;  %v8948_v50 = vld [vmem:[#allocation2 + $0xe24] ss:$16 sps:$4 sm:$0xff]   ;;  %v8951_v51 = vld [vmem:[#allocation2 + $0xe2c] ss:$16 sps:$4 sm:$0xff]  }
 0x1f8   :  { %5123 = vmatprep.subr.bf16.mxu0 %v8864_v52  ;;  %5615 = vmatprep.subr.bf16.mxu1 %v8867_v53  ;;  %v8946_v52 = vld [vmem:[#allocation2 + $0xe20] ss:$16 sps:$4 sm:$0xff]   ;;  %v8949_v53 = vld [vmem:[#allocation2 + $0xe28] ss:$16 sps:$4 sm:$0xff]  }
 0x1fb   :  { %5124 = vmatpush1.bf16.msra.mxu0 %v8862_v36  ;;  %5616 = vmatpush1.bf16.msra.mxu1 %v8865_v54  ;;  %v8954_v36 = vld [vmem:[#allocation2 + $0xe44] ss:$16 sps:$4 sm:$0xff]   ;;  %v8957_v54 = vld [vmem:[#allocation2 + $0xe4c] ss:$16 sps:$4 sm:$0xff]  }
 0x1fc   :  { %5125 = vmatprep.subr.bf16.mxu0 %v8870_v55  ;;  %5617 = vmatprep.subr.bf16.mxu1 %v8873_v56  ;;  %v8952_v55 = vld [vmem:[#allocation2 + $0xe40] ss:$16 sps:$4 sm:$0xff]   ;;  %v8955_v56 = vld [vmem:[#allocation2 + $0xe48] ss:$16 sps:$4 sm:$0xff]  }
 0x1ff   :  { %5126 = vmatpush1.bf16.msra.mxu0 %v8868_v57  ;;  %5618 = vmatpush1.bf16.msra.mxu1 %v8871_v58  ;;  %v8960_v57 = vld [vmem:[#allocation2 + $0xe64] ss:$16 sps:$4 sm:$0xff]   ;;  %v8963_v58 = vld [vmem:[#allocation2 + $0xe6c] ss:$16 sps:$4 sm:$0xff]  }
 0x200   :  { %5127 = vmatprep.subr.bf16.mxu0 %v8876_v59  ;;  %5619 = vmatprep.subr.bf16.mxu1 %v8879_v60  ;;  %v8961_v59 = vld [vmem:[#allocation2 + $0xe68] ss:$16 sps:$4 sm:$0xff]   ;;  %v8966_v60 = vld [vmem:[#allocation2 + $0xe84] ss:$16 sps:$4 sm:$0xff]  }
 0x203   :  { %5128 = vmatpush1.bf16.msra.mxu0 %v8874_v61  ;;  %5620 = vmatpush1.bf16.msra.mxu1 %v8877_v62  ;;  %v8969_v61 = vld [vmem:[#allocation2 + $0xe8c] ss:$16 sps:$4 sm:$0xff]   ;;  %v8964_v62 = vld [vmem:[#allocation2 + $0xe80] ss:$16 sps:$4 sm:$0xff]  }
 0x204   :  { %5129 = vmatprep.subr.bf16.mxu0 %v8882_v63  ;;  %5621 = vmatprep.subr.bf16.mxu1 %v8885_v0  ;;  %v8967_v63 = vld [vmem:[#allocation2 + $0xe88] ss:$16 sps:$4 sm:$0xff]   ;;  %v8972_v0 = vld [vmem:[#allocation2 + $0xea4] ss:$16 sps:$4 sm:$0xff]  }
 0x207   :  { %5130 = vmatpush1.bf16.msra.mxu0 %v8880_v1  ;;  %5622 = vmatpush1.bf16.msra.mxu1 %v8883_v2  ;;  %v8975_v1 = vld [vmem:[#allocation2 + $0xeac] ss:$16 sps:$4 sm:$0xff]   ;;  %v8970_v2 = vld [vmem:[#allocation2 + $0xea0] ss:$16 sps:$4 sm:$0xff]  }
 0x208   :  { %5131 = vmatprep.subr.bf16.mxu0 %v8888_v3  ;;  %5623 = vmatprep.subr.bf16.mxu1 %v8891_v4  ;;  %v8973_v3 = vld [vmem:[#allocation2 + $0xea8] ss:$16 sps:$4 sm:$0xff]   ;;  %v8978_v4 = vld [vmem:[#allocation2 + $0xec4] ss:$16 sps:$4 sm:$0xff]  }
 0x20b   :  { %5132 = vmatpush1.bf16.msra.mxu0 %v8886_v5  ;;  %5624 = vmatpush1.bf16.msra.mxu1 %v8889_v6  ;;  %v8981_v5 = vld [vmem:[#allocation2 + $0xecc] ss:$16 sps:$4 sm:$0xff]   ;;  %v8976_v6 = vld [vmem:[#allocation2 + $0xec0] ss:$16 sps:$4 sm:$0xff]  }
 0x20c   :  { %5133 = vmatprep.subr.bf16.mxu0 %v8894_v7  ;;  %5625 = vmatprep.subr.bf16.mxu1 %v8897_v8  ;;  %v8979_v7 = vld [vmem:[#allocation2 + $0xec8] ss:$16 sps:$4 sm:$0xff]   ;;  %v8984_v8 = vld [vmem:[#allocation2 + $0xee4] ss:$16 sps:$4 sm:$0xff]  }
 0x20f   :  { %5134 = vmatpush1.bf16.msra.mxu0 %v8892_v9  ;;  %5626 = vmatpush1.bf16.msra.mxu1 %v8895_v10  ;;  %v8987_v9 = vld [vmem:[#allocation2 + $0xeec] ss:$16 sps:$4 sm:$0xff]   ;;  %v8982_v10 = vld [vmem:[#allocation2 + $0xee0] ss:$16 sps:$4 sm:$0xff]  }
 0x210   :  { %5135 = vmatprep.subr.bf16.mxu0 %v8900_v11  ;;  %5627 = vmatprep.subr.bf16.mxu1 %v8903_v13  ;;  %v8985_v11 = vld [vmem:[#allocation2 + $0xee8] ss:$16 sps:$4 sm:$0xff]   ;;  %v8990_v13 = vld [vmem:[#allocation2 + $0xf04] ss:$16 sps:$4 sm:$0xff]  }
 0x213   :  { %5136 = vmatpush1.bf16.msra.mxu0 %v8898_v14  ;;  %5628 = vmatpush1.bf16.msra.mxu1 %v8901_v15  ;;  %v8993_v14 = vld [vmem:[#allocation2 + $0xf0c] ss:$16 sps:$4 sm:$0xff]   ;;  %v8988_v15 = vld [vmem:[#allocation2 + $0xf00] ss:$16 sps:$4 sm:$0xff]  }
 0x214   :  { %5137 = vmatprep.subr.bf16.mxu0 %v8906_v16  ;;  %5629 = vmatprep.subr.bf16.mxu1 %v8909_v17  ;;  %v8991_v16 = vld [vmem:[#allocation2 + $0xf08] ss:$16 sps:$4 sm:$0xff]   ;;  %v8996_v17 = vld [vmem:[#allocation2 + $0xf24] ss:$16 sps:$4 sm:$0xff]  }
 0x217   :  { %5138 = vmatpush1.bf16.msra.mxu0 %v8904_v18  ;;  %5630 = vmatpush1.bf16.msra.mxu1 %v8907_v20  ;;  %v8999_v18 = vld [vmem:[#allocation2 + $0xf2c] ss:$16 sps:$4 sm:$0xff]   ;;  %v8994_v20 = vld [vmem:[#allocation2 + $0xf20] ss:$16 sps:$4 sm:$0xff]  }
 0x218   :  { %5139 = vmatprep.subr.bf16.mxu0 %v8912_v21  ;;  %5631 = vmatprep.subr.bf16.mxu1 %v8915_v23  ;;  %v8997_v21 = vld [vmem:[#allocation2 + $0xf28] ss:$16 sps:$4 sm:$0xff]   ;;  %v9002_v23 = vld [vmem:[#allocation2 + $0xf44] ss:$16 sps:$4 sm:$0xff]  }
 0x21b   :  { %5140 = vmatpush1.bf16.msra.mxu0 %v8910_v24  ;;  %5632 = vmatpush1.bf16.msra.mxu1 %v8913_v26  ;;  %v9005_v24 = vld [vmem:[#allocation2 + $0xf4c] ss:$16 sps:$4 sm:$0xff]   ;;  %v9000_v26 = vld [vmem:[#allocation2 + $0xf40] ss:$16 sps:$4 sm:$0xff]  }
 0x21c   :  { %5141 = vmatprep.subr.bf16.mxu0 %v8918_v28  ;;  %5633 = vmatprep.subr.bf16.mxu1 %v8921_v29  ;;  %v9003_v28 = vld [vmem:[#allocation2 + $0xf48] ss:$16 sps:$4 sm:$0xff]   ;;  %v9008_v29 = vld [vmem:[#allocation2 + $0xf64] ss:$16 sps:$4 sm:$0xff]  }
 0x21f   :  { %5142 = vmatpush1.bf16.msra.mxu0 %v8916_v19  ;;  %5634 = vmatpush1.bf16.msra.mxu1 %v8919_v30  ;;  %v9011_v19 = vld [vmem:[#allocation2 + $0xf6c] ss:$16 sps:$4 sm:$0xff]   ;;  %v9006_v30 = vld [vmem:[#allocation2 + $0xf60] ss:$16 sps:$4 sm:$0xff]  }
 0x220   :  { %5143 = vmatprep.subr.bf16.mxu0 %v8924_v31  ;;  %5635 = vmatprep.subr.bf16.mxu1 %v8927_v32  ;;  %v9009_v31 = vld [vmem:[#allocation2 + $0xf68] ss:$16 sps:$4 sm:$0xff]   ;;  %v9014_v32 = vld [vmem:[#allocation2 + $0xf84] ss:$16 sps:$4 sm:$0xff]  }
 0x223   :  { %5144 = vmatpush1.bf16.msra.mxu0 %v8922_v33  ;;  %5636 = vmatpush1.bf16.msra.mxu1 %v8925_v34  ;;  %v9017_v33 = vld [vmem:[#allocation2 + $0xf8c] ss:$16 sps:$4 sm:$0xff]   ;;  %v9012_v34 = vld [vmem:[#allocation2 + $0xf80] ss:$16 sps:$4 sm:$0xff]  }
 0x224   :  { %5145 = vmatprep.subr.bf16.mxu0 %v8930_v35  ;;  %5637 = vmatprep.subr.bf16.mxu1 %v8933_v37  ;;  %v9015_v35 = vld [vmem:[#allocation2 + $0xf88] ss:$16 sps:$4 sm:$0xff]   ;;  %v9020_v37 = vld [vmem:[#allocation2 + $0xfa4] ss:$16 sps:$4 sm:$0xff]  }
 0x227   :  { %5146 = vmatpush1.bf16.msra.mxu0 %v8928_v38  ;;  %5638 = vmatpush1.bf16.msra.mxu1 %v8931_v39  ;;  %v9023_v38 = vld [vmem:[#allocation2 + $0xfac] ss:$16 sps:$4 sm:$0xff]   ;;  %v9018_v39 = vld [vmem:[#allocation2 + $0xfa0] ss:$16 sps:$4 sm:$0xff]  }
 0x228   :  { %5147 = vmatprep.subr.bf16.mxu0 %v8936_v27  ;;  %5639 = vmatprep.subr.bf16.mxu1 %v8939_v41  ;;  %v9021_v27 = vld [vmem:[#allocation2 + $0xfa8] ss:$16 sps:$4 sm:$0xff]   ;;  %v9026_v41 = vld [vmem:[#allocation2 + $0xfc4] ss:$16 sps:$4 sm:$0xff]  }
 0x22b   :  { %5148 = vmatpush1.bf16.msra.mxu0 %v8934_v43  ;;  %5640 = vmatpush1.bf16.msra.mxu1 %v8937_v44  ;;  %v9024_v43 = vld [vmem:[#allocation2 + $0xfc0] ss:$16 sps:$4 sm:$0xff]   ;;  %v9027_v44 = vld [vmem:[#allocation2 + $0xfc8] ss:$16 sps:$4 sm:$0xff]  }
 0x22c   :  { %5158 = vmatprep.subr.bf16.mxu0 %v8942_v45  ;;  %5650 = vmatprep.subr.bf16.mxu1 %v8945_v46  ;;  %v9032_v45 = vld [vmem:[#allocation2 + $0xfe4] ss:$16 sps:$4 sm:$0xff]   ;;  %v9035_v46 = vld [vmem:[#allocation2 + $0xfec] ss:$16 sps:$4 sm:$0xff]  }
 0x22e   :  { %5150 = vmatmul.mubr.bf16.vlgmr.msra.gmra.mrb[0].mxu0 %v9975_v40  ;;  %5642 = vmatmul.mubr.bf16.vlgmr.msra.gmra.mrb[0].mxu1 %v9975_v40  ;;  %v8958_v40 = vld [vmem:[#allocation2 + $0xe60] ss:$16 sps:$4 sm:$0xff]  }
 0x22f   :  { %5159 = vmatpush1.bf16.msra.mxu0 %v8940_v12  ;;  %5651 = vmatpush1.bf16.msra.mxu1 %v8943_v48  ;;  %v9993_v12 = vld [vmem:[%s10068_s0 + $0x20] sm:$0xff] }
 0x230   :  { %5160 = vmatprep.subr.bf16.mxu0 %v8948_v50  ;;  %5652 = vmatprep.subr.bf16.mxu1 %v8951_v51  ;;  %v9030_v48 = vld [vmem:[#allocation2 + $0xfe0] ss:$16 sps:$4 sm:$0xff]   ;;  %v9033_v50 = vld [vmem:[#allocation2 + $0xfe8] ss:$16 sps:$4 sm:$0xff]   ;;  %v9039_v51 = vld [vmem:[#allocation2 + $0x1004] ss:$16 sps:$4 sm:$0xff]  }
 0x231   :  { %5190 = vmatprep.mubr.bf16.mxu0 %v972_v22  ;;  %5682 = vmatprep.mubr.bf16.mxu1 %v972_v22  ;;  %v9042_v22 = vld [vmem:[#allocation2 + $0x100c] ss:$16 sps:$4 sm:$0xff]  }
 0x233   :  { %5161 = vmatpush1.bf16.msra.mxu0 %v8946_v52  ;;  %5653 = vmatpush1.bf16.msra.mxu1 %v8949_v53  ;;  %v9997_v52 = vrot.slane %v9993_v12, %v9913_v49  ;;  %v9037_v53 = vld [vmem:[#allocation2 + $0x1000] ss:$16 sps:$4 sm:$0xff]  }
 0x234   :  { %5162 = vmatprep.subr.bf16.mxu0 %v8954_v36  ;;  %5654 = vmatprep.subr.bf16.mxu1 %v8957_v54  ;;  %v9040_v36 = vld [vmem:[#allocation2 + $0x1008] ss:$16 sps:$4 sm:$0xff]   ;;  %v9045_v54 = vld [vmem:[#allocation2 + $0x1024] ss:$16 sps:$4 sm:$0xff]  }
 0x237   :  { %5163 = vmatpush1.bf16.msra.mxu0 %v8952_v55  ;;  %5655 = vmatpush1.bf16.msra.mxu1 %v8955_v56  ;;  %v9048_v55 = vld [vmem:[#allocation2 + $0x102c] ss:$16 sps:$4 sm:$0xff]   ;;  %v988_v56 = vcombine.high %v9997_v52, %v9997_v52 }
 0x238   :  { %5164 = vmatprep.subr.bf16.mxu0 %v8960_v57  ;;  %5656 = vmatprep.subr.bf16.mxu1 %v8963_v58  ;;  %v9043_v57 = vld [vmem:[#allocation2 + $0x1020] ss:$16 sps:$4 sm:$0xff]   ;;  %v9046_v58 = vld [vmem:[#allocation2 + $0x1028] ss:$16 sps:$4 sm:$0xff]  }
 0x23b   :  { %5165 = vmatpush1.bf16.msra.mxu0 %v8958_v40  ;;  %5657 = vmatpush1.bf16.msra.mxu1 %v8961_v59  ;;  %v9051_v40 = vld [vmem:[#allocation2 + $0x1044] ss:$16 sps:$4 sm:$0xff]   ;;  %v9054_v59 = vld [vmem:[#allocation2 + $0x104c] ss:$16 sps:$4 sm:$0xff]  }
 0x23c   :  { %5166 = vmatprep.subr.bf16.mxu0 %v8966_v60  ;;  %5658 = vmatprep.subr.bf16.mxu1 %v8969_v61  ;;  %v9049_v60 = vld [vmem:[#allocation2 + $0x1040] ss:$16 sps:$4 sm:$0xff]   ;;  %v9052_v61 = vld [vmem:[#allocation2 + $0x1048] ss:$16 sps:$4 sm:$0xff]  }
 0x23f   :  { %5167 = vmatpush1.bf16.msra.mxu0 %v8964_v62  ;;  %5659 = vmatpush1.bf16.msra.mxu1 %v8967_v63  ;;  %v9057_v62 = vld [vmem:[#allocation2 + $0x1064] ss:$16 sps:$4 sm:$0xff]   ;;  %v9060_v63 = vld [vmem:[#allocation2 + $0x106c] ss:$16 sps:$4 sm:$0xff]  }
 0x240   :  { %5168 = vmatprep.subr.bf16.mxu0 %v8972_v0  ;;  %5660 = vmatprep.subr.bf16.mxu1 %v8975_v1  ;;  %v9058_v0 = vld [vmem:[#allocation2 + $0x1068] ss:$16 sps:$4 sm:$0xff]   ;;  %v9063_v1 = vld [vmem:[#allocation2 + $0x1084] ss:$16 sps:$4 sm:$0xff]  }
 0x243   :  { %5169 = vmatpush1.bf16.msra.mxu0 %v8970_v2  ;;  %5661 = vmatpush1.bf16.msra.mxu1 %v8973_v3  ;;  %v9066_v2 = vld [vmem:[#allocation2 + $0x108c] ss:$16 sps:$4 sm:$0xff]   ;;  %v9061_v3 = vld [vmem:[#allocation2 + $0x1080] ss:$16 sps:$4 sm:$0xff]  }
 0x244   :  { %5170 = vmatprep.subr.bf16.mxu0 %v8978_v4  ;;  %5662 = vmatprep.subr.bf16.mxu1 %v8981_v5  ;;  %v9064_v4 = vld [vmem:[#allocation2 + $0x1088] ss:$16 sps:$4 sm:$0xff]   ;;  %v9069_v5 = vld [vmem:[#allocation2 + $0x10a4] ss:$16 sps:$4 sm:$0xff]  }
 0x247   :  { %5171 = vmatpush1.bf16.msra.mxu0 %v8976_v6  ;;  %5663 = vmatpush1.bf16.msra.mxu1 %v8979_v7  ;;  %v9072_v6 = vld [vmem:[#allocation2 + $0x10ac] ss:$16 sps:$4 sm:$0xff]   ;;  %v9067_v7 = vld [vmem:[#allocation2 + $0x10a0] ss:$16 sps:$4 sm:$0xff]  }
 0x248   :  { %5172 = vmatprep.subr.bf16.mxu0 %v8984_v8  ;;  %5664 = vmatprep.subr.bf16.mxu1 %v8987_v9  ;;  %v9070_v8 = vld [vmem:[#allocation2 + $0x10a8] ss:$16 sps:$4 sm:$0xff]   ;;  %v9075_v9 = vld [vmem:[#allocation2 + $0x10c4] ss:$16 sps:$4 sm:$0xff]  }
 0x24b   :  { %5173 = vmatpush1.bf16.msra.mxu0 %v8982_v10  ;;  %5665 = vmatpush1.bf16.msra.mxu1 %v8985_v11  ;;  %v9078_v10 = vld [vmem:[#allocation2 + $0x10cc] ss:$16 sps:$4 sm:$0xff]   ;;  %v9073_v11 = vld [vmem:[#allocation2 + $0x10c0] ss:$16 sps:$4 sm:$0xff]  }
 0x24c   :  { %5174 = vmatprep.subr.bf16.mxu0 %v8990_v13  ;;  %5666 = vmatprep.subr.bf16.mxu1 %v8993_v14  ;;  %v9076_v13 = vld [vmem:[#allocation2 + $0x10c8] ss:$16 sps:$4 sm:$0xff]   ;;  %v9081_v14 = vld [vmem:[#allocation2 + $0x10e4] ss:$16 sps:$4 sm:$0xff]  }
 0x24f   :  { %5175 = vmatpush1.bf16.msra.mxu0 %v8988_v15  ;;  %5667 = vmatpush1.bf16.msra.mxu1 %v8991_v16  ;;  %v9084_v15 = vld [vmem:[#allocation2 + $0x10ec] ss:$16 sps:$4 sm:$0xff]   ;;  %v9079_v16 = vld [vmem:[#allocation2 + $0x10e0] ss:$16 sps:$4 sm:$0xff]  }
 0x250   :  { %5176 = vmatprep.subr.bf16.mxu0 %v8996_v17  ;;  %5668 = vmatprep.subr.bf16.mxu1 %v8999_v18  ;;  %v9082_v17 = vld [vmem:[#allocation2 + $0x10e8] ss:$16 sps:$4 sm:$0xff]   ;;  %v9087_v18 = vld [vmem:[#allocation2 + $0x1104] ss:$16 sps:$4 sm:$0xff]  }
 0x253   :  { %5177 = vmatpush1.bf16.msra.mxu0 %v8994_v20  ;;  %5669 = vmatpush1.bf16.msra.mxu1 %v8997_v21  ;;  %v9090_v20 = vld [vmem:[#allocation2 + $0x110c] ss:$16 sps:$4 sm:$0xff]   ;;  %v9085_v21 = vld [vmem:[#allocation2 + $0x1100] ss:$16 sps:$4 sm:$0xff]  }
 0x254   :  { %5178 = vmatprep.subr.bf16.mxu0 %v9002_v23  ;;  %5670 = vmatprep.subr.bf16.mxu1 %v9005_v24  ;;  %v9088_v23 = vld [vmem:[#allocation2 + $0x1108] ss:$16 sps:$4 sm:$0xff]   ;;  %v9093_v24 = vld [vmem:[#allocation2 + $0x1124] ss:$16 sps:$4 sm:$0xff]  }
 0x257   :  { %5179 = vmatpush1.bf16.msra.mxu0 %v9000_v26  ;;  %5671 = vmatpush1.bf16.msra.mxu1 %v9003_v28  ;;  %v9096_v26 = vld [vmem:[#allocation2 + $0x112c] ss:$16 sps:$4 sm:$0xff]   ;;  %v9091_v28 = vld [vmem:[#allocation2 + $0x1120] ss:$16 sps:$4 sm:$0xff]  }
 0x258   :  { %5180 = vmatprep.subr.bf16.mxu0 %v9008_v29  ;;  %5672 = vmatprep.subr.bf16.mxu1 %v9011_v19  ;;  %v9094_v29 = vld [vmem:[#allocation2 + $0x1128] ss:$16 sps:$4 sm:$0xff]   ;;  %v9099_v19 = vld [vmem:[#allocation2 + $0x1144] ss:$16 sps:$4 sm:$0xff]  }
 0x25b   :  { %5181 = vmatpush1.bf16.msra.mxu0 %v9006_v30  ;;  %5673 = vmatpush1.bf16.msra.mxu1 %v9009_v31  ;;  %v9102_v30 = vld [vmem:[#allocation2 + $0x114c] ss:$16 sps:$4 sm:$0xff]   ;;  %v9097_v31 = vld [vmem:[#allocation2 + $0x1140] ss:$16 sps:$4 sm:$0xff]  }
 0x25c   :  { %5182 = vmatprep.subr.bf16.mxu0 %v9014_v32  ;;  %5674 = vmatprep.subr.bf16.mxu1 %v9017_v33  ;;  %v9100_v32 = vld [vmem:[#allocation2 + $0x1148] ss:$16 sps:$4 sm:$0xff]   ;;  %v9105_v33 = vld [vmem:[#allocation2 + $0x1164] ss:$16 sps:$4 sm:$0xff]  }
 0x25f   :  { %5183 = vmatpush1.bf16.msra.mxu0 %v9012_v34  ;;  %5675 = vmatpush1.bf16.msra.mxu1 %v9015_v35  ;;  %v9108_v34 = vld [vmem:[#allocation2 + $0x116c] ss:$16 sps:$4 sm:$0xff]   ;;  %v9103_v35 = vld [vmem:[#allocation2 + $0x1160] ss:$16 sps:$4 sm:$0xff]  }
 0x260   :  { %5184 = vmatprep.subr.bf16.mxu0 %v9020_v37  ;;  %5676 = vmatprep.subr.bf16.mxu1 %v9023_v38  ;;  %v9106_v37 = vld [vmem:[#allocation2 + $0x1168] ss:$16 sps:$4 sm:$0xff]   ;;  %v9111_v38 = vld [vmem:[#allocation2 + $0x1184] ss:$16 sps:$4 sm:$0xff]  }
 0x263   :  { %5185 = vmatpush1.bf16.msra.mxu0 %v9018_v39  ;;  %5677 = vmatpush1.bf16.msra.mxu1 %v9021_v27  ;;  %v9114_v39 = vld [vmem:[#allocation2 + $0x118c] ss:$16 sps:$4 sm:$0xff]   ;;  %v9109_v27 = vld [vmem:[#allocation2 + $0x1180] ss:$16 sps:$4 sm:$0xff]  }
 0x264   :  { %5186 = vmatprep.subr.bf16.mxu0 %v9026_v41  ;;  %5678 = vmatprep.subr.bf16.mxu1 %v9029_v25  ;;  %v9112_v41 = vld [vmem:[#allocation2 + $0x1188] ss:$16 sps:$4 sm:$0xff]   ;;  %v9117_v25 = vld [vmem:[#allocation2 + $0x11a4] ss:$16 sps:$4 sm:$0xff]  }
 0x267   :  { %5187 = vmatpush1.bf16.msra.mxu0 %v9024_v43  ;;  %5679 = vmatpush1.bf16.msra.mxu1 %v9027_v44  ;;  %v9120_v43 = vld [vmem:[#allocation2 + $0x11ac] ss:$16 sps:$4 sm:$0xff]   ;;  %v9115_v44 = vld [vmem:[#allocation2 + $0x11a0] ss:$16 sps:$4 sm:$0xff]  }
 0x268   :  { %5188 = vmatprep.subr.bf16.mxu0 %v9032_v45  ;;  %5680 = vmatprep.subr.bf16.mxu1 %v9035_v46  ;;  %v9118_v45 = vld [vmem:[#allocation2 + $0x11a8] ss:$16 sps:$4 sm:$0xff]   ;;  %v9123_v46 = vld [vmem:[#allocation2 + $0x11c4] ss:$16 sps:$4 sm:$0xff]  }
 0x26b   :  { %5189 = vmatpush1.bf16.msra.mxu0 %v9030_v48  ;;  %5681 = vmatpush1.bf16.msra.mxu1 %v9033_v50  ;;  %v9126_v48 = vld [vmem:[#allocation2 + $0x11cc] ss:$16 sps:$4 sm:$0xff]   ;;  %v9121_v50 = vld [vmem:[#allocation2 + $0x11c0] ss:$16 sps:$4 sm:$0xff]  }
 0x26c   :  { %5199 = vmatprep.subr.bf16.mxu0 %v9039_v51  ;;  %5691 = vmatprep.subr.bf16.mxu1 %v9042_v22  ;;  %v9124_v51 = vld [vmem:[#allocation2 + $0x11c8] ss:$16 sps:$4 sm:$0xff]   ;;  %v9129_v22 = vld [vmem:[#allocation2 + $0x11e4] ss:$16 sps:$4 sm:$0xff]  }
 0x26e   :  { %5191 = vmatmul.mubr.bf16.vlgmr.msra.gmra.mrb[0].mxu0 %v9984_v47  ;;  %5683 = vmatmul.mubr.bf16.vlgmr.msra.gmra.mrb[0].mxu1 %v9984_v47  ;;  %v9055_v47 = vld [vmem:[#allocation2 + $0x1060] ss:$16 sps:$4 sm:$0xff]  }
 0x26f   :  { %5200 = vmatpush1.bf16.msra.mxu0 %v9037_v53  ;;  %5692 = vmatpush1.bf16.msra.mxu1 %v9040_v36  ;;  %v9132_v53 = vld [vmem:[#allocation2 + $0x11ec] ss:$16 sps:$4 sm:$0xff]   ;;  %v973_v36 = vcombine.high %v9993_v12, %v9993_v12 }
 0x270   :  { %5201 = vmatprep.subr.bf16.mxu0 %v9045_v54  ;;  %5693 = vmatprep.subr.bf16.mxu1 %v9048_v55  ;;  %v9127_v54 = vld [vmem:[#allocation2 + $0x11e0] ss:$16 sps:$4 sm:$0xff]   ;;  %v9130_v55 = vld [vmem:[#allocation2 + $0x11e8] ss:$16 sps:$4 sm:$0xff]  }
 0x271   :  { %5231 = vmatprep.mubr.bf16.mxu0 %v988_v56  ;;  %5723 = vmatprep.mubr.bf16.mxu1 %v988_v56  ;;  %v9135_v56 = vld [vmem:[#allocation2 + $0x1204] ss:$16 sps:$4 sm:$0xff]  }
 0x273   :  { %5202 = vmatpush1.bf16.msra.mxu0 %v9043_v57  ;;  %5694 = vmatpush1.bf16.msra.mxu1 %v9046_v58  ;;  %v9138_v57 = vld [vmem:[#allocation2 + $0x120c] ss:$16 sps:$4 sm:$0xff]   ;;  %v10006_v58 = vrot.slane %v973_v36, %v9913_v49 }
 0x274   :  { %5203 = vmatprep.subr.bf16.mxu0 %v9051_v40  ;;  %5695 = vmatprep.subr.bf16.mxu1 %v9054_v59  ;;  %v9133_v40 = vld [vmem:[#allocation2 + $0x1200] ss:$16 sps:$4 sm:$0xff]   ;;  %v9136_v59 = vld [vmem:[#allocation2 + $0x1208] ss:$16 sps:$4 sm:$0xff]   ;;  %v9222_v36 = vld [vmem:[#allocation2 + $0x13cc] ss:$16 sps:$4 sm:$0xff]  }
 0x275   :  { %v989_v12 = vcombine.high %v10006_v58, %v10006_v58 }
 0x277   :  { %5204 = vmatpush1.bf16.msra.mxu0 %v9049_v60  ;;  %5696 = vmatpush1.bf16.msra.mxu1 %v9052_v61  ;;  %v9141_v60 = vld [vmem:[#allocation2 + $0x1224] ss:$16 sps:$4 sm:$0xff]   ;;  %v9144_v61 = vld [vmem:[#allocation2 + $0x122c] ss:$16 sps:$4 sm:$0xff]  }
 0x278   :  { %5205 = vmatprep.subr.bf16.mxu0 %v9057_v62  ;;  %5697 = vmatprep.subr.bf16.mxu1 %v9060_v63  ;;  %v9139_v62 = vld [vmem:[#allocation2 + $0x1220] ss:$16 sps:$4 sm:$0xff]   ;;  %v9142_v63 = vld [vmem:[#allocation2 + $0x1228] ss:$16 sps:$4 sm:$0xff]  }
 0x27b   :  { %5206 = vmatpush1.bf16.msra.mxu0 %v9055_v47  ;;  %5698 = vmatpush1.bf16.msra.mxu1 %v9058_v0  ;;  %v9147_v47 = vld [vmem:[#allocation2 + $0x1244] ss:$16 sps:$4 sm:$0xff]   ;;  %v9150_v0 = vld [vmem:[#allocation2 + $0x124c] ss:$16 sps:$4 sm:$0xff]  }
 0x27c   :  { %5207 = vmatprep.subr.bf16.mxu0 %v9063_v1  ;;  %5699 = vmatprep.subr.bf16.mxu1 %v9066_v2  ;;  %v9145_v1 = vld [vmem:[#allocation2 + $0x1240] ss:$16 sps:$4 sm:$0xff]   ;;  %v9148_v2 = vld [vmem:[#allocation2 + $0x1248] ss:$16 sps:$4 sm:$0xff]  }
 0x27f   :  { %5208 = vmatpush1.bf16.msra.mxu0 %v9061_v3  ;;  %5700 = vmatpush1.bf16.msra.mxu1 %v9064_v4  ;;  %v9153_v3 = vld [vmem:[#allocation2 + $0x1264] ss:$16 sps:$4 sm:$0xff]   ;;  %v9156_v4 = vld [vmem:[#allocation2 + $0x126c] ss:$16 sps:$4 sm:$0xff]  }
 0x280   :  { %5209 = vmatprep.subr.bf16.mxu0 %v9069_v5  ;;  %5701 = vmatprep.subr.bf16.mxu1 %v9072_v6  ;;  %v9154_v5 = vld [vmem:[#allocation2 + $0x1268] ss:$16 sps:$4 sm:$0xff]   ;;  %v9159_v6 = vld [vmem:[#allocation2 + $0x1284] ss:$16 sps:$4 sm:$0xff]  }
 0x283   :  { %5210 = vmatpush1.bf16.msra.mxu0 %v9067_v7  ;;  %5702 = vmatpush1.bf16.msra.mxu1 %v9070_v8  ;;  %v9162_v7 = vld [vmem:[#allocation2 + $0x128c] ss:$16 sps:$4 sm:$0xff]   ;;  %v9157_v8 = vld [vmem:[#allocation2 + $0x1280] ss:$16 sps:$4 sm:$0xff]  }
 0x284   :  { %5211 = vmatprep.subr.bf16.mxu0 %v9075_v9  ;;  %5703 = vmatprep.subr.bf16.mxu1 %v9078_v10  ;;  %v9160_v9 = vld [vmem:[#allocation2 + $0x1288] ss:$16 sps:$4 sm:$0xff]   ;;  %v9165_v10 = vld [vmem:[#allocation2 + $0x12a4] ss:$16 sps:$4 sm:$0xff]  }
 0x287   :  { %5212 = vmatpush1.bf16.msra.mxu0 %v9073_v11  ;;  %5704 = vmatpush1.bf16.msra.mxu1 %v9076_v13  ;;  %v9168_v11 = vld [vmem:[#allocation2 + $0x12ac] ss:$16 sps:$4 sm:$0xff]   ;;  %v9163_v13 = vld [vmem:[#allocation2 + $0x12a0] ss:$16 sps:$4 sm:$0xff]  }
 0x288   :  { %5213 = vmatprep.subr.bf16.mxu0 %v9081_v14  ;;  %5705 = vmatprep.subr.bf16.mxu1 %v9084_v15  ;;  %v9166_v14 = vld [vmem:[#allocation2 + $0x12a8] ss:$16 sps:$4 sm:$0xff]   ;;  %v9171_v15 = vld [vmem:[#allocation2 + $0x12c4] ss:$16 sps:$4 sm:$0xff]  }
 0x28b   :  { %5214 = vmatpush1.bf16.msra.mxu0 %v9079_v16  ;;  %5706 = vmatpush1.bf16.msra.mxu1 %v9082_v17  ;;  %v9174_v16 = vld [vmem:[#allocation2 + $0x12cc] ss:$16 sps:$4 sm:$0xff]   ;;  %v9169_v17 = vld [vmem:[#allocation2 + $0x12c0] ss:$16 sps:$4 sm:$0xff]  }
 0x28c   :  { %5215 = vmatprep.subr.bf16.mxu0 %v9087_v18  ;;  %5707 = vmatprep.subr.bf16.mxu1 %v9090_v20  ;;  %v9172_v18 = vld [vmem:[#allocation2 + $0x12c8] ss:$16 sps:$4 sm:$0xff]   ;;  %v9177_v20 = vld [vmem:[#allocation2 + $0x12e4] ss:$16 sps:$4 sm:$0xff]  }
 0x28f   :  { %5216 = vmatpush1.bf16.msra.mxu0 %v9085_v21  ;;  %5708 = vmatpush1.bf16.msra.mxu1 %v9088_v23  ;;  %v9180_v21 = vld [vmem:[#allocation2 + $0x12ec] ss:$16 sps:$4 sm:$0xff]   ;;  %v9175_v23 = vld [vmem:[#allocation2 + $0x12e0] ss:$16 sps:$4 sm:$0xff]  }
 0x290   :  { %5217 = vmatprep.subr.bf16.mxu0 %v9093_v24  ;;  %5709 = vmatprep.subr.bf16.mxu1 %v9096_v26  ;;  %v9178_v24 = vld [vmem:[#allocation2 + $0x12e8] ss:$16 sps:$4 sm:$0xff]   ;;  %v9183_v26 = vld [vmem:[#allocation2 + $0x1304] ss:$16 sps:$4 sm:$0xff]  }
 0x293   :  { %5218 = vmatpush1.bf16.msra.mxu0 %v9091_v28  ;;  %5710 = vmatpush1.bf16.msra.mxu1 %v9094_v29  ;;  %v9186_v28 = vld [vmem:[#allocation2 + $0x130c] ss:$16 sps:$4 sm:$0xff]   ;;  %v9181_v29 = vld [vmem:[#allocation2 + $0x1300] ss:$16 sps:$4 sm:$0xff]  }
 0x294   :  { %5219 = vmatprep.subr.bf16.mxu0 %v9099_v19  ;;  %5711 = vmatprep.subr.bf16.mxu1 %v9102_v30  ;;  %v9184_v19 = vld [vmem:[#allocation2 + $0x1308] ss:$16 sps:$4 sm:$0xff]   ;;  %v9189_v30 = vld [vmem:[#allocation2 + $0x1324] ss:$16 sps:$4 sm:$0xff]  }
 0x297   :  { %5220 = vmatpush1.bf16.msra.mxu0 %v9097_v31  ;;  %5712 = vmatpush1.bf16.msra.mxu1 %v9100_v32  ;;  %v9192_v31 = vld [vmem:[#allocation2 + $0x132c] ss:$16 sps:$4 sm:$0xff]   ;;  %v9187_v32 = vld [vmem:[#allocation2 + $0x1320] ss:$16 sps:$4 sm:$0xff]  }
 0x298   :  { %5221 = vmatprep.subr.bf16.mxu0 %v9105_v33  ;;  %5713 = vmatprep.subr.bf16.mxu1 %v9108_v34  ;;  %v9190_v33 = vld [vmem:[#allocation2 + $0x1328] ss:$16 sps:$4 sm:$0xff]   ;;  %v9195_v34 = vld [vmem:[#allocation2 + $0x1344] ss:$16 sps:$4 sm:$0xff]  }
 0x29b   :  { %5222 = vmatpush1.bf16.msra.mxu0 %v9103_v35  ;;  %5714 = vmatpush1.bf16.msra.mxu1 %v9106_v37  ;;  %v9198_v35 = vld [vmem:[#allocation2 + $0x134c] ss:$16 sps:$4 sm:$0xff]   ;;  %v9193_v37 = vld [vmem:[#allocation2 + $0x1340] ss:$16 sps:$4 sm:$0xff]  }
 0x29c   :  { %5223 = vmatprep.subr.bf16.mxu0 %v9111_v38  ;;  %5715 = vmatprep.subr.bf16.mxu1 %v9114_v39  ;;  %v9196_v38 = vld [vmem:[#allocation2 + $0x1348] ss:$16 sps:$4 sm:$0xff]   ;;  %v9201_v39 = vld [vmem:[#allocation2 + $0x1364] ss:$16 sps:$4 sm:$0xff]  }
 0x29f   :  { %5224 = vmatpush1.bf16.msra.mxu0 %v9109_v27  ;;  %5716 = vmatpush1.bf16.msra.mxu1 %v9112_v41  ;;  %v9204_v27 = vld [vmem:[#allocation2 + $0x136c] ss:$16 sps:$4 sm:$0xff]   ;;  %v9199_v41 = vld [vmem:[#allocation2 + $0x1360] ss:$16 sps:$4 sm:$0xff]  }
 0x2a0   :  { %5225 = vmatprep.subr.bf16.mxu0 %v9117_v25  ;;  %5717 = vmatprep.subr.bf16.mxu1 %v9120_v43  ;;  %v9202_v25 = vld [vmem:[#allocation2 + $0x1368] ss:$16 sps:$4 sm:$0xff]   ;;  %v9207_v43 = vld [vmem:[#allocation2 + $0x1384] ss:$16 sps:$4 sm:$0xff]  }
 0x2a3   :  { %5226 = vmatpush1.bf16.msra.mxu0 %v9115_v44  ;;  %5718 = vmatpush1.bf16.msra.mxu1 %v9118_v45  ;;  %v9210_v44 = vld [vmem:[#allocation2 + $0x138c] ss:$16 sps:$4 sm:$0xff]   ;;  %v9205_v45 = vld [vmem:[#allocation2 + $0x1380] ss:$16 sps:$4 sm:$0xff]  }
 0x2a4   :  { %5227 = vmatprep.subr.bf16.mxu0 %v9123_v46  ;;  %5719 = vmatprep.subr.bf16.mxu1 %v9126_v48  ;;  %v9208_v46 = vld [vmem:[#allocation2 + $0x1388] ss:$16 sps:$4 sm:$0xff]   ;;  %v9213_v48 = vld [vmem:[#allocation2 + $0x13a4] ss:$16 sps:$4 sm:$0xff]  }
 0x2a7   :  { %5228 = vmatpush1.bf16.msra.mxu0 %v9121_v50  ;;  %5720 = vmatpush1.bf16.msra.mxu1 %v9124_v51  ;;  %v9216_v50 = vld [vmem:[#allocation2 + $0x13ac] ss:$16 sps:$4 sm:$0xff]   ;;  %v9211_v51 = vld [vmem:[#allocation2 + $0x13a0] ss:$16 sps:$4 sm:$0xff]  }
 0x2a8   :  { %5229 = vmatprep.subr.bf16.mxu0 %v9129_v22  ;;  %5721 = vmatprep.subr.bf16.mxu1 %v9132_v53  ;;  %v9214_v22 = vld [vmem:[#allocation2 + $0x13a8] ss:$16 sps:$4 sm:$0xff]   ;;  %v9219_v53 = vld [vmem:[#allocation2 + $0x13c4] ss:$16 sps:$4 sm:$0xff]  }
 0x2ab   :  { %5230 = vmatpush1.bf16.msra.mxu0 %v9127_v54  ;;  %5722 = vmatpush1.bf16.msra.mxu1 %v9130_v55  ;;  %v9217_v54 = vld [vmem:[#allocation2 + $0x13c0] ss:$16 sps:$4 sm:$0xff]   ;;  %v9220_v55 = vld [vmem:[#allocation2 + $0x13c8] ss:$16 sps:$4 sm:$0xff]  }
 0x2ac   :  { %5240 = vmatprep.subr.bf16.mxu0 %v9135_v56  ;;  %5732 = vmatprep.subr.bf16.mxu1 %v9138_v57  ;;  %v9225_v56 = vld [vmem:[#allocation2 + $0x13e4] ss:$16 sps:$4 sm:$0xff]   ;;  %v9228_v57 = vld [vmem:[#allocation2 + $0x13ec] ss:$16 sps:$4 sm:$0xff]  }
 0x2ae   :  { %5232 = vmatmul.mubr.bf16.vlgmr.msra.gmra.mrb[0].mxu0 %v9997_v52  ;;  %5724 = vmatmul.mubr.bf16.vlgmr.msra.gmra.mrb[0].mxu1 %v9997_v52  ;;  %v9151_v52 = vld [vmem:[#allocation2 + $0x1260] ss:$16 sps:$4 sm:$0xff]  }
 0x2af   :  { %5241 = vmatpush1.bf16.msra.mxu0 %v9133_v40  ;;  %5733 = vmatpush1.bf16.msra.mxu1 %v9136_v59  ;;  %v10015_v40 = vld [vmem:[%s10068_s0 + $0x28] sm:$0xff]  ;;  %v9223_v59 = vld [vmem:[#allocation2 + $0x13e0] ss:$16 sps:$4 sm:$0xff]  }
 0x2b0   :  { %5242 = vmatprep.subr.bf16.mxu0 %v9141_v60  ;;  %5734 = vmatprep.subr.bf16.mxu1 %v9144_v61  ;;  %v9226_v60 = vld [vmem:[#allocation2 + $0x13e8] ss:$16 sps:$4 sm:$0xff]   ;;  %v9232_v61 = vld [vmem:[#allocation2 + $0x1404] ss:$16 sps:$4 sm:$0xff]  }
 0x2b1   :  { %5272 = vmatprep.mubr.bf16.mxu0 %v989_v12  ;;  %5764 = vmatprep.mubr.bf16.mxu1 %v989_v12  ;;  %v9235_v12 = vld [vmem:[#allocation2 + $0x140c] ss:$16 sps:$4 sm:$0xff]  }
 0x2b3   :  { %5243 = vmatpush1.bf16.msra.mxu0 %v9139_v62  ;;  %5735 = vmatpush1.bf16.msra.mxu1 %v9142_v63  ;;  %v10019_v62 = vrot.slane %v10015_v40, %v9913_v49  ;;  %v9230_v63 = vld [vmem:[#allocation2 + $0x1400] ss:$16 sps:$4 sm:$0xff]  }
 0x2b4   :  { %5244 = vmatprep.subr.bf16.mxu0 %v9147_v47  ;;  %5736 = vmatprep.subr.bf16.mxu1 %v9150_v0  ;;  %v9233_v47 = vld [vmem:[#allocation2 + $0x1408] ss:$16 sps:$4 sm:$0xff]   ;;  %v9238_v0 = vld [vmem:[#allocation2 + $0x1424] ss:$16 sps:$4 sm:$0xff]  }
 0x2b7   :  { %5245 = vmatpush1.bf16.msra.mxu0 %v9145_v1  ;;  %5737 = vmatpush1.bf16.msra.mxu1 %v9148_v2  ;;  %v9241_v1 = vld [vmem:[#allocation2 + $0x142c] ss:$16 sps:$4 sm:$0xff]   ;;  %v1005_v2 = vcombine.high %v10019_v62, %v10019_v62 }
 0x2b8   :  { %5246 = vmatprep.subr.bf16.mxu0 %v9153_v3  ;;  %5738 = vmatprep.subr.bf16.mxu1 %v9156_v4  ;;  %v9236_v3 = vld [vmem:[#allocation2 + $0x1420] ss:$16 sps:$4 sm:$0xff]   ;;  %v9239_v4 = vld [vmem:[#allocation2 + $0x1428] ss:$16 sps:$4 sm:$0xff]  }
 0x2bb   :  { %5247 = vmatpush1.bf16.msra.mxu0 %v9151_v52  ;;  %5739 = vmatpush1.bf16.msra.mxu1 %v9154_v5  ;;  %v9244_v52 = vld [vmem:[#allocation2 + $0x1444] ss:$16 sps:$4 sm:$0xff]   ;;  %v9247_v5 = vld [vmem:[#allocation2 + $0x144c] ss:$16 sps:$4 sm:$0xff]  }
 0x2bc   :  { %5248 = vmatprep.subr.bf16.mxu0 %v9159_v6  ;;  %5740 = vmatprep.subr.bf16.mxu1 %v9162_v7  ;;  %v9242_v6 = vld [vmem:[#allocation2 + $0x1440] ss:$16 sps:$4 sm:$0xff]   ;;  %v9245_v7 = vld [vmem:[#allocation2 + $0x1448] ss:$16 sps:$4 sm:$0xff]  }
 0x2bf   :  { %5249 = vmatpush1.bf16.msra.mxu0 %v9157_v8  ;;  %5741 = vmatpush1.bf16.msra.mxu1 %v9160_v9  ;;  %v9250_v8 = vld [vmem:[#allocation2 + $0x1464] ss:$16 sps:$4 sm:$0xff]   ;;  %v9253_v9 = vld [vmem:[#allocation2 + $0x146c] ss:$16 sps:$4 sm:$0xff]  }
 0x2c0   :  { %5250 = vmatprep.subr.bf16.mxu0 %v9165_v10  ;;  %5742 = vmatprep.subr.bf16.mxu1 %v9168_v11  ;;  %v9251_v10 = vld [vmem:[#allocation2 + $0x1468] ss:$16 sps:$4 sm:$0xff]   ;;  %v9256_v11 = vld [vmem:[#allocation2 + $0x1484] ss:$16 sps:$4 sm:$0xff]  }
 0x2c3   :  { %5251 = vmatpush1.bf16.msra.mxu0 %v9163_v13  ;;  %5743 = vmatpush1.bf16.msra.mxu1 %v9166_v14  ;;  %v9259_v13 = vld [vmem:[#allocation2 + $0x148c] ss:$16 sps:$4 sm:$0xff]   ;;  %v9254_v14 = vld [vmem:[#allocation2 + $0x1480] ss:$16 sps:$4 sm:$0xff]  }
 0x2c4   :  { %5252 = vmatprep.subr.bf16.mxu0 %v9171_v15  ;;  %5744 = vmatprep.subr.bf16.mxu1 %v9174_v16  ;;  %v9257_v15 = vld [vmem:[#allocation2 + $0x1488] ss:$16 sps:$4 sm:$0xff]   ;;  %v9262_v16 = vld [vmem:[#allocation2 + $0x14a4] ss:$16 sps:$4 sm:$0xff]  }
 0x2c7   :  { %5253 = vmatpush1.bf16.msra.mxu0 %v9169_v17  ;;  %5745 = vmatpush1.bf16.msra.mxu1 %v9172_v18  ;;  %v9265_v17 = vld [vmem:[#allocation2 + $0x14ac] ss:$16 sps:$4 sm:$0xff]   ;;  %v9260_v18 = vld [vmem:[#allocation2 + $0x14a0] ss:$16 sps:$4 sm:$0xff]  }
 0x2c8   :  { %5254 = vmatprep.subr.bf16.mxu0 %v9177_v20  ;;  %5746 = vmatprep.subr.bf16.mxu1 %v9180_v21  ;;  %v9263_v20 = vld [vmem:[#allocation2 + $0x14a8] ss:$16 sps:$4 sm:$0xff]   ;;  %v9268_v21 = vld [vmem:[#allocation2 + $0x14c4] ss:$16 sps:$4 sm:$0xff]  }
 0x2cb   :  { %5255 = vmatpush1.bf16.msra.mxu0 %v9175_v23  ;;  %5747 = vmatpush1.bf16.msra.mxu1 %v9178_v24  ;;  %v9271_v23 = vld [vmem:[#allocation2 + $0x14cc] ss:$16 sps:$4 sm:$0xff]   ;;  %v9266_v24 = vld [vmem:[#allocation2 + $0x14c0] ss:$16 sps:$4 sm:$0xff]  }
 0x2cc   :  { %5256 = vmatprep.subr.bf16.mxu0 %v9183_v26  ;;  %5748 = vmatprep.subr.bf16.mxu1 %v9186_v28  ;;  %v9269_v26 = vld [vmem:[#allocation2 + $0x14c8] ss:$16 sps:$4 sm:$0xff]   ;;  %v9274_v28 = vld [vmem:[#allocation2 + $0x14e4] ss:$16 sps:$4 sm:$0xff]  }
 0x2cf   :  { %5257 = vmatpush1.bf16.msra.mxu0 %v9181_v29  ;;  %5749 = vmatpush1.bf16.msra.mxu1 %v9184_v19  ;;  %v9277_v29 = vld [vmem:[#allocation2 + $0x14ec] ss:$16 sps:$4 sm:$0xff]   ;;  %v9272_v19 = vld [vmem:[#allocation2 + $0x14e0] ss:$16 sps:$4 sm:$0xff]  }
 0x2d0   :  { %5258 = vmatprep.subr.bf16.mxu0 %v9189_v30  ;;  %5750 = vmatprep.subr.bf16.mxu1 %v9192_v31  ;;  %v9275_v30 = vld [vmem:[#allocation2 + $0x14e8] ss:$16 sps:$4 sm:$0xff]   ;;  %v9280_v31 = vld [vmem:[#allocation2 + $0x1504] ss:$16 sps:$4 sm:$0xff]  }
 0x2d3   :  { %5259 = vmatpush1.bf16.msra.mxu0 %v9187_v32  ;;  %5751 = vmatpush1.bf16.msra.mxu1 %v9190_v33  ;;  %v9283_v32 = vld [vmem:[#allocation2 + $0x150c] ss:$16 sps:$4 sm:$0xff]   ;;  %v9278_v33 = vld [vmem:[#allocation2 + $0x1500] ss:$16 sps:$4 sm:$0xff]  }
 0x2d4   :  { %5260 = vmatprep.subr.bf16.mxu0 %v9195_v34  ;;  %5752 = vmatprep.subr.bf16.mxu1 %v9198_v35  ;;  %v9281_v34 = vld [vmem:[#allocation2 + $0x1508] ss:$16 sps:$4 sm:$0xff]   ;;  %v9286_v35 = vld [vmem:[#allocation2 + $0x1524] ss:$16 sps:$4 sm:$0xff]  }
 0x2d7   :  { %5261 = vmatpush1.bf16.msra.mxu0 %v9193_v37  ;;  %5753 = vmatpush1.bf16.msra.mxu1 %v9196_v38  ;;  %v9289_v37 = vld [vmem:[#allocation2 + $0x152c] ss:$16 sps:$4 sm:$0xff]   ;;  %v9284_v38 = vld [vmem:[#allocation2 + $0x1520] ss:$16 sps:$4 sm:$0xff]  }
 0x2d8   :  { %5262 = vmatprep.subr.bf16.mxu0 %v9201_v39  ;;  %5754 = vmatprep.subr.bf16.mxu1 %v9204_v27  ;;  %v9287_v39 = vld [vmem:[#allocation2 + $0x1528] ss:$16 sps:$4 sm:$0xff]   ;;  %v9292_v27 = vld [vmem:[#allocation2 + $0x1544] ss:$16 sps:$4 sm:$0xff]  }
 0x2db   :  { %5263 = vmatpush1.bf16.msra.mxu0 %v9199_v41  ;;  %5755 = vmatpush1.bf16.msra.mxu1 %v9202_v25  ;;  %v9295_v41 = vld [vmem:[#allocation2 + $0x154c] ss:$16 sps:$4 sm:$0xff]   ;;  %v9290_v25 = vld [vmem:[#allocation2 + $0x1540] ss:$16 sps:$4 sm:$0xff]  }
 0x2dc   :  { %5264 = vmatprep.subr.bf16.mxu0 %v9207_v43  ;;  %5756 = vmatprep.subr.bf16.mxu1 %v9210_v44  ;;  %v9293_v43 = vld [vmem:[#allocation2 + $0x1548] ss:$16 sps:$4 sm:$0xff]   ;;  %v9298_v44 = vld [vmem:[#allocation2 + $0x1564] ss:$16 sps:$4 sm:$0xff]  }
 0x2df   :  { %5265 = vmatpush1.bf16.msra.mxu0 %v9205_v45  ;;  %5757 = vmatpush1.bf16.msra.mxu1 %v9208_v46  ;;  %v9301_v45 = vld [vmem:[#allocation2 + $0x156c] ss:$16 sps:$4 sm:$0xff]   ;;  %v9296_v46 = vld [vmem:[#allocation2 + $0x1560] ss:$16 sps:$4 sm:$0xff]  }
 0x2e0   :  { %5266 = vmatprep.subr.bf16.mxu0 %v9213_v48  ;;  %5758 = vmatprep.subr.bf16.mxu1 %v9216_v50  ;;  %v9299_v48 = vld [vmem:[#allocation2 + $0x1568] ss:$16 sps:$4 sm:$0xff]   ;;  %v9304_v50 = vld [vmem:[#allocation2 + $0x1584] ss:$16 sps:$4 sm:$0xff]  }
 0x2e3   :  { %5267 = vmatpush1.bf16.msra.mxu0 %v9211_v51  ;;  %5759 = vmatpush1.bf16.msra.mxu1 %v9214_v22  ;;  %v9307_v51 = vld [vmem:[#allocation2 + $0x158c] ss:$16 sps:$4 sm:$0xff]   ;;  %v9302_v22 = vld [vmem:[#allocation2 + $0x1580] ss:$16 sps:$4 sm:$0xff]  }
 0x2e4   :  { %5268 = vmatprep.subr.bf16.mxu0 %v9219_v53  ;;  %5760 = vmatprep.subr.bf16.mxu1 %v9222_v36  ;;  %v9305_v53 = vld [vmem:[#allocation2 + $0x1588] ss:$16 sps:$4 sm:$0xff]   ;;  %v9310_v36 = vld [vmem:[#allocation2 + $0x15a4] ss:$16 sps:$4 sm:$0xff]  }
 0x2e7   :  { %5269 = vmatpush1.bf16.msra.mxu0 %v9217_v54  ;;  %5761 = vmatpush1.bf16.msra.mxu1 %v9220_v55  ;;  %v9313_v54 = vld [vmem:[#allocation2 + $0x15ac] ss:$16 sps:$4 sm:$0xff]   ;;  %v9308_v55 = vld [vmem:[#allocation2 + $0x15a0] ss:$16 sps:$4 sm:$0xff]  }
 0x2e8   :  { %5270 = vmatprep.subr.bf16.mxu0 %v9225_v56  ;;  %5762 = vmatprep.subr.bf16.mxu1 %v9228_v57  ;;  %v9311_v56 = vld [vmem:[#allocation2 + $0x15a8] ss:$16 sps:$4 sm:$0xff]   ;;  %v9316_v57 = vld [vmem:[#allocation2 + $0x15c4] ss:$16 sps:$4 sm:$0xff]  }
 0x2eb   :  { %5271 = vmatpush1.bf16.msra.mxu0 %v9223_v59  ;;  %5763 = vmatpush1.bf16.msra.mxu1 %v9226_v60  ;;  %v9319_v59 = vld [vmem:[#allocation2 + $0x15cc] ss:$16 sps:$4 sm:$0xff]   ;;  %v9314_v60 = vld [vmem:[#allocation2 + $0x15c0] ss:$16 sps:$4 sm:$0xff]  }
 0x2ec   :  { %5281 = vmatprep.subr.bf16.mxu0 %v9232_v61  ;;  %5773 = vmatprep.subr.bf16.mxu1 %v9235_v12  ;;  %v9317_v61 = vld [vmem:[#allocation2 + $0x15c8] ss:$16 sps:$4 sm:$0xff]   ;;  %v9322_v12 = vld [vmem:[#allocation2 + $0x15e4] ss:$16 sps:$4 sm:$0xff]  }
 0x2ee   :  { %5273 = vmatmul.mubr.bf16.vlgmr.msra.gmra.mrb[0].mxu0 %v10006_v58  ;;  %5765 = vmatmul.mubr.bf16.vlgmr.msra.gmra.mrb[0].mxu1 %v10006_v58  ;;  %v9248_v58 = vld [vmem:[#allocation2 + $0x1460] ss:$16 sps:$4 sm:$0xff]  }
 0x2ef   :  { %5282 = vmatpush1.bf16.msra.mxu0 %v9230_v63  ;;  %5774 = vmatpush1.bf16.msra.mxu1 %v9233_v47  ;;  %v9325_v63 = vld [vmem:[#allocation2 + $0x15ec] ss:$16 sps:$4 sm:$0xff]   ;;  %v990_v47 = vcombine.high %v10015_v40, %v10015_v40 }
 0x2f0   :  { %5283 = vmatprep.subr.bf16.mxu0 %v9238_v0  ;;  %5775 = vmatprep.subr.bf16.mxu1 %v9241_v1  ;;  %v9320_v0 = vld [vmem:[#allocation2 + $0x15e0] ss:$16 sps:$4 sm:$0xff]   ;;  %v9323_v1 = vld [vmem:[#allocation2 + $0x15e8] ss:$16 sps:$4 sm:$0xff]  }
 0x2f1   :  { %5313 = vmatprep.mubr.bf16.mxu0 %v1005_v2  ;;  %5805 = vmatprep.mubr.bf16.mxu1 %v1005_v2  ;;  %v9328_v2 = vld [vmem:[#allocation2 + $0x1604] ss:$16 sps:$4 sm:$0xff]  }
 0x2f3   :  { %5284 = vmatpush1.bf16.msra.mxu0 %v9236_v3  ;;  %5776 = vmatpush1.bf16.msra.mxu1 %v9239_v4  ;;  %v9331_v3 = vld [vmem:[#allocation2 + $0x160c] ss:$16 sps:$4 sm:$0xff]   ;;  %v10028_v4 = vrot.slane %v990_v47, %v9913_v49  ;;  %v9335_v49 = vld [vmem:[#allocation2 + $0x1628] ss:$16 sps:$4 sm:$0xff]   ;;  %v9410_v47 = vld [vmem:[#allocation2 + $0x17c0] ss:$16 sps:$4 sm:$0xff]  }
 0x2f4   :  { %5285 = vmatprep.subr.bf16.mxu0 %v9244_v52  ;;  %5777 = vmatprep.subr.bf16.mxu1 %v9247_v5  ;;  %v9326_v52 = vld [vmem:[#allocation2 + $0x1600] ss:$16 sps:$4 sm:$0xff]   ;;  %v9329_v5 = vld [vmem:[#allocation2 + $0x1608] ss:$16 sps:$4 sm:$0xff]  }
 0x2f5   :  { %v1006_v40 = vcombine.high %v10028_v4, %v10028_v4 }
 0x2f7   :  { %5286 = vmatpush1.bf16.msra.mxu0 %v9242_v6  ;;  %5778 = vmatpush1.bf16.msra.mxu1 %v9245_v7  ;;  %v9334_v6 = vld [vmem:[#allocation2 + $0x1624] ss:$16 sps:$4 sm:$0xff]   ;;  %v9337_v7 = vld [vmem:[#allocation2 + $0x162c] ss:$16 sps:$4 sm:$0xff]  }
 0x2f8   :  { %5287 = vmatprep.subr.bf16.mxu0 %v9250_v8  ;;  %5779 = vmatprep.subr.bf16.mxu1 %v9253_v9  ;;  %v9332_v8 = vld [vmem:[#allocation2 + $0x1620] ss:$16 sps:$4 sm:$0xff]   ;;  %v9340_v9 = vld [vmem:[#allocation2 + $0x1644] ss:$16 sps:$4 sm:$0xff]  }
 0x2fb   :  { %5288 = vmatpush1.bf16.msra.mxu0 %v9248_v58  ;;  %5780 = vmatpush1.bf16.msra.mxu1 %v9251_v10  ;;  %v9343_v58 = vld [vmem:[#allocation2 + $0x164c] ss:$16 sps:$4 sm:$0xff]   ;;  %v9338_v10 = vld [vmem:[#allocation2 + $0x1640] ss:$16 sps:$4 sm:$0xff]  }
 0x2fc   :  { %5289 = vmatprep.subr.bf16.mxu0 %v9256_v11  ;;  %5781 = vmatprep.subr.bf16.mxu1 %v9259_v13  ;;  %v9341_v11 = vld [vmem:[#allocation2 + $0x1648] ss:$16 sps:$4 sm:$0xff]   ;;  %v9346_v13 = vld [vmem:[#allocation2 + $0x1664] ss:$16 sps:$4 sm:$0xff]  }
 0x2ff   :  { %5290 = vmatpush1.bf16.msra.mxu0 %v9254_v14  ;;  %5782 = vmatpush1.bf16.msra.mxu1 %v9257_v15  ;;  %v9349_v14 = vld [vmem:[#allocation2 + $0x166c] ss:$16 sps:$4 sm:$0xff]   ;;  %v9347_v15 = vld [vmem:[#allocation2 + $0x1668] ss:$16 sps:$4 sm:$0xff]  }
 0x300   :  { %5291 = vmatprep.subr.bf16.mxu0 %v9262_v16  ;;  %5783 = vmatprep.subr.bf16.mxu1 %v9265_v17  ;;  %v9352_v16 = vld [vmem:[#allocation2 + $0x1684] ss:$16 sps:$4 sm:$0xff]   ;;  %v9355_v17 = vld [vmem:[#allocation2 + $0x168c] ss:$16 sps:$4 sm:$0xff]  }
 0x303   :  { %5292 = vmatpush1.bf16.msra.mxu0 %v9260_v18  ;;  %5784 = vmatpush1.bf16.msra.mxu1 %v9263_v20  ;;  %v9350_v18 = vld [vmem:[#allocation2 + $0x1680] ss:$16 sps:$4 sm:$0xff]   ;;  %v9353_v20 = vld [vmem:[#allocation2 + $0x1688] ss:$16 sps:$4 sm:$0xff]  }
 0x304   :  { %5293 = vmatprep.subr.bf16.mxu0 %v9268_v21  ;;  %5785 = vmatprep.subr.bf16.mxu1 %v9271_v23  ;;  %v9358_v21 = vld [vmem:[#allocation2 + $0x16a4] ss:$16 sps:$4 sm:$0xff]   ;;  %v9361_v23 = vld [vmem:[#allocation2 + $0x16ac] ss:$16 sps:$4 sm:$0xff]  }
 0x307   :  { %5294 = vmatpush1.bf16.msra.mxu0 %v9266_v24  ;;  %5786 = vmatpush1.bf16.msra.mxu1 %v9269_v26  ;;  %v9356_v24 = vld [vmem:[#allocation2 + $0x16a0] ss:$16 sps:$4 sm:$0xff]   ;;  %v9359_v26 = vld [vmem:[#allocation2 + $0x16a8] ss:$16 sps:$4 sm:$0xff]  }
 0x308   :  { %5295 = vmatprep.subr.bf16.mxu0 %v9274_v28  ;;  %5787 = vmatprep.subr.bf16.mxu1 %v9277_v29  ;;  %v9364_v28 = vld [vmem:[#allocation2 + $0x16c4] ss:$16 sps:$4 sm:$0xff]   ;;  %v9367_v29 = vld [vmem:[#allocation2 + $0x16cc] ss:$16 sps:$4 sm:$0xff]  }
 0x30b   :  { %5296 = vmatpush1.bf16.msra.mxu0 %v9272_v19  ;;  %5788 = vmatpush1.bf16.msra.mxu1 %v9275_v30  ;;  %v9362_v19 = vld [vmem:[#allocation2 + $0x16c0] ss:$16 sps:$4 sm:$0xff]   ;;  %v9365_v30 = vld [vmem:[#allocation2 + $0x16c8] ss:$16 sps:$4 sm:$0xff]  }
 0x30c   :  { %5297 = vmatprep.subr.bf16.mxu0 %v9280_v31  ;;  %5789 = vmatprep.subr.bf16.mxu1 %v9283_v32  ;;  %v9370_v31 = vld [vmem:[#allocation2 + $0x16e4] ss:$16 sps:$4 sm:$0xff]   ;;  %v9373_v32 = vld [vmem:[#allocation2 + $0x16ec] ss:$16 sps:$4 sm:$0xff]  }
 0x30f   :  { %5298 = vmatpush1.bf16.msra.mxu0 %v9278_v33  ;;  %5790 = vmatpush1.bf16.msra.mxu1 %v9281_v34  ;;  %v9368_v33 = vld [vmem:[#allocation2 + $0x16e0] ss:$16 sps:$4 sm:$0xff]   ;;  %v9371_v34 = vld [vmem:[#allocation2 + $0x16e8] ss:$16 sps:$4 sm:$0xff]  }
 0x310   :  { %5299 = vmatprep.subr.bf16.mxu0 %v9286_v35  ;;  %5791 = vmatprep.subr.bf16.mxu1 %v9289_v37  ;;  %v9376_v35 = vld [vmem:[#allocation2 + $0x1704] ss:$16 sps:$4 sm:$0xff]   ;;  %v9379_v37 = vld [vmem:[#allocation2 + $0x170c] ss:$16 sps:$4 sm:$0xff]  }
 0x313   :  { %5300 = vmatpush1.bf16.msra.mxu0 %v9284_v38  ;;  %5792 = vmatpush1.bf16.msra.mxu1 %v9287_v39  ;;  %v9374_v38 = vld [vmem:[#allocation2 + $0x1700] ss:$16 sps:$4 sm:$0xff]   ;;  %v9377_v39 = vld [vmem:[#allocation2 + $0x1708] ss:$16 sps:$4 sm:$0xff]  }
 0x314   :  { %5301 = vmatprep.subr.bf16.mxu0 %v9292_v27  ;;  %5793 = vmatprep.subr.bf16.mxu1 %v9295_v41  ;;  %v9382_v27 = vld [vmem:[#allocation2 + $0x1724] ss:$16 sps:$4 sm:$0xff]   ;;  %v9385_v41 = vld [vmem:[#allocation2 + $0x172c] ss:$16 sps:$4 sm:$0xff]  }
 0x317   :  { %5302 = vmatpush1.bf16.msra.mxu0 %v9290_v25  ;;  %5794 = vmatpush1.bf16.msra.mxu1 %v9293_v43  ;;  %v9380_v25 = vld [vmem:[#allocation2 + $0x1720] ss:$16 sps:$4 sm:$0xff]   ;;  %v9383_v43 = vld [vmem:[#allocation2 + $0x1728] ss:$16 sps:$4 sm:$0xff]  }
 0x318   :  { %5303 = vmatprep.subr.bf16.mxu0 %v9298_v44  ;;  %5795 = vmatprep.subr.bf16.mxu1 %v9301_v45  ;;  %v9388_v44 = vld [vmem:[#allocation2 + $0x1744] ss:$16 sps:$4 sm:$0xff]   ;;  %v9391_v45 = vld [vmem:[#allocation2 + $0x174c] ss:$16 sps:$4 sm:$0xff]  }
 0x31b   :  { %5304 = vmatpush1.bf16.msra.mxu0 %v9296_v46  ;;  %5796 = vmatpush1.bf16.msra.mxu1 %v9299_v48  ;;  %v9386_v46 = vld [vmem:[#allocation2 + $0x1740] ss:$16 sps:$4 sm:$0xff]   ;;  %v9389_v48 = vld [vmem:[#allocation2 + $0x1748] ss:$16 sps:$4 sm:$0xff]  }
 0x31c   :  { %5305 = vmatprep.subr.bf16.mxu0 %v9304_v50  ;;  %5797 = vmatprep.subr.bf16.mxu1 %v9307_v51  ;;  %v9394_v50 = vld [vmem:[#allocation2 + $0x1764] ss:$16 sps:$4 sm:$0xff]   ;;  %v9397_v51 = vld [vmem:[#allocation2 + $0x176c] ss:$16 sps:$4 sm:$0xff]  }
 0x31f   :  { %5306 = vmatpush1.bf16.msra.mxu0 %v9302_v22  ;;  %5798 = vmatpush1.bf16.msra.mxu1 %v9305_v53  ;;  %v9392_v22 = vld [vmem:[#allocation2 + $0x1760] ss:$16 sps:$4 sm:$0xff]   ;;  %v9395_v53 = vld [vmem:[#allocation2 + $0x1768] ss:$16 sps:$4 sm:$0xff]  }
 0x320   :  { %5307 = vmatprep.subr.bf16.mxu0 %v9310_v36  ;;  %5799 = vmatprep.subr.bf16.mxu1 %v9313_v54  ;;  %v9400_v36 = vld [vmem:[#allocation2 + $0x1784] ss:$16 sps:$4 sm:$0xff]   ;;  %v9403_v54 = vld [vmem:[#allocation2 + $0x178c] ss:$16 sps:$4 sm:$0xff]  }
 0x323   :  { %5308 = vmatpush1.bf16.msra.mxu0 %v9308_v55  ;;  %5800 = vmatpush1.bf16.msra.mxu1 %v9311_v56  ;;  %v9398_v55 = vld [vmem:[#allocation2 + $0x1780] ss:$16 sps:$4 sm:$0xff]   ;;  %v9401_v56 = vld [vmem:[#allocation2 + $0x1788] ss:$16 sps:$4 sm:$0xff]  }
 0x324   :  { %5309 = vmatprep.subr.bf16.mxu0 %v9316_v57  ;;  %5801 = vmatprep.subr.bf16.mxu1 %v9319_v59  ;;  %v9406_v57 = vld [vmem:[#allocation2 + $0x17a4] ss:$16 sps:$4 sm:$0xff]   ;;  %v9409_v59 = vld [vmem:[#allocation2 + $0x17ac] ss:$16 sps:$4 sm:$0xff]  }
 0x327   :  { %5310 = vmatpush1.bf16.msra.mxu0 %v9314_v60  ;;  %5802 = vmatpush1.bf16.msra.mxu1 %v9317_v61  ;;  %v9404_v60 = vld [vmem:[#allocation2 + $0x17a0] ss:$16 sps:$4 sm:$0xff]   ;;  %v9407_v61 = vld [vmem:[#allocation2 + $0x17a8] ss:$16 sps:$4 sm:$0xff]  }
 0x328   :  { %5311 = vmatprep.subr.bf16.mxu0 %v9322_v12  ;;  %5803 = vmatprep.subr.bf16.mxu1 %v9325_v63  ;;  %v9412_v12 = vld [vmem:[#allocation2 + $0x17c4] ss:$16 sps:$4 sm:$0xff]   ;;  %v9415_v63 = vld [vmem:[#allocation2 + $0x17cc] ss:$16 sps:$4 sm:$0xff]  }
 0x32b   :  { %5312 = vmatpush1.bf16.msra.mxu0 %v9320_v0  ;;  %5804 = vmatpush1.bf16.msra.mxu1 %v9323_v1  ;;  %v9413_v0 = vld [vmem:[#allocation2 + $0x17c8] ss:$16 sps:$4 sm:$0xff]   ;;  %v9418_v1 = vld [vmem:[#allocation2 + $0x17e4] ss:$16 sps:$4 sm:$0xff]  }
 0x32c   :  { %5322 = vmatprep.subr.bf16.mxu0 %v9328_v2  ;;  %5814 = vmatprep.subr.bf16.mxu1 %v9331_v3  ;;  %v9421_v2 = vld [vmem:[#allocation2 + $0x17ec] ss:$16 sps:$4 sm:$0xff]   ;;  %v9416_v3 = vld [vmem:[#allocation2 + $0x17e0] ss:$16 sps:$4 sm:$0xff]  }
 0x32e   :  { %5314 = vmatmul.mubr.bf16.vlgmr.msra.gmra.mrb[0].mxu0 %v10019_v62  ;;  %5806 = vmatmul.mubr.bf16.vlgmr.msra.gmra.mrb[0].mxu1 %v10019_v62  ;;  %v9344_v62 = vld [vmem:[#allocation2 + $0x1660] ss:$16 sps:$4 sm:$0xff]  }
 0x32f   :  { %5323 = vmatpush1.bf16.msra.mxu0 %v9326_v52  ;;  %5815 = vmatpush1.bf16.msra.mxu1 %v9329_v5  ;;  %v9419_v52 = vld [vmem:[#allocation2 + $0x17e8] ss:$16 sps:$4 sm:$0xff]  }
 0x330   :  { %5324 = vmatprep.subr.bf16.mxu0 %v9334_v6  ;;  %5816 = vmatprep.subr.bf16.mxu1 %v9337_v7  ;;  %v9425_v5 = vld [vmem:[#allocation6 + $0x4] ss:$16 sps:$4 sm:$0xff]   ;;  %v9428_v6 = vld [vmem:[#allocation6 + $0xc] ss:$16 sps:$4 sm:$0xff]   ;;  %v9423_v7 = vld [vmem:[#allocation6] ss:$16 sps:$4 sm:$0xff]  }
 0x331   :  { %5354 = vmatprep.mubr.bf16.mxu0 %v1006_v40  ;;  %5846 = vmatprep.mubr.bf16.mxu1 %v1006_v40  ;;  %v9426_v40 = vld [vmem:[#allocation6 + $0x8] ss:$16 sps:$4 sm:$0xff]  }
 0x333   :  { %5325 = vmatpush1.bf16.msra.mxu0 %v9332_v8  ;;  %5817 = vmatpush1.bf16.msra.mxu1 %v9335_v49  ;;  %v9431_v8 = vld [vmem:[#allocation6 + $0x24] ss:$16 sps:$4 sm:$0xff]   ;;  %v9434_v49 = vld [vmem:[#allocation6 + $0x2c] ss:$16 sps:$4 sm:$0xff]  }
 0x334   :  { %5326 = vmatprep.subr.bf16.mxu0 %v9340_v9  ;;  %5818 = vmatprep.subr.bf16.mxu1 %v9343_v58  ;;  %v9429_v9 = vld [vmem:[#allocation6 + $0x20] ss:$16 sps:$4 sm:$0xff]   ;;  %v9432_v58 = vld [vmem:[#allocation6 + $0x28] ss:$16 sps:$4 sm:$0xff]  }
 0x337   :  { %5327 = vmatpush1.bf16.msra.mxu0 %v9338_v10  ;;  %5819 = vmatpush1.bf16.msra.mxu1 %v9341_v11  ;;  %v9437_v10 = vld [vmem:[#allocation6 + $0x44] ss:$16 sps:$4 sm:$0xff]   ;;  %v9440_v11 = vld [vmem:[#allocation6 + $0x4c] ss:$16 sps:$4 sm:$0xff]  }
 0x338   :  { %5328 = vmatprep.subr.bf16.mxu0 %v9346_v13  ;;  %5820 = vmatprep.subr.bf16.mxu1 %v9349_v14  ;;  %v9435_v13 = vld [vmem:[#allocation6 + $0x40] ss:$16 sps:$4 sm:$0xff]   ;;  %v9438_v14 = vld [vmem:[#allocation6 + $0x48] ss:$16 sps:$4 sm:$0xff]  }
 0x33b   :  { %5329 = vmatpush1.bf16.msra.mxu0 %v9344_v62  ;;  %5821 = vmatpush1.bf16.msra.mxu1 %v9347_v15  ;;  %v9443_v62 = vld [vmem:[#allocation6 + $0x64] ss:$16 sps:$4 sm:$0xff]   ;;  %v9446_v15 = vld [vmem:[#allocation6 + $0x6c] ss:$16 sps:$4 sm:$0xff]  }
 0x33c   :  { %5330 = vmatprep.subr.bf16.mxu0 %v9352_v16  ;;  %5822 = vmatprep.subr.bf16.mxu1 %v9355_v17  ;;  %v9441_v16 = vld [vmem:[#allocation6 + $0x60] ss:$16 sps:$4 sm:$0xff]   ;;  %v9449_v17 = vld [vmem:[#allocation6 + $0x84] ss:$16 sps:$4 sm:$0xff]  }
 0x33f   :  { %5331 = vmatpush1.bf16.msra.mxu0 %v9350_v18  ;;  %5823 = vmatpush1.bf16.msra.mxu1 %v9353_v20  ;;  %v9452_v18 = vld [vmem:[#allocation6 + $0x8c] ss:$16 sps:$4 sm:$0xff]   ;;  %v9447_v20 = vld [vmem:[#allocation6 + $0x80] ss:$16 sps:$4 sm:$0xff]  }
 0x340   :  { %5332 = vmatprep.subr.bf16.mxu0 %v9358_v21  ;;  %5824 = vmatprep.subr.bf16.mxu1 %v9361_v23  ;;  %v9450_v21 = vld [vmem:[#allocation6 + $0x88] ss:$16 sps:$4 sm:$0xff]   ;;  %v9455_v23 = vld [vmem:[#allocation6 + $0xa4] ss:$16 sps:$4 sm:$0xff]  }
 0x343   :  { %5333 = vmatpush1.bf16.msra.mxu0 %v9356_v24  ;;  %5825 = vmatpush1.bf16.msra.mxu1 %v9359_v26  ;;  %v9458_v24 = vld [vmem:[#allocation6 + $0xac] ss:$16 sps:$4 sm:$0xff]   ;;  %v9453_v26 = vld [vmem:[#allocation6 + $0xa0] ss:$16 sps:$4 sm:$0xff]  }
 0x344   :  { %5334 = vmatprep.subr.bf16.mxu0 %v9364_v28  ;;  %5826 = vmatprep.subr.bf16.mxu1 %v9367_v29  ;;  %v9456_v28 = vld [vmem:[#allocation6 + $0xa8] ss:$16 sps:$4 sm:$0xff]   ;;  %v9461_v29 = vld [vmem:[#allocation6 + $0xc4] ss:$16 sps:$4 sm:$0xff]  }
 0x347   :  { %5335 = vmatpush1.bf16.msra.mxu0 %v9362_v19  ;;  %5827 = vmatpush1.bf16.msra.mxu1 %v9365_v30  ;;  %v9464_v19 = vld [vmem:[#allocation6 + $0xcc] ss:$16 sps:$4 sm:$0xff]   ;;  %v9459_v30 = vld [vmem:[#allocation6 + $0xc0] ss:$16 sps:$4 sm:$0xff]  }
 0x348   :  { %5336 = vmatprep.subr.bf16.mxu0 %v9370_v31  ;;  %5828 = vmatprep.subr.bf16.mxu1 %v9373_v32  ;;  %v9462_v31 = vld [vmem:[#allocation6 + $0xc8] ss:$16 sps:$4 sm:$0xff]   ;;  %v9467_v32 = vld [vmem:[#allocation6 + $0xe4] ss:$16 sps:$4 sm:$0xff]  }
 0x34b   :  { %5337 = vmatpush1.bf16.msra.mxu0 %v9368_v33  ;;  %5829 = vmatpush1.bf16.msra.mxu1 %v9371_v34  ;;  %v9470_v33 = vld [vmem:[#allocation6 + $0xec] ss:$16 sps:$4 sm:$0xff]   ;;  %v9465_v34 = vld [vmem:[#allocation6 + $0xe0] ss:$16 sps:$4 sm:$0xff]  }
 0x34c   :  { %5338 = vmatprep.subr.bf16.mxu0 %v9376_v35  ;;  %5830 = vmatprep.subr.bf16.mxu1 %v9379_v37  ;;  %v9468_v35 = vld [vmem:[#allocation6 + $0xe8] ss:$16 sps:$4 sm:$0xff]   ;;  %v9473_v37 = vld [vmem:[#allocation6 + $0x104] ss:$16 sps:$4 sm:$0xff]  }
 0x34f   :  { %5339 = vmatpush1.bf16.msra.mxu0 %v9374_v38  ;;  %5831 = vmatpush1.bf16.msra.mxu1 %v9377_v39  ;;  %v9476_v38 = vld [vmem:[#allocation6 + $0x10c] ss:$16 sps:$4 sm:$0xff]   ;;  %v9471_v39 = vld [vmem:[#allocation6 + $0x100] ss:$16 sps:$4 sm:$0xff]  }
 0x350   :  { %5340 = vmatprep.subr.bf16.mxu0 %v9382_v27  ;;  %5832 = vmatprep.subr.bf16.mxu1 %v9385_v41  ;;  %v9474_v27 = vld [vmem:[#allocation6 + $0x108] ss:$16 sps:$4 sm:$0xff]   ;;  %v9479_v41 = vld [vmem:[#allocation6 + $0x124] ss:$16 sps:$4 sm:$0xff]  }
 0x353   :  { %5341 = vmatpush1.bf16.msra.mxu0 %v9380_v25  ;;  %5833 = vmatpush1.bf16.msra.mxu1 %v9383_v43  ;;  %v9482_v25 = vld [vmem:[#allocation6 + $0x12c] ss:$16 sps:$4 sm:$0xff]   ;;  %v9477_v43 = vld [vmem:[#allocation6 + $0x120] ss:$16 sps:$4 sm:$0xff]  }
 0x354   :  { %5342 = vmatprep.subr.bf16.mxu0 %v9388_v44  ;;  %5834 = vmatprep.subr.bf16.mxu1 %v9391_v45  ;;  %v9480_v44 = vld [vmem:[#allocation6 + $0x128] ss:$16 sps:$4 sm:$0xff]   ;;  %v9485_v45 = vld [vmem:[#allocation6 + $0x144] ss:$16 sps:$4 sm:$0xff]  }
 0x357   :  { %5343 = vmatpush1.bf16.msra.mxu0 %v9386_v46  ;;  %5835 = vmatpush1.bf16.msra.mxu1 %v9389_v48  ;;  %v9488_v46 = vld [vmem:[#allocation6 + $0x14c] ss:$16 sps:$4 sm:$0xff]   ;;  %v9483_v48 = vld [vmem:[#allocation6 + $0x140] ss:$16 sps:$4 sm:$0xff]  }
 0x358   :  { %5344 = vmatprep.subr.bf16.mxu0 %v9394_v50  ;;  %5836 = vmatprep.subr.bf16.mxu1 %v9397_v51  ;;  %v9486_v50 = vld [vmem:[#allocation6 + $0x148] ss:$16 sps:$4 sm:$0xff]   ;;  %v9491_v51 = vld [vmem:[#allocation6 + $0x164] ss:$16 sps:$4 sm:$0xff]  }
 0x35b   :  { %5345 = vmatpush1.bf16.msra.mxu0 %v9392_v22  ;;  %5837 = vmatpush1.bf16.msra.mxu1 %v9395_v53  ;;  %v9494_v22 = vld [vmem:[#allocation6 + $0x16c] ss:$16 sps:$4 sm:$0xff]   ;;  %v9489_v53 = vld [vmem:[#allocation6 + $0x160] ss:$16 sps:$4 sm:$0xff]  }
 0x35c   :  { %5346 = vmatprep.subr.bf16.mxu0 %v9400_v36  ;;  %5838 = vmatprep.subr.bf16.mxu1 %v9403_v54  ;;  %v9492_v36 = vld [vmem:[#allocation6 + $0x168] ss:$16 sps:$4 sm:$0xff]   ;;  %v9497_v54 = vld [vmem:[#allocation6 + $0x184] ss:$16 sps:$4 sm:$0xff]  }
 0x35f   :  { %5347 = vmatpush1.bf16.msra.mxu0 %v9398_v55  ;;  %5839 = vmatpush1.bf16.msra.mxu1 %v9401_v56  ;;  %v9500_v55 = vld [vmem:[#allocation6 + $0x18c] ss:$16 sps:$4 sm:$0xff]   ;;  %v9495_v56 = vld [vmem:[#allocation6 + $0x180] ss:$16 sps:$4 sm:$0xff]  }
 0x360   :  { %5348 = vmatprep.subr.bf16.mxu0 %v9406_v57  ;;  %5840 = vmatprep.subr.bf16.mxu1 %v9409_v59  ;;  %v9498_v57 = vld [vmem:[#allocation6 + $0x188] ss:$16 sps:$4 sm:$0xff]   ;;  %v9503_v59 = vld [vmem:[#allocation6 + $0x1a4] ss:$16 sps:$4 sm:$0xff]  }
 0x363   :  { %5349 = vmatpush1.bf16.msra.mxu0 %v9404_v60  ;;  %5841 = vmatpush1.bf16.msra.mxu1 %v9407_v61  ;;  %v9506_v60 = vld [vmem:[#allocation6 + $0x1ac] ss:$16 sps:$4 sm:$0xff]   ;;  %v9501_v61 = vld [vmem:[#allocation6 + $0x1a0] ss:$16 sps:$4 sm:$0xff]  }
 0x364   :  { %5350 = vmatprep.subr.bf16.mxu0 %v9412_v12  ;;  %5842 = vmatprep.subr.bf16.mxu1 %v9415_v63  ;;  %v9504_v12 = vld [vmem:[#allocation6 + $0x1a8] ss:$16 sps:$4 sm:$0xff]   ;;  %v9509_v63 = vld [vmem:[#allocation6 + $0x1c4] ss:$16 sps:$4 sm:$0xff]  }
 0x367   :  { %5351 = vmatpush1.bf16.msra.mxu0 %v9410_v47  ;;  %5843 = vmatpush1.bf16.msra.mxu1 %v9413_v0  ;;  %v9512_v47 = vld [vmem:[#allocation6 + $0x1cc] ss:$16 sps:$4 sm:$0xff]   ;;  %v9507_v0 = vld [vmem:[#allocation6 + $0x1c0] ss:$16 sps:$4 sm:$0xff]  }
 0x368   :  { %5352 = vmatprep.subr.bf16.mxu0 %v9418_v1  ;;  %5844 = vmatprep.subr.bf16.mxu1 %v9421_v2  ;;  %v9510_v1 = vld [vmem:[#allocation6 + $0x1c8] ss:$16 sps:$4 sm:$0xff]   ;;  %v9515_v2 = vld [vmem:[#allocation6 + $0x1e4] ss:$16 sps:$4 sm:$0xff]  }
 0x36b   :  { %5353 = vmatpush1.bf16.msra.mxu0 %v9416_v3  ;;  %5845 = vmatpush1.bf16.msra.mxu1 %v9419_v52  ;;  %v9518_v3 = vld [vmem:[#allocation6 + $0x1ec] ss:$16 sps:$4 sm:$0xff]   ;;  %v9513_v52 = vld [vmem:[#allocation6 + $0x1e0] ss:$16 sps:$4 sm:$0xff]  }
 0x36c   :  { %6653 = vmatprep.subr.bf16.mxu0 %v9425_v5  ;;  %6735 = vmatprep.subr.bf16.mxu1 %v9428_v6  ;;  %v9516_v5 = vld [vmem:[#allocation6 + $0x1e8] ss:$16 sps:$4 sm:$0xff]   ;;  %v9521_v6 = vld [vmem:[#allocation6 + $0x204] ss:$16 sps:$4 sm:$0xff]  }
 0x36e   :  { %5355 = vmatmul.mubr.bf16.vlgmr.msra.gmra.mrb[0].mxu0 %v10028_v4  ;;  %5847 = vmatmul.mubr.bf16.vlgmr.msra.gmra.mrb[0].mxu1 %v10028_v4  ;;  %v9444_v4 = vld [vmem:[#allocation6 + $0x68] ss:$16 sps:$4 sm:$0xff]  }
 0x36f   :  { %6654 = vmatpush1.bf16.msra.mxu0 %v9423_v7  ;;  %6736 = vmatpush1.bf16.msra.mxu1 %v9426_v40  ;;  %v9524_v7 = vld [vmem:[#allocation6 + $0x20c] ss:$16 sps:$4 sm:$0xff]   ;;  %v881_v40 = vsub.s32 0, %v9910_v42 }
 0x370   :  { %6655 = vmatprep.subr.bf16.mxu0 %v9431_v8  ;;  %6737 = vmatprep.subr.bf16.mxu1 %v9434_v49  ;;  %v10037_v8 = vld [vmem:[#allocation4] sm:$0xf]  ;;  %v885_v49 = vsub.s32 1, %v9910_v42 }
 0x373   :  { %6656 = vmatpush1.bf16.msra.mxu0 %v9429_v9  ;;  %6738 = vmatpush1.bf16.msra.mxu1 %v9432_v58  ;;  %v893_v9 = vsub.s32 3, %v9910_v42  ;;  %v882_v58 = vrot.slane %v10037_v8, %v881_v40 }
 0x374   :  { %6657 = vmatprep.subr.bf16.mxu0 %v9437_v10  ;;  %6739 = vmatprep.subr.bf16.mxu1 %v9440_v11  ;;  %v886_v10 = vrot.slane %v10037_v8, %v885_v49 }
 0x375   :  { %v894_v11 = vrot.slane %v10037_v8, %v893_v9 }
 0x377   :  { %6658 = vmatpush1.bf16.msra.mxu0 %v9435_v13  ;;  %6740 = vmatpush1.bf16.msra.mxu1 %v9438_v14 }
 0x378   :  { %6659 = vmatprep.subr.bf16.mxu0 %v9443_v62  ;;  %6741 = vmatprep.subr.bf16.mxu1 %v9446_v15 }
 0x37b   :  { %6660 = vmatpush1.bf16.msra.mxu0 %v9441_v16  ;;  %6742 = vmatpush1.bf16.msra.mxu1 %v9444_v4 }
 0x37c   :  { %6661 = vmatprep.subr.bf16.mxu0 %v9449_v17  ;;  %6743 = vmatprep.subr.bf16.mxu1 %v9452_v18 }
 0x37f   :  { %6662 = vmatpush1.bf16.msra.mxu0 %v9447_v20  ;;  %6744 = vmatpush1.bf16.msra.mxu1 %v9450_v21 }
 0x380   :  { %6663 = vmatprep.subr.bf16.mxu0 %v9455_v23  ;;  %6745 = vmatprep.subr.bf16.mxu1 %v9458_v24 }
 0x383   :  { %6664 = vmatpush1.bf16.msra.mxu0 %v9453_v26  ;;  %6746 = vmatpush1.bf16.msra.mxu1 %v9456_v28 }
 0x384   :  { %6665 = vmatprep.subr.bf16.mxu0 %v9461_v29  ;;  %6747 = vmatprep.subr.bf16.mxu1 %v9464_v19  ;;  %v9519_v19 = vld [vmem:[#allocation6 + $0x200] ss:$16 sps:$4 sm:$0xff]  }
 0x387   :  { %6666 = vmatpush1.bf16.msra.mxu0 %v9459_v30  ;;  %6748 = vmatpush1.bf16.msra.mxu1 %v9462_v31  ;;  %v9522_v30 = vld [vmem:[#allocation6 + $0x208] ss:$16 sps:$4 sm:$0xff]  }
 0x388   :  { %6667 = vmatprep.subr.bf16.mxu0 %v9467_v32  ;;  %6749 = vmatprep.subr.bf16.mxu1 %v9470_v33  ;;  %v9527_v32 = vld [vmem:[#allocation6 + $0x224] ss:$16 sps:$4 sm:$0xff]   ;;  %v9530_v33 = vld [vmem:[#allocation6 + $0x22c] ss:$16 sps:$4 sm:$0xff]  }
 0x38b   :  { %6668 = vmatpush1.bf16.msra.mxu0 %v9465_v34  ;;  %6750 = vmatpush1.bf16.msra.mxu1 %v9468_v35  ;;  %v9525_v35 = vld [vmem:[#allocation6 + $0x220] ss:$16 sps:$4 sm:$0xff]  }
 0x38c   :  { %6669 = vmatprep.subr.bf16.mxu0 %v9473_v37  ;;  %6751 = vmatprep.subr.bf16.mxu1 %v9476_v38  ;;  %v9528_v37 = vld [vmem:[#allocation6 + $0x228] ss:$16 sps:$4 sm:$0xff]   ;;  %v9533_v38 = vld [vmem:[#allocation6 + $0x244] ss:$16 sps:$4 sm:$0xff]  }
 0x38f   :  { %6670 = vmatpush1.bf16.msra.mxu0 %v9471_v39  ;;  %6752 = vmatpush1.bf16.msra.mxu1 %v9474_v27  ;;  %v9536_v39 = vld [vmem:[#allocation6 + $0x24c] ss:$16 sps:$4 sm:$0xff]   ;;  %v9531_v27 = vld [vmem:[#allocation6 + $0x240] ss:$16 sps:$4 sm:$0xff]  }
 0x390   :  { %6671 = vmatprep.subr.bf16.mxu0 %v9479_v41  ;;  %6753 = vmatprep.subr.bf16.mxu1 %v9482_v25  ;;  %v9534_v41 = vld [vmem:[#allocation6 + $0x248] ss:$16 sps:$4 sm:$0xff]   ;;  %v9539_v25 = vld [vmem:[#allocation6 + $0x264] ss:$16 sps:$4 sm:$0xff]  }
 0x393   :  { %6672 = vmatpush1.bf16.msra.mxu0 %v9477_v43  ;;  %6754 = vmatpush1.bf16.msra.mxu1 %v9480_v44  ;;  %v9542_v43 = vld [vmem:[#allocation6 + $0x26c] ss:$16 sps:$4 sm:$0xff]   ;;  %v9537_v44 = vld [vmem:[#allocation6 + $0x260] ss:$16 sps:$4 sm:$0xff]  }
 0x394   :  { %6673 = vmatprep.subr.bf16.mxu0 %v9485_v45  ;;  %6755 = vmatprep.subr.bf16.mxu1 %v9488_v46  ;;  %v9540_v45 = vld [vmem:[#allocation6 + $0x268] ss:$16 sps:$4 sm:$0xff]   ;;  %v9545_v46 = vld [vmem:[#allocation6 + $0x284] ss:$16 sps:$4 sm:$0xff]  }
 0x397   :  { %6674 = vmatpush1.bf16.msra.mxu0 %v9483_v48  ;;  %6756 = vmatpush1.bf16.msra.mxu1 %v9486_v50  ;;  %v9548_v48 = vld [vmem:[#allocation6 + $0x28c] ss:$16 sps:$4 sm:$0xff]   ;;  %v9543_v50 = vld [vmem:[#allocation6 + $0x280] ss:$16 sps:$4 sm:$0xff]  }
 0x398   :  { %6675 = vmatprep.subr.bf16.mxu0 %v9491_v51  ;;  %6757 = vmatprep.subr.bf16.mxu1 %v9494_v22  ;;  %v9546_v51 = vld [vmem:[#allocation6 + $0x288] ss:$16 sps:$4 sm:$0xff]   ;;  %v9551_v22 = vld [vmem:[#allocation6 + $0x2a4] ss:$16 sps:$4 sm:$0xff]  }
 0x39b   :  { %6676 = vmatpush1.bf16.msra.mxu0 %v9489_v53  ;;  %6758 = vmatpush1.bf16.msra.mxu1 %v9492_v36  ;;  %v9554_v53 = vld [vmem:[#allocation6 + $0x2ac] ss:$16 sps:$4 sm:$0xff]   ;;  %v9549_v36 = vld [vmem:[#allocation6 + $0x2a0] ss:$16 sps:$4 sm:$0xff]  }
 0x39c   :  { %6677 = vmatprep.subr.bf16.mxu0 %v9497_v54  ;;  %6759 = vmatprep.subr.bf16.mxu1 %v9500_v55  ;;  %v9552_v54 = vld [vmem:[#allocation6 + $0x2a8] ss:$16 sps:$4 sm:$0xff]   ;;  %v9557_v55 = vld [vmem:[#allocation6 + $0x2c4] ss:$16 sps:$4 sm:$0xff]  }
 0x39f   :  { %6678 = vmatpush1.bf16.msra.mxu0 %v9495_v56  ;;  %6760 = vmatpush1.bf16.msra.mxu1 %v9498_v57  ;;  %v9560_v56 = vld [vmem:[#allocation6 + $0x2cc] ss:$16 sps:$4 sm:$0xff]   ;;  %v9555_v57 = vld [vmem:[#allocation6 + $0x2c0] ss:$16 sps:$4 sm:$0xff]  }
 0x3a0   :  { %6679 = vmatprep.subr.bf16.mxu0 %v9503_v59  ;;  %6761 = vmatprep.subr.bf16.mxu1 %v9506_v60  ;;  %v9558_v59 = vld [vmem:[#allocation6 + $0x2c8] ss:$16 sps:$4 sm:$0xff]   ;;  %v9563_v60 = vld [vmem:[#allocation6 + $0x2e4] ss:$16 sps:$4 sm:$0xff]  }
 0x3a3   :  { %6680 = vmatpush1.bf16.msra.mxu0 %v9501_v61  ;;  %6762 = vmatpush1.bf16.msra.mxu1 %v9504_v12  ;;  %v9566_v61 = vld [vmem:[#allocation6 + $0x2ec] ss:$16 sps:$4 sm:$0xff]   ;;  %v9561_v12 = vld [vmem:[#allocation6 + $0x2e0] ss:$16 sps:$4 sm:$0xff]  }
 0x3a4   :  { %6681 = vmatprep.subr.bf16.mxu0 %v9509_v63  ;;  %6763 = vmatprep.subr.bf16.mxu1 %v9512_v47  ;;  %v9564_v63 = vld [vmem:[#allocation6 + $0x2e8] ss:$16 sps:$4 sm:$0xff]   ;;  %v9569_v47 = vld [vmem:[#allocation6 + $0x304] ss:$16 sps:$4 sm:$0xff]  }
 0x3a7   :  { %6682 = vmatpush1.bf16.msra.mxu0 %v9507_v0  ;;  %6764 = vmatpush1.bf16.msra.mxu1 %v9510_v1  ;;  %v9572_v0 = vld [vmem:[#allocation6 + $0x30c] ss:$16 sps:$4 sm:$0xff]   ;;  %v9567_v1 = vld [vmem:[#allocation6 + $0x300] ss:$16 sps:$4 sm:$0xff]  }
 0x3a8   :  { %6683 = vmatprep.subr.bf16.mxu0 %v9515_v2  ;;  %6765 = vmatprep.subr.bf16.mxu1 %v9518_v3  ;;  %v9570_v2 = vld [vmem:[#allocation6 + $0x308] ss:$16 sps:$4 sm:$0xff]   ;;  %v9575_v3 = vld [vmem:[#allocation6 + $0x324] ss:$16 sps:$4 sm:$0xff]  }
 0x3ab   :  { %6684 = vmatpush1.bf16.msra.mxu0 %v9513_v52  ;;  %6766 = vmatpush1.bf16.msra.mxu1 %v9516_v5  ;;  %v9578_v52 = vld [vmem:[#allocation6 + $0x32c] ss:$16 sps:$4 sm:$0xff]   ;;  %v9573_v5 = vld [vmem:[#allocation6 + $0x320] ss:$16 sps:$4 sm:$0xff]  }
 0x3ac   :  { %6694 = vmatprep.subr.bf16.mxu0 %v9521_v6  ;;  %6776 = vmatprep.subr.bf16.mxu1 %v9524_v7  ;;  %v9576_v6 = vld [vmem:[#allocation6 + $0x328] ss:$16 sps:$4 sm:$0xff]   ;;  %v9581_v7 = vld [vmem:[#allocation6 + $0x344] ss:$16 sps:$4 sm:$0xff]  }
 0x441   :  { %v5356_v13 = vpop.f32.mrb[0].mxu0  ;;  %v10050_v14 = vpop.f32.mrb[0].mxu1 }
 0x442   :  { %v8150_v62 = vadd.f32 %v5356_v13, %v882_v58  ;;  %v5358_v15 = vpop.f32.mrb[1].mxu0  ;;  %v5850_v16 = vpop.f32.mrb[1].mxu1  ;;  %v9584_v58 = vld [vmem:[#allocation6 + $0x34c] ss:$16 sps:$4 sm:$0xff]   ;;  %v9587_v13 = vld [vmem:[#allocation6 + $0x364] ss:$16 sps:$4 sm:$0xff]  }
 0x443   :  { %v8151_v4 = vadd.f32 %v5358_v15, %v886_v10  ;;  %v8153_v17 = vadd.f32 %v5850_v16, %v894_v11  ;;  %v5360_v18 = vpop.f32.mrb[2].mxu0  ;;  %v5852_v20 = vpop.f32.mrb[2].mxu1  ;;  %v9579_v10 = vld [vmem:[#allocation6 + $0x340] ss:$16 sps:$4 sm:$0xff]   ;;  %v9582_v11 = vld [vmem:[#allocation6 + $0x348] ss:$16 sps:$4 sm:$0xff]  }
 0x444   :  { %v5855_v21 = vmax.f32 %v8150_v62, 0.0  ;;  %v5361_v23 = vpop.f32.mrb[3].mxu0  ;;  %v5853_v24 = vpop.f32.mrb[3].mxu1  ;;  %v9590_v62 = vld [vmem:[#allocation6 + $0x36c] ss:$16 sps:$4 sm:$0xff]  }
 0x445   :  { %v5856_v26 = vmax.f32 %v8151_v4, 0.0  ;;  %v5858_v28 = vmax.f32 %v8153_v17, 0.0  ;;  %v9585_v15 = vld [vmem:[#allocation6 + $0x360] ss:$16 sps:$4 sm:$0xff]   ;;  %v9588_v16 = vld [vmem:[#allocation6 + $0x368] ss:$16 sps:$4 sm:$0xff]  }
 0x446   :  { %v5859_v31 = vpack.c.bf16 %v5855_v21, %v5855_v21  ;;  %v9593_v4 = vld [vmem:[#allocation6 + $0x384] ss:$16 sps:$4 sm:$0xff]   ;;  %v9596_v17 = vld [vmem:[#allocation6 + $0x38c] ss:$16 sps:$4 sm:$0xff]   ;;  %v9591_v18 = vld [vmem:[#allocation6 + $0x380] ss:$16 sps:$4 sm:$0xff]  }
 0x447   :  { %v5860_v29 = vpack.c.bf16 %v5856_v26, %v5856_v26  ;;  %v5862_v34 = vpack.c.bf16 %v5858_v28, %v5858_v28  ;;  %v9594_v20 = vld [vmem:[#allocation6 + $0x388] ss:$16 sps:$4 sm:$0xff]   ;;  %v889_v21 = vsub.s32 2, %v9910_v42  ;;  %v9599_v23 = vld [vmem:[#allocation6 + $0x3a4] ss:$16 sps:$4 sm:$0xff]  }
 0x448   :  { %v9602_v24 = vld [vmem:[#allocation6 + $0x3ac] ss:$16 sps:$4 sm:$0xff]   ;;  %v9597_v26 = vld [vmem:[#allocation6 + $0x3a0] ss:$16 sps:$4 sm:$0xff]   ;;  %v9600_v28 = vld [vmem:[#allocation6 + $0x3a8] ss:$16 sps:$4 sm:$0xff]  }
 0x449   :  { %6685 = vmatprep.mubr.bf16.mxu0 %v5860_v29  ;;  %6767 = vmatprep.mubr.bf16.mxu1 %v5860_v29  ;;  %v890_v29 = vrot.slane %v10037_v8, %v889_v21  ;;  %v9615_v8 = vld [vmem:[#allocation9 + $0x40] sm:$0xff]  }
 0x44a   :  { %6686 = vmatmul.mubr.bf16.vlgmr.msra.gmra.mrb[4].mxu0 %v5859_v31  ;;  %6768 = vmatmul.mubr.bf16.vlgmr.msra.gmra.mrb[4].mxu1 %v5859_v31  ;;  %v9603_v31 = vld [vmem:[#allocation6 + $0x3c0] ss:$16 sps:$4 sm:$0xff]  }
 0x44b   :  { %6695 = vmatpush1.bf16.msra.mxu0 %v9519_v19  ;;  %6777 = vmatpush1.bf16.msra.mxu1 %v9522_v30  ;;  %v9605_v19 = vld [vmem:[#allocation6 + $0x3c4] ss:$16 sps:$4 sm:$0xff]   ;;  %v9608_v30 = vld [vmem:[#allocation6 + $0x3cc] ss:$16 sps:$4 sm:$0xff]  }
 0x44c   :  { %6726 = vmatprep.mubr.bf16.mxu0 %v5862_v34  ;;  %6808 = vmatprep.mubr.bf16.mxu1 %v5862_v34  ;;  %v9611_v34 = vld [vmem:[#allocation6 + $0x3e4] ss:$16 sps:$4 sm:$0xff]  }
 0x44d   :  { %6696 = vmatprep.subr.bf16.mxu0 %v9527_v32  ;;  %6778 = vmatprep.subr.bf16.mxu1 %v9530_v33  ;;  %v9606_v32 = vld [vmem:[#allocation6 + $0x3c8] ss:$16 sps:$4 sm:$0xff]   ;;  %v8152_v33 = vadd.f32 %v10050_v14, %v890_v29  ;;  %v9619_v14 = vld [vmem:[#allocation9 + $0x48] sm:$0xff]  }
 0x44f   :  { %6697 = vmatpush1.bf16.msra.mxu0 %v9525_v35  ;;  %6779 = vmatpush1.bf16.msra.mxu1 %v9528_v37  ;;  %v9614_v35 = vld [vmem:[#allocation6 + $0x3ec] ss:$16 sps:$4 sm:$0xff]   ;;  %v9609_v37 = vld [vmem:[#allocation6 + $0x3e0] ss:$16 sps:$4 sm:$0xff]  }
 0x450   :  { %6698 = vmatprep.subr.bf16.mxu0 %v9533_v38  ;;  %6780 = vmatprep.subr.bf16.mxu1 %v9536_v39  ;;  %v9612_v38 = vld [vmem:[#allocation6 + $0x3e8] ss:$16 sps:$4 sm:$0xff]   ;;  %v5857_v39 = vmax.f32 %v8152_v33, 0.0 }
 0x453   :  { %6699 = vmatpush1.bf16.msra.mxu0 %v9531_v27  ;;  %6781 = vmatpush1.bf16.msra.mxu1 %v9534_v41  ;;  %v9616_v27 = vld [vmem:[#allocation9 + $0xc0] sm:$0xff]  }
 0x454   :  { %6700 = vmatprep.subr.bf16.mxu0 %v9539_v25  ;;  %6782 = vmatprep.subr.bf16.mxu1 %v9542_v43  ;;  %v9617_v41 = vld [vmem:[#allocation9] sm:$0xff]   ;;  %v5861_v43 = vpack.c.bf16 %v5857_v39, %v5857_v39 }
 0x455   :  { %v9618_v25 = vld [vmem:[#allocation9 + $0x80] sm:$0xff]  }
 0x457   :  { %6701 = vmatpush1.bf16.msra.mxu0 %v9537_v44  ;;  %6783 = vmatpush1.bf16.msra.mxu1 %v9540_v45  ;;  %v9620_v44 = vld [vmem:[#allocation9 + $0xc8] sm:$0xff]  }
 0x458   :  { %6702 = vmatprep.subr.bf16.mxu0 %v9545_v46  ;;  %6784 = vmatprep.subr.bf16.mxu1 %v9548_v48  ;;  %v9621_v45 = vld [vmem:[#allocation9 + $0x8] sm:$0xff]   ;;  %v9623_v48 = vld [vmem:[#allocation9 + $0x50] sm:$0xff]  }
 0x459   :  { %v9622_v46 = vld [vmem:[#allocation9 + $0x88] sm:$0xff]  }
 0x45b   :  { %6703 = vmatpush1.bf16.msra.mxu0 %v9543_v50  ;;  %6785 = vmatpush1.bf16.msra.mxu1 %v9546_v51  ;;  %v9624_v50 = vld [vmem:[#allocation9 + $0xd0] sm:$0xff]  }
 0x45c   :  { %6704 = vmatprep.subr.bf16.mxu0 %v9551_v22  ;;  %6786 = vmatprep.subr.bf16.mxu1 %v9554_v53  ;;  %v9625_v51 = vld [vmem:[#allocation9 + $0x10] sm:$0xff]   ;;  %v9627_v53 = vld [vmem:[#allocation9 + $0x58] sm:$0xff]  }
 0x45d   :  { %v9626_v22 = vld [vmem:[#allocation9 + $0x90] sm:$0xff]  }
 0x45f   :  { %6705 = vmatpush1.bf16.msra.mxu0 %v9549_v36  ;;  %6787 = vmatpush1.bf16.msra.mxu1 %v9552_v54  ;;  %v9628_v36 = vld [vmem:[#allocation9 + $0xd8] sm:$0xff]  }
 0x460   :  { %6706 = vmatprep.subr.bf16.mxu0 %v9557_v55  ;;  %6788 = vmatprep.subr.bf16.mxu1 %v9560_v56  ;;  %v9629_v54 = vld [vmem:[#allocation9 + $0x18] sm:$0xff]   ;;  %v9631_v56 = vld [vmem:[#allocation9 + $0x60] sm:$0xff]  }
 0x461   :  { %v9630_v55 = vld [vmem:[#allocation9 + $0x98] sm:$0xff]  }
 0x463   :  { %6707 = vmatpush1.bf16.msra.mxu0 %v9555_v57  ;;  %6789 = vmatpush1.bf16.msra.mxu1 %v9558_v59  ;;  %v9632_v57 = vld [vmem:[#allocation9 + $0xe0] sm:$0xff]  }
 0x464   :  { %6708 = vmatprep.subr.bf16.mxu0 %v9563_v60  ;;  %6790 = vmatprep.subr.bf16.mxu1 %v9566_v61  ;;  %v9633_v59 = vld [vmem:[#allocation9 + $0x20] sm:$0xff]   ;;  %v9635_v61 = vld [vmem:[#allocation9 + $0x68] sm:$0xff]  }
 0x465   :  { %v9634_v60 = vld [vmem:[#allocation9 + $0xa0] sm:$0xff]  }
 0x467   :  { %6709 = vmatpush1.bf16.msra.mxu0 %v9561_v12  ;;  %6791 = vmatpush1.bf16.msra.mxu1 %v9564_v63  ;;  %v9636_v12 = vld [vmem:[#allocation9 + $0xe8] sm:$0xff]  }
 0x468   :  { %6710 = vmatprep.subr.bf16.mxu0 %v9569_v47  ;;  %6792 = vmatprep.subr.bf16.mxu1 %v9572_v0  ;;  %v9637_v63 = vld [vmem:[#allocation9 + $0x28] sm:$0xff]   ;;  %v9639_v0 = vld [vmem:[#allocation9 + $0x70] sm:$0xff]  }
 0x469   :  { %v9638_v47 = vld [vmem:[#allocation9 + $0xa8] sm:$0xff]  }
 0x46b   :  { %6711 = vmatpush1.bf16.msra.mxu0 %v9567_v1  ;;  %6793 = vmatpush1.bf16.msra.mxu1 %v9570_v2  ;;  %v9640_v1 = vld [vmem:[#allocation9 + $0xf0] sm:$0xff]  }
 0x46c   :  { %6712 = vmatprep.subr.bf16.mxu0 %v9575_v3  ;;  %6794 = vmatprep.subr.bf16.mxu1 %v9578_v52  ;;  %v9641_v2 = vld [vmem:[#allocation9 + $0x30] sm:$0xff]   ;;  %v9643_v52 = vld [vmem:[#allocation9 + $0x78] sm:$0xff]  }
 0x46d   :  { %v9642_v3 = vld [vmem:[#allocation9 + $0xb0] sm:$0xff]  }
 0x46f   :  { %6713 = vmatpush1.bf16.msra.mxu0 %v9573_v5  ;;  %6795 = vmatpush1.bf16.msra.mxu1 %v9576_v6  ;;  %v9644_v5 = vld [vmem:[#allocation9 + $0xf8] sm:$0xff]  }
 0x470   :  { %6714 = vmatprep.subr.bf16.mxu0 %v9581_v7  ;;  %6796 = vmatprep.subr.bf16.mxu1 %v9584_v58  ;;  %v9645_v6 = vld [vmem:[#allocation9 + $0x38] sm:$0xff]  }
 0x471   :  { %v9646_v7 = vld [vmem:[#allocation9 + $0xb8] sm:$0xff]  }
 0x472   :  { %v5991_v58 = vld [vmem:[#allocation7] sm:$0xf] }
 0x473   :  { %6715 = vmatpush1.bf16.msra.mxu0 %v9579_v10  ;;  %6797 = vmatpush1.bf16.msra.mxu1 %v9582_v11  ;;  %v5996_v10 = vrot.slane %v5991_v58, %v881_v40  ;;  %v6004_v11 = vrot.slane %v5991_v58, %v889_v21 }
 0x474   :  { %6716 = vmatprep.subr.bf16.mxu0 %v9587_v13  ;;  %6798 = vmatprep.subr.bf16.mxu1 %v9590_v62  ;;  %v6000_v13 = vrot.slane %v5991_v58, %v885_v49  ;;  %v6008_v62 = vrot.slane %v5991_v58, %v893_v9 }
 0x477   :  { %6717 = vmatpush1.bf16.msra.mxu0 %v9585_v15  ;;  %6799 = vmatpush1.bf16.msra.mxu1 %v9588_v16 }
 0x478   :  { %6718 = vmatprep.subr.bf16.mxu0 %v9593_v4  ;;  %6800 = vmatprep.subr.bf16.mxu1 %v9596_v17 }
 0x47b   :  { %6719 = vmatpush1.bf16.msra.mxu0 %v9591_v18  ;;  %6801 = vmatpush1.bf16.msra.mxu1 %v9594_v20 }
 0x47c   :  { %6720 = vmatprep.subr.bf16.mxu0 %v9599_v23  ;;  %6802 = vmatprep.subr.bf16.mxu1 %v9602_v24 }
 0x47f   :  { %6721 = vmatpush1.bf16.msra.mxu0 %v9597_v26  ;;  %6803 = vmatpush1.bf16.msra.mxu1 %v9600_v28 }
 0x480   :  { %6722 = vmatprep.subr.bf16.mxu0 %v9605_v19  ;;  %6804 = vmatprep.subr.bf16.mxu1 %v9608_v30 }
 0x483   :  { %6723 = vmatpush1.bf16.msra.mxu0 %v9603_v31  ;;  %6805 = vmatpush1.bf16.msra.mxu1 %v9606_v32 }
 0x484   :  { %6724 = vmatprep.subr.bf16.mxu0 %v9611_v34  ;;  %6806 = vmatprep.subr.bf16.mxu1 %v9614_v35  ;;  %v8073_v35 = vld [vmem:[#allocation10] ss:$0 sm:$0xff] }
 0x487   :  { %6725 = vmatpush1.bf16.msra.mxu0 %v9609_v37  ;;  %6807 = vmatpush1.bf16.msra.mxu1 %v9612_v38 }
 0x488   :  { %8106 = vmatprep.subr.bf16.mxu0 %v9615_v8  ;;  %8128 = vmatprep.subr.bf16.mxu1 %v9616_v27 }
 0x48a   :  { %6727 = vmatmul.mubr.bf16.vlgmr.msra.gmra.mrb[4].mxu0 %v5861_v43  ;;  %6809 = vmatmul.mubr.bf16.vlgmr.msra.gmra.mrb[4].mxu1 %v5861_v43 }
 0x48b   :  { %8107 = vmatpush3.bf16.msra.mxu0 %v9617_v41  ;;  %8129 = vmatpush3.bf16.msra.mxu1 %v9618_v25 }
 0x48c   :  { %8108 = vmatprep.subr.bf16.mxu0 %v9619_v14  ;;  %8130 = vmatprep.subr.bf16.mxu1 %v9620_v44 }
 0x48f   :  { %8109 = vmatpush3.bf16.msra.mxu0 %v9621_v45  ;;  %8131 = vmatpush3.bf16.msra.mxu1 %v9622_v46 }
 0x490   :  { %8110 = vmatprep.subr.bf16.mxu0 %v9623_v48  ;;  %8132 = vmatprep.subr.bf16.mxu1 %v9624_v50 }
 0x493   :  { %8111 = vmatpush3.bf16.msra.mxu0 %v9625_v51  ;;  %8133 = vmatpush3.bf16.msra.mxu1 %v9626_v22 }
 0x494   :  { %8112 = vmatprep.subr.bf16.mxu0 %v9627_v53  ;;  %8134 = vmatprep.subr.bf16.mxu1 %v9628_v36 }
 0x497   :  { %8113 = vmatpush3.bf16.msra.mxu0 %v9629_v54  ;;  %8135 = vmatpush3.bf16.msra.mxu1 %v9630_v55 }
 0x498   :  { %8114 = vmatprep.subr.bf16.mxu0 %v9631_v56  ;;  %8136 = vmatprep.subr.bf16.mxu1 %v9632_v57 }
 0x49b   :  { %8115 = vmatpush3.bf16.msra.mxu0 %v9633_v59  ;;  %8137 = vmatpush3.bf16.msra.mxu1 %v9634_v60 }
 0x49c   :  { %8116 = vmatprep.subr.bf16.mxu0 %v9635_v61  ;;  %8138 = vmatprep.subr.bf16.mxu1 %v9636_v12 }
 0x49f   :  { %8117 = vmatpush3.bf16.msra.mxu0 %v9637_v63  ;;  %8139 = vmatpush3.bf16.msra.mxu1 %v9638_v47 }
 0x4a0   :  { %8118 = vmatprep.subr.bf16.mxu0 %v9639_v0  ;;  %8140 = vmatprep.subr.bf16.mxu1 %v9640_v1 }
 0x4a3   :  { %8119 = vmatpush3.bf16.msra.mxu0 %v9641_v2  ;;  %8141 = vmatpush3.bf16.msra.mxu1 %v9642_v3 }
 0x4a4   :  { %8120 = vmatprep.subr.bf16.mxu0 %v9643_v52  ;;  %8142 = vmatprep.subr.bf16.mxu1 %v9644_v5 }
 0x4a7   :  { %8121 = vmatpush3.bf16.msra.mxu0 %v9645_v6  ;;  %8143 = vmatpush3.bf16.msra.mxu1 %v9646_v7 }
 0x55d   :  { %v6728_v15 = vpop.f32.mrb[4].mxu0  ;;  %v6810_v16 = vpop.f32.mrb[4].mxu1 }
 0x55e   :  { %v8154_v4 = vadd.f32 %v6728_v15, %v5996_v10  ;;  %v8156_v17 = vadd.f32 %v6810_v16, %v6004_v11  ;;  %v6730_v18 = vpop.f32.mrb[5].mxu0  ;;  %v6812_v20 = vpop.f32.mrb[5].mxu1 }
 0x55f   :  { %v8155_v23 = vadd.f32 %v6730_v18, %v6000_v13  ;;  %v8157_v24 = vadd.f32 %v6812_v20, %v6008_v62  ;;  %v6732_v26 = vpop.f32.mrb[6].mxu0  ;;  %v6814_v28 = vpop.f32.mrb[6].mxu1 }
 0x560   :  { %v6817_v40 = vmax.f32 %v8154_v4, 0.0  ;;  %v6819_v29 = vmax.f32 %v8156_v17, 0.0  ;;  %v6733_v19 = vpop.f32.mrb[7].mxu0  ;;  %v6815_v21 = vpop.f32.mrb[7].mxu1 }
 0x561   :  { %v6818_v30 = vmax.f32 %v8155_v23, 0.0  ;;  %v6820_v31 = vmax.f32 %v8157_v24, 0.0 }
 0x562   :  { %v6821_v42 = vpack.c.bf16 %v6817_v40, %v6817_v40  ;;  %v6823_v9 = vpack.c.bf16 %v6819_v29, %v6819_v29 }
 0x563   :  { %v6822_v49 = vpack.c.bf16 %v6818_v30, %v6818_v30  ;;  %v6824_v32 = vpack.c.bf16 %v6820_v31, %v6820_v31 }
 0x565   :  { %7120 = vmatprep.mubr.bf16.mxu0 %v6822_v49  ;;  %7160 = vmatprep.mubr.bf16.mxu1 %v6824_v32 }
 0x566   :  { %7121 = vmatmul.mubr.bf16.vlgmr.msra.gmra.mrb[8].mxu0 %v6821_v42  ;;  %7161 = vmatmul.mubr.bf16.vlgmr.msra.gmra.mrb[8].mxu1 %v6823_v9 }
 0x639   :  { %v8122_v33 = vpop.f32.mrb[8].mxu0  ;;  %v8144_v34 = vpop.f32.mrb[8].mxu1 }
 0x63a   :  { %v8123_v37 = vpop.f32.mrb[9].mxu0  ;;  %v8145_v38 = vpop.f32.mrb[9].mxu1 }
 0x63b   :  { %v8124_v39 = vadd.f32 %v8123_v37, %v8122_v33  ;;  %v8146_v8 = vadd.f32 %v8145_v38, %v8144_v34  ;;  %v8125_v27 = vpop.f32.mrb[10].mxu0  ;;  %v8147_v41 = vpop.f32.mrb[10].mxu1 }
 0x63c   :  { %v8126_v25 = vpop.f32.mrb[11].mxu0  ;;  %v8148_v43 = vpop.f32.mrb[11].mxu1 }
 0x63d   :  { %v7123_v14 = vadd.f32 %v8124_v39, %v8073_v35 }
 0x63f   :  { %v7163_v44 = vadd.f32 %v8146_v8, %v7123_v14 }
 0x641   :  { %7168 = vst [vmem:[%s10075_s7] sm:$0xf] %v7163_v44 }
 0x642   :  { %7173 = vsyncpa [#allocation3], 1 }
 0x643   :  { %7174 = vsyncpa [#allocation5], 1 }
 0x644   :  { %7175 = vsyncpa [#allocation8], 1 }
 0x645   :  { %7176 = vsyncpa [#allocation11], 1 }

</bundles_post_ra>
